<compile_context>
chip_gen: v7x
topology: tpu7x:2x2x1
jax: 0.10.0
libtpu: 0.0.40
codegen_flags: <defaults>
</compile_context>

<pallas_src>
import jax
import jax.numpy as jnp
from jax.experimental import pallas as pl
from jax.experimental.pallas import tpu as pltpu


def _round_up(x, m):
    return ((x + m - 1) // m) * m


def _vmem_limits():
    """(vmem_limit_bytes, per_step_single_copy_budget_bytes), generation-aware."""
    try:
        cap = pltpu.get_tpu_info().vmem_capacity_bytes
    except Exception:  # interpret mode / unknown target
        cap = 64 * 1024 * 1024
    vmem_limit = (3 * cap) // 4                    # 96 MiB v5e/v6e, 48 MiB v7x
    # Budget covers ONE copy of (x + A + out) blocks; the pipeline holds ~2x
    # (double buffering) plus compiler scratch, so keep budget <= limit / 4.
    per_step_budget = min(20 * 1024 * 1024, vmem_limit // 4)
    return int(vmem_limit), int(per_step_budget)


def _pick_tm(M, F, N, V, itemsize, budget_bytes):
    """Largest lane tile of M whose (padded) single-copy block set fits the budget."""
    per_lane128 = itemsize * 128 * (
        F * _round_up(N, 8)        # x block   (F, N, TM)
        + V * _round_up(N, 8)      # A block   (V, N, TM)
        + F * _round_up(V, 8)      # out block (F, V, TM)
    )
    n128 = max(1, budget_bytes // per_lane128)
    if M <= n128 * 128:
        return M                   # whole M axis in one lane-dense block
    tm = n128 * 128
    # Prefer an evenly dividing multiple of 128 (avoids a clipped trailing
    # block) unless that would shrink the tile by more than 2x.
    for cand in range(tm, 0, -128):
        if M % cand == 0:
            if cand * 2 >= tm:
                tm = cand
            break
    return tm


def _nconv_kernel(x_ref, a_ref, o_ref):
    # x_ref: (F, N, TM)   x[b, f, n, m-tile]          (m on lanes)
    # a_ref: (V, N, TM)   A pre-swizzled: A[b, m, n, v] -> a[v, n, m]
    # o_ref: (F, V, TM)   out[b, f, v, m-tile]        (m on lanes)
    # out[f, v, m] = sum_n x[f, n, m] * a[v, n, m]   -- pure VPU, lane-parallel
    # over m, f32 accumulation, tiny (F, TM) live accumulator per v.
    n_dim = x_ref.shape[1]
    v_dim = a_ref.shape[0]
    for v in range(v_dim):
        acc = (x_ref[:, 0, :].astype(jnp.float32)
               * a_ref[v:v + 1, 0, :].astype(jnp.float32))
        for n in range(1, n_dim):
            acc = acc + (x_ref[:, n, :].astype(jnp.float32)
                         * a_ref[v:v + 1, n, :].astype(jnp.float32))
        o_ref[:, v, :] = acc.astype(o_ref.dtype)


def nconv(x, A):
    """x: (B, F, N, M), A: (B, M, N, V) -> (B, F, V, M)  (matches torch.einsum)."""
    B, F, N, M = x.shape
    Ba, Ma, Na, V = A.shape
    assert (B, M, N) == (Ba, Ma, Na), "shape mismatch between x and A"
    if A.dtype != x.dtype:          # keep output dtype == x.dtype, like the module
        A = A.astype(x.dtype)

    itemsize = jnp.dtype(x.dtype).itemsize
    vmem_limit, per_step_budget = _vmem_limits()
    TM = _pick_tm(M, F, N, V, itemsize, per_step_budget)
    num_mt = pl.cdiv(M, TM)

    # Single layout-glue op: put A's m index on the lane axis (see TODO above).
    a_sw = jnp.transpose(A, (0, 3, 2, 1))  # (B, V, N, M)

    cost = pl.CostEstimate(
        flops=2 * B * F * N * V * M,
        transcendentals=0,
        bytes_accessed=itemsize * B * (F * N * M + V * N * M + F * V * M),
    )

    return pl.pallas_call(
        _nconv_kernel,
        out_shape=jax.ShapeDtypeStruct((B, F, V, M), x.dtype),
        grid_spec=pltpu.PrefetchScalarGridSpec(
            num_scalar_prefetch=0,
            grid=(num_mt, B),   # big m-tile axis leading -> balanced megacore split
            in_specs=[
                pl.BlockSpec((pl.Squeezed(), F, N, TM), lambda mt, b: (b, 0, 0, mt)),
                pl.BlockSpec((pl.Squeezed(), V, N, TM), lambda mt, b: (b, 0, 0, mt)),
            ],
            out_specs=pl.BlockSpec((pl.Squeezed(), F, V, TM), lambda mt, b: (b, 0, 0, mt)),
        ),
        compiler_params=pltpu.CompilerParams(
            dimension_semantics=("parallel", "parallel"),
            vmem_limit_bytes=vmem_limit,
        ),
        cost_estimate=cost,
    )(x, a_sw)


if __name__ == "__main__":
    # Small shapes consistent with the einsum: b=2, f=8, n=16, m=4, v=8
    B, F, N, M, V = 2, 8, 16, 4, 8
    key = jax.random.PRNGKey(0)
    kx, ka = jax.random.split(key)
    x = jax.random.normal(kx, (B, F, N, M), dtype=jnp.float32)
    A = jax.random.normal(ka, (B, M, N, V), dtype=jnp.float32)

    out = nconv(x, A)
    out = jax.block_until_ready(out)

    # Reference check against plain-JAX einsum (same contraction as torch).
    ref = jnp.einsum("bfnm,bmnv->bfvm", x, A)
    assert out.shape == (B, F, V, M)
    assert jnp.allclose(out, ref, atol=1e-5, rtol=1e-5)

    print("KERNEL_OK")
</pallas_src>

<mosaic_0001>
module attributes {stable_mosaic.version = 11 : i64} {
  func.func @_nconv_kernel(%arg0: i32, %arg1: i32, %arg2: memref<1x8x16x4xf32, #tpu.memory_space<vmem>>, %arg3: memref<1x8x16x4xf32, #tpu.memory_space<vmem>>, %arg4: memref<1x8x8x4xf32, #tpu.memory_space<vmem>>) attributes {dimension_semantics = [#tpu.dimension_semantics<parallel>, #tpu.dimension_semantics<parallel>], iteration_bounds = array<i64: 1, 2>, scalar_prefetch = 0 : i64, scratch_operands = 0 : i64, tpu.core_type = #tpu.core_type<tc>, window_params = [{transform_indices = @transform_0, window_bounds = array<i64: 1, 8, 16, 4>}, {transform_indices = @transform_1, window_bounds = array<i64: 1, 8, 16, 4>}, {transform_indices = @transform_2, window_bounds = array<i64: 1, 8, 8, 4>}]} {
    %c0 = arith.constant 0 : index
    %c0_0 = arith.constant 0 : index
    %c0_1 = arith.constant 0 : index
    %c0_2 = arith.constant 0 : index
    %0 = vector.load %arg2[%c0, %c0_0, %c0_1, %c0_2] : memref<1x8x16x4xf32, #tpu.memory_space<vmem>>, vector<1x8x1x4xf32>
    %1 = vector.shape_cast %0 : vector<1x8x1x4xf32> to vector<8x4xf32>
    %c0_3 = arith.constant 0 : index
    %c0_4 = arith.constant 0 : index
    %c0_5 = arith.constant 0 : index
    %c0_6 = arith.constant 0 : index
    %2 = vector.load %arg3[%c0_3, %c0_4, %c0_5, %c0_6] : memref<1x8x16x4xf32, #tpu.memory_space<vmem>>, vector<1x1x1x4xf32>
    %3 = vector.shape_cast %2 : vector<1x1x1x4xf32> to vector<1x4xf32>
    %4 = vector.broadcast %3 : vector<1x4xf32> to vector<8x4xf32>
    %5 = arith.mulf %1, %4 : vector<8x4xf32>
    %c0_7 = arith.constant 0 : index
    %c0_8 = arith.constant 0 : index
    %c1 = arith.constant 1 : index
    %c0_9 = arith.constant 0 : index
    %6 = vector.load %arg2[%c0_7, %c0_8, %c1, %c0_9] : memref<1x8x16x4xf32, #tpu.memory_space<vmem>>, vector<1x8x1x4xf32>
    %7 = vector.shape_cast %6 : vector<1x8x1x4xf32> to vector<8x4xf32>
    %c0_10 = arith.constant 0 : index
    %c0_11 = arith.constant 0 : index
    %c1_12 = arith.constant 1 : index
    %c0_13 = arith.constant 0 : index
    %8 = vector.load %arg3[%c0_10, %c0_11, %c1_12, %c0_13] : memref<1x8x16x4xf32, #tpu.memory_space<vmem>>, vector<1x1x1x4xf32>
    %9 = vector.shape_cast %8 : vector<1x1x1x4xf32> to vector<1x4xf32>
    %10 = vector.broadcast %9 : vector<1x4xf32> to vector<8x4xf32>
    %11 = arith.mulf %7, %10 : vector<8x4xf32>
    %12 = arith.addf %5, %11 : vector<8x4xf32>
    %c0_14 = arith.constant 0 : index
    %c0_15 = arith.constant 0 : index
    %c2 = arith.constant 2 : index
    %c0_16 = arith.constant 0 : index
    %13 = vector.load %arg2[%c0_14, %c0_15, %c2, %c0_16] : memref<1x8x16x4xf32, #tpu.memory_space<vmem>>, vector<1x8x1x4xf32>
    %14 = vector.shape_cast %13 : vector<1x8x1x4xf32> to vector<8x4xf32>
    %c0_17 = arith.constant 0 : index
    %c0_18 = arith.constant 0 : index
    %c2_19 = arith.constant 2 : index
    %c0_20 = arith.constant 0 : index
    %15 = vector.load %arg3[%c0_17, %c0_18, %c2_19, %c0_20] : memref<1x8x16x4xf32, #tpu.memory_space<vmem>>, vector<1x1x1x4xf32>
    %16 = vector.shape_cast %15 : vector<1x1x1x4xf32> to vector<1x4xf32>
    %17 = vector.broadcast %16 : vector<1x4xf32> to vector<8x4xf32>
    %18 = arith.mulf %14, %17 : vector<8x4xf32>
    %19 = arith.addf %12, %18 : vector<8x4xf32>
    %c0_21 = arith.constant 0 : index
    %c0_22 = arith.constant 0 : index
    %c3 = arith.constant 3 : index
    %c0_23 = arith.constant 0 : index
    %20 = vector.load %arg2[%c0_21, %c0_22, %c3, %c0_23] : memref<1x8x16x4xf32, #tpu.memory_space<vmem>>, vector<1x8x1x4xf32>
    %21 = vector.shape_cast %20 : vector<1x8x1x4xf32> to vector<8x4xf32>
    %c0_24 = arith.constant 0 : index
    %c0_25 = arith.constant 0 : index
    %c3_26 = arith.constant 3 : index
    %c0_27 = arith.constant 0 : index
    %22 = vector.load %arg3[%c0_24, %c0_25, %c3_26, %c0_27] : memref<1x8x16x4xf32, #tpu.memory_space<vmem>>, vector<1x1x1x4xf32>
    %23 = vector.shape_cast %22 : vector<1x1x1x4xf32> to vector<1x4xf32>
    %24 = vector.broadcast %23 : vector<1x4xf32> to vector<8x4xf32>
    %25 = arith.mulf %21, %24 : vector<8x4xf32>
    %26 = arith.addf %19, %25 : vector<8x4xf32>
    %c0_28 = arith.constant 0 : index
    %c0_29 = arith.constant 0 : index
    %c4 = arith.constant 4 : index
    %c0_30 = arith.constant 0 : index
    %27 = vector.load %arg2[%c0_28, %c0_29, %c4, %c0_30] : memref<1x8x16x4xf32, #tpu.memory_space<vmem>>, vector<1x8x1x4xf32>
    %28 = vector.shape_cast %27 : vector<1x8x1x4xf32> to vector<8x4xf32>
    %c0_31 = arith.constant 0 : index
    %c0_32 = arith.constant 0 : index
    %c4_33 = arith.constant 4 : index
    %c0_34 = arith.constant 0 : index
    %29 = vector.load %arg3[%c0_31, %c0_32, %c4_33, %c0_34] : memref<1x8x16x4xf32, #tpu.memory_space<vmem>>, vector<1x1x1x4xf32>
    %30 = vector.shape_cast %29 : vector<1x1x1x4xf32> to vector<1x4xf32>
    %31 = vector.broadcast %30 : vector<1x4xf32> to vector<8x4xf32>
    %32 = arith.mulf %28, %31 : vector<8x4xf32>
    %33 = arith.addf %26, %32 : vector<8x4xf32>
    %c0_35 = arith.constant 0 : index
    %c0_36 = arith.constant 0 : index
    %c5 = arith.constant 5 : index
    %c0_37 = arith.constant 0 : index
    %34 = vector.load %arg2[%c0_35, %c0_36, %c5, %c0_37] : memref<1x8x16x4xf32, #tpu.memory_space<vmem>>, vector<1x8x1x4xf32>
    %35 = vector.shape_cast %34 : vector<1x8x1x4xf32> to vector<8x4xf32>
    %c0_38 = arith.constant 0 : index
    %c0_39 = arith.constant 0 : index
    %c5_40 = arith.constant 5 : index
    %c0_41 = arith.constant 0 : index
    %36 = vector.load %arg3[%c0_38, %c0_39, %c5_40, %c0_41] : memref<1x8x16x4xf32, #tpu.memory_space<vmem>>, vector<1x1x1x4xf32>
    %37 = vector.shape_cast %36 : vector<1x1x1x4xf32> to vector<1x4xf32>
    %38 = vector.broadcast %37 : vector<1x4xf32> to vector<8x4xf32>
    %39 = arith.mulf %35, %38 : vector<8x4xf32>
    %40 = arith.addf %33, %39 : vector<8x4xf32>
    %c0_42 = arith.constant 0 : index
    %c0_43 = arith.constant 0 : index
    %c6 = arith.constant 6 : index
    %c0_44 = arith.constant 0 : index
    %41 = vector.load %arg2[%c0_42, %c0_43, %c6, %c0_44] : memref<1x8x16x4xf32, #tpu.memory_space<vmem>>, vector<1x8x1x4xf32>
    %42 = vector.shape_cast %41 : vector<1x8x1x4xf32> to vector<8x4xf32>
    %c0_45 = arith.constant 0 : index
    %c0_46 = arith.constant 0 : index
    %c6_47 = arith.constant 6 : index
    %c0_48 = arith.constant 0 : index
    %43 = vector.load %arg3[%c0_45, %c0_46, %c6_47, %c0_48] : memref<1x8x16x4xf32, #tpu.memory_space<vmem>>, vector<1x1x1x4xf32>
    %44 = vector.shape_cast %43 : vector<1x1x1x4xf32> to vector<1x4xf32>
    %45 = vector.broadcast %44 : vector<1x4xf32> to vector<8x4xf32>
    %46 = arith.mulf %42, %45 : vector<8x4xf32>
    %47 = arith.addf %40, %46 : vector<8x4xf32>
    %c0_49 = arith.constant 0 : index
    %c0_50 = arith.constant 0 : index
    %c7 = arith.constant 7 : index
    %c0_51 = arith.constant 0 : index
    %48 = vector.load %arg2[%c0_49, %c0_50, %c7, %c0_51] : memref<1x8x16x4xf32, #tpu.memory_space<vmem>>, vector<1x8x1x4xf32>
    %49 = vector.shape_cast %48 : vector<1x8x1x4xf32> to vector<8x4xf32>
    %c0_52 = arith.constant 0 : index
    %c0_53 = arith.constant 0 : index
    %c7_54 = arith.constant 7 : index
    %c0_55 = arith.constant 0 : index
    %50 = vector.load %arg3[%c0_52, %c0_53, %c7_54, %c0_55] : memref<1x8x16x4xf32, #tpu.memory_space<vmem>>, vector<1x1x1x4xf32>
    %51 = vector.shape_cast %50 : vector<1x1x1x4xf32> to vector<1x4xf32>
    %52 = vector.broadcast %51 : vector<1x4xf32> to vector<8x4xf32>
    %53 = arith.mulf %49, %52 : vector<8x4xf32>
    %54 = arith.addf %47, %53 : vector<8x4xf32>
    %c0_56 = arith.constant 0 : index
    %c0_57 = arith.constant 0 : index
    %c8 = arith.constant 8 : index
    %c0_58 = arith.constant 0 : index
    %55 = vector.load %arg2[%c0_56, %c0_57, %c8, %c0_58] : memref<1x8x16x4xf32, #tpu.memory_space<vmem>>, vector<1x8x1x4xf32>
    %56 = vector.shape_cast %55 : vector<1x8x1x4xf32> to vector<8x4xf32>
    %c0_59 = arith.constant 0 : index
    %c0_60 = arith.constant 0 : index
    %c8_61 = arith.constant 8 : index
    %c0_62 = arith.constant 0 : index
    %57 = vector.load %arg3[%c0_59, %c0_60, %c8_61, %c0_62] : memref<1x8x16x4xf32, #tpu.memory_space<vmem>>, vector<1x1x1x4xf32>
    %58 = vector.shape_cast %57 : vector<1x1x1x4xf32> to vector<1x4xf32>
    %59 = vector.broadcast %58 : vector<1x4xf32> to vector<8x4xf32>
    %60 = arith.mulf %56, %59 : vector<8x4xf32>
    %61 = arith.addf %54, %60 : vector<8x4xf32>
    %c0_63 = arith.constant 0 : index
    %c0_64 = arith.constant 0 : index
    %c9 = arith.constant 9 : index
    %c0_65 = arith.constant 0 : index
    %62 = vector.load %arg2[%c0_63, %c0_64, %c9, %c0_65] : memref<1x8x16x4xf32, #tpu.memory_space<vmem>>, vector<1x8x1x4xf32>
    %63 = vector.shape_cast %62 : vector<1x8x1x4xf32> to vector<8x4xf32>
    %c0_66 = arith.constant 0 : index
    %c0_67 = arith.constant 0 : index
    %c9_68 = arith.constant 9 : index
    %c0_69 = arith.constant 0 : index
    %64 = vector.load %arg3[%c0_66, %c0_67, %c9_68, %c0_69] : memref<1x8x16x4xf32, #tpu.memory_space<vmem>>, vector<1x1x1x4xf32>
    %65 = vector.shape_cast %64 : vector<1x1x1x4xf32> to vector<1x4xf32>
    %66 = vector.broadcast %65 : vector<1x4xf32> to vector<8x4xf32>
    %67 = arith.mulf %63, %66 : vector<8x4xf32>
    %68 = arith.addf %61, %67 : vector<8x4xf32>
    %c0_70 = arith.constant 0 : index
    %c0_71 = arith.constant 0 : index
    %c10 = arith.constant 10 : index
    %c0_72 = arith.constant 0 : index
    %69 = vector.load %arg2[%c0_70, %c0_71, %c10, %c0_72] : memref<1x8x16x4xf32, #tpu.memory_space<vmem>>, vector<1x8x1x4xf32>
    %70 = vector.shape_cast %69 : vector<1x8x1x4xf32> to vector<8x4xf32>
    %c0_73 = arith.constant 0 : index
    %c0_74 = arith.constant 0 : index
    %c10_75 = arith.constant 10 : index
    %c0_76 = arith.constant 0 : index
    %71 = vector.load %arg3[%c0_73, %c0_74, %c10_75, %c0_76] : memref<1x8x16x4xf32, #tpu.memory_space<vmem>>, vector<1x1x1x4xf32>
    %72 = vector.shape_cast %71 : vector<1x1x1x4xf32> to vector<1x4xf32>
    %73 = vector.broadcast %72 : vector<1x4xf32> to vector<8x4xf32>
    %74 = arith.mulf %70, %73 : vector<8x4xf32>
    %75 = arith.addf %68, %74 : vector<8x4xf32>
    %c0_77 = arith.constant 0 : index
    %c0_78 = arith.constant 0 : index
    %c11 = arith.constant 11 : index
    %c0_79 = arith.constant 0 : index
    %76 = vector.load %arg2[%c0_77, %c0_78, %c11, %c0_79] : memref<1x8x16x4xf32, #tpu.memory_space<vmem>>, vector<1x8x1x4xf32>
    %77 = vector.shape_cast %76 : vector<1x8x1x4xf32> to vector<8x4xf32>
    %c0_80 = arith.constant 0 : index
    %c0_81 = arith.constant 0 : index
    %c11_82 = arith.constant 11 : index
    %c0_83 = arith.constant 0 : index
    %78 = vector.load %arg3[%c0_80, %c0_81, %c11_82, %c0_83] : memref<1x8x16x4xf32, #tpu.memory_space<vmem>>, vector<1x1x1x4xf32>
    %79 = vector.shape_cast %78 : vector<1x1x1x4xf32> to vector<1x4xf32>
    %80 = vector.broadcast %79 : vector<1x4xf32> to vector<8x4xf32>
    %81 = arith.mulf %77, %80 : vector<8x4xf32>
    %82 = arith.addf %75, %81 : vector<8x4xf32>
    %c0_84 = arith.constant 0 : index
    %c0_85 = arith.constant 0 : index
    %c12 = arith.constant 12 : index
    %c0_86 = arith.constant 0 : index
    %83 = vector.load %arg2[%c0_84, %c0_85, %c12, %c0_86] : memref<1x8x16x4xf32, #tpu.memory_space<vmem>>, vector<1x8x1x4xf32>
    %84 = vector.shape_cast %83 : vector<1x8x1x4xf32> to vector<8x4xf32>
    %c0_87 = arith.constant 0 : index
    %c0_88 = arith.constant 0 : index
    %c12_89 = arith.constant 12 : index
    %c0_90 = arith.constant 0 : index
    %85 = vector.load %arg3[%c0_87, %c0_88, %c12_89, %c0_90] : memref<1x8x16x4xf32, #tpu.memory_space<vmem>>, vector<1x1x1x4xf32>
    %86 = vector.shape_cast %85 : vector<1x1x1x4xf32> to vector<1x4xf32>
    %87 = vector.broadcast %86 : vector<1x4xf32> to vector<8x4xf32>
    %88 = arith.mulf %84, %87 : vector<8x4xf32>
    %89 = arith.addf %82, %88 : vector<8x4xf32>
    %c0_91 = arith.constant 0 : index
    %c0_92 = arith.constant 0 : index
    %c13 = arith.constant 13 : index
    %c0_93 = arith.constant 0 : index
    %90 = vector.load %arg2[%c0_91, %c0_92, %c13, %c0_93] : memref<1x8x16x4xf32, #tpu.memory_space<vmem>>, vector<1x8x1x4xf32>
    %91 = vector.shape_cast %90 : vector<1x8x1x4xf32> to vector<8x4xf32>
    %c0_94 = arith.constant 0 : index
    %c0_95 = arith.constant 0 : index
    %c13_96 = arith.constant 13 : index
    %c0_97 = arith.constant 0 : index
    %92 = vector.load %arg3[%c0_94, %c0_95, %c13_96, %c0_97] : memref<1x8x16x4xf32, #tpu.memory_space<vmem>>, vector<1x1x1x4xf32>
    %93 = vector.shape_cast %92 : vector<1x1x1x4xf32> to vector<1x4xf32>
    %94 = vector.broadcast %93 : vector<1x4xf32> to vector<8x4xf32>
    %95 = arith.mulf %91, %94 : vector<8x4xf32>
    %96 = arith.addf %89, %95 : vector<8x4xf32>
    %c0_98 = arith.constant 0 : index
    %c0_99 = arith.constant 0 : index
    %c14 = arith.constant 14 : index
    %c0_100 = arith.constant 0 : index
    %97 = vector.load %arg2[%c0_98, %c0_99, %c14, %c0_100] : memref<1x8x16x4xf32, #tpu.memory_space<vmem>>, vector<1x8x1x4xf32>
    %98 = vector.shape_cast %97 : vector<1x8x1x4xf32> to vector<8x4xf32>
    %c0_101 = arith.constant 0 : index
    %c0_102 = arith.constant 0 : index
    %c14_103 = arith.constant 14 : index
    %c0_104 = arith.constant 0 : index
    %99 = vector.load %arg3[%c0_101, %c0_102, %c14_103, %c0_104] : memref<1x8x16x4xf32, #tpu.memory_space<vmem>>, vector<1x1x1x4xf32>
    %100 = vector.shape_cast %99 : vector<1x1x1x4xf32> to vector<1x4xf32>
    %101 = vector.broadcast %100 : vector<1x4xf32> to vector<8x4xf32>
    %102 = arith.mulf %98, %101 : vector<8x4xf32>
    %103 = arith.addf %96, %102 : vector<8x4xf32>
    %c0_105 = arith.constant 0 : index
    %c0_106 = arith.constant 0 : index
    %c15 = arith.constant 15 : index
    %c0_107 = arith.constant 0 : index
    %104 = vector.load %arg2[%c0_105, %c0_106, %c15, %c0_107] : memref<1x8x16x4xf32, #tpu.memory_space<vmem>>, vector<1x8x1x4xf32>
    %105 = vector.shape_cast %104 : vector<1x8x1x4xf32> to vector<8x4xf32>
    %c0_108 = arith.constant 0 : index
    %c0_109 = arith.constant 0 : index
    %c15_110 = arith.constant 15 : index
    %c0_111 = arith.constant 0 : index
    %106 = vector.load %arg3[%c0_108, %c0_109, %c15_110, %c0_111] : memref<1x8x16x4xf32, #tpu.memory_space<vmem>>, vector<1x1x1x4xf32>
    %107 = vector.shape_cast %106 : vector<1x1x1x4xf32> to vector<1x4xf32>
    %108 = vector.broadcast %107 : vector<1x4xf32> to vector<8x4xf32>
    %109 = arith.mulf %105, %108 : vector<8x4xf32>
    %110 = arith.addf %103, %109 : vector<8x4xf32>
    %c0_112 = arith.constant 0 : index
    %c0_113 = arith.constant 0 : index
    %c0_114 = arith.constant 0 : index
    %c0_115 = arith.constant 0 : index
    %111 = vector.load %arg4[%c0_112, %c0_113, %c0_114, %c0_115] : memref<1x8x8x4xf32, #tpu.memory_space<vmem>>, vector<1x8x1x4xf32>
    %112 = vector.shape_cast %111 : vector<1x8x1x4xf32> to vector<8x4xf32>
    %113 = vector.shape_cast %110 : vector<8x4xf32> to vector<1x8x1x4xf32>
    tpu.vector_store %arg4[%c0_112, %c0_113, %c0_114, %c0_115], %113 {strides = array<i32>} : memref<1x8x8x4xf32, #tpu.memory_space<vmem>>, vector<1x8x1x4xf32>,
    %c0_116 = arith.constant 0 : index
    %c0_117 = arith.constant 0 : index
    %c0_118 = arith.constant 0 : index
    %c0_119 = arith.constant 0 : index
    %114 = vector.load %arg2[%c0_116, %c0_117, %c0_118, %c0_119] : memref<1x8x16x4xf32, #tpu.memory_space<vmem>>, vector<1x8x1x4xf32>
    %115 = vector.shape_cast %114 : vector<1x8x1x4xf32> to vector<8x4xf32>
    %c0_120 = arith.constant 0 : index
    %c1_121 = arith.constant 1 : index
    %c0_122 = arith.constant 0 : index
    %c0_123 = arith.constant 0 : index
    %116 = vector.load %arg3[%c0_120, %c1_121, %c0_122, %c0_123] : memref<1x8x16x4xf32, #tpu.memory_space<vmem>>, vector<1x1x1x4xf32>
    %117 = vector.shape_cast %116 : vector<1x1x1x4xf32> to vector<1x4xf32>
    %118 = vector.broadcast %117 : vector<1x4xf32> to vector<8x4xf32>
    %119 = arith.mulf %115, %118 : vector<8x4xf32>
    %c0_124 = arith.constant 0 : index
    %c0_125 = arith.constant 0 : index
    %c1_126 = arith.constant 1 : index
    %c0_127 = arith.constant 0 : index
    %120 = vector.load %arg2[%c0_124, %c0_125, %c1_126, %c0_127] : memref<1x8x16x4xf32, #tpu.memory_space<vmem>>, vector<1x8x1x4xf32>
    %121 = vector.shape_cast %120 : vector<1x8x1x4xf32> to vector<8x4xf32>
    %c0_128 = arith.constant 0 : index
    %c1_129 = arith.constant 1 : index
    %c1_130 = arith.constant 1 : index
    %c0_131 = arith.constant 0 : index
    %122 = vector.load %arg3[%c0_128, %c1_129, %c1_130, %c0_131] : memref<1x8x16x4xf32, #tpu.memory_space<vmem>>, vector<1x1x1x4xf32>
    %123 = vector.shape_cast %122 : vector<1x1x1x4xf32> to vector<1x4xf32>
    %124 = vector.broadcast %123 : vector<1x4xf32> to vector<8x4xf32>
    %125 = arith.mulf %121, %124 : vector<8x4xf32>
    %126 = arith.addf %119, %125 : vector<8x4xf32>
    %c0_132 = arith.constant 0 : index
    %c0_133 = arith.constant 0 : index
    %c2_134 = arith.constant 2 : index
    %c0_135 = arith.constant 0 : index
    %127 = vector.load %arg2[%c0_132, %c0_133, %c2_134, %c0_135] : memref<1x8x16x4xf32, #tpu.memory_space<vmem>>, vector<1x8x1x4xf32>
    %128 = vector.shape_cast %127 : vector<1x8x1x4xf32> to vector<8x4xf32>
    %c0_136 = arith.constant 0 : index
    %c1_137 = arith.constant 1 : index
    %c2_138 = arith.constant 2 : index
    %c0_139 = arith.constant 0 : index
    %129 = vector.load %arg3[%c0_136, %c1_137, %c2_138, %c0_139] : memref<1x8x16x4xf32, #tpu.memory_space<vmem>>, vector<1x1x1x4xf32>
    %130 = vector.shape_cast %129 : vector<1x1x1x4xf32> to vector<1x4xf32>
    %131 = vector.broadcast %130 : vector<1x4xf32> to vector<8x4xf32>
    %132 = arith.mulf %128, %131 : vector<8x4xf32>
    %133 = arith.addf %126, %132 : vector<8x4xf32>
    %c0_140 = arith.constant 0 : index
    %c0_141 = arith.constant 0 : index
    %c3_142 = arith.constant 3 : index
    %c0_143 = arith.constant 0 : index
    %134 = vector.load %arg2[%c0_140, %c0_141, %c3_142, %c0_143] : memref<1x8x16x4xf32, #tpu.memory_space<vmem>>, vector<1x8x1x4xf32>
    %135 = vector.shape_cast %134 : vector<1x8x1x4xf32> to vector<8x4xf32>
    %c0_144 = arith.constant 0 : index
    %c1_145 = arith.constant 1 : index
    %c3_146 = arith.constant 3 : index
    %c0_147 = arith.constant 0 : index
    %136 = vector.load %arg3[%c0_144, %c1_145, %c3_146, %c0_147] : memref<1x8x16x4xf32, #tpu.memory_space<vmem>>, vector<1x1x1x4xf32>
    %137 = vector.shape_cast %136 : vector<1x1x1x4xf32> to vector<1x4xf32>
    %138 = vector.broadcast %137 : vector<1x4xf32> to vector<8x4xf32>
    %139 = arith.mulf %135, %138 : vector<8x4xf32>
    %140 = arith.addf %133, %139 : vector<8x4xf32>
    %c0_148 = arith.constant 0 : index
    %c0_149 = arith.constant 0 : index
    %c4_150 = arith.constant 4 : index
    %c0_151 = arith.constant 0 : index
    %141 = vector.load %arg2[%c0_148, %c0_149, %c4_150, %c0_151] : memref<1x8x16x4xf32, #tpu.memory_space<vmem>>, vector<1x8x1x4xf32>
    %142 = vector.shape_cast %141 : vector<1x8x1x4xf32> to vector<8x4xf32>
    %c0_152 = arith.constant 0 : index
    %c1_153 = arith.constant 1 : index
    %c4_154 = arith.constant 4 : index
    %c0_155 = arith.constant 0 : index
    %143 = vector.load %arg3[%c0_152, %c1_153, %c4_154, %c0_155] : memref<1x8x16x4xf32, #tpu.memory_space<vmem>>, vector<1x1x1x4xf32>
    %144 = vector.shape_cast %143 : vector<1x1x1x4xf32> to vector<1x4xf32>
    %145 = vector.broadcast %144 : vector<1x4xf32> to vector<8x4xf32>
    %146 = arith.mulf %142, %145 : vector<8x4xf32>
    %147 = arith.addf %140, %146 : vector<8x4xf32>
    %c0_156 = arith.constant 0 : index
    %c0_157 = arith.constant 0 : index
    %c5_158 = arith.constant 5 : index
    %c0_159 = arith.constant 0 : index
    %148 = vector.load %arg2[%c0_156, %c0_157, %c5_158, %c0_159] : memref<1x8x16x4xf32, #tpu.memory_space<vmem>>, vector<1x8x1x4xf32>
    %149 = vector.shape_cast %148 : vector<1x8x1x4xf32> to vector<8x4xf32>
    %c0_160 = arith.constant 0 : index
    %c1_161 = arith.constant 1 : index
    %c5_162 = arith.constant 5 : index
    %c0_163 = arith.constant 0 : index
    %150 = vector.load %arg3[%c0_160, %c1_161, %c5_162, %c0_163] : memref<1x8x16x4xf32, #tpu.memory_space<vmem>>, vector<1x1x1x4xf32>
    %151 = vector.shape_cast %150 : vector<1x1x1x4xf32> to vector<1x4xf32>
    %152 = vector.broadcast %151 : vector<1x4xf32> to vector<8x4xf32>
    %153 = arith.mulf %149, %152 : vector<8x4xf32>
    %154 = arith.addf %147, %153 : vector<8x4xf32>
    %c0_164 = arith.constant 0 : index
    %c0_165 = arith.constant 0 : index
    %c6_166 = arith.constant 6 : index
    %c0_167 = arith.constant 0 : index
    %155 = vector.load %arg2[%c0_164, %c0_165, %c6_166, %c0_167] : memref<1x8x16x4xf32, #tpu.memory_space<vmem>>, vector<1x8x1x4xf32>
    %156 = vector.shape_cast %155 : vector<1x8x1x4xf32> to vector<8x4xf32>
    %c0_168 = arith.constant 0 : index
    %c1_169 = arith.constant 1 : index
    %c6_170 = arith.constant 6 : index
    %c0_171 = arith.constant 0 : index
    %157 = vector.load %arg3[%c0_168, %c1_169, %c6_170, %c0_171] : memref<1x8x16x4xf32, #tpu.memory_space<vmem>>, vector<1x1x1x4xf32>
    %158 = vector.shape_cast %157 : vector<1x1x1x4xf32> to vector<1x4xf32>
    %159 = vector.broadcast %158 : vector<1x4xf32> to vector<8x4xf32>
    %160 = arith.mulf %156, %159 : vector<8x4xf32>
    %161 = arith.addf %154, %160 : vector<8x4xf32>
    %c0_172 = arith.constant 0 : index
    %c0_173 = arith.constant 0 : index
    %c7_174 = arith.constant 7 : index
    %c0_175 = arith.constant 0 : index
    %162 = vector.load %arg2[%c0_172, %c0_173, %c7_174, %c0_175] : memref<1x8x16x4xf32, #tpu.memory_space<vmem>>, vector<1x8x1x4xf32>
    %163 = vector.shape_cast %162 : vector<1x8x1x4xf32> to vector<8x4xf32>
    %c0_176 = arith.constant 0 : index
    %c1_177 = arith.constant 1 : index
    %c7_178 = arith.constant 7 : index
    %c0_179 = arith.constant 0 : index
    %164 = vector.load %arg3[%c0_176, %c1_177, %c7_178, %c0_179] : memref<1x8x16x4xf32, #tpu.memory_space<vmem>>, vector<1x1x1x4xf32>
    %165 = vector.shape_cast %164 : vector<1x1x1x4xf32> to vector<1x4xf32>
    %166 = vector.broadcast %165 : vector<1x4xf32> to vector<8x4xf32>
    %167 = arith.mulf %163, %166 : vector<8x4xf32>
    %168 = arith.addf %161, %167 : vector<8x4xf32>
    %c0_180 = arith.constant 0 : index
    %c0_181 = arith.constant 0 : index
    %c8_182 = arith.constant 8 : index
    %c0_183 = arith.constant 0 : index
    %169 = vector.load %arg2[%c0_180, %c0_181, %c8_182, %c0_183] : memref<1x8x16x4xf32, #tpu.memory_space<vmem>>, vector<1x8x1x4xf32>
    %170 = vector.shape_cast %169 : vector<1x8x1x4xf32> to vector<8x4xf32>
    %c0_184 = arith.constant 0 : index
    %c1_185 = arith.constant 1 : index
    %c8_186 = arith.constant 8 : index
    %c0_187 = arith.constant 0 : index
    %171 = vector.load %arg3[%c0_184, %c1_185, %c8_186, %c0_187] : memref<1x8x16x4xf32, #tpu.memory_space<vmem>>, vector<1x1x1x4xf32>
    %172 = vector.shape_cast %171 : vector<1x1x1x4xf32> to vector<1x4xf32>
    %173 = vector.broadcast %172 : vector<1x4xf32> to vector<8x4xf32>
    %174 = arith.mulf %170, %173 : vector<8x4xf32>
    %175 = arith.addf %168, %174 : vector<8x4xf32>
    %c0_188 = arith.constant 0 : index
    %c0_189 = arith.constant 0 : index
    %c9_190 = arith.constant 9 : index
    %c0_191 = arith.constant 0 : index
    %176 = vector.load %arg2[%c0_188, %c0_189, %c9_190, %c0_191] : memref<1x8x16x4xf32, #tpu.memory_space<vmem>>, vector<1x8x1x4xf32>
    %177 = vector.shape_cast %176 : vector<1x8x1x4xf32> to vector<8x4xf32>
    %c0_192 = arith.constant 0 : index
    %c1_193 = arith.constant 1 : index
    %c9_194 = arith.constant 9 : index
    %c0_195 = arith.constant 0 : index
    %178 = vector.load %arg3[%c0_192, %c1_193, %c9_194, %c0_195] : memref<1x8x16x4xf32, #tpu.memory_space<vmem>>, vector<1x1x1x4xf32>
    %179 = vector.shape_cast %178 : vector<1x1x1x4xf32> to vector<1x4xf32>
    %180 = vector.broadcast %179 : vector<1x4xf32> to vector<8x4xf32>
    %181 = arith.mulf %177, %180 : vector<8x4xf32>
    %182 = arith.addf %175, %181 : vector<8x4xf32>
    %c0_196 = arith.constant 0 : index
    %c0_197 = arith.constant 0 : index
    %c10_198 = arith.constant 10 : index
    %c0_199 = arith.constant 0 : index
    %183 = vector.load %arg2[%c0_196, %c0_197, %c10_198, %c0_199] : memref<1x8x16x4xf32, #tpu.memory_space<vmem>>, vector<1x8x1x4xf32>
    %184 = vector.shape_cast %183 : vector<1x8x1x4xf32> to vector<8x4xf32>
    %c0_200 = arith.constant 0 : index
    %c1_201 = arith.constant 1 : index
    %c10_202 = arith.constant 10 : index
    %c0_203 = arith.constant 0 : index
    %185 = vector.load %arg3[%c0_200, %c1_201, %c10_202, %c0_203] : memref<1x8x16x4xf32, #tpu.memory_space<vmem>>, vector<1x1x1x4xf32>
    %186 = vector.shape_cast %185 : vector<1x1x1x4xf32> to vector<1x4xf32>
    %187 = vector.broadcast %186 : vector<1x4xf32> to vector<8x4xf32>
    %188 = arith.mulf %184, %187 : vector<8x4xf32>
    %189 = arith.addf %182, %188 : vector<8x4xf32>
    %c0_204 = arith.constant 0 : index
    %c0_205 = arith.constant 0 : index
    %c11_206 = arith.constant 11 : index
    %c0_207 = arith.constant 0 : index
    %190 = vector.load %arg2[%c0_204, %c0_205, %c11_206, %c0_207] : memref<1x8x16x4xf32, #tpu.memory_space<vmem>>, vector<1x8x1x4xf32>
    %191 = vector.shape_cast %190 : vector<1x8x1x4xf32> to vector<8x4xf32>
    %c0_208 = arith.constant 0 : index
    %c1_209 = arith.constant 1 : index
    %c11_210 = arith.constant 11 : index
    %c0_211 = arith.constant 0 : index
    %192 = vector.load %arg3[%c0_208, %c1_209, %c11_210, %c0_211] : memref<1x8x16x4xf32, #tpu.memory_space<vmem>>, vector<1x1x1x4xf32>
    %193 = vector.shape_cast %192 : vector<1x1x1x4xf32> to vector<1x4xf32>
    %194 = vector.broadcast %193 : vector<1x4xf32> to vector<8x4xf32>
    %195 = arith.mulf %191, %194 : vector<8x4xf32>
    %196 = arith.addf %189, %195 : vector<8x4xf32>
    %c0_212 = arith.constant 0 : index
    %c0_213 = arith.constant 0 : index
    %c12_214 = arith.constant 12 : index
    %c0_215 = arith.constant 0 : index
    %197 = vector.load %arg2[%c0_212, %c0_213, %c12_214, %c0_215] : memref<1x8x16x4xf32, #tpu.memory_space<vmem>>, vector<1x8x1x4xf32>
    %198 = vector.shape_cast %197 : vector<1x8x1x4xf32> to vector<8x4xf32>
    %c0_216 = arith.constant 0 : index
    %c1_217 = arith.constant 1 : index
    %c12_218 = arith.constant 12 : index
    %c0_219 = arith.constant 0 : index
    %199 = vector.load %arg3[%c0_216, %c1_217, %c12_218, %c0_219] : memref<1x8x16x4xf32, #tpu.memory_space<vmem>>, vector<1x1x1x4xf32>
    %200 = vector.shape_cast %199 : vector<1x1x1x4xf32> to vector<1x4xf32>
    %201 = vector.broadcast %200 : vector<1x4xf32> to vector<8x4xf32>
    %202 = arith.mulf %198, %201 : vector<8x4xf32>
    %203 = arith.addf %196, %202 : vector<8x4xf32>
    %c0_220 = arith.constant 0 : index
    %c0_221 = arith.constant 0 : index
    %c13_222 = arith.constant 13 : index
    %c0_223 = arith.constant 0 : index
    %204 = vector.load %arg2[%c0_220, %c0_221, %c13_222, %c0_223] : memref<1x8x16x4xf32, #tpu.memory_space<vmem>>, vector<1x8x1x4xf32>
    %205 = vector.shape_cast %204 : vector<1x8x1x4xf32> to vector<8x4xf32>
    %c0_224 = arith.constant 0 : index
    %c1_225 = arith.constant 1 : index
    %c13_226 = arith.constant 13 : index
    %c0_227 = arith.constant 0 : index
    %206 = vector.load %arg3[%c0_224, %c1_225, %c13_226, %c0_227] : memref<1x8x16x4xf32, #tpu.memory_space<vmem>>, vector<1x1x1x4xf32>
    %207 = vector.shape_cast %206 : vector<1x1x1x4xf32> to vector<1x4xf32>
    %208 = vector.broadcast %207 : vector<1x4xf32> to vector<8x4xf32>
    %209 = arith.mulf %205, %208 : vector<8x4xf32>
    %210 = arith.addf %203, %209 : vector<8x4xf32>
    %c0_228 = arith.constant 0 : index
    %c0_229 = arith.constant 0 : index
    %c14_230 = arith.constant 14 : index
    %c0_231 = arith.constant 0 : index
    %211 = vector.load %arg2[%c0_228, %c0_229, %c14_230, %c0_231] : memref<1x8x16x4xf32, #tpu.memory_space<vmem>>, vector<1x8x1x4xf32>
    %212 = vector.shape_cast %211 : vector<1x8x1x4xf32> to vector<8x4xf32>
    %c0_232 = arith.constant 0 : index
    %c1_233 = arith.constant 1 : index
    %c14_234 = arith.constant 14 : index
    %c0_235 = arith.constant 0 : index
    %213 = vector.load %arg3[%c0_232, %c1_233, %c14_234, %c0_235] : memref<1x8x16x4xf32, #tpu.memory_space<vmem>>, vector<1x1x1x4xf32>
    %214 = vector.shape_cast %213 : vector<1x1x1x4xf32> to vector<1x4xf32>
    %215 = vector.broadcast %214 : vector<1x4xf32> to vector<8x4xf32>
    %216 = arith.mulf %212, %215 : vector<8x4xf32>
    %217 = arith.addf %210, %216 : vector<8x4xf32>
    %c0_236 = arith.constant 0 : index
    %c0_237 = arith.constant 0 : index
    %c15_238 = arith.constant 15 : index
    %c0_239 = arith.constant 0 : index
    %218 = vector.load %arg2[%c0_236, %c0_237, %c15_238, %c0_239] : memref<1x8x16x4xf32, #tpu.memory_space<vmem>>, vector<1x8x1x4xf32>
    %219 = vector.shape_cast %218 : vector<1x8x1x4xf32> to vector<8x4xf32>
    %c0_240 = arith.constant 0 : index
    %c1_241 = arith.constant 1 : index
    %c15_242 = arith.constant 15 : index
    %c0_243 = arith.constant 0 : index
    %220 = vector.load %arg3[%c0_240, %c1_241, %c15_242, %c0_243] : memref<1x8x16x4xf32, #tpu.memory_space<vmem>>, vector<1x1x1x4xf32>
    %221 = vector.shape_cast %220 : vector<1x1x1x4xf32> to vector<1x4xf32>
    %222 = vector.broadcast %221 : vector<1x4xf32> to vector<8x4xf32>
    %223 = arith.mulf %219, %222 : vector<8x4xf32>
    %224 = arith.addf %217, %223 : vector<8x4xf32>
    %c0_244 = arith.constant 0 : index
    %c0_245 = arith.constant 0 : index
    %c1_246 = arith.constant 1 : index
    %c0_247 = arith.constant 0 : index
    %225 = vector.load %arg4[%c0_244, %c0_245, %c1_246, %c0_247] : memref<1x8x8x4xf32, #tpu.memory_space<vmem>>, vector<1x8x1x4xf32>
    %226 = vector.shape_cast %225 : vector<1x8x1x4xf32> to vector<8x4xf32>
    %227 = vector.shape_cast %224 : vector<8x4xf32> to vector<1x8x1x4xf32>
    tpu.vector_store %arg4[%c0_244, %c0_245, %c1_246, %c0_247], %227 {strides = array<i32>} : memref<1x8x8x4xf32, #tpu.memory_space<vmem>>, vector<1x8x1x4xf32>,
    %c0_248 = arith.constant 0 : index
    %c0_249 = arith.constant 0 : index
    %c0_250 = arith.constant 0 : index
    %c0_251 = arith.constant 0 : index
    %228 = vector.load %arg2[%c0_248, %c0_249, %c0_250, %c0_251] : memref<1x8x16x4xf32, #tpu.memory_space<vmem>>, vector<1x8x1x4xf32>
    %229 = vector.shape_cast %228 : vector<1x8x1x4xf32> to vector<8x4xf32>
    %c0_252 = arith.constant 0 : index
    %c2_253 = arith.constant 2 : index
    %c0_254 = arith.constant 0 : index
    %c0_255 = arith.constant 0 : index
    %230 = vector.load %arg3[%c0_252, %c2_253, %c0_254, %c0_255] : memref<1x8x16x4xf32, #tpu.memory_space<vmem>>, vector<1x1x1x4xf32>
    %231 = vector.shape_cast %230 : vector<1x1x1x4xf32> to vector<1x4xf32>
    %232 = vector.broadcast %231 : vector<1x4xf32> to vector<8x4xf32>
    %233 = arith.mulf %229, %232 : vector<8x4xf32>
    %c0_256 = arith.constant 0 : index
    %c0_257 = arith.constant 0 : index
    %c1_258 = arith.constant 1 : index
    %c0_259 = arith.constant 0 : index
    %234 = vector.load %arg2[%c0_256, %c0_257, %c1_258, %c0_259] : memref<1x8x16x4xf32, #tpu.memory_space<vmem>>, vector<1x8x1x4xf32>
    %235 = vector.shape_cast %234 : vector<1x8x1x4xf32> to vector<8x4xf32>
    %c0_260 = arith.constant 0 : index
    %c2_261 = arith.constant 2 : index
    %c1_262 = arith.constant 1 : index
    %c0_263 = arith.constant 0 : index
    %236 = vector.load %arg3[%c0_260, %c2_261, %c1_262, %c0_263] : memref<1x8x16x4xf32, #tpu.memory_space<vmem>>, vector<1x1x1x4xf32>
    %237 = vector.shape_cast %236 : vector<1x1x1x4xf32> to vector<1x4xf32>
    %238 = vector.broadcast %237 : vector<1x4xf32> to vector<8x4xf32>
    %239 = arith.mulf %235, %238 : vector<8x4xf32>
    %240 = arith.addf %233, %239 : vector<8x4xf32>
    %c0_264 = arith.constant 0 : index
    %c0_265 = arith.constant 0 : index
    %c2_266 = arith.constant 2 : index
    %c0_267 = arith.constant 0 : index
    %241 = vector.load %arg2[%c0_264, %c0_265, %c2_266, %c0_267] : memref<1x8x16x4xf32, #tpu.memory_space<vmem>>, vector<1x8x1x4xf32>
    %242 = vector.shape_cast %241 : vector<1x8x1x4xf32> to vector<8x4xf32>
    %c0_268 = arith.constant 0 : index
    %c2_269 = arith.constant 2 : index
    %c2_270 = arith.constant 2 : index
    %c0_271 = arith.constant 0 : index
    %243 = vector.load %arg3[%c0_268, %c2_269, %c2_270, %c0_271] : memref<1x8x16x4xf32, #tpu.memory_space<vmem>>, vector<1x1x1x4xf32>
    %244 = vector.shape_cast %243 : vector<1x1x1x4xf32> to vector<1x4xf32>
    %245 = vector.broadcast %244 : vector<1x4xf32> to vector<8x4xf32>
    %246 = arith.mulf %242, %245 : vector<8x4xf32>
    %247 = arith.addf %240, %246 : vector<8x4xf32>
    %c0_272 = arith.constant 0 : index
    %c0_273 = arith.constant 0 : index
    %c3_274 = arith.constant 3 : index
    %c0_275 = arith.constant 0 : index
    %248 = vector.load %arg2[%c0_272, %c0_273, %c3_274, %c0_275] : memref<1x8x16x4xf32, #tpu.memory_space<vmem>>, vector<1x8x1x4xf32>
    %249 = vector.shape_cast %248 : vector<1x8x1x4xf32> to vector<8x4xf32>
    %c0_276 = arith.constant 0 : index
    %c2_277 = arith.constant 2 : index
    %c3_278 = arith.constant 3 : index
    %c0_279 = arith.constant 0 : index
    %250 = vector.load %arg3[%c0_276, %c2_277, %c3_278, %c0_279] : memref<1x8x16x4xf32, #tpu.memory_space<vmem>>, vector<1x1x1x4xf32>
    %251 = vector.shape_cast %250 : vector<1x1x1x4xf32> to vector<1x4xf32>
    %252 = vector.broadcast %251 : vector<1x4xf32> to vector<8x4xf32>
    %253 = arith.mulf %249, %252 : vector<8x4xf32>
    %254 = arith.addf %247, %253 : vector<8x4xf32>
    %c0_280 = arith.constant 0 : index
    %c0_281 = arith.constant 0 : index
    %c4_282 = arith.constant 4 : index
    %c0_283 = arith.constant 0 : index
    %255 = vector.load %arg2[%c0_280, %c0_281, %c4_282, %c0_283] : memref<1x8x16x4xf32, #tpu.memory_space<vmem>>, vector<1x8x1x4xf32>
    %256 = vector.shape_cast %255 : vector<1x8x1x4xf32> to vector<8x4xf32>
    %c0_284 = arith.constant 0 : index
    %c2_285 = arith.constant 2 : index
    %c4_286 = arith.constant 4 : index
    %c0_287 = arith.constant 0 : index
    %257 = vector.load %arg3[%c0_284, %c2_285, %c4_286, %c0_287] : memref<1x8x16x4xf32, #tpu.memory_space<vmem>>, vector<1x1x1x4xf32>
    %258 = vector.shape_cast %257 : vector<1x1x1x4xf32> to vector<1x4xf32>
    %259 = vector.broadcast %258 : vector<1x4xf32> to vector<8x4xf32>
    %260 = arith.mulf %256, %259 : vector<8x4xf32>
    %261 = arith.addf %254, %260 : vector<8x4xf32>
    %c0_288 = arith.constant 0 : index
    %c0_289 = arith.constant 0 : index
    %c5_290 = arith.constant 5 : index
    %c0_291 = arith.constant 0 : index
    %262 = vector.load %arg2[%c0_288, %c0_289, %c5_290, %c0_291] : memref<1x8x16x4xf32, #tpu.memory_space<vmem>>, vector<1x8x1x4xf32>
    %263 = vector.shape_cast %262 : vector<1x8x1x4xf32> to vector<8x4xf32>
    %c0_292 = arith.constant 0 : index
    %c2_293 = arith.constant 2 : index
    %c5_294 = arith.constant 5 : index
    %c0_295 = arith.constant 0 : index
    %264 = vector.load %arg3[%c0_292, %c2_293, %c5_294, %c0_295] : memref<1x8x16x4xf32, #tpu.memory_space<vmem>>, vector<1x1x1x4xf32>
    %265 = vector.shape_cast %264 : vector<1x1x1x4xf32> to vector<1x4xf32>
    %266 = vector.broadcast %265 : vector<1x4xf32> to vector<8x4xf32>
    %267 = arith.mulf %263, %266 : vector<8x4xf32>
    %268 = arith.addf %261, %267 : vector<8x4xf32>
    %c0_296 = arith.constant 0 : index
    %c0_297 = arith.constant 0 : index
    %c6_298 = arith.constant 6 : index
    %c0_299 = arith.constant 0 : index
    %269 = vector.load %arg2[%c0_296, %c0_297, %c6_298, %c0_299] : memref<1x8x16x4xf32, #tpu.memory_space<vmem>>, vector<1x8x1x4xf32>
    %270 = vector.shape_cast %269 : vector<1x8x1x4xf32> to vector<8x4xf32>
    %c0_300 = arith.constant 0 : index
    %c2_301 = arith.constant 2 : index
    %c6_302 = arith.constant 6 : index
    %c0_303 = arith.constant 0 : index
    %271 = vector.load %arg3[%c0_300, %c2_301, %c6_302, %c0_303] : memref<1x8x16x4xf32, #tpu.memory_space<vmem>>, vector<1x1x1x4xf32>
    %272 = vector.shape_cast %271 : vector<1x1x1x4xf32> to vector<1x4xf32>
    %273 = vector.broadcast %272 : vector<1x4xf32> to vector<8x4xf32>
    %274 = arith.mulf %270, %273 : vector<8x4xf32>
    %275 = arith.addf %268, %274 : vector<8x4xf32>
    %c0_304 = arith.constant 0 : index
    %c0_305 = arith.constant 0 : index
    %c7_306 = arith.constant 7 : index
    %c0_307 = arith.constant 0 : index
    %276 = vector.load %arg2[%c0_304, %c0_305, %c7_306, %c0_307] : memref<1x8x16x4xf32, #tpu.memory_space<vmem>>, vector<1x8x1x4xf32>
    %277 = vector.shape_cast %276 : vector<1x8x1x4xf32> to vector<8x4xf32>
    %c0_308 = arith.constant 0 : index
    %c2_309 = arith.constant 2 : index
    %c7_310 = arith.constant 7 : index
    %c0_311 = arith.constant 0 : index
    %278 = vector.load %arg3[%c0_308, %c2_309, %c7_310, %c0_311] : memref<1x8x16x4xf32, #tpu.memory_space<vmem>>, vector<1x1x1x4xf32>
    %279 = vector.shape_cast %278 : vector<1x1x1x4xf32> to vector<1x4xf32>
    %280 = vector.broadcast %279 : vector<1x4xf32> to vector<8x4xf32>
    %281 = arith.mulf %277, %280 : vector<8x4xf32>
    %282 = arith.addf %275, %281 : vector<8x4xf32>
    %c0_312 = arith.constant 0 : index
    %c0_313 = arith.constant 0 : index
    %c8_314 = arith.constant 8 : index
    %c0_315 = arith.constant 0 : index
    %283 = vector.load %arg2[%c0_312, %c0_313, %c8_314, %c0_315] : memref<1x8x16x4xf32, #tpu.memory_space<vmem>>, vector<1x8x1x4xf32>
    %284 = vector.shape_cast %283 : vector<1x8x1x4xf32> to vector<8x4xf32>
    %c0_316 = arith.constant 0 : index
    %c2_317 = arith.constant 2 : index
    %c8_318 = arith.constant 8 : index
    %c0_319 = arith.constant 0 : index
    %285 = vector.load %arg3[%c0_316, %c2_317, %c8_318, %c0_319] : memref<1x8x16x4xf32, #tpu.memory_space<vmem>>, vector<1x1x1x4xf32>
    %286 = vector.shape_cast %285 : vector<1x1x1x4xf32> to vector<1x4xf32>
    %287 = vector.broadcast %286 : vector<1x4xf32> to vector<8x4xf32>
    %288 = arith.mulf %284, %287 : vector<8x4xf32>
    %289 = arith.addf %282, %288 : vector<8x4xf32>
    %c0_320 = arith.constant 0 : index
    %c0_321 = arith.constant 0 : index
    %c9_322 = arith.constant 9 : index
    %c0_323 = arith.constant 0 : index
    %290 = vector.load %arg2[%c0_320, %c0_321, %c9_322, %c0_323] : memref<1x8x16x4xf32, #tpu.memory_space<vmem>>, vector<1x8x1x4xf32>
    %291 = vector.shape_cast %290 : vector<1x8x1x4xf32> to vector<8x4xf32>
    %c0_324 = arith.constant 0 : index
    %c2_325 = arith.constant 2 : index
    %c9_326 = arith.constant 9 : index
    %c0_327 = arith.constant 0 : index
    %292 = vector.load %arg3[%c0_324, %c2_325, %c9_326, %c0_327] : memref<1x8x16x4xf32, #tpu.memory_space<vmem>>, vector<1x1x1x4xf32>
    %293 = vector.shape_cast %292 : vector<1x1x1x4xf32> to vector<1x4xf32>
    %294 = vector.broadcast %293 : vector<1x4xf32> to vector<8x4xf32>
    %295 = arith.mulf %291, %294 : vector<8x4xf32>
    %296 = arith.addf %289, %295 : vector<8x4xf32>
    %c0_328 = arith.constant 0 : index
    %c0_329 = arith.constant 0 : index
    %c10_330 = arith.constant 10 : index
    %c0_331 = arith.constant 0 : index
    %297 = vector.load %arg2[%c0_328, %c0_329, %c10_330, %c0_331] : memref<1x8x16x4xf32, #tpu.memory_space<vmem>>, vector<1x8x1x4xf32>
    %298 = vector.shape_cast %297 : vector<1x8x1x4xf32> to vector<8x4xf32>
    %c0_332 = arith.constant 0 : index
    %c2_333 = arith.constant 2 : index
    %c10_334 = arith.constant 10 : index
    %c0_335 = arith.constant 0 : index
    %299 = vector.load %arg3[%c0_332, %c2_333, %c10_334, %c0_335] : memref<1x8x16x4xf32, #tpu.memory_space<vmem>>, vector<1x1x1x4xf32>
    %300 = vector.shape_cast %299 : vector<1x1x1x4xf32> to vector<1x4xf32>
    %301 = vector.broadcast %300 : vector<1x4xf32> to vector<8x4xf32>
    %302 = arith.mulf %298, %301 : vector<8x4xf32>
    %303 = arith.addf %296, %302 : vector<8x4xf32>
    %c0_336 = arith.constant 0 : index
    %c0_337 = arith.constant 0 : index
    %c11_338 = arith.constant 11 : index
    %c0_339 = arith.constant 0 : index
    %304 = vector.load %arg2[%c0_336, %c0_337, %c11_338, %c0_339] : memref<1x8x16x4xf32, #tpu.memory_space<vmem>>, vector<1x8x1x4xf32>
    %305 = vector.shape_cast %304 : vector<1x8x1x4xf32> to vector<8x4xf32>
    %c0_340 = arith.constant 0 : index
    %c2_341 = arith.constant 2 : index
    %c11_342 = arith.constant 11 : index
    %c0_343 = arith.constant 0 : index
    %306 = vector.load %arg3[%c0_340, %c2_341, %c11_342, %c0_343] : memref<1x8x16x4xf32, #tpu.memory_space<vmem>>, vector<1x1x1x4xf32>
    %307 = vector.shape_cast %306 : vector<1x1x1x4xf32> to vector<1x4xf32>
    %308 = vector.broadcast %307 : vector<1x4xf32> to vector<8x4xf32>
    %309 = arith.mulf %305, %308 : vector<8x4xf32>
    %310 = arith.addf %303, %309 : vector<8x4xf32>
    %c0_344 = arith.constant 0 : index
    %c0_345 = arith.constant 0 : index
    %c12_346 = arith.constant 12 : index
    %c0_347 = arith.constant 0 : index
    %311 = vector.load %arg2[%c0_344, %c0_345, %c12_346, %c0_347] : memref<1x8x16x4xf32, #tpu.memory_space<vmem>>, vector<1x8x1x4xf32>
    %312 = vector.shape_cast %311 : vector<1x8x1x4xf32> to vector<8x4xf32>
    %c0_348 = arith.constant 0 : index
    %c2_349 = arith.constant 2 : index
    %c12_350 = arith.constant 12 : index
    %c0_351 = arith.constant 0 : index
    %313 = vector.load %arg3[%c0_348, %c2_349, %c12_350, %c0_351] : memref<1x8x16x4xf32, #tpu.memory_space<vmem>>, vector<1x1x1x4xf32>
    %314 = vector.shape_cast %313 : vector<1x1x1x4xf32> to vector<1x4xf32>
    %315 = vector.broadcast %314 : vector<1x4xf32> to vector<8x4xf32>
    %316 = arith.mulf %312, %315 : vector<8x4xf32>
    %317 = arith.addf %310, %316 : vector<8x4xf32>
    %c0_352 = arith.constant 0 : index
    %c0_353 = arith.constant 0 : index
    %c13_354 = arith.constant 13 : index
    %c0_355 = arith.constant 0 : index
    %318 = vector.load %arg2[%c0_352, %c0_353, %c13_354, %c0_355] : memref<1x8x16x4xf32, #tpu.memory_space<vmem>>, vector<1x8x1x4xf32>
    %319 = vector.shape_cast %318 : vector<1x8x1x4xf32> to vector<8x4xf32>
    %c0_356 = arith.constant 0 : index
    %c2_357 = arith.constant 2 : index
    %c13_358 = arith.constant 13 : index
    %c0_359 = arith.constant 0 : index
    %320 = vector.load %arg3[%c0_356, %c2_357, %c13_358, %c0_359] : memref<1x8x16x4xf32, #tpu.memory_space<vmem>>, vector<1x1x1x4xf32>
    %321 = vector.shape_cast %320 : vector<1x1x1x4xf32> to vector<1x4xf32>
    %322 = vector.broadcast %321 : vector<1x4xf32> to vector<8x4xf32>
    %323 = arith.mulf %319, %322 : vector<8x4xf32>
    %324 = arith.addf %317, %323 : vector<8x4xf32>
    %c0_360 = arith.constant 0 : index
    %c0_361 = arith.constant 0 : index
    %c14_362 = arith.constant 14 : index
    %c0_363 = arith.constant 0 : index
    %325 = vector.load %arg2[%c0_360, %c0_361, %c14_362, %c0_363] : memref<1x8x16x4xf32, #tpu.memory_space<vmem>>, vector<1x8x1x4xf32>
    %326 = vector.shape_cast %325 : vector<1x8x1x4xf32> to vector<8x4xf32>
    %c0_364 = arith.constant 0 : index
    %c2_365 = arith.constant 2 : index
    %c14_366 = arith.constant 14 : index
    %c0_367 = arith.constant 0 : index
    %327 = vector.load %arg3[%c0_364, %c2_365, %c14_366, %c0_367] : memref<1x8x16x4xf32, #tpu.memory_space<vmem>>, vector<1x1x1x4xf32>
    %328 = vector.shape_cast %327 : vector<1x1x1x4xf32> to vector<1x4xf32>
    %329 = vector.broadcast %328 : vector<1x4xf32> to vector<8x4xf32>
    %330 = arith.mulf %326, %329 : vector<8x4xf32>
    %331 = arith.addf %324, %330 : vector<8x4xf32>
    %c0_368 = arith.constant 0 : index
    %c0_369 = arith.constant 0 : index
    %c15_370 = arith.constant 15 : index
    %c0_371 = arith.constant 0 : index
    %332 = vector.load %arg2[%c0_368, %c0_369, %c15_370, %c0_371] : memref<1x8x16x4xf32, #tpu.memory_space<vmem>>, vector<1x8x1x4xf32>
    %333 = vector.shape_cast %332 : vector<1x8x1x4xf32> to vector<8x4xf32>
    %c0_372 = arith.constant 0 : index
    %c2_373 = arith.constant 2 : index
    %c15_374 = arith.constant 15 : index
    %c0_375 = arith.constant 0 : index
    %334 = vector.load %arg3[%c0_372, %c2_373, %c15_374, %c0_375] : memref<1x8x16x4xf32, #tpu.memory_space<vmem>>, vector<1x1x1x4xf32>
    %335 = vector.shape_cast %334 : vector<1x1x1x4xf32> to vector<1x4xf32>
    %336 = vector.broadcast %335 : vector<1x4xf32> to vector<8x4xf32>
    %337 = arith.mulf %333, %336 : vector<8x4xf32>
    %338 = arith.addf %331, %337 : vector<8x4xf32>
    %c0_376 = arith.constant 0 : index
    %c0_377 = arith.constant 0 : index
    %c2_378 = arith.constant 2 : index
    %c0_379 = arith.constant 0 : index
    %339 = vector.load %arg4[%c0_376, %c0_377, %c2_378, %c0_379] : memref<1x8x8x4xf32, #tpu.memory_space<vmem>>, vector<1x8x1x4xf32>
    %340 = vector.shape_cast %339 : vector<1x8x1x4xf32> to vector<8x4xf32>
    %341 = vector.shape_cast %338 : vector<8x4xf32> to vector<1x8x1x4xf32>
    tpu.vector_store %arg4[%c0_376, %c0_377, %c2_378, %c0_379], %341 {strides = array<i32>} : memref<1x8x8x4xf32, #tpu.memory_space<vmem>>, vector<1x8x1x4xf32>,
    %c0_380 = arith.constant 0 : index
    %c0_381 = arith.constant 0 : index
    %c0_382 = arith.constant 0 : index
    %c0_383 = arith.constant 0 : index
    %342 = vector.load %arg2[%c0_380, %c0_381, %c0_382, %c0_383] : memref<1x8x16x4xf32, #tpu.memory_space<vmem>>, vector<1x8x1x4xf32>
    %343 = vector.shape_cast %342 : vector<1x8x1x4xf32> to vector<8x4xf32>
    %c0_384 = arith.constant 0 : index
    %c3_385 = arith.constant 3 : index
    %c0_386 = arith.constant 0 : index
    %c0_387 = arith.constant 0 : index
    %344 = vector.load %arg3[%c0_384, %c3_385, %c0_386, %c0_387] : memref<1x8x16x4xf32, #tpu.memory_space<vmem>>, vector<1x1x1x4xf32>
    %345 = vector.shape_cast %344 : vector<1x1x1x4xf32> to vector<1x4xf32>
    %346 = vector.broadcast %345 : vector<1x4xf32> to vector<8x4xf32>
    %347 = arith.mulf %343, %346 : vector<8x4xf32>
    %c0_388 = arith.constant 0 : index
    %c0_389 = arith.constant 0 : index
    %c1_390 = arith.constant 1 : index
    %c0_391 = arith.constant 0 : index
    %348 = vector.load %arg2[%c0_388, %c0_389, %c1_390, %c0_391] : memref<1x8x16x4xf32, #tpu.memory_space<vmem>>, vector<1x8x1x4xf32>
    %349 = vector.shape_cast %348 : vector<1x8x1x4xf32> to vector<8x4xf32>
    %c0_392 = arith.constant 0 : index
    %c3_393 = arith.constant 3 : index
    %c1_394 = arith.constant 1 : index
    %c0_395 = arith.constant 0 : index
    %350 = vector.load %arg3[%c0_392, %c3_393, %c1_394, %c0_395] : memref<1x8x16x4xf32, #tpu.memory_space<vmem>>, vector<1x1x1x4xf32>
    %351 = vector.shape_cast %350 : vector<1x1x1x4xf32> to vector<1x4xf32>
    %352 = vector.broadcast %351 : vector<1x4xf32> to vector<8x4xf32>
    %353 = arith.mulf %349, %352 : vector<8x4xf32>
    %354 = arith.addf %347, %353 : vector<8x4xf32>
    %c0_396 = arith.constant 0 : index
    %c0_397 = arith.constant 0 : index
    %c2_398 = arith.constant 2 : index
    %c0_399 = arith.constant 0 : index
    %355 = vector.load %arg2[%c0_396, %c0_397, %c2_398, %c0_399] : memref<1x8x16x4xf32, #tpu.memory_space<vmem>>, vector<1x8x1x4xf32>
    %356 = vector.shape_cast %355 : vector<1x8x1x4xf32> to vector<8x4xf32>
    %c0_400 = arith.constant 0 : index
    %c3_401 = arith.constant 3 : index
    %c2_402 = arith.constant 2 : index
    %c0_403 = arith.constant 0 : index
    %357 = vector.load %arg3[%c0_400, %c3_401, %c2_402, %c0_403] : memref<1x8x16x4xf32, #tpu.memory_space<vmem>>, vector<1x1x1x4xf32>
    %358 = vector.shape_cast %357 : vector<1x1x1x4xf32> to vector<1x4xf32>
    %359 = vector.broadcast %358 : vector<1x4xf32> to vector<8x4xf32>
    %360 = arith.mulf %356, %359 : vector<8x4xf32>
    %361 = arith.addf %354, %360 : vector<8x4xf32>
    %c0_404 = arith.constant 0 : index
    %c0_405 = arith.constant 0 : index
    %c3_406 = arith.constant 3 : index
    %c0_407 = arith.constant 0 : index
    %362 = vector.load %arg2[%c0_404, %c0_405, %c3_406, %c0_407] : memref<1x8x16x4xf32, #tpu.memory_space<vmem>>, vector<1x8x1x4xf32>
    %363 = vector.shape_cast %362 : vector<1x8x1x4xf32> to vector<8x4xf32>
    %c0_408 = arith.constant 0 : index
    %c3_409 = arith.constant 3 : index
    %c3_410 = arith.constant 3 : index
    %c0_411 = arith.constant 0 : index
    %364 = vector.load %arg3[%c0_408, %c3_409, %c3_410, %c0_411] : memref<1x8x16x4xf32, #tpu.memory_space<vmem>>, vector<1x1x1x4xf32>
    %365 = vector.shape_cast %364 : vector<1x1x1x4xf32> to vector<1x4xf32>
    %366 = vector.broadcast %365 : vector<1x4xf32> to vector<8x4xf32>
    %367 = arith.mulf %363, %366 : vector<8x4xf32>
    %368 = arith.addf %361, %367 : vector<8x4xf32>
    %c0_412 = arith.constant 0 : index
    %c0_413 = arith.constant 0 : index
    %c4_414 = arith.constant 4 : index
    %c0_415 = arith.constant 0 : index
    %369 = vector.load %arg2[%c0_412, %c0_413, %c4_414, %c0_415] : memref<1x8x16x4xf32, #tpu.memory_space<vmem>>, vector<1x8x1x4xf32>
    %370 = vector.shape_cast %369 : vector<1x8x1x4xf32> to vector<8x4xf32>
    %c0_416 = arith.constant 0 : index
    %c3_417 = arith.constant 3 : index
    %c4_418 = arith.constant 4 : index
    %c0_419 = arith.constant 0 : index
    %371 = vector.load %arg3[%c0_416, %c3_417, %c4_418, %c0_419] : memref<1x8x16x4xf32, #tpu.memory_space<vmem>>, vector<1x1x1x4xf32>
    %372 = vector.shape_cast %371 : vector<1x1x1x4xf32> to vector<1x4xf32>
    %373 = vector.broadcast %372 : vector<1x4xf32> to vector<8x4xf32>
    %374 = arith.mulf %370, %373 : vector<8x4xf32>
    %375 = arith.addf %368, %374 : vector<8x4xf32>
    %c0_420 = arith.constant 0 : index
    %c0_421 = arith.constant 0 : index
    %c5_422 = arith.constant 5 : index
    %c0_423 = arith.constant 0 : index
    %376 = vector.load %arg2[%c0_420, %c0_421, %c5_422, %c0_423] : memref<1x8x16x4xf32, #tpu.memory_space<vmem>>, vector<1x8x1x4xf32>
    %377 = vector.shape_cast %376 : vector<1x8x1x4xf32> to vector<8x4xf32>
    %c0_424 = arith.constant 0 : index
    %c3_425 = arith.constant 3 : index
    %c5_426 = arith.constant 5 : index
    %c0_427 = arith.constant 0 : index
    %378 = vector.load %arg3[%c0_424, %c3_425, %c5_426, %c0_427] : memref<1x8x16x4xf32, #tpu.memory_space<vmem>>, vector<1x1x1x4xf32>
    %379 = vector.shape_cast %378 : vector<1x1x1x4xf32> to vector<1x4xf32>
    %380 = vector.broadcast %379 : vector<1x4xf32> to vector<8x4xf32>
    %381 = arith.mulf %377, %380 : vector<8x4xf32>
    %382 = arith.addf %375, %381 : vector<8x4xf32>
    %c0_428 = arith.constant 0 : index
    %c0_429 = arith.constant 0 : index
    %c6_430 = arith.constant 6 : index
    %c0_431 = arith.constant 0 : index
    %383 = vector.load %arg2[%c0_428, %c0_429, %c6_430, %c0_431] : memref<1x8x16x4xf32, #tpu.memory_space<vmem>>, vector<1x8x1x4xf32>
    %384 = vector.shape_cast %383 : vector<1x8x1x4xf32> to vector<8x4xf32>
    %c0_432 = arith.constant 0 : index
    %c3_433 = arith.constant 3 : index
    %c6_434 = arith.constant 6 : index
    %c0_435 = arith.constant 0 : index
    %385 = vector.load %arg3[%c0_432, %c3_433, %c6_434, %c0_435] : memref<1x8x16x4xf32, #tpu.memory_space<vmem>>, vector<1x1x1x4xf32>
    %386 = vector.shape_cast %385 : vector<1x1x1x4xf32> to vector<1x4xf32>
    %387 = vector.broadcast %386 : vector<1x4xf32> to vector<8x4xf32>
    %388 = arith.mulf %384, %387 : vector<8x4xf32>
    %389 = arith.addf %382, %388 : vector<8x4xf32>
    %c0_436 = arith.constant 0 : index
    %c0_437 = arith.constant 0 : index
    %c7_438 = arith.constant 7 : index
    %c0_439 = arith.constant 0 : index
    %390 = vector.load %arg2[%c0_436, %c0_437, %c7_438, %c0_439] : memref<1x8x16x4xf32, #tpu.memory_space<vmem>>, vector<1x8x1x4xf32>
    %391 = vector.shape_cast %390 : vector<1x8x1x4xf32> to vector<8x4xf32>
    %c0_440 = arith.constant 0 : index
    %c3_441 = arith.constant 3 : index
    %c7_442 = arith.constant 7 : index
    %c0_443 = arith.constant 0 : index
    %392 = vector.load %arg3[%c0_440, %c3_441, %c7_442, %c0_443] : memref<1x8x16x4xf32, #tpu.memory_space<vmem>>, vector<1x1x1x4xf32>
    %393 = vector.shape_cast %392 : vector<1x1x1x4xf32> to vector<1x4xf32>
    %394 = vector.broadcast %393 : vector<1x4xf32> to vector<8x4xf32>
    %395 = arith.mulf %391, %394 : vector<8x4xf32>
    %396 = arith.addf %389, %395 : vector<8x4xf32>
    %c0_444 = arith.constant 0 : index
    %c0_445 = arith.constant 0 : index
    %c8_446 = arith.constant 8 : index
    %c0_447 = arith.constant 0 : index
    %397 = vector.load %arg2[%c0_444, %c0_445, %c8_446, %c0_447] : memref<1x8x16x4xf32, #tpu.memory_space<vmem>>, vector<1x8x1x4xf32>
    %398 = vector.shape_cast %397 : vector<1x8x1x4xf32> to vector<8x4xf32>
    %c0_448 = arith.constant 0 : index
    %c3_449 = arith.constant 3 : index
    %c8_450 = arith.constant 8 : index
    %c0_451 = arith.constant 0 : index
    %399 = vector.load %arg3[%c0_448, %c3_449, %c8_450, %c0_451] : memref<1x8x16x4xf32, #tpu.memory_space<vmem>>, vector<1x1x1x4xf32>
    %400 = vector.shape_cast %399 : vector<1x1x1x4xf32> to vector<1x4xf32>
    %401 = vector.broadcast %400 : vector<1x4xf32> to vector<8x4xf32>
    %402 = arith.mulf %398, %401 : vector<8x4xf32>
    %403 = arith.addf %396, %402 : vector<8x4xf32>
    %c0_452 = arith.constant 0 : index
    %c0_453 = arith.constant 0 : index
    %c9_454 = arith.constant 9 : index
    %c0_455 = arith.constant 0 : index
    %404 = vector.load %arg2[%c0_452, %c0_453, %c9_454, %c0_455] : memref<1x8x16x4xf32, #tpu.memory_space<vmem>>, vector<1x8x1x4xf32>
    %405 = vector.shape_cast %404 : vector<1x8x1x4xf32> to vector<8x4xf32>
    %c0_456 = arith.constant 0 : index
    %c3_457 = arith.constant 3 : index
    %c9_458 = arith.constant 9 : index
    %c0_459 = arith.constant 0 : index
    %406 = vector.load %arg3[%c0_456, %c3_457, %c9_458, %c0_459] : memref<1x8x16x4xf32, #tpu.memory_space<vmem>>, vector<1x1x1x4xf32>
    %407 = vector.shape_cast %406 : vector<1x1x1x4xf32> to vector<1x4xf32>
    %408 = vector.broadcast %407 : vector<1x4xf32> to vector<8x4xf32>
    %409 = arith.mulf %405, %408 : vector<8x4xf32>
    %410 = arith.addf %403, %409 : vector<8x4xf32>
    %c0_460 = arith.constant 0 : index
    %c0_461 = arith.constant 0 : index
    %c10_462 = arith.constant 10 : index
    %c0_463 = arith.constant 0 : index
    %411 = vector.load %arg2[%c0_460, %c0_461, %c10_462, %c0_463] : memref<1x8x16x4xf32, #tpu.memory_space<vmem>>, vector<1x8x1x4xf32>
    %412 = vector.shape_cast %411 : vector<1x8x1x4xf32> to vector<8x4xf32>
    %c0_464 = arith.constant 0 : index
    %c3_465 = arith.constant 3 : index
    %c10_466 = arith.constant 10 : index
    %c0_467 = arith.constant 0 : index
    %413 = vector.load %arg3[%c0_464, %c3_465, %c10_466, %c0_467] : memref<1x8x16x4xf32, #tpu.memory_space<vmem>>, vector<1x1x1x4xf32>
    %414 = vector.shape_cast %413 : vector<1x1x1x4xf32> to vector<1x4xf32>
    %415 = vector.broadcast %414 : vector<1x4xf32> to vector<8x4xf32>
    %416 = arith.mulf %412, %415 : vector<8x4xf32>
    %417 = arith.addf %410, %416 : vector<8x4xf32>
    %c0_468 = arith.constant 0 : index
    %c0_469 = arith.constant 0 : index
    %c11_470 = arith.constant 11 : index
    %c0_471 = arith.constant 0 : index
    %418 = vector.load %arg2[%c0_468, %c0_469, %c11_470, %c0_471] : memref<1x8x16x4xf32, #tpu.memory_space<vmem>>, vector<1x8x1x4xf32>
    %419 = vector.shape_cast %418 : vector<1x8x1x4xf32> to vector<8x4xf32>
    %c0_472 = arith.constant 0 : index
    %c3_473 = arith.constant 3 : index
    %c11_474 = arith.constant 11 : index
    %c0_475 = arith.constant 0 : index
    %420 = vector.load %arg3[%c0_472, %c3_473, %c11_474, %c0_475] : memref<1x8x16x4xf32, #tpu.memory_space<vmem>>, vector<1x1x1x4xf32>
    %421 = vector.shape_cast %420 : vector<1x1x1x4xf32> to vector<1x4xf32>
    %422 = vector.broadcast %421 : vector<1x4xf32> to vector<8x4xf32>
    %423 = arith.mulf %419, %422 : vector<8x4xf32>
    %424 = arith.addf %417, %423 : vector<8x4xf32>
    %c0_476 = arith.constant 0 : index
    %c0_477 = arith.constant 0 : index
    %c12_478 = arith.constant 12 : index
    %c0_479 = arith.constant 0 : index
    %425 = vector.load %arg2[%c0_476, %c0_477, %c12_478, %c0_479] : memref<1x8x16x4xf32, #tpu.memory_space<vmem>>, vector<1x8x1x4xf32>
    %426 = vector.shape_cast %425 : vector<1x8x1x4xf32> to vector<8x4xf32>
    %c0_480 = arith.constant 0 : index
    %c3_481 = arith.constant 3 : index
    %c12_482 = arith.constant 12 : index
    %c0_483 = arith.constant 0 : index
    %427 = vector.load %arg3[%c0_480, %c3_481, %c12_482, %c0_483] : memref<1x8x16x4xf32, #tpu.memory_space<vmem>>, vector<1x1x1x4xf32>
    %428 = vector.shape_cast %427 : vector<1x1x1x4xf32> to vector<1x4xf32>
    %429 = vector.broadcast %428 : vector<1x4xf32> to vector<8x4xf32>
    %430 = arith.mulf %426, %429 : vector<8x4xf32>
    %431 = arith.addf %424, %430 : vector<8x4xf32>
    %c0_484 = arith.constant 0 : index
    %c0_485 = arith.constant 0 : index
    %c13_486 = arith.constant 13 : index
    %c0_487 = arith.constant 0 : index
    %432 = vector.load %arg2[%c0_484, %c0_485, %c13_486, %c0_487] : memref<1x8x16x4xf32, #tpu.memory_space<vmem>>, vector<1x8x1x4xf32>
    %433 = vector.shape_cast %432 : vector<1x8x1x4xf32> to vector<8x4xf32>
    %c0_488 = arith.constant 0 : index
    %c3_489 = arith.constant 3 : index
    %c13_490 = arith.constant 13 : index
    %c0_491 = arith.constant 0 : index
    %434 = vector.load %arg3[%c0_488, %c3_489, %c13_490, %c0_491] : memref<1x8x16x4xf32, #tpu.memory_space<vmem>>, vector<1x1x1x4xf32>
    %435 = vector.shape_cast %434 : vector<1x1x1x4xf32> to vector<1x4xf32>
    %436 = vector.broadcast %435 : vector<1x4xf32> to vector<8x4xf32>
    %437 = arith.mulf %433, %436 : vector<8x4xf32>
    %438 = arith.addf %431, %437 : vector<8x4xf32>
    %c0_492 = arith.constant 0 : index
    %c0_493 = arith.constant 0 : index
    %c14_494 = arith.constant 14 : index
    %c0_495 = arith.constant 0 : index
    %439 = vector.load %arg2[%c0_492, %c0_493, %c14_494, %c0_495] : memref<1x8x16x4xf32, #tpu.memory_space<vmem>>, vector<1x8x1x4xf32>
    %440 = vector.shape_cast %439 : vector<1x8x1x4xf32> to vector<8x4xf32>
    %c0_496 = arith.constant 0 : index
    %c3_497 = arith.constant 3 : index
    %c14_498 = arith.constant 14 : index
    %c0_499 = arith.constant 0 : index
    %441 = vector.load %arg3[%c0_496, %c3_497, %c14_498, %c0_499] : memref<1x8x16x4xf32, #tpu.memory_space<vmem>>, vector<1x1x1x4xf32>
    %442 = vector.shape_cast %441 : vector<1x1x1x4xf32> to vector<1x4xf32>
    %443 = vector.broadcast %442 : vector<1x4xf32> to vector<8x4xf32>
    %444 = arith.mulf %440, %443 : vector<8x4xf32>
    %445 = arith.addf %438, %444 : vector<8x4xf32>
    %c0_500 = arith.constant 0 : index
    %c0_501 = arith.constant 0 : index
    %c15_502 = arith.constant 15 : index
    %c0_503 = arith.constant 0 : index
    %446 = vector.load %arg2[%c0_500, %c0_501, %c15_502, %c0_503] : memref<1x8x16x4xf32, #tpu.memory_space<vmem>>, vector<1x8x1x4xf32>
    %447 = vector.shape_cast %446 : vector<1x8x1x4xf32> to vector<8x4xf32>
    %c0_504 = arith.constant 0 : index
    %c3_505 = arith.constant 3 : index
    %c15_506 = arith.constant 15 : index
    %c0_507 = arith.constant 0 : index
    %448 = vector.load %arg3[%c0_504, %c3_505, %c15_506, %c0_507] : memref<1x8x16x4xf32, #tpu.memory_space<vmem>>, vector<1x1x1x4xf32>
    %449 = vector.shape_cast %448 : vector<1x1x1x4xf32> to vector<1x4xf32>
    %450 = vector.broadcast %449 : vector<1x4xf32> to vector<8x4xf32>
    %451 = arith.mulf %447, %450 : vector<8x4xf32>
    %452 = arith.addf %445, %451 : vector<8x4xf32>
    %c0_508 = arith.constant 0 : index
    %c0_509 = arith.constant 0 : index
    %c3_510 = arith.constant 3 : index
    %c0_511 = arith.constant 0 : index
    %453 = vector.load %arg4[%c0_508, %c0_509, %c3_510, %c0_511] : memref<1x8x8x4xf32, #tpu.memory_space<vmem>>, vector<1x8x1x4xf32>
    %454 = vector.shape_cast %453 : vector<1x8x1x4xf32> to vector<8x4xf32>
    %455 = vector.shape_cast %452 : vector<8x4xf32> to vector<1x8x1x4xf32>
    tpu.vector_store %arg4[%c0_508, %c0_509, %c3_510, %c0_511], %455 {strides = array<i32>} : memref<1x8x8x4xf32, #tpu.memory_space<vmem>>, vector<1x8x1x4xf32>,
    %c0_512 = arith.constant 0 : index
    %c0_513 = arith.constant 0 : index
    %c0_514 = arith.constant 0 : index
    %c0_515 = arith.constant 0 : index
    %456 = vector.load %arg2[%c0_512, %c0_513, %c0_514, %c0_515] : memref<1x8x16x4xf32, #tpu.memory_space<vmem>>, vector<1x8x1x4xf32>
    %457 = vector.shape_cast %456 : vector<1x8x1x4xf32> to vector<8x4xf32>
    %c0_516 = arith.constant 0 : index
    %c4_517 = arith.constant 4 : index
    %c0_518 = arith.constant 0 : index
    %c0_519 = arith.constant 0 : index
    %458 = vector.load %arg3[%c0_516, %c4_517, %c0_518, %c0_519] : memref<1x8x16x4xf32, #tpu.memory_space<vmem>>, vector<1x1x1x4xf32>
    %459 = vector.shape_cast %458 : vector<1x1x1x4xf32> to vector<1x4xf32>
    %460 = vector.broadcast %459 : vector<1x4xf32> to vector<8x4xf32>
    %461 = arith.mulf %457, %460 : vector<8x4xf32>
    %c0_520 = arith.constant 0 : index
    %c0_521 = arith.constant 0 : index
    %c1_522 = arith.constant 1 : index
    %c0_523 = arith.constant 0 : index
    %462 = vector.load %arg2[%c0_520, %c0_521, %c1_522, %c0_523] : memref<1x8x16x4xf32, #tpu.memory_space<vmem>>, vector<1x8x1x4xf32>
    %463 = vector.shape_cast %462 : vector<1x8x1x4xf32> to vector<8x4xf32>
    %c0_524 = arith.constant 0 : index
    %c4_525 = arith.constant 4 : index
    %c1_526 = arith.constant 1 : index
    %c0_527 = arith.constant 0 : index
    %464 = vector.load %arg3[%c0_524, %c4_525, %c1_526, %c0_527] : memref<1x8x16x4xf32, #tpu.memory_space<vmem>>, vector<1x1x1x4xf32>
    %465 = vector.shape_cast %464 : vector<1x1x1x4xf32> to vector<1x4xf32>
    %466 = vector.broadcast %465 : vector<1x4xf32> to vector<8x4xf32>
    %467 = arith.mulf %463, %466 : vector<8x4xf32>
    %468 = arith.addf %461, %467 : vector<8x4xf32>
    %c0_528 = arith.constant 0 : index
    %c0_529 = arith.constant 0 : index
    %c2_530 = arith.constant 2 : index
    %c0_531 = arith.constant 0 : index
    %469 = vector.load %arg2[%c0_528, %c0_529, %c2_530, %c0_531] : memref<1x8x16x4xf32, #tpu.memory_space<vmem>>, vector<1x8x1x4xf32>
    %470 = vector.shape_cast %469 : vector<1x8x1x4xf32> to vector<8x4xf32>
    %c0_532 = arith.constant 0 : index
    %c4_533 = arith.constant 4 : index
    %c2_534 = arith.constant 2 : index
    %c0_535 = arith.constant 0 : index
    %471 = vector.load %arg3[%c0_532, %c4_533, %c2_534, %c0_535] : memref<1x8x16x4xf32, #tpu.memory_space<vmem>>, vector<1x1x1x4xf32>
    %472 = vector.shape_cast %471 : vector<1x1x1x4xf32> to vector<1x4xf32>
    %473 = vector.broadcast %472 : vector<1x4xf32> to vector<8x4xf32>
    %474 = arith.mulf %470, %473 : vector<8x4xf32>
    %475 = arith.addf %468, %474 : vector<8x4xf32>
    %c0_536 = arith.constant 0 : index
    %c0_537 = arith.constant 0 : index
    %c3_538 = arith.constant 3 : index
    %c0_539 = arith.constant 0 : index
    %476 = vector.load %arg2[%c0_536, %c0_537, %c3_538, %c0_539] : memref<1x8x16x4xf32, #tpu.memory_space<vmem>>, vector<1x8x1x4xf32>
    %477 = vector.shape_cast %476 : vector<1x8x1x4xf32> to vector<8x4xf32>
    %c0_540 = arith.constant 0 : index
    %c4_541 = arith.constant 4 : index
    %c3_542 = arith.constant 3 : index
    %c0_543 = arith.constant 0 : index
    %478 = vector.load %arg3[%c0_540, %c4_541, %c3_542, %c0_543] : memref<1x8x16x4xf32, #tpu.memory_space<vmem>>, vector<1x1x1x4xf32>
    %479 = vector.shape_cast %478 : vector<1x1x1x4xf32> to vector<1x4xf32>
    %480 = vector.broadcast %479 : vector<1x4xf32> to vector<8x4xf32>
    %481 = arith.mulf %477, %480 : vector<8x4xf32>
    %482 = arith.addf %475, %481 : vector<8x4xf32>
    %c0_544 = arith.constant 0 : index
    %c0_545 = arith.constant 0 : index
    %c4_546 = arith.constant 4 : index
    %c0_547 = arith.constant 0 : index
    %483 = vector.load %arg2[%c0_544, %c0_545, %c4_546, %c0_547] : memref<1x8x16x4xf32, #tpu.memory_space<vmem>>, vector<1x8x1x4xf32>
    %484 = vector.shape_cast %483 : vector<1x8x1x4xf32> to vector<8x4xf32>
    %c0_548 = arith.constant 0 : index
    %c4_549 = arith.constant 4 : index
    %c4_550 = arith.constant 4 : index
    %c0_551 = arith.constant 0 : index
    %485 = vector.load %arg3[%c0_548, %c4_549, %c4_550, %c0_551] : memref<1x8x16x4xf32, #tpu.memory_space<vmem>>, vector<1x1x1x4xf32>
    %486 = vector.shape_cast %485 : vector<1x1x1x4xf32> to vector<1x4xf32>
    %487 = vector.broadcast %486 : vector<1x4xf32> to vector<8x4xf32>
    %488 = arith.mulf %484, %487 : vector<8x4xf32>
    %489 = arith.addf %482, %488 : vector<8x4xf32>
    %c0_552 = arith.constant 0 : index
    %c0_553 = arith.constant 0 : index
    %c5_554 = arith.constant 5 : index
    %c0_555 = arith.constant 0 : index
    %490 = vector.load %arg2[%c0_552, %c0_553, %c5_554, %c0_555] : memref<1x8x16x4xf32, #tpu.memory_space<vmem>>, vector<1x8x1x4xf32>
    %491 = vector.shape_cast %490 : vector<1x8x1x4xf32> to vector<8x4xf32>
    %c0_556 = arith.constant 0 : index
    %c4_557 = arith.constant 4 : index
    %c5_558 = arith.constant 5 : index
    %c0_559 = arith.constant 0 : index
    %492 = vector.load %arg3[%c0_556, %c4_557, %c5_558, %c0_559] : memref<1x8x16x4xf32, #tpu.memory_space<vmem>>, vector<1x1x1x4xf32>
    %493 = vector.shape_cast %492 : vector<1x1x1x4xf32> to vector<1x4xf32>
    %494 = vector.broadcast %493 : vector<1x4xf32> to vector<8x4xf32>
    %495 = arith.mulf %491, %494 : vector<8x4xf32>
    %496 = arith.addf %489, %495 : vector<8x4xf32>
    %c0_560 = arith.constant 0 : index
    %c0_561 = arith.constant 0 : index
    %c6_562 = arith.constant 6 : index
    %c0_563 = arith.constant 0 : index
    %497 = vector.load %arg2[%c0_560, %c0_561, %c6_562, %c0_563] : memref<1x8x16x4xf32, #tpu.memory_space<vmem>>, vector<1x8x1x4xf32>
    %498 = vector.shape_cast %497 : vector<1x8x1x4xf32> to vector<8x4xf32>
    %c0_564 = arith.constant 0 : index
    %c4_565 = arith.constant 4 : index
    %c6_566 = arith.constant 6 : index
    %c0_567 = arith.constant 0 : index
    %499 = vector.load %arg3[%c0_564, %c4_565, %c6_566, %c0_567] : memref<1x8x16x4xf32, #tpu.memory_space<vmem>>, vector<1x1x1x4xf32>
    %500 = vector.shape_cast %499 : vector<1x1x1x4xf32> to vector<1x4xf32>
    %501 = vector.broadcast %500 : vector<1x4xf32> to vector<8x4xf32>
    %502 = arith.mulf %498, %501 : vector<8x4xf32>
    %503 = arith.addf %496, %502 : vector<8x4xf32>
    %c0_568 = arith.constant 0 : index
    %c0_569 = arith.constant 0 : index
    %c7_570 = arith.constant 7 : index
    %c0_571 = arith.constant 0 : index
    %504 = vector.load %arg2[%c0_568, %c0_569, %c7_570, %c0_571] : memref<1x8x16x4xf32, #tpu.memory_space<vmem>>, vector<1x8x1x4xf32>
    %505 = vector.shape_cast %504 : vector<1x8x1x4xf32> to vector<8x4xf32>
    %c0_572 = arith.constant 0 : index
    %c4_573 = arith.constant 4 : index
    %c7_574 = arith.constant 7 : index
    %c0_575 = arith.constant 0 : index
    %506 = vector.load %arg3[%c0_572, %c4_573, %c7_574, %c0_575] : memref<1x8x16x4xf32, #tpu.memory_space<vmem>>, vector<1x1x1x4xf32>
    %507 = vector.shape_cast %506 : vector<1x1x1x4xf32> to vector<1x4xf32>
    %508 = vector.broadcast %507 : vector<1x4xf32> to vector<8x4xf32>
    %509 = arith.mulf %505, %508 : vector<8x4xf32>
    %510 = arith.addf %503, %509 : vector<8x4xf32>
    %c0_576 = arith.constant 0 : index
    %c0_577 = arith.constant 0 : index
    %c8_578 = arith.constant 8 : index
    %c0_579 = arith.constant 0 : index
    %511 = vector.load %arg2[%c0_576, %c0_577, %c8_578, %c0_579] : memref<1x8x16x4xf32, #tpu.memory_space<vmem>>, vector<1x8x1x4xf32>
    %512 = vector.shape_cast %511 : vector<1x8x1x4xf32> to vector<8x4xf32>
    %c0_580 = arith.constant 0 : index
    %c4_581 = arith.constant 4 : index
    %c8_582 = arith.constant 8 : index
    %c0_583 = arith.constant 0 : index
    %513 = vector.load %arg3[%c0_580, %c4_581, %c8_582, %c0_583] : memref<1x8x16x4xf32, #tpu.memory_space<vmem>>, vector<1x1x1x4xf32>
    %514 = vector.shape_cast %513 : vector<1x1x1x4xf32> to vector<1x4xf32>
    %515 = vector.broadcast %514 : vector<1x4xf32> to vector<8x4xf32>
    %516 = arith.mulf %512, %515 : vector<8x4xf32>
    %517 = arith.addf %510, %516 : vector<8x4xf32>
    %c0_584 = arith.constant 0 : index
    %c0_585 = arith.constant 0 : index
    %c9_586 = arith.constant 9 : index
    %c0_587 = arith.constant 0 : index
    %518 = vector.load %arg2[%c0_584, %c0_585, %c9_586, %c0_587] : memref<1x8x16x4xf32, #tpu.memory_space<vmem>>, vector<1x8x1x4xf32>
    %519 = vector.shape_cast %518 : vector<1x8x1x4xf32> to vector<8x4xf32>
    %c0_588 = arith.constant 0 : index
    %c4_589 = arith.constant 4 : index
    %c9_590 = arith.constant 9 : index
    %c0_591 = arith.constant 0 : index
    %520 = vector.load %arg3[%c0_588, %c4_589, %c9_590, %c0_591] : memref<1x8x16x4xf32, #tpu.memory_space<vmem>>, vector<1x1x1x4xf32>
    %521 = vector.shape_cast %520 : vector<1x1x1x4xf32> to vector<1x4xf32>
    %522 = vector.broadcast %521 : vector<1x4xf32> to vector<8x4xf32>
    %523 = arith.mulf %519, %522 : vector<8x4xf32>
    %524 = arith.addf %517, %523 : vector<8x4xf32>
    %c0_592 = arith.constant 0 : index
    %c0_593 = arith.constant 0 : index
    %c10_594 = arith.constant 10 : index
    %c0_595 = arith.constant 0 : index
    %525 = vector.load %arg2[%c0_592, %c0_593, %c10_594, %c0_595] : memref<1x8x16x4xf32, #tpu.memory_space<vmem>>, vector<1x8x1x4xf32>
    %526 = vector.shape_cast %525 : vector<1x8x1x4xf32> to vector<8x4xf32>
    %c0_596 = arith.constant 0 : index
    %c4_597 = arith.constant 4 : index
    %c10_598 = arith.constant 10 : index
    %c0_599 = arith.constant 0 : index
    %527 = vector.load %arg3[%c0_596, %c4_597, %c10_598, %c0_599] : memref<1x8x16x4xf32, #tpu.memory_space<vmem>>, vector<1x1x1x4xf32>
    %528 = vector.shape_cast %527 : vector<1x1x1x4xf32> to vector<1x4xf32>
    %529 = vector.broadcast %528 : vector<1x4xf32> to vector<8x4xf32>
    %530 = arith.mulf %526, %529 : vector<8x4xf32>
    %531 = arith.addf %524, %530 : vector<8x4xf32>
    %c0_600 = arith.constant 0 : index
    %c0_601 = arith.constant 0 : index
    %c11_602 = arith.constant 11 : index
    %c0_603 = arith.constant 0 : index
    %532 = vector.load %arg2[%c0_600, %c0_601, %c11_602, %c0_603] : memref<1x8x16x4xf32, #tpu.memory_space<vmem>>, vector<1x8x1x4xf32>
    %533 = vector.shape_cast %532 : vector<1x8x1x4xf32> to vector<8x4xf32>
    %c0_604 = arith.constant 0 : index
    %c4_605 = arith.constant 4 : index
    %c11_606 = arith.constant 11 : index
    %c0_607 = arith.constant 0 : index
    %534 = vector.load %arg3[%c0_604, %c4_605, %c11_606, %c0_607] : memref<1x8x16x4xf32, #tpu.memory_space<vmem>>, vector<1x1x1x4xf32>
    %535 = vector.shape_cast %534 : vector<1x1x1x4xf32> to vector<1x4xf32>
    %536 = vector.broadcast %535 : vector<1x4xf32> to vector<8x4xf32>
    %537 = arith.mulf %533, %536 : vector<8x4xf32>
    %538 = arith.addf %531, %537 : vector<8x4xf32>
    %c0_608 = arith.constant 0 : index
    %c0_609 = arith.constant 0 : index
    %c12_610 = arith.constant 12 : index
    %c0_611 = arith.constant 0 : index
    %539 = vector.load %arg2[%c0_608, %c0_609, %c12_610, %c0_611] : memref<1x8x16x4xf32, #tpu.memory_space<vmem>>, vector<1x8x1x4xf32>
    %540 = vector.shape_cast %539 : vector<1x8x1x4xf32> to vector<8x4xf32>
    %c0_612 = arith.constant 0 : index
    %c4_613 = arith.constant 4 : index
    %c12_614 = arith.constant 12 : index
    %c0_615 = arith.constant 0 : index
    %541 = vector.load %arg3[%c0_612, %c4_613, %c12_614, %c0_615] : memref<1x8x16x4xf32, #tpu.memory_space<vmem>>, vector<1x1x1x4xf32>
    %542 = vector.shape_cast %541 : vector<1x1x1x4xf32> to vector<1x4xf32>
    %543 = vector.broadcast %542 : vector<1x4xf32> to vector<8x4xf32>
    %544 = arith.mulf %540, %543 : vector<8x4xf32>
    %545 = arith.addf %538, %544 : vector<8x4xf32>
    %c0_616 = arith.constant 0 : index
    %c0_617 = arith.constant 0 : index
    %c13_618 = arith.constant 13 : index
    %c0_619 = arith.constant 0 : index
    %546 = vector.load %arg2[%c0_616, %c0_617, %c13_618, %c0_619] : memref<1x8x16x4xf32, #tpu.memory_space<vmem>>, vector<1x8x1x4xf32>
    %547 = vector.shape_cast %546 : vector<1x8x1x4xf32> to vector<8x4xf32>
    %c0_620 = arith.constant 0 : index
    %c4_621 = arith.constant 4 : index
    %c13_622 = arith.constant 13 : index
    %c0_623 = arith.constant 0 : index
    %548 = vector.load %arg3[%c0_620, %c4_621, %c13_622, %c0_623] : memref<1x8x16x4xf32, #tpu.memory_space<vmem>>, vector<1x1x1x4xf32>
    %549 = vector.shape_cast %548 : vector<1x1x1x4xf32> to vector<1x4xf32>
    %550 = vector.broadcast %549 : vector<1x4xf32> to vector<8x4xf32>
    %551 = arith.mulf %547, %550 : vector<8x4xf32>
    %552 = arith.addf %545, %551 : vector<8x4xf32>
    %c0_624 = arith.constant 0 : index
    %c0_625 = arith.constant 0 : index
    %c14_626 = arith.constant 14 : index
    %c0_627 = arith.constant 0 : index
    %553 = vector.load %arg2[%c0_624, %c0_625, %c14_626, %c0_627] : memref<1x8x16x4xf32, #tpu.memory_space<vmem>>, vector<1x8x1x4xf32>
    %554 = vector.shape_cast %553 : vector<1x8x1x4xf32> to vector<8x4xf32>
    %c0_628 = arith.constant 0 : index
    %c4_629 = arith.constant 4 : index
    %c14_630 = arith.constant 14 : index
    %c0_631 = arith.constant 0 : index
    %555 = vector.load %arg3[%c0_628, %c4_629, %c14_630, %c0_631] : memref<1x8x16x4xf32, #tpu.memory_space<vmem>>, vector<1x1x1x4xf32>
    %556 = vector.shape_cast %555 : vector<1x1x1x4xf32> to vector<1x4xf32>
    %557 = vector.broadcast %556 : vector<1x4xf32> to vector<8x4xf32>
    %558 = arith.mulf %554, %557 : vector<8x4xf32>
    %559 = arith.addf %552, %558 : vector<8x4xf32>
    %c0_632 = arith.constant 0 : index
    %c0_633 = arith.constant 0 : index
    %c15_634 = arith.constant 15 : index
    %c0_635 = arith.constant 0 : index
    %560 = vector.load %arg2[%c0_632, %c0_633, %c15_634, %c0_635] : memref<1x8x16x4xf32, #tpu.memory_space<vmem>>, vector<1x8x1x4xf32>
    %561 = vector.shape_cast %560 : vector<1x8x1x4xf32> to vector<8x4xf32>
    %c0_636 = arith.constant 0 : index
    %c4_637 = arith.constant 4 : index
    %c15_638 = arith.constant 15 : index
    %c0_639 = arith.constant 0 : index
    %562 = vector.load %arg3[%c0_636, %c4_637, %c15_638, %c0_639] : memref<1x8x16x4xf32, #tpu.memory_space<vmem>>, vector<1x1x1x4xf32>
    %563 = vector.shape_cast %562 : vector<1x1x1x4xf32> to vector<1x4xf32>
    %564 = vector.broadcast %563 : vector<1x4xf32> to vector<8x4xf32>
    %565 = arith.mulf %561, %564 : vector<8x4xf32>
    %566 = arith.addf %559, %565 : vector<8x4xf32>
    %c0_640 = arith.constant 0 : index
    %c0_641 = arith.constant 0 : index
    %c4_642 = arith.constant 4 : index
    %c0_643 = arith.constant 0 : index
    %567 = vector.load %arg4[%c0_640, %c0_641, %c4_642, %c0_643] : memref<1x8x8x4xf32, #tpu.memory_space<vmem>>, vector<1x8x1x4xf32>
    %568 = vector.shape_cast %567 : vector<1x8x1x4xf32> to vector<8x4xf32>
    %569 = vector.shape_cast %566 : vector<8x4xf32> to vector<1x8x1x4xf32>
    tpu.vector_store %arg4[%c0_640, %c0_641, %c4_642, %c0_643], %569 {strides = array<i32>} : memref<1x8x8x4xf32, #tpu.memory_space<vmem>>, vector<1x8x1x4xf32>,
    %c0_644 = arith.constant 0 : index
    %c0_645 = arith.constant 0 : index
    %c0_646 = arith.constant 0 : index
    %c0_647 = arith.constant 0 : index
    %570 = vector.load %arg2[%c0_644, %c0_645, %c0_646, %c0_647] : memref<1x8x16x4xf32, #tpu.memory_space<vmem>>, vector<1x8x1x4xf32>
    %571 = vector.shape_cast %570 : vector<1x8x1x4xf32> to vector<8x4xf32>
    %c0_648 = arith.constant 0 : index
    %c5_649 = arith.constant 5 : index
    %c0_650 = arith.constant 0 : index
    %c0_651 = arith.constant 0 : index
    %572 = vector.load %arg3[%c0_648, %c5_649, %c0_650, %c0_651] : memref<1x8x16x4xf32, #tpu.memory_space<vmem>>, vector<1x1x1x4xf32>
    %573 = vector.shape_cast %572 : vector<1x1x1x4xf32> to vector<1x4xf32>
    %574 = vector.broadcast %573 : vector<1x4xf32> to vector<8x4xf32>
    %575 = arith.mulf %571, %574 : vector<8x4xf32>
    %c0_652 = arith.constant 0 : index
    %c0_653 = arith.constant 0 : index
    %c1_654 = arith.constant 1 : index
    %c0_655 = arith.constant 0 : index
    %576 = vector.load %arg2[%c0_652, %c0_653, %c1_654, %c0_655] : memref<1x8x16x4xf32, #tpu.memory_space<vmem>>, vector<1x8x1x4xf32>
    %577 = vector.shape_cast %576 : vector<1x8x1x4xf32> to vector<8x4xf32>
    %c0_656 = arith.constant 0 : index
    %c5_657 = arith.constant 5 : index
    %c1_658 = arith.constant 1 : index
    %c0_659 = arith.constant 0 : index
    %578 = vector.load %arg3[%c0_656, %c5_657, %c1_658, %c0_659] : memref<1x8x16x4xf32, #tpu.memory_space<vmem>>, vector<1x1x1x4xf32>
    %579 = vector.shape_cast %578 : vector<1x1x1x4xf32> to vector<1x4xf32>
    %580 = vector.broadcast %579 : vector<1x4xf32> to vector<8x4xf32>
    %581 = arith.mulf %577, %580 : vector<8x4xf32>
    %582 = arith.addf %575, %581 : vector<8x4xf32>
    %c0_660 = arith.constant 0 : index
    %c0_661 = arith.constant 0 : index
    %c2_662 = arith.constant 2 : index
    %c0_663 = arith.constant 0 : index
    %583 = vector.load %arg2[%c0_660, %c0_661, %c2_662, %c0_663] : memref<1x8x16x4xf32, #tpu.memory_space<vmem>>, vector<1x8x1x4xf32>
    %584 = vector.shape_cast %583 : vector<1x8x1x4xf32> to vector<8x4xf32>
    %c0_664 = arith.constant 0 : index
    %c5_665 = arith.constant 5 : index
    %c2_666 = arith.constant 2 : index
    %c0_667 = arith.constant 0 : index
    %585 = vector.load %arg3[%c0_664, %c5_665, %c2_666, %c0_667] : memref<1x8x16x4xf32, #tpu.memory_space<vmem>>, vector<1x1x1x4xf32>
    %586 = vector.shape_cast %585 : vector<1x1x1x4xf32> to vector<1x4xf32>
    %587 = vector.broadcast %586 : vector<1x4xf32> to vector<8x4xf32>
    %588 = arith.mulf %584, %587 : vector<8x4xf32>
    %589 = arith.addf %582, %588 : vector<8x4xf32>
    %c0_668 = arith.constant 0 : index
    %c0_669 = arith.constant 0 : index
    %c3_670 = arith.constant 3 : index
    %c0_671 = arith.constant 0 : index
    %590 = vector.load %arg2[%c0_668, %c0_669, %c3_670, %c0_671] : memref<1x8x16x4xf32, #tpu.memory_space<vmem>>, vector<1x8x1x4xf32>
    %591 = vector.shape_cast %590 : vector<1x8x1x4xf32> to vector<8x4xf32>
    %c0_672 = arith.constant 0 : index
    %c5_673 = arith.constant 5 : index
    %c3_674 = arith.constant 3 : index
    %c0_675 = arith.constant 0 : index
    %592 = vector.load %arg3[%c0_672, %c5_673, %c3_674, %c0_675] : memref<1x8x16x4xf32, #tpu.memory_space<vmem>>, vector<1x1x1x4xf32>
    %593 = vector.shape_cast %592 : vector<1x1x1x4xf32> to vector<1x4xf32>
    %594 = vector.broadcast %593 : vector<1x4xf32> to vector<8x4xf32>
    %595 = arith.mulf %591, %594 : vector<8x4xf32>
    %596 = arith.addf %589, %595 : vector<8x4xf32>
    %c0_676 = arith.constant 0 : index
    %c0_677 = arith.constant 0 : index
    %c4_678 = arith.constant 4 : index
    %c0_679 = arith.constant 0 : index
    %597 = vector.load %arg2[%c0_676, %c0_677, %c4_678, %c0_679] : memref<1x8x16x4xf32, #tpu.memory_space<vmem>>, vector<1x8x1x4xf32>
    %598 = vector.shape_cast %597 : vector<1x8x1x4xf32> to vector<8x4xf32>
    %c0_680 = arith.constant 0 : index
    %c5_681 = arith.constant 5 : index
    %c4_682 = arith.constant 4 : index
    %c0_683 = arith.constant 0 : index
    %599 = vector.load %arg3[%c0_680, %c5_681, %c4_682, %c0_683] : memref<1x8x16x4xf32, #tpu.memory_space<vmem>>, vector<1x1x1x4xf32>
    %600 = vector.shape_cast %599 : vector<1x1x1x4xf32> to vector<1x4xf32>
    %601 = vector.broadcast %600 : vector<1x4xf32> to vector<8x4xf32>
    %602 = arith.mulf %598, %601 : vector<8x4xf32>
    %603 = arith.addf %596, %602 : vector<8x4xf32>
    %c0_684 = arith.constant 0 : index
    %c0_685 = arith.constant 0 : index
    %c5_686 = arith.constant 5 : index
    %c0_687 = arith.constant 0 : index
    %604 = vector.load %arg2[%c0_684, %c0_685, %c5_686, %c0_687] : memref<1x8x16x4xf32, #tpu.memory_space<vmem>>, vector<1x8x1x4xf32>
    %605 = vector.shape_cast %604 : vector<1x8x1x4xf32> to vector<8x4xf32>
    %c0_688 = arith.constant 0 : index
    %c5_689 = arith.constant 5 : index
    %c5_690 = arith.constant 5 : index
    %c0_691 = arith.constant 0 : index
    %606 = vector.load %arg3[%c0_688, %c5_689, %c5_690, %c0_691] : memref<1x8x16x4xf32, #tpu.memory_space<vmem>>, vector<1x1x1x4xf32>
    %607 = vector.shape_cast %606 : vector<1x1x1x4xf32> to vector<1x4xf32>
    %608 = vector.broadcast %607 : vector<1x4xf32> to vector<8x4xf32>
    %609 = arith.mulf %605, %608 : vector<8x4xf32>
    %610 = arith.addf %603, %609 : vector<8x4xf32>
    %c0_692 = arith.constant 0 : index
    %c0_693 = arith.constant 0 : index
    %c6_694 = arith.constant 6 : index
    %c0_695 = arith.constant 0 : index
    %611 = vector.load %arg2[%c0_692, %c0_693, %c6_694, %c0_695] : memref<1x8x16x4xf32, #tpu.memory_space<vmem>>, vector<1x8x1x4xf32>
    %612 = vector.shape_cast %611 : vector<1x8x1x4xf32> to vector<8x4xf32>
    %c0_696 = arith.constant 0 : index
    %c5_697 = arith.constant 5 : index
    %c6_698 = arith.constant 6 : index
    %c0_699 = arith.constant 0 : index
    %613 = vector.load %arg3[%c0_696, %c5_697, %c6_698, %c0_699] : memref<1x8x16x4xf32, #tpu.memory_space<vmem>>, vector<1x1x1x4xf32>
    %614 = vector.shape_cast %613 : vector<1x1x1x4xf32> to vector<1x4xf32>
    %615 = vector.broadcast %614 : vector<1x4xf32> to vector<8x4xf32>
    %616 = arith.mulf %612, %615 : vector<8x4xf32>
    %617 = arith.addf %610, %616 : vector<8x4xf32>
    %c0_700 = arith.constant 0 : index
    %c0_701 = arith.constant 0 : index
    %c7_702 = arith.constant 7 : index
    %c0_703 = arith.constant 0 : index
    %618 = vector.load %arg2[%c0_700, %c0_701, %c7_702, %c0_703] : memref<1x8x16x4xf32, #tpu.memory_space<vmem>>, vector<1x8x1x4xf32>
    %619 = vector.shape_cast %618 : vector<1x8x1x4xf32> to vector<8x4xf32>
    %c0_704 = arith.constant 0 : index
    %c5_705 = arith.constant 5 : index
    %c7_706 = arith.constant 7 : index
    %c0_707 = arith.constant 0 : index
    %620 = vector.load %arg3[%c0_704, %c5_705, %c7_706, %c0_707] : memref<1x8x16x4xf32, #tpu.memory_space<vmem>>, vector<1x1x1x4xf32>
    %621 = vector.shape_cast %620 : vector<1x1x1x4xf32> to vector<1x4xf32>
    %622 = vector.broadcast %621 : vector<1x4xf32> to vector<8x4xf32>
    %623 = arith.mulf %619, %622 : vector<8x4xf32>
    %624 = arith.addf %617, %623 : vector<8x4xf32>
    %c0_708 = arith.constant 0 : index
    %c0_709 = arith.constant 0 : index
    %c8_710 = arith.constant 8 : index
    %c0_711 = arith.constant 0 : index
    %625 = vector.load %arg2[%c0_708, %c0_709, %c8_710, %c0_711] : memref<1x8x16x4xf32, #tpu.memory_space<vmem>>, vector<1x8x1x4xf32>
    %626 = vector.shape_cast %625 : vector<1x8x1x4xf32> to vector<8x4xf32>
    %c0_712 = arith.constant 0 : index
    %c5_713 = arith.constant 5 : index
    %c8_714 = arith.constant 8 : index
    %c0_715 = arith.constant 0 : index
    %627 = vector.load %arg3[%c0_712, %c5_713, %c8_714, %c0_715] : memref<1x8x16x4xf32, #tpu.memory_space<vmem>>, vector<1x1x1x4xf32>
    %628 = vector.shape_cast %627 : vector<1x1x1x4xf32> to vector<1x4xf32>
    %629 = vector.broadcast %628 : vector<1x4xf32> to vector<8x4xf32>
    %630 = arith.mulf %626, %629 : vector<8x4xf32>
    %631 = arith.addf %624, %630 : vector<8x4xf32>
    %c0_716 = arith.constant 0 : index
    %c0_717 = arith.constant 0 : index
    %c9_718 = arith.constant 9 : index
    %c0_719 = arith.constant 0 : index
    %632 = vector.load %arg2[%c0_716, %c0_717, %c9_718, %c0_719] : memref<1x8x16x4xf32, #tpu.memory_space<vmem>>, vector<1x8x1x4xf32>
    %633 = vector.shape_cast %632 : vector<1x8x1x4xf32> to vector<8x4xf32>
    %c0_720 = arith.constant 0 : index
    %c5_721 = arith.constant 5 : index
    %c9_722 = arith.constant 9 : index
    %c0_723 = arith.constant 0 : index
    %634 = vector.load %arg3[%c0_720, %c5_721, %c9_722, %c0_723] : memref<1x8x16x4xf32, #tpu.memory_space<vmem>>, vector<1x1x1x4xf32>
    %635 = vector.shape_cast %634 : vector<1x1x1x4xf32> to vector<1x4xf32>
    %636 = vector.broadcast %635 : vector<1x4xf32> to vector<8x4xf32>
    %637 = arith.mulf %633, %636 : vector<8x4xf32>
    %638 = arith.addf %631, %637 : vector<8x4xf32>
    %c0_724 = arith.constant 0 : index
    %c0_725 = arith.constant 0 : index
    %c10_726 = arith.constant 10 : index
    %c0_727 = arith.constant 0 : index
    %639 = vector.load %arg2[%c0_724, %c0_725, %c10_726, %c0_727] : memref<1x8x16x4xf32, #tpu.memory_space<vmem>>, vector<1x8x1x4xf32>
    %640 = vector.shape_cast %639 : vector<1x8x1x4xf32> to vector<8x4xf32>
    %c0_728 = arith.constant 0 : index
    %c5_729 = arith.constant 5 : index
    %c10_730 = arith.constant 10 : index
    %c0_731 = arith.constant 0 : index
    %641 = vector.load %arg3[%c0_728, %c5_729, %c10_730, %c0_731] : memref<1x8x16x4xf32, #tpu.memory_space<vmem>>, vector<1x1x1x4xf32>
    %642 = vector.shape_cast %641 : vector<1x1x1x4xf32> to vector<1x4xf32>
    %643 = vector.broadcast %642 : vector<1x4xf32> to vector<8x4xf32>
    %644 = arith.mulf %640, %643 : vector<8x4xf32>
    %645 = arith.addf %638, %644 : vector<8x4xf32>
    %c0_732 = arith.constant 0 : index
    %c0_733 = arith.constant 0 : index
    %c11_734 = arith.constant 11 : index
    %c0_735 = arith.constant 0 : index
    %646 = vector.load %arg2[%c0_732, %c0_733, %c11_734, %c0_735] : memref<1x8x16x4xf32, #tpu.memory_space<vmem>>, vector<1x8x1x4xf32>
    %647 = vector.shape_cast %646 : vector<1x8x1x4xf32> to vector<8x4xf32>
    %c0_736 = arith.constant 0 : index
    %c5_737 = arith.constant 5 : index
    %c11_738 = arith.constant 11 : index
    %c0_739 = arith.constant 0 : index
    %648 = vector.load %arg3[%c0_736, %c5_737, %c11_738, %c0_739] : memref<1x8x16x4xf32, #tpu.memory_space<vmem>>, vector<1x1x1x4xf32>
    %649 = vector.shape_cast %648 : vector<1x1x1x4xf32> to vector<1x4xf32>
    %650 = vector.broadcast %649 : vector<1x4xf32> to vector<8x4xf32>
    %651 = arith.mulf %647, %650 : vector<8x4xf32>
    %652 = arith.addf %645, %651 : vector<8x4xf32>
    %c0_740 = arith.constant 0 : index
    %c0_741 = arith.constant 0 : index
    %c12_742 = arith.constant 12 : index
    %c0_743 = arith.constant 0 : index
    %653 = vector.load %arg2[%c0_740, %c0_741, %c12_742, %c0_743] : memref<1x8x16x4xf32, #tpu.memory_space<vmem>>, vector<1x8x1x4xf32>
    %654 = vector.shape_cast %653 : vector<1x8x1x4xf32> to vector<8x4xf32>
    %c0_744 = arith.constant 0 : index
    %c5_745 = arith.constant 5 : index
    %c12_746 = arith.constant 12 : index
    %c0_747 = arith.constant 0 : index
    %655 = vector.load %arg3[%c0_744, %c5_745, %c12_746, %c0_747] : memref<1x8x16x4xf32, #tpu.memory_space<vmem>>, vector<1x1x1x4xf32>
    %656 = vector.shape_cast %655 : vector<1x1x1x4xf32> to vector<1x4xf32>
    %657 = vector.broadcast %656 : vector<1x4xf32> to vector<8x4xf32>
    %658 = arith.mulf %654, %657 : vector<8x4xf32>
    %659 = arith.addf %652, %658 : vector<8x4xf32>
    %c0_748 = arith.constant 0 : index
    %c0_749 = arith.constant 0 : index
    %c13_750 = arith.constant 13 : index
    %c0_751 = arith.constant 0 : index
    %660 = vector.load %arg2[%c0_748, %c0_749, %c13_750, %c0_751] : memref<1x8x16x4xf32, #tpu.memory_space<vmem>>, vector<1x8x1x4xf32>
    %661 = vector.shape_cast %660 : vector<1x8x1x4xf32> to vector<8x4xf32>
    %c0_752 = arith.constant 0 : index
    %c5_753 = arith.constant 5 : index
    %c13_754 = arith.constant 13 : index
    %c0_755 = arith.constant 0 : index
    %662 = vector.load %arg3[%c0_752, %c5_753, %c13_754, %c0_755] : memref<1x8x16x4xf32, #tpu.memory_space<vmem>>, vector<1x1x1x4xf32>
    %663 = vector.shape_cast %662 : vector<1x1x1x4xf32> to vector<1x4xf32>
    %664 = vector.broadcast %663 : vector<1x4xf32> to vector<8x4xf32>
    %665 = arith.mulf %661, %664 : vector<8x4xf32>
    %666 = arith.addf %659, %665 : vector<8x4xf32>
    %c0_756 = arith.constant 0 : index
    %c0_757 = arith.constant 0 : index
    %c14_758 = arith.constant 14 : index
    %c0_759 = arith.constant 0 : index
    %667 = vector.load %arg2[%c0_756, %c0_757, %c14_758, %c0_759] : memref<1x8x16x4xf32, #tpu.memory_space<vmem>>, vector<1x8x1x4xf32>
    %668 = vector.shape_cast %667 : vector<1x8x1x4xf32> to vector<8x4xf32>
    %c0_760 = arith.constant 0 : index
    %c5_761 = arith.constant 5 : index
    %c14_762 = arith.constant 14 : index
    %c0_763 = arith.constant 0 : index
    %669 = vector.load %arg3[%c0_760, %c5_761, %c14_762, %c0_763] : memref<1x8x16x4xf32, #tpu.memory_space<vmem>>, vector<1x1x1x4xf32>
    %670 = vector.shape_cast %669 : vector<1x1x1x4xf32> to vector<1x4xf32>
    %671 = vector.broadcast %670 : vector<1x4xf32> to vector<8x4xf32>
    %672 = arith.mulf %668, %671 : vector<8x4xf32>
    %673 = arith.addf %666, %672 : vector<8x4xf32>
    %c0_764 = arith.constant 0 : index
    %c0_765 = arith.constant 0 : index
    %c15_766 = arith.constant 15 : index
    %c0_767 = arith.constant 0 : index
    %674 = vector.load %arg2[%c0_764, %c0_765, %c15_766, %c0_767] : memref<1x8x16x4xf32, #tpu.memory_space<vmem>>, vector<1x8x1x4xf32>
    %675 = vector.shape_cast %674 : vector<1x8x1x4xf32> to vector<8x4xf32>
    %c0_768 = arith.constant 0 : index
    %c5_769 = arith.constant 5 : index
    %c15_770 = arith.constant 15 : index
    %c0_771 = arith.constant 0 : index
    %676 = vector.load %arg3[%c0_768, %c5_769, %c15_770, %c0_771] : memref<1x8x16x4xf32, #tpu.memory_space<vmem>>, vector<1x1x1x4xf32>
    %677 = vector.shape_cast %676 : vector<1x1x1x4xf32> to vector<1x4xf32>
    %678 = vector.broadcast %677 : vector<1x4xf32> to vector<8x4xf32>
    %679 = arith.mulf %675, %678 : vector<8x4xf32>
    %680 = arith.addf %673, %679 : vector<8x4xf32>
    %c0_772 = arith.constant 0 : index
    %c0_773 = arith.constant 0 : index
    %c5_774 = arith.constant 5 : index
    %c0_775 = arith.constant 0 : index
    %681 = vector.load %arg4[%c0_772, %c0_773, %c5_774, %c0_775] : memref<1x8x8x4xf32, #tpu.memory_space<vmem>>, vector<1x8x1x4xf32>
    %682 = vector.shape_cast %681 : vector<1x8x1x4xf32> to vector<8x4xf32>
    %683 = vector.shape_cast %680 : vector<8x4xf32> to vector<1x8x1x4xf32>
    tpu.vector_store %arg4[%c0_772, %c0_773, %c5_774, %c0_775], %683 {strides = array<i32>} : memref<1x8x8x4xf32, #tpu.memory_space<vmem>>, vector<1x8x1x4xf32>,
    %c0_776 = arith.constant 0 : index
    %c0_777 = arith.constant 0 : index
    %c0_778 = arith.constant 0 : index
    %c0_779 = arith.constant 0 : index
    %684 = vector.load %arg2[%c0_776, %c0_777, %c0_778, %c0_779] : memref<1x8x16x4xf32, #tpu.memory_space<vmem>>, vector<1x8x1x4xf32>
    %685 = vector.shape_cast %684 : vector<1x8x1x4xf32> to vector<8x4xf32>
    %c0_780 = arith.constant 0 : index
    %c6_781 = arith.constant 6 : index
    %c0_782 = arith.constant 0 : index
    %c0_783 = arith.constant 0 : index
    %686 = vector.load %arg3[%c0_780, %c6_781, %c0_782, %c0_783] : memref<1x8x16x4xf32, #tpu.memory_space<vmem>>, vector<1x1x1x4xf32>
    %687 = vector.shape_cast %686 : vector<1x1x1x4xf32> to vector<1x4xf32>
    %688 = vector.broadcast %687 : vector<1x4xf32> to vector<8x4xf32>
    %689 = arith.mulf %685, %688 : vector<8x4xf32>
    %c0_784 = arith.constant 0 : index
    %c0_785 = arith.constant 0 : index
    %c1_786 = arith.constant 1 : index
    %c0_787 = arith.constant 0 : index
    %690 = vector.load %arg2[%c0_784, %c0_785, %c1_786, %c0_787] : memref<1x8x16x4xf32, #tpu.memory_space<vmem>>, vector<1x8x1x4xf32>
    %691 = vector.shape_cast %690 : vector<1x8x1x4xf32> to vector<8x4xf32>
    %c0_788 = arith.constant 0 : index
    %c6_789 = arith.constant 6 : index
    %c1_790 = arith.constant 1 : index
    %c0_791 = arith.constant 0 : index
    %692 = vector.load %arg3[%c0_788, %c6_789, %c1_790, %c0_791] : memref<1x8x16x4xf32, #tpu.memory_space<vmem>>, vector<1x1x1x4xf32>
    %693 = vector.shape_cast %692 : vector<1x1x1x4xf32> to vector<1x4xf32>
    %694 = vector.broadcast %693 : vector<1x4xf32> to vector<8x4xf32>
    %695 = arith.mulf %691, %694 : vector<8x4xf32>
    %696 = arith.addf %689, %695 : vector<8x4xf32>
    %c0_792 = arith.constant 0 : index
    %c0_793 = arith.constant 0 : index
    %c2_794 = arith.constant 2 : index
    %c0_795 = arith.constant 0 : index
    %697 = vector.load %arg2[%c0_792, %c0_793, %c2_794, %c0_795] : memref<1x8x16x4xf32, #tpu.memory_space<vmem>>, vector<1x8x1x4xf32>
    %698 = vector.shape_cast %697 : vector<1x8x1x4xf32> to vector<8x4xf32>
    %c0_796 = arith.constant 0 : index
    %c6_797 = arith.constant 6 : index
    %c2_798 = arith.constant 2 : index
    %c0_799 = arith.constant 0 : index
    %699 = vector.load %arg3[%c0_796, %c6_797, %c2_798, %c0_799] : memref<1x8x16x4xf32, #tpu.memory_space<vmem>>, vector<1x1x1x4xf32>
    %700 = vector.shape_cast %699 : vector<1x1x1x4xf32> to vector<1x4xf32>
    %701 = vector.broadcast %700 : vector<1x4xf32> to vector<8x4xf32>
    %702 = arith.mulf %698, %701 : vector<8x4xf32>
    %703 = arith.addf %696, %702 : vector<8x4xf32>
    %c0_800 = arith.constant 0 : index
    %c0_801 = arith.constant 0 : index
    %c3_802 = arith.constant 3 : index
    %c0_803 = arith.constant 0 : index
    %704 = vector.load %arg2[%c0_800, %c0_801, %c3_802, %c0_803] : memref<1x8x16x4xf32, #tpu.memory_space<vmem>>, vector<1x8x1x4xf32>
    %705 = vector.shape_cast %704 : vector<1x8x1x4xf32> to vector<8x4xf32>
    %c0_804 = arith.constant 0 : index
    %c6_805 = arith.constant 6 : index
    %c3_806 = arith.constant 3 : index
    %c0_807 = arith.constant 0 : index
    %706 = vector.load %arg3[%c0_804, %c6_805, %c3_806, %c0_807] : memref<1x8x16x4xf32, #tpu.memory_space<vmem>>, vector<1x1x1x4xf32>
    %707 = vector.shape_cast %706 : vector<1x1x1x4xf32> to vector<1x4xf32>
    %708 = vector.broadcast %707 : vector<1x4xf32> to vector<8x4xf32>
    %709 = arith.mulf %705, %708 : vector<8x4xf32>
    %710 = arith.addf %703, %709 : vector<8x4xf32>
    %c0_808 = arith.constant 0 : index
    %c0_809 = arith.constant 0 : index
    %c4_810 = arith.constant 4 : index
    %c0_811 = arith.constant 0 : index
    %711 = vector.load %arg2[%c0_808, %c0_809, %c4_810, %c0_811] : memref<1x8x16x4xf32, #tpu.memory_space<vmem>>, vector<1x8x1x4xf32>
    %712 = vector.shape_cast %711 : vector<1x8x1x4xf32> to vector<8x4xf32>
    %c0_812 = arith.constant 0 : index
    %c6_813 = arith.constant 6 : index
    %c4_814 = arith.constant 4 : index
    %c0_815 = arith.constant 0 : index
    %713 = vector.load %arg3[%c0_812, %c6_813, %c4_814, %c0_815] : memref<1x8x16x4xf32, #tpu.memory_space<vmem>>, vector<1x1x1x4xf32>
    %714 = vector.shape_cast %713 : vector<1x1x1x4xf32> to vector<1x4xf32>
    %715 = vector.broadcast %714 : vector<1x4xf32> to vector<8x4xf32>
    %716 = arith.mulf %712, %715 : vector<8x4xf32>
    %717 = arith.addf %710, %716 : vector<8x4xf32>
    %c0_816 = arith.constant 0 : index
    %c0_817 = arith.constant 0 : index
    %c5_818 = arith.constant 5 : index
    %c0_819 = arith.constant 0 : index
    %718 = vector.load %arg2[%c0_816, %c0_817, %c5_818, %c0_819] : memref<1x8x16x4xf32, #tpu.memory_space<vmem>>, vector<1x8x1x4xf32>
    %719 = vector.shape_cast %718 : vector<1x8x1x4xf32> to vector<8x4xf32>
    %c0_820 = arith.constant 0 : index
    %c6_821 = arith.constant 6 : index
    %c5_822 = arith.constant 5 : index
    %c0_823 = arith.constant 0 : index
    %720 = vector.load %arg3[%c0_820, %c6_821, %c5_822, %c0_823] : memref<1x8x16x4xf32, #tpu.memory_space<vmem>>, vector<1x1x1x4xf32>
    %721 = vector.shape_cast %720 : vector<1x1x1x4xf32> to vector<1x4xf32>
    %722 = vector.broadcast %721 : vector<1x4xf32> to vector<8x4xf32>
    %723 = arith.mulf %719, %722 : vector<8x4xf32>
    %724 = arith.addf %717, %723 : vector<8x4xf32>
    %c0_824 = arith.constant 0 : index
    %c0_825 = arith.constant 0 : index
    %c6_826 = arith.constant 6 : index
    %c0_827 = arith.constant 0 : index
    %725 = vector.load %arg2[%c0_824, %c0_825, %c6_826, %c0_827] : memref<1x8x16x4xf32, #tpu.memory_space<vmem>>, vector<1x8x1x4xf32>
    %726 = vector.shape_cast %725 : vector<1x8x1x4xf32> to vector<8x4xf32>
    %c0_828 = arith.constant 0 : index
    %c6_829 = arith.constant 6 : index
    %c6_830 = arith.constant 6 : index
    %c0_831 = arith.constant 0 : index
    %727 = vector.load %arg3[%c0_828, %c6_829, %c6_830, %c0_831] : memref<1x8x16x4xf32, #tpu.memory_space<vmem>>, vector<1x1x1x4xf32>
    %728 = vector.shape_cast %727 : vector<1x1x1x4xf32> to vector<1x4xf32>
    %729 = vector.broadcast %728 : vector<1x4xf32> to vector<8x4xf32>
    %730 = arith.mulf %726, %729 : vector<8x4xf32>
    %731 = arith.addf %724, %730 : vector<8x4xf32>
    %c0_832 = arith.constant 0 : index
    %c0_833 = arith.constant 0 : index
    %c7_834 = arith.constant 7 : index
    %c0_835 = arith.constant 0 : index
    %732 = vector.load %arg2[%c0_832, %c0_833, %c7_834, %c0_835] : memref<1x8x16x4xf32, #tpu.memory_space<vmem>>, vector<1x8x1x4xf32>
    %733 = vector.shape_cast %732 : vector<1x8x1x4xf32> to vector<8x4xf32>
    %c0_836 = arith.constant 0 : index
    %c6_837 = arith.constant 6 : index
    %c7_838 = arith.constant 7 : index
    %c0_839 = arith.constant 0 : index
    %734 = vector.load %arg3[%c0_836, %c6_837, %c7_838, %c0_839] : memref<1x8x16x4xf32, #tpu.memory_space<vmem>>, vector<1x1x1x4xf32>
    %735 = vector.shape_cast %734 : vector<1x1x1x4xf32> to vector<1x4xf32>
    %736 = vector.broadcast %735 : vector<1x4xf32> to vector<8x4xf32>
    %737 = arith.mulf %733, %736 : vector<8x4xf32>
    %738 = arith.addf %731, %737 : vector<8x4xf32>
    %c0_840 = arith.constant 0 : index
    %c0_841 = arith.constant 0 : index
    %c8_842 = arith.constant 8 : index
    %c0_843 = arith.constant 0 : index
    %739 = vector.load %arg2[%c0_840, %c0_841, %c8_842, %c0_843] : memref<1x8x16x4xf32, #tpu.memory_space<vmem>>, vector<1x8x1x4xf32>
    %740 = vector.shape_cast %739 : vector<1x8x1x4xf32> to vector<8x4xf32>
    %c0_844 = arith.constant 0 : index
    %c6_845 = arith.constant 6 : index
    %c8_846 = arith.constant 8 : index
    %c0_847 = arith.constant 0 : index
    %741 = vector.load %arg3[%c0_844, %c6_845, %c8_846, %c0_847] : memref<1x8x16x4xf32, #tpu.memory_space<vmem>>, vector<1x1x1x4xf32>
    %742 = vector.shape_cast %741 : vector<1x1x1x4xf32> to vector<1x4xf32>
    %743 = vector.broadcast %742 : vector<1x4xf32> to vector<8x4xf32>
    %744 = arith.mulf %740, %743 : vector<8x4xf32>
    %745 = arith.addf %738, %744 : vector<8x4xf32>
    %c0_848 = arith.constant 0 : index
    %c0_849 = arith.constant 0 : index
    %c9_850 = arith.constant 9 : index
    %c0_851 = arith.constant 0 : index
    %746 = vector.load %arg2[%c0_848, %c0_849, %c9_850, %c0_851] : memref<1x8x16x4xf32, #tpu.memory_space<vmem>>, vector<1x8x1x4xf32>
    %747 = vector.shape_cast %746 : vector<1x8x1x4xf32> to vector<8x4xf32>
    %c0_852 = arith.constant 0 : index
    %c6_853 = arith.constant 6 : index
    %c9_854 = arith.constant 9 : index
    %c0_855 = arith.constant 0 : index
    %748 = vector.load %arg3[%c0_852, %c6_853, %c9_854, %c0_855] : memref<1x8x16x4xf32, #tpu.memory_space<vmem>>, vector<1x1x1x4xf32>
    %749 = vector.shape_cast %748 : vector<1x1x1x4xf32> to vector<1x4xf32>
    %750 = vector.broadcast %749 : vector<1x4xf32> to vector<8x4xf32>
    %751 = arith.mulf %747, %750 : vector<8x4xf32>
    %752 = arith.addf %745, %751 : vector<8x4xf32>
    %c0_856 = arith.constant 0 : index
    %c0_857 = arith.constant 0 : index
    %c10_858 = arith.constant 10 : index
    %c0_859 = arith.constant 0 : index
    %753 = vector.load %arg2[%c0_856, %c0_857, %c10_858, %c0_859] : memref<1x8x16x4xf32, #tpu.memory_space<vmem>>, vector<1x8x1x4xf32>
    %754 = vector.shape_cast %753 : vector<1x8x1x4xf32> to vector<8x4xf32>
    %c0_860 = arith.constant 0 : index
    %c6_861 = arith.constant 6 : index
    %c10_862 = arith.constant 10 : index
    %c0_863 = arith.constant 0 : index
    %755 = vector.load %arg3[%c0_860, %c6_861, %c10_862, %c0_863] : memref<1x8x16x4xf32, #tpu.memory_space<vmem>>, vector<1x1x1x4xf32>
    %756 = vector.shape_cast %755 : vector<1x1x1x4xf32> to vector<1x4xf32>
    %757 = vector.broadcast %756 : vector<1x4xf32> to vector<8x4xf32>
    %758 = arith.mulf %754, %757 : vector<8x4xf32>
    %759 = arith.addf %752, %758 : vector<8x4xf32>
    %c0_864 = arith.constant 0 : index
    %c0_865 = arith.constant 0 : index
    %c11_866 = arith.constant 11 : index
    %c0_867 = arith.constant 0 : index
    %760 = vector.load %arg2[%c0_864, %c0_865, %c11_866, %c0_867] : memref<1x8x16x4xf32, #tpu.memory_space<vmem>>, vector<1x8x1x4xf32>
    %761 = vector.shape_cast %760 : vector<1x8x1x4xf32> to vector<8x4xf32>
    %c0_868 = arith.constant 0 : index
    %c6_869 = arith.constant 6 : index
    %c11_870 = arith.constant 11 : index
    %c0_871 = arith.constant 0 : index
    %762 = vector.load %arg3[%c0_868, %c6_869, %c11_870, %c0_871] : memref<1x8x16x4xf32, #tpu.memory_space<vmem>>, vector<1x1x1x4xf32>
    %763 = vector.shape_cast %762 : vector<1x1x1x4xf32> to vector<1x4xf32>
    %764 = vector.broadcast %763 : vector<1x4xf32> to vector<8x4xf32>
    %765 = arith.mulf %761, %764 : vector<8x4xf32>
    %766 = arith.addf %759, %765 : vector<8x4xf32>
    %c0_872 = arith.constant 0 : index
    %c0_873 = arith.constant 0 : index
    %c12_874 = arith.constant 12 : index
    %c0_875 = arith.constant 0 : index
    %767 = vector.load %arg2[%c0_872, %c0_873, %c12_874, %c0_875] : memref<1x8x16x4xf32, #tpu.memory_space<vmem>>, vector<1x8x1x4xf32>
    %768 = vector.shape_cast %767 : vector<1x8x1x4xf32> to vector<8x4xf32>
    %c0_876 = arith.constant 0 : index
    %c6_877 = arith.constant 6 : index
    %c12_878 = arith.constant 12 : index
    %c0_879 = arith.constant 0 : index
    %769 = vector.load %arg3[%c0_876, %c6_877, %c12_878, %c0_879] : memref<1x8x16x4xf32, #tpu.memory_space<vmem>>, vector<1x1x1x4xf32>
    %770 = vector.shape_cast %769 : vector<1x1x1x4xf32> to vector<1x4xf32>
    %771 = vector.broadcast %770 : vector<1x4xf32> to vector<8x4xf32>
    %772 = arith.mulf %768, %771 : vector<8x4xf32>
    %773 = arith.addf %766, %772 : vector<8x4xf32>
    %c0_880 = arith.constant 0 : index
    %c0_881 = arith.constant 0 : index
    %c13_882 = arith.constant 13 : index
    %c0_883 = arith.constant 0 : index
    %774 = vector.load %arg2[%c0_880, %c0_881, %c13_882, %c0_883] : memref<1x8x16x4xf32, #tpu.memory_space<vmem>>, vector<1x8x1x4xf32>
    %775 = vector.shape_cast %774 : vector<1x8x1x4xf32> to vector<8x4xf32>
    %c0_884 = arith.constant 0 : index
    %c6_885 = arith.constant 6 : index
    %c13_886 = arith.constant 13 : index
    %c0_887 = arith.constant 0 : index
    %776 = vector.load %arg3[%c0_884, %c6_885, %c13_886, %c0_887] : memref<1x8x16x4xf32, #tpu.memory_space<vmem>>, vector<1x1x1x4xf32>
    %777 = vector.shape_cast %776 : vector<1x1x1x4xf32> to vector<1x4xf32>
    %778 = vector.broadcast %777 : vector<1x4xf32> to vector<8x4xf32>
    %779 = arith.mulf %775, %778 : vector<8x4xf32>
    %780 = arith.addf %773, %779 : vector<8x4xf32>
    %c0_888 = arith.constant 0 : index
    %c0_889 = arith.constant 0 : index
    %c14_890 = arith.constant 14 : index
    %c0_891 = arith.constant 0 : index
    %781 = vector.load %arg2[%c0_888, %c0_889, %c14_890, %c0_891] : memref<1x8x16x4xf32, #tpu.memory_space<vmem>>, vector<1x8x1x4xf32>
    %782 = vector.shape_cast %781 : vector<1x8x1x4xf32> to vector<8x4xf32>
    %c0_892 = arith.constant 0 : index
    %c6_893 = arith.constant 6 : index
    %c14_894 = arith.constant 14 : index
    %c0_895 = arith.constant 0 : index
    %783 = vector.load %arg3[%c0_892, %c6_893, %c14_894, %c0_895] : memref<1x8x16x4xf32, #tpu.memory_space<vmem>>, vector<1x1x1x4xf32>
    %784 = vector.shape_cast %783 : vector<1x1x1x4xf32> to vector<1x4xf32>
    %785 = vector.broadcast %784 : vector<1x4xf32> to vector<8x4xf32>
    %786 = arith.mulf %782, %785 : vector<8x4xf32>
    %787 = arith.addf %780, %786 : vector<8x4xf32>
    %c0_896 = arith.constant 0 : index
    %c0_897 = arith.constant 0 : index
    %c15_898 = arith.constant 15 : index
    %c0_899 = arith.constant 0 : index
    %788 = vector.load %arg2[%c0_896, %c0_897, %c15_898, %c0_899] : memref<1x8x16x4xf32, #tpu.memory_space<vmem>>, vector<1x8x1x4xf32>
    %789 = vector.shape_cast %788 : vector<1x8x1x4xf32> to vector<8x4xf32>
    %c0_900 = arith.constant 0 : index
    %c6_901 = arith.constant 6 : index
    %c15_902 = arith.constant 15 : index
    %c0_903 = arith.constant 0 : index
    %790 = vector.load %arg3[%c0_900, %c6_901, %c15_902, %c0_903] : memref<1x8x16x4xf32, #tpu.memory_space<vmem>>, vector<1x1x1x4xf32>
    %791 = vector.shape_cast %790 : vector<1x1x1x4xf32> to vector<1x4xf32>
    %792 = vector.broadcast %791 : vector<1x4xf32> to vector<8x4xf32>
    %793 = arith.mulf %789, %792 : vector<8x4xf32>
    %794 = arith.addf %787, %793 : vector<8x4xf32>
    %c0_904 = arith.constant 0 : index
    %c0_905 = arith.constant 0 : index
    %c6_906 = arith.constant 6 : index
    %c0_907 = arith.constant 0 : index
    %795 = vector.load %arg4[%c0_904, %c0_905, %c6_906, %c0_907] : memref<1x8x8x4xf32, #tpu.memory_space<vmem>>, vector<1x8x1x4xf32>
    %796 = vector.shape_cast %795 : vector<1x8x1x4xf32> to vector<8x4xf32>
    %797 = vector.shape_cast %794 : vector<8x4xf32> to vector<1x8x1x4xf32>
    tpu.vector_store %arg4[%c0_904, %c0_905, %c6_906, %c0_907], %797 {strides = array<i32>} : memref<1x8x8x4xf32, #tpu.memory_space<vmem>>, vector<1x8x1x4xf32>,
    %c0_908 = arith.constant 0 : index
    %c0_909 = arith.constant 0 : index
    %c0_910 = arith.constant 0 : index
    %c0_911 = arith.constant 0 : index
    %798 = vector.load %arg2[%c0_908, %c0_909, %c0_910, %c0_911] : memref<1x8x16x4xf32, #tpu.memory_space<vmem>>, vector<1x8x1x4xf32>
    %799 = vector.shape_cast %798 : vector<1x8x1x4xf32> to vector<8x4xf32>
    %c0_912 = arith.constant 0 : index
    %c7_913 = arith.constant 7 : index
    %c0_914 = arith.constant 0 : index
    %c0_915 = arith.constant 0 : index
    %800 = vector.load %arg3[%c0_912, %c7_913, %c0_914, %c0_915] : memref<1x8x16x4xf32, #tpu.memory_space<vmem>>, vector<1x1x1x4xf32>
    %801 = vector.shape_cast %800 : vector<1x1x1x4xf32> to vector<1x4xf32>
    %802 = vector.broadcast %801 : vector<1x4xf32> to vector<8x4xf32>
    %803 = arith.mulf %799, %802 : vector<8x4xf32>
    %c0_916 = arith.constant 0 : index
    %c0_917 = arith.constant 0 : index
    %c1_918 = arith.constant 1 : index
    %c0_919 = arith.constant 0 : index
    %804 = vector.load %arg2[%c0_916, %c0_917, %c1_918, %c0_919] : memref<1x8x16x4xf32, #tpu.memory_space<vmem>>, vector<1x8x1x4xf32>
    %805 = vector.shape_cast %804 : vector<1x8x1x4xf32> to vector<8x4xf32>
    %c0_920 = arith.constant 0 : index
    %c7_921 = arith.constant 7 : index
    %c1_922 = arith.constant 1 : index
    %c0_923 = arith.constant 0 : index
    %806 = vector.load %arg3[%c0_920, %c7_921, %c1_922, %c0_923] : memref<1x8x16x4xf32, #tpu.memory_space<vmem>>, vector<1x1x1x4xf32>
    %807 = vector.shape_cast %806 : vector<1x1x1x4xf32> to vector<1x4xf32>
    %808 = vector.broadcast %807 : vector<1x4xf32> to vector<8x4xf32>
    %809 = arith.mulf %805, %808 : vector<8x4xf32>
    %810 = arith.addf %803, %809 : vector<8x4xf32>
    %c0_924 = arith.constant 0 : index
    %c0_925 = arith.constant 0 : index
    %c2_926 = arith.constant 2 : index
    %c0_927 = arith.constant 0 : index
    %811 = vector.load %arg2[%c0_924, %c0_925, %c2_926, %c0_927] : memref<1x8x16x4xf32, #tpu.memory_space<vmem>>, vector<1x8x1x4xf32>
    %812 = vector.shape_cast %811 : vector<1x8x1x4xf32> to vector<8x4xf32>
    %c0_928 = arith.constant 0 : index
    %c7_929 = arith.constant 7 : index
    %c2_930 = arith.constant 2 : index
    %c0_931 = arith.constant 0 : index
    %813 = vector.load %arg3[%c0_928, %c7_929, %c2_930, %c0_931] : memref<1x8x16x4xf32, #tpu.memory_space<vmem>>, vector<1x1x1x4xf32>
    %814 = vector.shape_cast %813 : vector<1x1x1x4xf32> to vector<1x4xf32>
    %815 = vector.broadcast %814 : vector<1x4xf32> to vector<8x4xf32>
    %816 = arith.mulf %812, %815 : vector<8x4xf32>
    %817 = arith.addf %810, %816 : vector<8x4xf32>
    %c0_932 = arith.constant 0 : index
    %c0_933 = arith.constant 0 : index
    %c3_934 = arith.constant 3 : index
    %c0_935 = arith.constant 0 : index
    %818 = vector.load %arg2[%c0_932, %c0_933, %c3_934, %c0_935] : memref<1x8x16x4xf32, #tpu.memory_space<vmem>>, vector<1x8x1x4xf32>
    %819 = vector.shape_cast %818 : vector<1x8x1x4xf32> to vector<8x4xf32>
    %c0_936 = arith.constant 0 : index
    %c7_937 = arith.constant 7 : index
    %c3_938 = arith.constant 3 : index
    %c0_939 = arith.constant 0 : index
    %820 = vector.load %arg3[%c0_936, %c7_937, %c3_938, %c0_939] : memref<1x8x16x4xf32, #tpu.memory_space<vmem>>, vector<1x1x1x4xf32>
    %821 = vector.shape_cast %820 : vector<1x1x1x4xf32> to vector<1x4xf32>
    %822 = vector.broadcast %821 : vector<1x4xf32> to vector<8x4xf32>
    %823 = arith.mulf %819, %822 : vector<8x4xf32>
    %824 = arith.addf %817, %823 : vector<8x4xf32>
    %c0_940 = arith.constant 0 : index
    %c0_941 = arith.constant 0 : index
    %c4_942 = arith.constant 4 : index
    %c0_943 = arith.constant 0 : index
    %825 = vector.load %arg2[%c0_940, %c0_941, %c4_942, %c0_943] : memref<1x8x16x4xf32, #tpu.memory_space<vmem>>, vector<1x8x1x4xf32>
    %826 = vector.shape_cast %825 : vector<1x8x1x4xf32> to vector<8x4xf32>
    %c0_944 = arith.constant 0 : index
    %c7_945 = arith.constant 7 : index
    %c4_946 = arith.constant 4 : index
    %c0_947 = arith.constant 0 : index
    %827 = vector.load %arg3[%c0_944, %c7_945, %c4_946, %c0_947] : memref<1x8x16x4xf32, #tpu.memory_space<vmem>>, vector<1x1x1x4xf32>
    %828 = vector.shape_cast %827 : vector<1x1x1x4xf32> to vector<1x4xf32>
    %829 = vector.broadcast %828 : vector<1x4xf32> to vector<8x4xf32>
    %830 = arith.mulf %826, %829 : vector<8x4xf32>
    %831 = arith.addf %824, %830 : vector<8x4xf32>
    %c0_948 = arith.constant 0 : index
    %c0_949 = arith.constant 0 : index
    %c5_950 = arith.constant 5 : index
    %c0_951 = arith.constant 0 : index
    %832 = vector.load %arg2[%c0_948, %c0_949, %c5_950, %c0_951] : memref<1x8x16x4xf32, #tpu.memory_space<vmem>>, vector<1x8x1x4xf32>
    %833 = vector.shape_cast %832 : vector<1x8x1x4xf32> to vector<8x4xf32>
    %c0_952 = arith.constant 0 : index
    %c7_953 = arith.constant 7 : index
    %c5_954 = arith.constant 5 : index
    %c0_955 = arith.constant 0 : index
    %834 = vector.load %arg3[%c0_952, %c7_953, %c5_954, %c0_955] : memref<1x8x16x4xf32, #tpu.memory_space<vmem>>, vector<1x1x1x4xf32>
    %835 = vector.shape_cast %834 : vector<1x1x1x4xf32> to vector<1x4xf32>
    %836 = vector.broadcast %835 : vector<1x4xf32> to vector<8x4xf32>
    %837 = arith.mulf %833, %836 : vector<8x4xf32>
    %838 = arith.addf %831, %837 : vector<8x4xf32>
    %c0_956 = arith.constant 0 : index
    %c0_957 = arith.constant 0 : index
    %c6_958 = arith.constant 6 : index
    %c0_959 = arith.constant 0 : index
    %839 = vector.load %arg2[%c0_956, %c0_957, %c6_958, %c0_959] : memref<1x8x16x4xf32, #tpu.memory_space<vmem>>, vector<1x8x1x4xf32>
    %840 = vector.shape_cast %839 : vector<1x8x1x4xf32> to vector<8x4xf32>
    %c0_960 = arith.constant 0 : index
    %c7_961 = arith.constant 7 : index
    %c6_962 = arith.constant 6 : index
    %c0_963 = arith.constant 0 : index
    %841 = vector.load %arg3[%c0_960, %c7_961, %c6_962, %c0_963] : memref<1x8x16x4xf32, #tpu.memory_space<vmem>>, vector<1x1x1x4xf32>
    %842 = vector.shape_cast %841 : vector<1x1x1x4xf32> to vector<1x4xf32>
    %843 = vector.broadcast %842 : vector<1x4xf32> to vector<8x4xf32>
    %844 = arith.mulf %840, %843 : vector<8x4xf32>
    %845 = arith.addf %838, %844 : vector<8x4xf32>
    %c0_964 = arith.constant 0 : index
    %c0_965 = arith.constant 0 : index
    %c7_966 = arith.constant 7 : index
    %c0_967 = arith.constant 0 : index
    %846 = vector.load %arg2[%c0_964, %c0_965, %c7_966, %c0_967] : memref<1x8x16x4xf32, #tpu.memory_space<vmem>>, vector<1x8x1x4xf32>
    %847 = vector.shape_cast %846 : vector<1x8x1x4xf32> to vector<8x4xf32>
    %c0_968 = arith.constant 0 : index
    %c7_969 = arith.constant 7 : index
    %c7_970 = arith.constant 7 : index
    %c0_971 = arith.constant 0 : index
    %848 = vector.load %arg3[%c0_968, %c7_969, %c7_970, %c0_971] : memref<1x8x16x4xf32, #tpu.memory_space<vmem>>, vector<1x1x1x4xf32>
    %849 = vector.shape_cast %848 : vector<1x1x1x4xf32> to vector<1x4xf32>
    %850 = vector.broadcast %849 : vector<1x4xf32> to vector<8x4xf32>
    %851 = arith.mulf %847, %850 : vector<8x4xf32>
    %852 = arith.addf %845, %851 : vector<8x4xf32>
    %c0_972 = arith.constant 0 : index
    %c0_973 = arith.constant 0 : index
    %c8_974 = arith.constant 8 : index
    %c0_975 = arith.constant 0 : index
    %853 = vector.load %arg2[%c0_972, %c0_973, %c8_974, %c0_975] : memref<1x8x16x4xf32, #tpu.memory_space<vmem>>, vector<1x8x1x4xf32>
    %854 = vector.shape_cast %853 : vector<1x8x1x4xf32> to vector<8x4xf32>
    %c0_976 = arith.constant 0 : index
    %c7_977 = arith.constant 7 : index
    %c8_978 = arith.constant 8 : index
    %c0_979 = arith.constant 0 : index
    %855 = vector.load %arg3[%c0_976, %c7_977, %c8_978, %c0_979] : memref<1x8x16x4xf32, #tpu.memory_space<vmem>>, vector<1x1x1x4xf32>
    %856 = vector.shape_cast %855 : vector<1x1x1x4xf32> to vector<1x4xf32>
    %857 = vector.broadcast %856 : vector<1x4xf32> to vector<8x4xf32>
    %858 = arith.mulf %854, %857 : vector<8x4xf32>
    %859 = arith.addf %852, %858 : vector<8x4xf32>
    %c0_980 = arith.constant 0 : index
    %c0_981 = arith.constant 0 : index
    %c9_982 = arith.constant 9 : index
    %c0_983 = arith.constant 0 : index
    %860 = vector.load %arg2[%c0_980, %c0_981, %c9_982, %c0_983] : memref<1x8x16x4xf32, #tpu.memory_space<vmem>>, vector<1x8x1x4xf32>
    %861 = vector.shape_cast %860 : vector<1x8x1x4xf32> to vector<8x4xf32>
    %c0_984 = arith.constant 0 : index
    %c7_985 = arith.constant 7 : index
    %c9_986 = arith.constant 9 : index
    %c0_987 = arith.constant 0 : index
    %862 = vector.load %arg3[%c0_984, %c7_985, %c9_986, %c0_987] : memref<1x8x16x4xf32, #tpu.memory_space<vmem>>, vector<1x1x1x4xf32>
    %863 = vector.shape_cast %862 : vector<1x1x1x4xf32> to vector<1x4xf32>
    %864 = vector.broadcast %863 : vector<1x4xf32> to vector<8x4xf32>
    %865 = arith.mulf %861, %864 : vector<8x4xf32>
    %866 = arith.addf %859, %865 : vector<8x4xf32>
    %c0_988 = arith.constant 0 : index
    %c0_989 = arith.constant 0 : index
    %c10_990 = arith.constant 10 : index
    %c0_991 = arith.constant 0 : index
    %867 = vector.load %arg2[%c0_988, %c0_989, %c10_990, %c0_991] : memref<1x8x16x4xf32, #tpu.memory_space<vmem>>, vector<1x8x1x4xf32>
    %868 = vector.shape_cast %867 : vector<1x8x1x4xf32> to vector<8x4xf32>
    %c0_992 = arith.constant 0 : index
    %c7_993 = arith.constant 7 : index
    %c10_994 = arith.constant 10 : index
    %c0_995 = arith.constant 0 : index
    %869 = vector.load %arg3[%c0_992, %c7_993, %c10_994, %c0_995] : memref<1x8x16x4xf32, #tpu.memory_space<vmem>>, vector<1x1x1x4xf32>
    %870 = vector.shape_cast %869 : vector<1x1x1x4xf32> to vector<1x4xf32>
    %871 = vector.broadcast %870 : vector<1x4xf32> to vector<8x4xf32>
    %872 = arith.mulf %868, %871 : vector<8x4xf32>
    %873 = arith.addf %866, %872 : vector<8x4xf32>
    %c0_996 = arith.constant 0 : index
    %c0_997 = arith.constant 0 : index
    %c11_998 = arith.constant 11 : index
    %c0_999 = arith.constant 0 : index
    %874 = vector.load %arg2[%c0_996, %c0_997, %c11_998, %c0_999] : memref<1x8x16x4xf32, #tpu.memory_space<vmem>>, vector<1x8x1x4xf32>
    %875 = vector.shape_cast %874 : vector<1x8x1x4xf32> to vector<8x4xf32>
    %c0_1000 = arith.constant 0 : index
    %c7_1001 = arith.constant 7 : index
    %c11_1002 = arith.constant 11 : index
    %c0_1003 = arith.constant 0 : index
    %876 = vector.load %arg3[%c0_1000, %c7_1001, %c11_1002, %c0_1003] : memref<1x8x16x4xf32, #tpu.memory_space<vmem>>, vector<1x1x1x4xf32>
    %877 = vector.shape_cast %876 : vector<1x1x1x4xf32> to vector<1x4xf32>
    %878 = vector.broadcast %877 : vector<1x4xf32> to vector<8x4xf32>
    %879 = arith.mulf %875, %878 : vector<8x4xf32>
    %880 = arith.addf %873, %879 : vector<8x4xf32>
    %c0_1004 = arith.constant 0 : index
    %c0_1005 = arith.constant 0 : index
    %c12_1006 = arith.constant 12 : index
    %c0_1007 = arith.constant 0 : index
    %881 = vector.load %arg2[%c0_1004, %c0_1005, %c12_1006, %c0_1007] : memref<1x8x16x4xf32, #tpu.memory_space<vmem>>, vector<1x8x1x4xf32>
    %882 = vector.shape_cast %881 : vector<1x8x1x4xf32> to vector<8x4xf32>
    %c0_1008 = arith.constant 0 : index
    %c7_1009 = arith.constant 7 : index
    %c12_1010 = arith.constant 12 : index
    %c0_1011 = arith.constant 0 : index
    %883 = vector.load %arg3[%c0_1008, %c7_1009, %c12_1010, %c0_1011] : memref<1x8x16x4xf32, #tpu.memory_space<vmem>>, vector<1x1x1x4xf32>
    %884 = vector.shape_cast %883 : vector<1x1x1x4xf32> to vector<1x4xf32>
    %885 = vector.broadcast %884 : vector<1x4xf32> to vector<8x4xf32>
    %886 = arith.mulf %882, %885 : vector<8x4xf32>
    %887 = arith.addf %880, %886 : vector<8x4xf32>
    %c0_1012 = arith.constant 0 : index
    %c0_1013 = arith.constant 0 : index
    %c13_1014 = arith.constant 13 : index
    %c0_1015 = arith.constant 0 : index
    %888 = vector.load %arg2[%c0_1012, %c0_1013, %c13_1014, %c0_1015] : memref<1x8x16x4xf32, #tpu.memory_space<vmem>>, vector<1x8x1x4xf32>
    %889 = vector.shape_cast %888 : vector<1x8x1x4xf32> to vector<8x4xf32>
    %c0_1016 = arith.constant 0 : index
    %c7_1017 = arith.constant 7 : index
    %c13_1018 = arith.constant 13 : index
    %c0_1019 = arith.constant 0 : index
    %890 = vector.load %arg3[%c0_1016, %c7_1017, %c13_1018, %c0_1019] : memref<1x8x16x4xf32, #tpu.memory_space<vmem>>, vector<1x1x1x4xf32>
    %891 = vector.shape_cast %890 : vector<1x1x1x4xf32> to vector<1x4xf32>
    %892 = vector.broadcast %891 : vector<1x4xf32> to vector<8x4xf32>
    %893 = arith.mulf %889, %892 : vector<8x4xf32>
    %894 = arith.addf %887, %893 : vector<8x4xf32>
    %c0_1020 = arith.constant 0 : index
    %c0_1021 = arith.constant 0 : index
    %c14_1022 = arith.constant 14 : index
    %c0_1023 = arith.constant 0 : index
    %895 = vector.load %arg2[%c0_1020, %c0_1021, %c14_1022, %c0_1023] : memref<1x8x16x4xf32, #tpu.memory_space<vmem>>, vector<1x8x1x4xf32>
    %896 = vector.shape_cast %895 : vector<1x8x1x4xf32> to vector<8x4xf32>
    %c0_1024 = arith.constant 0 : index
    %c7_1025 = arith.constant 7 : index
    %c14_1026 = arith.constant 14 : index
    %c0_1027 = arith.constant 0 : index
    %897 = vector.load %arg3[%c0_1024, %c7_1025, %c14_1026, %c0_1027] : memref<1x8x16x4xf32, #tpu.memory_space<vmem>>, vector<1x1x1x4xf32>
    %898 = vector.shape_cast %897 : vector<1x1x1x4xf32> to vector<1x4xf32>
    %899 = vector.broadcast %898 : vector<1x4xf32> to vector<8x4xf32>
    %900 = arith.mulf %896, %899 : vector<8x4xf32>
    %901 = arith.addf %894, %900 : vector<8x4xf32>
    %c0_1028 = arith.constant 0 : index
    %c0_1029 = arith.constant 0 : index
    %c15_1030 = arith.constant 15 : index
    %c0_1031 = arith.constant 0 : index
    %902 = vector.load %arg2[%c0_1028, %c0_1029, %c15_1030, %c0_1031] : memref<1x8x16x4xf32, #tpu.memory_space<vmem>>, vector<1x8x1x4xf32>
    %903 = vector.shape_cast %902 : vector<1x8x1x4xf32> to vector<8x4xf32>
    %c0_1032 = arith.constant 0 : index
    %c7_1033 = arith.constant 7 : index
    %c15_1034 = arith.constant 15 : index
    %c0_1035 = arith.constant 0 : index
    %904 = vector.load %arg3[%c0_1032, %c7_1033, %c15_1034, %c0_1035] : memref<1x8x16x4xf32, #tpu.memory_space<vmem>>, vector<1x1x1x4xf32>
    %905 = vector.shape_cast %904 : vector<1x1x1x4xf32> to vector<1x4xf32>
    %906 = vector.broadcast %905 : vector<1x4xf32> to vector<8x4xf32>
    %907 = arith.mulf %903, %906 : vector<8x4xf32>
    %908 = arith.addf %901, %907 : vector<8x4xf32>
    %c0_1036 = arith.constant 0 : index
    %c0_1037 = arith.constant 0 : index
    %c7_1038 = arith.constant 7 : index
    %c0_1039 = arith.constant 0 : index
    %909 = vector.load %arg4[%c0_1036, %c0_1037, %c7_1038, %c0_1039] : memref<1x8x8x4xf32, #tpu.memory_space<vmem>>, vector<1x8x1x4xf32>
    %910 = vector.shape_cast %909 : vector<1x8x1x4xf32> to vector<8x4xf32>
    %911 = vector.shape_cast %908 : vector<8x4xf32> to vector<1x8x1x4xf32>
    tpu.vector_store %arg4[%c0_1036, %c0_1037, %c7_1038, %c0_1039], %911 {strides = array<i32>} : memref<1x8x8x4xf32, #tpu.memory_space<vmem>>, vector<1x8x1x4xf32>,
    return
  }
  func.func @transform_0(%arg0: i32, %arg1: i32) -> (i32, i32, i32, i32) {
    %c0_i32 = arith.constant 0 : i32
    %c0_i32_0 = arith.constant 0 : i32
    %c0_i32_1 = arith.constant 0 : i32
    return %arg1, %c0_i32, %c0_i32_0, %arg0 : i32, i32, i32, i32
  }
  func.func @transform_1(%arg0: i32, %arg1: i32) -> (i32, i32, i32, i32) {
    %c0_i32 = arith.constant 0 : i32
    %c0_i32_0 = arith.constant 0 : i32
    %c0_i32_1 = arith.constant 0 : i32
    return %arg1, %c0_i32, %c0_i32_0, %arg0 : i32, i32, i32, i32
  }
  func.func @transform_2(%arg0: i32, %arg1: i32) -> (i32, i32, i32, i32) {
    %c0_i32 = arith.constant 0 : i32
    %c0_i32_0 = arith.constant 0 : i32
    %c0_i32_1 = arith.constant 0 : i32
    return %arg1, %c0_i32, %c0_i32_0, %arg0 : i32, i32, i32, i32
  }
}

</mosaic_0001>

<bundles_post_ra>
// kernel: tpu_custom_call.1
= control target key start
LH: loop header
LB: loop body
LE: loop exit
PB: predicated region body
PF: predicated region fallthrough
CT: control target
= control target key end

     0   :  { %s4346_s9 = smov 0   ;;  %s4348_s10 = smov 0   ;;  %s7006_s0 = inlined_call_operand.vmem [shape: f32[2,8,16,4], index: 0, kind: input, shape index: {}]   ;;  %s7007_s1 = inlined_call_operand.vmem [shape: f32[2,8,16,4], index: 1, kind: input, shape index: {}]   ;;  %s7008_s2 = inlined_call_operand.vmem [shape: f32[2,8,8,4], index: 2, kind: output, shape index: {}]  }
   0x1   :  { %s4350_s11 = smov 0  }
   0x2 LB: > { %s21_s12 = sadd.s32 1, %s4325_s10  ;;  %p4031_p0 = scmp.ge.s32.totalorder %s4329_s11, 1  ;;  %s4329_s11 = sphi %s4350_s11, %s12_s11   ;;  %s4325_s10 = sphi %s4348_s10, %s7010_s10   ;;  %s4321_s9 = sphi %s4346_s9, %s7009_s9  }
   0x3   : > { %p22_p1 = scmp.ge.s32.totalorder %s21_s12, 2  ;;  %p146_p2 = scmp.lt.s32.totalorder %s4329_s11, 3 }
   0x5   : > { %s7012_s12 = smov (%p22_p1, %s21_s12), 0  ;;  %p147_p3 = pnand %p4031_p0, %p146_p2 }
   0x6   : > { %p182_p4 = scmp.lt.s32.totalorder (!%p147_p3), %s4321_s9, 1  ;;  %vm662_vm0 = vcmask (!%p147_p3), 24576  }
   0x7   : > { %150 = sbr.rel (%p147_p3) target bundleno = 535 (0x217), region = 28 }
   0xe   : > { %s7014_s9 = smov (!%p182_p4, %s4321_s9), 1 }
   0xf   : > { %s4280_s13 = sshll.u32 %s7014_s9, 7  ;;  %s4282_s20 = sshll.u32 %s7014_s9, 6 }
  0x10   : > { %s4370_s16 = scalar_lea.vmem %s7006_s0, %s4280_s13  ;;  %s4375_s19 = scalar_lea.vmem %s7007_s1, %s4280_s13 }
  0x11   : > { %v206_v0 = vld [vmem:[%s4370_s16] sm:$0x1]  ;;  %v227_v2 = vld [vmem:[%s4370_s16 + $0x1] sm:$0x1]  ;;  %v256_v5 = vld [vmem:[%s4370_s16 + $0x2] sm:$0x1]  ;;  %s4554_s23 = scalar_lea.vmem %s7008_s2, %s4282_s20 }
  0x12   : > { %v4379_v1 = vld [vmem:[%s4375_s19] ss:$0 sm:$0xff]  ;;  %v4384_v4 = vld [vmem:[%s4375_s19 + $0x1] ss:$0 sm:$0xff]  ;;  %v4388_v6 = vld [vmem:[%s4375_s19 + $0x2] ss:$0 sm:$0xff] }
  0x13   : > { %v219_v3 = vmul.f32 %v4379_v1, %v206_v0  ;;  %v240_v7 = vmul.f32 %v4384_v4, %v227_v2  ;;  %v269_v8 = vmul.f32 %v4388_v6, %v256_v5  ;;  %v285_v9 = vld [vmem:[%s4370_s16 + $0x3] sm:$0x1]  ;;  %v314_v11 = vld [vmem:[%s4370_s16 + $0x4] sm:$0x1]  ;;  %v343_v15 = vld [vmem:[%s4370_s16 + $0x5] sm:$0x1] }
  0x14   : > { %v4394_v10 = vld [vmem:[%s4375_s19 + $0x3] ss:$0 sm:$0xff]  ;;  %v4398_v12 = vld [vmem:[%s4375_s19 + $0x4] ss:$0 sm:$0xff]  ;;  %v4403_v16 = vld [vmem:[%s4375_s19 + $0x5] ss:$0 sm:$0xff] }
  0x15   : > { %v248_v13 = vadd.f32 %v240_v7, %v219_v3  ;;  %v298_v14 = vmul.f32 %v4394_v10, %v285_v9  ;;  %v327_v18 = vmul.f32 %v4398_v12, %v314_v11  ;;  %v372_v19 = vld [vmem:[%s4370_s16 + $0x6] sm:$0x1]  ;;  %v356_v22 = vmul.f32 %v4403_v16, %v343_v15  ;;  %v401_v23 = vld [vmem:[%s4370_s16 + $0x7] sm:$0x1]  ;;  %v430_v25 = vld [vmem:[%s4370_s16 + $0x8] sm:$0x1] }
  0x16   : > { %v4408_v20 = vld [vmem:[%s4375_s19 + $0x6] ss:$0 sm:$0xff]  ;;  %v4413_v24 = vld [vmem:[%s4375_s19 + $0x7] ss:$0 sm:$0xff]  ;;  %v4417_v26 = vld [vmem:[%s4375_s19 + $0x8] ss:$0 sm:$0xff] }
  0x17   : > { %v277_v17 = vadd.f32 %v269_v8, %v248_v13  ;;  %v385_v28 = vmul.f32 %v4408_v20, %v372_v19  ;;  %v459_v29 = vld [vmem:[%s4370_s16 + $0x9] sm:$0x1]  ;;  %v488_v31 = vld [vmem:[%s4370_s16 + $0xa] sm:$0x1]  ;;  %v207_v33 = vld [vmem:[%s4370_s16 + $0x10] sm:$0x1]  ;;  %v414_v39 = vmul.f32 %v4413_v24, %v401_v23  ;;  %v443_v49 = vmul.f32 %v4417_v26, %v430_v25 }
  0x18   : > { %v4422_v30 = vld [vmem:[%s4375_s19 + $0x9] ss:$0 sm:$0xff]  ;;  %v4426_v32 = vld [vmem:[%s4375_s19 + $0xa] ss:$0 sm:$0xff]  ;;  %v220_v34 = vmul.f32 %v4379_v1, %v207_v33  ;;  %v228_v35 = vld [vmem:[%s4370_s16 + $0x11] sm:$0x1] }
  0x19   : > { %v306_v21 = vadd.f32 %v298_v14, %v277_v17  ;;  %v257_v36 = vld [vmem:[%s4370_s16 + $0x12] sm:$0x1]  ;;  %v286_v37 = vld [vmem:[%s4370_s16 + $0x13] sm:$0x1]  ;;  %v517_v40 = vld [vmem:[%s4370_s16 + $0xb] sm:$0x1]  ;;  %v241_v43 = vmul.f32 %v4384_v4, %v228_v35  ;;  %v472_v55 = vmul.f32 %v4422_v30, %v459_v29  ;;  %v501_v56 = vmul.f32 %v4426_v32, %v488_v31 }
  0x1a   : > { %v4436_v41 = vld [vmem:[%s4375_s19 + $0xb] ss:$0 sm:$0xff]  ;;  %v546_v42 = vld [vmem:[%s4370_s16 + $0xc] sm:$0x1]  ;;  %v270_v44 = vmul.f32 %v4388_v6, %v257_v36  ;;  %v575_v46 = vld [vmem:[%s4370_s16 + $0xd] sm:$0x1]  ;;  %v299_v54 = vmul.f32 %v4394_v10, %v286_v37 }
  0x1b   : > { %v335_v27 = vadd.f32 %v327_v18, %v306_v21  ;;  %v4442_v45 = vld [vmem:[%s4375_s19 + $0xc] ss:$0 sm:$0xff]  ;;  %v315_v47 = vld [vmem:[%s4370_s16 + $0x14] sm:$0x1]  ;;  %v4448_v50 = vld [vmem:[%s4375_s19 + $0xd] ss:$0 sm:$0xff]  ;;  %v249_v53 = vadd.f32 %v241_v43, %v220_v34  ;;  %v530_v61 = vmul.f32 %v4436_v41, %v517_v40 }
  0x1c   : > { %v604_v51 = vld [vmem:[%s4370_s16 + $0xe] sm:$0x1]  ;;  %v633_v57 = vld [vmem:[%s4370_s16 + $0xf] sm:$0x1]  ;;  %v344_v59 = vld [vmem:[%s4370_s16 + $0x15] sm:$0x1]  ;;  %v328_v63 = vmul.f32 %v4398_v12, %v315_v47  ;;  %v559_v5 = vmul.f32 %v4442_v45, %v546_v42  ;;  %v4475_v17 = vmul.f32 %v4448_v50, %v575_v46 }
  0x1d   : > { %v364_v38 = vadd.f32 %v356_v22, %v335_v27  ;;  %v4452_v52 = vld [vmem:[%s4375_s19 + $0xe] ss:$0 sm:$0xff]  ;;  %v4459_v58 = vld [vmem:[%s4375_s19 + $0xf] ss:$0 sm:$0xff]  ;;  %v278_v62 = vadd.f32 %v270_v44, %v249_v53  ;;  %v208_v0 = vld [vmem:[%s4370_s16 + $0x20] sm:$0x1]  ;;  %v357_v19 = vmul.f32 %v4403_v16, %v344_v59 }
  0x1e   : > { %v229_v2 = vld [vmem:[%s4370_s16 + $0x21] sm:$0x1]  ;;  %v258_v3 = vld [vmem:[%s4370_s16 + $0x22] sm:$0x1]  ;;  %v373_v7 = vld [vmem:[%s4370_s16 + $0x16] sm:$0x1]  ;;  %v221_v9 = vmul.f32 %v4379_v1, %v208_v0  ;;  %v4482_v25 = vmul.f32 %v4452_v52, %v604_v51  ;;  %v4485_v27 = vmul.f32 %v4459_v58, %v633_v57 }
  0x1f   : > { %v393_v48 = vadd.f32 %v385_v28, %v364_v38  ;;  %v402_v8 = vld [vmem:[%s4370_s16 + $0x17] sm:$0x1]  ;;  %v242_v11 = vmul.f32 %v4384_v4, %v229_v2  ;;  %v271_v13 = vmul.f32 %v4388_v6, %v258_v3  ;;  %v287_v14 = vld [vmem:[%s4370_s16 + $0x23] sm:$0x1]  ;;  %v307_v18 = vadd.f32 %v299_v54, %v278_v62  ;;  %v431_v21 = vld [vmem:[%s4370_s16 + $0x18] sm:$0x1] }
  0x20   : > { %v460_v22 = vld [vmem:[%s4370_s16 + $0x19] sm:$0x1]  ;;  %v316_v23 = vld [vmem:[%s4370_s16 + $0x24] sm:$0x1]  ;;  %v489_v28 = vld [vmem:[%s4370_s16 + $0x1a] sm:$0x1]  ;;  %v300_v33 = vmul.f32 %v4394_v10, %v287_v14  ;;  %v386_v36 = vmul.f32 %v4408_v20, %v373_v7  ;;  %v415_v37 = vmul.f32 %v4413_v24, %v402_v8 }
  0x21   : > { %v422_v60 = vadd.f32 %v414_v39, %v393_v48  ;;  %v518_v29 = vld [vmem:[%s4370_s16 + $0x1b] sm:$0x1]  ;;  %v250_v31 = vadd.f32 %v242_v11, %v221_v9  ;;  %v336_v35 = vadd.f32 %v328_v63, %v307_v18  ;;  %v345_v38 = vld [vmem:[%s4370_s16 + $0x25] sm:$0x1]  ;;  %v444_v39 = vmul.f32 %v4417_v26, %v431_v21  ;;  %v547_v42 = vld [vmem:[%s4370_s16 + $0x1c] sm:$0x1] }
  0x22   : > { %v473_v40 = vmul.f32 %v4422_v30, %v460_v22  ;;  %v329_v44 = vmul.f32 %v4398_v12, %v316_v23  ;;  %v209_v46 = vld [vmem:[%s4370_s16 + $0x30] sm:$0x1]  ;;  %v230_v47 = vld [vmem:[%s4370_s16 + $0x31] sm:$0x1]  ;;  %v4500_v51 = vmul.f32 %v4426_v32, %v489_v28  ;;  %v4503_v53 = vmul.f32 %v4436_v41, %v518_v29  ;;  %v374_v54 = vld [vmem:[%s4370_s16 + $0x26] sm:$0x1] }
  0x23   : > { %v451_v15 = vadd.f32 %v443_v49, %v422_v60  ;;  %v279_v43 = vadd.f32 %v271_v13, %v250_v31  ;;  %v365_v49 = vadd.f32 %v357_v19, %v336_v35  ;;  %v288_v57 = vld [vmem:[%s4370_s16 + $0x33] sm:$0x1]  ;;  %v576_v59 = vld [vmem:[%s4370_s16 + $0x1d] sm:$0x1]  ;;  %v605_v60 = vld [vmem:[%s4370_s16 + $0x1e] sm:$0x1]  ;;  %v222_v63 = vmul.f32 %v4379_v1, %v209_v46 }
  0x24   : > { %v243_v0 = vmul.f32 %v4384_v4, %v230_v47  ;;  %v4514_v7 = vmul.f32 %v4442_v45, %v547_v42  ;;  %v403_v8 = vld [vmem:[%s4370_s16 + $0x27] sm:$0x1]  ;;  %v317_v11 = vld [vmem:[%s4370_s16 + $0x34] sm:$0x1]  ;;  %v634_v13 = vld [vmem:[%s4370_s16 + $0x1f] sm:$0x1]  ;;  %v4524_v23 = vmul.f32 %v4448_v50, %v576_v59  ;;  %v4527_v28 = vmul.f32 %v4452_v52, %v605_v60 }
  0x25   : > { %v480_v34 = vadd.f32 %v472_v55, %v451_v15  ;;  %v259_v55 = vld [vmem:[%s4370_s16 + $0x32] sm:$0x1]  ;;  %v308_v62 = vadd.f32 %v300_v33, %v279_v43  ;;  %v394_v3 = vadd.f32 %v386_v36, %v365_v49  ;;  %v387_v15 = vmul.f32 %v4408_v20, %v374_v54  ;;  %v432_v18 = vld [vmem:[%s4370_s16 + $0x28] sm:$0x1]  ;;  %v461_v29 = vld [vmem:[%s4370_s16 + $0x29] sm:$0x1] }
  0x26   : > { %v272_v9 = vmul.f32 %v4388_v6, %v259_v55  ;;  %v251_v19 = vadd.f32 %v243_v0, %v222_v63  ;;  %v346_v31 = vld [vmem:[%s4370_s16 + $0x35] sm:$0x1]  ;;  %v490_v35 = vld [vmem:[%s4370_s16 + $0x2a] sm:$0x1]  ;;  %v4538_v43 = vmul.f32 %v4459_v58, %v634_v13  ;;  %v210_v46 = vld [vmem:[%s4370_s16 + $0x40] sm:$0x1]  ;;  %v474_v49 = vmul.f32 %v4422_v30, %v461_v29 }
  0x27   : > { %v509_v48 = vadd.f32 %v501_v56, %v480_v34  ;;  %v358_v56 = vmul.f32 %v4403_v16, %v345_v38  ;;  %v337_v14 = vadd.f32 %v329_v44, %v308_v62  ;;  %v423_v22 = vadd.f32 %v415_v37, %v394_v3  ;;  %v375_v37 = vld [vmem:[%s4370_s16 + $0x36] sm:$0x1]  ;;  %v231_v47 = vld [vmem:[%s4370_s16 + $0x41] sm:$0x1]  ;;  %v519_v0 = vld [vmem:[%s4370_s16 + $0x2b] sm:$0x1] }
  0x28   : > { %v416_v34 = vmul.f32 %v4413_v24, %v403_v8  ;;  %v280_v36 = vadd.f32 %v272_v9, %v251_v19  ;;  %v445_v44 = vmul.f32 %v4417_v26, %v432_v18  ;;  %v359_v55 = vmul.f32 %v4403_v16, %v346_v31  ;;  %v577_v19 = vld [vmem:[%s4370_s16 + $0x2d] sm:$0x1] }
  0x29   : > { %v538_v2 = vadd.f32 %v530_v61, %v509_v48  ;;  %v301_v61 = vmul.f32 %v4394_v10, %v288_v57  ;;  %v366_v33 = vadd.f32 %v358_v56, %v337_v14  ;;  %v452_v42 = vadd.f32 %v444_v39, %v423_v22  ;;  %v404_v57 = vld [vmem:[%s4370_s16 + $0x37] sm:$0x1]  ;;  %v289_v56 = vld [vmem:[%s4370_s16 + $0x43] sm:$0x1]  ;;  %v462_v22 = vld [vmem:[%s4370_s16 + $0x39] sm:$0x1] }
  0x2a   : > { %v503_v60 = vmul.f32 %v4426_v32, %v490_v35  ;;  %v388_v62 = vmul.f32 %v4408_v20, %v375_v37  ;;  %v244_v8 = vmul.f32 %v4384_v4, %v231_v47  ;;  %v417_v13 = vmul.f32 %v4413_v24, %v404_v57  ;;  %v347_v35 = vld [vmem:[%s4370_s16 + $0x45] sm:$0x1] }
  0x2b   : > { %v567_v21 = vadd.f32 %v559_v5, %v538_v2  ;;  %v330_v5 = vmul.f32 %v4398_v12, %v317_v11  ;;  %v395_v48 = vadd.f32 %v387_v15, %v366_v33  ;;  %v309_v54 = vadd.f32 %v301_v61, %v280_v36  ;;  %v548_v2 = vld [vmem:[%s4370_s16 + $0x2c] sm:$0x1]  ;;  %v318_v15 = vld [vmem:[%s4370_s16 + $0x44] sm:$0x1]  ;;  %v606_v61 = vld [vmem:[%s4370_s16 + $0x2e] sm:$0x1] }
  0x2c   : > { %v481_v59 = vadd.f32 %v473_v40, %v452_v42  ;;  %v223_v40 = vmul.f32 %v4379_v1, %v210_v46  ;;  %v302_v31 = vmul.f32 %v4394_v10, %v289_v56  ;;  %v561_v33 = vmul.f32 %v4442_v45, %v548_v2  ;;  %v376_v46 = vld [vmem:[%s4370_s16 + $0x46] sm:$0x1]  ;;  %v261_v56 = vld [vmem:[%s4370_s16 + $0x52] sm:$0x1] }
  0x2d   : > { %v596_v38 = vadd.f32 %v4475_v17, %v567_v21  ;;  %v260_v17 = vld [vmem:[%s4370_s16 + $0x42] sm:$0x1]  ;;  %v424_v63 = vadd.f32 %v416_v34, %v395_v48  ;;  %v338_v3 = vadd.f32 %v330_v5, %v309_v54  ;;  %v635_v5 = vld [vmem:[%s4370_s16 + $0x2f] sm:$0x1]  ;;  %v590_v47 = vmul.f32 %v4448_v50, %v577_v19 }
  0x2e   : > { %v510_v11 = vadd.f32 %v4500_v51, %v481_v59  ;;  %v273_v14 = vmul.f32 %v4388_v6, %v260_v17  ;;  %v252_v29 = vadd.f32 %v244_v8, %v223_v40  ;;  %v532_v51 = vmul.f32 %v4436_v41, %v519_v0  ;;  %v520_v17 = vld [vmem:[%s4370_s16 + $0x3b] sm:$0x1]  ;;  %v549_v40 = vld [vmem:[%s4370_s16 + $0x3c] sm:$0x1] }
  0x2f   : > { %v625_v39 = vadd.f32 %v4482_v25, %v596_v38  ;;  %v433_v25 = vld [vmem:[%s4370_s16 + $0x38] sm:$0x1]  ;;  %v453_v18 = vadd.f32 %v445_v44, %v424_v63  ;;  %v367_v21 = vadd.f32 %v359_v55, %v338_v3  ;;  %v491_v38 = vld [vmem:[%s4370_s16 + $0x3a] sm:$0x1]  ;;  %v331_v44 = vmul.f32 %v4398_v12, %v318_v15 }
  0x30   : > { %v446_v34 = vmul.f32 %v4417_v26, %v433_v25  ;;  %v281_v42 = vadd.f32 %v273_v14, %v252_v29  ;;  %v619_v48 = vmul.f32 %v4452_v52, %v606_v61  ;;  %v475_v54 = vmul.f32 %v4422_v30, %v462_v22  ;;  %v434_v14 = vld [vmem:[%s4370_s16 + $0x48] sm:$0x1]  ;;  %v607_v22 = vld [vmem:[%s4370_s16 + $0x3e] sm:$0x1] }
  0x31   : > { %v654_v9 = vadd.f32 %v4485_v27, %v625_v39  ;;  %v539_v27 = vadd.f32 %v4503_v53, %v510_v11  ;;  %v482_v36 = vadd.f32 %v474_v49, %v453_v18  ;;  %v396_v37 = vadd.f32 %v388_v62, %v367_v21  ;;  %v211_v49 = vld [vmem:[%s4370_s16 + $0x50] sm:$0x1]  ;;  %v232_v62 = vld [vmem:[%s4370_s16 + $0x51] sm:$0x1]  ;;  %v290_v11 = vld [vmem:[%s4370_s16 + $0x53] sm:$0x1] }
  0x32   : > { %v310_v39 = vadd.f32 %v302_v31, %v281_v42  ;;  %v360_v59 = vmul.f32 %v4403_v16, %v347_v35  ;;  %v648_v63 = vmul.f32 %v4459_v58, %v635_v5  ;;  %v504_v0 = vmul.f32 %v4426_v32, %v491_v38  ;;  %v578_v21 = vld [vmem:[%s4370_s16 + $0x3d] sm:$0x1] }
  0x33   : > { %663 = vst.msk [vmem:[%s4554_s23] sm:$0x1] %vm662_vm0, %v654_v9  ;;  %v568_v53 = vadd.f32 %v4514_v7, %v539_v27  ;;  %v511_v55 = vadd.f32 %v503_v60, %v482_v36  ;;  %v425_v57 = vadd.f32 %v417_v13, %v396_v37  ;;  %v389_v2 = vmul.f32 %v4408_v20, %v376_v46  ;;  %v405_v60 = vld [vmem:[%s4370_s16 + $0x47] sm:$0x1]  ;;  %v319_v27 = vld [vmem:[%s4370_s16 + $0x54] sm:$0x1] }
  0x34   : > { %v339_v8 = vadd.f32 %v331_v44, %v310_v39  ;;  %v224_v9 = vmul.f32 %v4379_v1, %v211_v49  ;;  %v533_v13 = vmul.f32 %v4436_v41, %v520_v17  ;;  %v245_v15 = vmul.f32 %v4384_v4, %v232_v62  ;;  %v636_v37 = vld [vmem:[%s4370_s16 + $0x3f] sm:$0x1]  ;;  %v492_v44 = vld [vmem:[%s4370_s16 + $0x4a] sm:$0x1]  ;;  %v348_v46 = vld [vmem:[%s4370_s16 + $0x55] sm:$0x1] }
  0x35   : > { %v597_v7 = vadd.f32 %v4524_v23, %v568_v53  ;;  %v540_v3 = vadd.f32 %v532_v51, %v511_v55  ;;  %v454_v25 = vadd.f32 %v446_v34, %v425_v57  ;;  %v274_v18 = vmul.f32 %v4388_v6, %v261_v56  ;;  %v463_v34 = vld [vmem:[%s4370_s16 + $0x49] sm:$0x1]  ;;  %v377_v49 = vld [vmem:[%s4370_s16 + $0x56] sm:$0x1]  ;;  %v233_v62 = vld [vmem:[%s4370_s16 + $0x61] sm:$0x1] }
  0x36   : > { %v368_v29 = vadd.f32 %v360_v59, %v339_v8  ;;  %v418_v31 = vmul.f32 %v4413_v24, %v405_v60  ;;  %v562_v51 = vmul.f32 %v4442_v45, %v549_v40  ;;  %v253_v35 = vadd.f32 %v245_v15, %v224_v9  ;;  %v212_v59 = vld [vmem:[%s4370_s16 + $0x60] sm:$0x1]  ;;  %v262_v56 = vld [vmem:[%s4370_s16 + $0x62] sm:$0x1]  ;;  %v550_v60 = vld [vmem:[%s4370_s16 + $0x4c] sm:$0x1] }
  0x37   : > { %v626_v23 = vadd.f32 %v4527_v28, %v597_v7  ;;  %v569_v19 = vadd.f32 %v561_v33, %v540_v3  ;;  %v483_v61 = vadd.f32 %v475_v54, %v454_v25  ;;  %v303_v36 = vmul.f32 %v4394_v10, %v290_v11  ;;  %v406_v11 = vld [vmem:[%s4370_s16 + $0x57] sm:$0x1] }
  0x38   : > { %v397_v38 = vadd.f32 %v389_v2, %v368_v29  ;;  %v447_v42 = vmul.f32 %v4417_v26, %v434_v14  ;;  %v620_v53 = vmul.f32 %v4452_v52, %v607_v22  ;;  %v282_v54 = vadd.f32 %v274_v18, %v253_v35  ;;  %v521_v2 = vld [vmem:[%s4370_s16 + $0x4b] sm:$0x1]  ;;  %v608_v14 = vld [vmem:[%s4370_s16 + $0x4e] sm:$0x1]  ;;  %v464_v35 = vld [vmem:[%s4370_s16 + $0x59] sm:$0x1] }
  0x39   : > { %v655_v28 = vadd.f32 %v4538_v43, %v626_v23  ;;  %v598_v33 = vadd.f32 %v590_v47, %v569_v19  ;;  %v512_v5 = vadd.f32 %v504_v0, %v483_v61  ;;  %v591_v43 = vmul.f32 %v4448_v50, %v578_v21  ;;  %v291_v23 = vld [vmem:[%s4370_s16 + $0x63] sm:$0x1] }
  0x3a   : > { %v332_v47 = vmul.f32 %v4398_v12, %v319_v27  ;;  %v426_v17 = vadd.f32 %v418_v31, %v397_v38  ;;  %v476_v39 = vmul.f32 %v4422_v30, %v463_v34  ;;  %v649_v7 = vmul.f32 %v4459_v58, %v636_v37  ;;  %v435_v31 = vld [vmem:[%s4370_s16 + $0x58] sm:$0x1]  ;;  %v320_v27 = vld [vmem:[%s4370_s16 + $0x64] sm:$0x1] }
  0x3b   : > { %664 = vst.msk [vmem:[%s4554_s23 + $0x8] sm:$0x1] %vm662_vm0, %v655_v28  ;;  %v627_v55 = vadd.f32 %v619_v48, %v598_v33  ;;  %v541_v57 = vadd.f32 %v533_v13, %v512_v5  ;;  %v505_v0 = vmul.f32 %v4426_v32, %v492_v44  ;;  %v311_v3 = vadd.f32 %v303_v36, %v282_v54  ;;  %v579_v13 = vld [vmem:[%s4370_s16 + $0x4d] sm:$0x1]  ;;  %v637_v28 = vld [vmem:[%s4370_s16 + $0x4f] sm:$0x1] }
  0x3c   : > { %v361_v48 = vmul.f32 %v4403_v16, %v348_v46  ;;  %v455_v8 = vadd.f32 %v447_v42, %v426_v17  ;;  %v390_v9 = vmul.f32 %v4408_v20, %v377_v49  ;;  %v225_v18 = vmul.f32 %v4379_v1, %v212_v59  ;;  %v493_v44 = vld [vmem:[%s4370_s16 + $0x5a] sm:$0x1]  ;;  %v349_v46 = vld [vmem:[%s4370_s16 + $0x65] sm:$0x1] }
  0x3d   : > { %v656_v25 = vadd.f32 %v648_v63, %v627_v55  ;;  %v570_v40 = vadd.f32 %v562_v51, %v541_v57  ;;  %v340_v15 = vadd.f32 %v332_v47, %v311_v3  ;;  %v246_v19 = vmul.f32 %v4384_v4, %v233_v62  ;;  %v522_v47 = vld [vmem:[%s4370_s16 + $0x5b] sm:$0x1]  ;;  %v234_v57 = vld [vmem:[%s4370_s16 + $0x71] sm:$0x1]  ;;  %v551_v3 = vld [vmem:[%s4370_s16 + $0x5c] sm:$0x1] }
  0x3e   : > { %v275_v61 = vmul.f32 %v4388_v6, %v262_v56  ;;  %v484_v21 = vadd.f32 %v476_v39, %v455_v8  ;;  %v534_v22 = vmul.f32 %v4436_v41, %v521_v2  ;;  %v563_v29 = vmul.f32 %v4442_v45, %v550_v60  ;;  %v378_v56 = vld [vmem:[%s4370_s16 + $0x66] sm:$0x1] }
  0x3f   : > { %665 = vst.msk [vmem:[%s4554_s23 + $0x10] sm:$0x1] %vm662_vm0, %v656_v25  ;;  %v599_v63 = vadd.f32 %v591_v43, %v570_v40  ;;  %v369_v51 = vadd.f32 %v361_v48, %v340_v15  ;;  %v419_v34 = vmul.f32 %v4413_v24, %v406_v11  ;;  %v254_v36 = vadd.f32 %v246_v19, %v225_v18  ;;  %v292_v40 = vld [vmem:[%s4370_s16 + $0x73] sm:$0x1]  ;;  %v407_v11 = vld [vmem:[%s4370_s16 + $0x67] sm:$0x1] }
  0x40   : > { %v304_v33 = vmul.f32 %v4394_v10, %v291_v23  ;;  %v513_v37 = vadd.f32 %v505_v0, %v484_v21  ;;  %v592_v38 = vmul.f32 %v4448_v50, %v579_v13  ;;  %v621_v42 = vmul.f32 %v4452_v52, %v608_v14  ;;  %v263_v0 = vld [vmem:[%s4370_s16 + $0x72] sm:$0x1]  ;;  %v609_v15 = vld [vmem:[%s4370_s16 + $0x5e] sm:$0x1] }
  0x41   : > { %v628_v5 = vadd.f32 %v620_v53, %v599_v63  ;;  %v398_v43 = vadd.f32 %v390_v9, %v369_v51  ;;  %v448_v54 = vmul.f32 %v4417_v26, %v435_v31  ;;  %v283_v49 = vadd.f32 %v275_v61, %v254_v36  ;;  %v213_v53 = vld [vmem:[%s4370_s16 + $0x70] sm:$0x1]  ;;  %v580_v9 = vld [vmem:[%s4370_s16 + $0x5d] sm:$0x1]  ;;  %v321_v63 = vld [vmem:[%s4370_s16 + $0x74] sm:$0x1] }
  0x42   : > { %v333_v55 = vmul.f32 %v4398_v12, %v320_v27  ;;  %v542_v39 = vadd.f32 %v534_v22, %v513_v37  ;;  %v650_v59 = vmul.f32 %v4459_v58, %v637_v28  ;;  %v477_v62 = vmul.f32 %v4422_v30, %v464_v35  ;;  %v436_v31 = vld [vmem:[%s4370_s16 + $0x68] sm:$0x1]  ;;  %v494_v35 = vld [vmem:[%s4370_s16 + $0x6a] sm:$0x1]  ;;  %v350_v36 = vld [vmem:[%s4370_s16 + $0x75] sm:$0x1] }
  0x43   : > { %v657_v17 = vadd.f32 %v649_v7, %v628_v5  ;;  %v427_v2 = vadd.f32 %v419_v34, %v398_v43  ;;  %v506_v60 = vmul.f32 %v4426_v32, %v493_v44  ;;  %v312_v48 = vadd.f32 %v304_v33, %v283_v49  ;;  %v379_v33 = vld [vmem:[%s4370_s16 + $0x76] sm:$0x1]  ;;  %v671_v44 = vld [vmem:[%s4370_s16] sm:$0x1]  ;;  %v693_v43 = vld [vmem:[%s4370_s16 + $0x1] sm:$0x1] }
  0x44   : > { %v362_v25 = vmul.f32 %v4403_v16, %v349_v46  ;;  %v571_v7 = vadd.f32 %v563_v29, %v542_v39  ;;  %v535_v8 = vmul.f32 %v4436_v41, %v522_v47  ;;  %v226_v23 = vmul.f32 %v4379_v1, %v213_v53  ;;  %v638_v29 = vld [vmem:[%s4370_s16 + $0x5f] sm:$0x1]  ;;  %v465_v1 = vld [vmem:[%s4370_s16 + $0x69] sm:$0x1]  ;;  %v4690_v46 = vld [vmem:[%s4375_s19 + $0x10] ss:$0 sm:$0xff] }
  0x45   : > { %666 = vst.msk [vmem:[%s4554_s23 + $0x18] sm:$0x1] %vm662_vm0, %v657_v17  ;;  %v247_v13 = vmul.f32 %v4384_v4, %v234_v57  ;;  %v456_v14 = vadd.f32 %v448_v54, %v427_v2  ;;  %v341_v18 = vadd.f32 %v333_v55, %v312_v48  ;;  %v391_v19 = vmul.f32 %v4408_v20, %v378_v56  ;;  %v4698_v55 = vld [vmem:[%s4375_s19 + $0x11] ss:$0 sm:$0xff]  ;;  %v722_v53 = vld [vmem:[%s4370_s16 + $0x2] sm:$0x1] }
  0x46   : > { %v276_v61 = vmul.f32 %v4388_v6, %v263_v0  ;;  %v600_v21 = vadd.f32 %v592_v38, %v571_v7  ;;  %v564_v22 = vmul.f32 %v4442_v45, %v551_v3  ;;  %v305_v27 = vmul.f32 %v4394_v10, %v292_v40  ;;  %v523_v39 = vld [vmem:[%s4370_s16 + $0x6b] sm:$0x1]  ;;  %v751_v40 = vld [vmem:[%s4370_s16 + $0x3] sm:$0x1]  ;;  %v581_v7 = vld [vmem:[%s4370_s16 + $0x6d] sm:$0x1] }
  0x47   : > { %v255_v4 = vadd.f32 %v247_v13, %v226_v23  ;;  %v485_v28 = vadd.f32 %v477_v62, %v456_v14  ;;  %v593_v51 = vmul.f32 %v4448_v50, %v580_v9  ;;  %v370_v34 = vadd.f32 %v362_v25, %v341_v18  ;;  %v552_v62 = vld [vmem:[%s4370_s16 + $0x6c] sm:$0x1]  ;;  %v408_v25 = vld [vmem:[%s4370_s16 + $0x77] sm:$0x1]  ;;  %v610_v9 = vld [vmem:[%s4370_s16 + $0x6e] sm:$0x1] }
  0x48   : > { %v420_v6 = vmul.f32 %v4413_v24, %v407_v11  ;;  %v629_v5 = vadd.f32 %v621_v42, %v600_v21  ;;  %v622_v37 = vmul.f32 %v4452_v52, %v609_v15  ;;  %v334_v10 = vmul.f32 %v4398_v12, %v321_v63  ;;  %v4702_v12 = vld [vmem:[%s4375_s19 + $0x12] ss:$0 sm:$0xff]  ;;  %v437_v18 = vld [vmem:[%s4370_s16 + $0x78] sm:$0x1]  ;;  %v639_v63 = vld [vmem:[%s4370_s16 + $0x6f] sm:$0x1] }
  0x49   : > { %v284_v38 = vadd.f32 %v276_v61, %v255_v4  ;;  %v514_v54 = vadd.f32 %v506_v60, %v485_v28  ;;  %v4694_v47 = vmul.f32 %v4459_v58, %v638_v29  ;;  %v399_v49 = vadd.f32 %v391_v19, %v370_v34  ;;  %v780_v19 = vld [vmem:[%s4370_s16 + $0x4] sm:$0x1]  ;;  %v4727_v61 = vld [vmem:[%s4375_s19 + $0x14] ss:$0 sm:$0xff] }
  0x4a   : > { %v449_v42 = vmul.f32 %v4417_v26, %v436_v31  ;;  %v658_v57 = vadd.f32 %v650_v59, %v629_v5  ;;  %v478_v17 = vmul.f32 %v4422_v30, %v465_v1  ;;  %v363_v0 = vmul.f32 %v4403_v16, %v350_v36  ;;  %v4713_v59 = vld [vmem:[%s4375_s19 + $0x13] ss:$0 sm:$0xff]  ;;  %v466_v31 = vld [vmem:[%s4370_s16 + $0x79] sm:$0x1]  ;;  %v4740_v36 = vld [vmem:[%s4375_s19 + $0x15] ss:$0 sm:$0xff] }
  0x4b   : > { %v313_v56 = vadd.f32 %v305_v27, %v284_v38  ;;  %v543_v2 = vadd.f32 %v535_v8, %v514_v54  ;;  %v428_v60 = vadd.f32 %v420_v6, %v399_v49  ;;  %v507_v3 = vmul.f32 %v4426_v32, %v494_v35  ;;  %v495_v6 = vld [vmem:[%s4370_s16 + $0x7a] sm:$0x1]  ;;  %v809_v35 = vld [vmem:[%s4370_s16 + $0x5] sm:$0x1]  ;;  %v838_v38 = vld [vmem:[%s4370_s16 + $0x6] sm:$0x1] }
  0x4c   : > { %v392_v48 = vmul.f32 %v4408_v20, %v379_v33  ;;  %667 = vst.msk [vmem:[%s4554_s23 + $0x20] sm:$0x1] %vm662_vm0, %v658_v57  ;;  %v685_v8 = vmul.f32 %v4690_v46, %v671_v44  ;;  %v706_v11 = vmul.f32 %v4698_v55, %v693_v43  ;;  %v735_v23 = vmul.f32 %v4702_v12, %v722_v53  ;;  %v672_v44 = vld [vmem:[%s4370_s16 + $0x10] sm:$0x1]  ;;  %v524_v53 = vld [vmem:[%s4370_s16 + $0x7b] sm:$0x1] }
  0x4d   : > { %v342_v16 = vadd.f32 %v334_v10, %v313_v56  ;;  %v572_v20 = vadd.f32 %v564_v22, %v543_v2  ;;  %v457_v13 = vadd.f32 %v449_v42, %v428_v60  ;;  %v536_v14 = vmul.f32 %v4436_v41, %v523_v39  ;;  %v4746_v10 = vld [vmem:[%s4375_s19 + $0x16] ss:$0 sm:$0xff]  ;;  %v723_v57 = vld [vmem:[%s4370_s16 + $0x12] sm:$0x1]  ;;  %v4761_v2 = vld [vmem:[%s4375_s19 + $0x17] ss:$0 sm:$0xff] }
  0x4e   : > { %v565_v15 = vmul.f32 %v4442_v45, %v552_v62  ;;  %v421_v29 = vmul.f32 %v4413_v24, %v408_v25  ;;  %v714_v22 = vadd.f32 %v706_v11, %v685_v8  ;;  %v764_v1 = vmul.f32 %v4713_v59, %v751_v40  ;;  %v553_v62 = vld [vmem:[%s4370_s16 + $0x7c] sm:$0x1]  ;;  %v4771_v8 = vld [vmem:[%s4375_s19 + $0x18] ss:$0 sm:$0xff] }
  0x4f   : > { %v371_v21 = vadd.f32 %v363_v0, %v342_v16  ;;  %v601_v4 = vadd.f32 %v593_v51, %v572_v20  ;;  %v486_v27 = vadd.f32 %v478_v17, %v457_v13  ;;  %v594_v28 = vmul.f32 %v4448_v50, %v581_v7  ;;  %v867_v0 = vld [vmem:[%s4370_s16 + $0x7] sm:$0x1]  ;;  %v611_v7 = vld [vmem:[%s4370_s16 + $0x7e] sm:$0x1]  ;;  %v896_v16 = vld [vmem:[%s4370_s16 + $0x8] sm:$0x1] }
  0x50   : > { %v4735_v34 = vmul.f32 %v4452_v52, %v610_v9  ;;  %v450_v33 = vmul.f32 %v4417_v26, %v437_v18  ;;  %v743_v5 = vadd.f32 %v735_v23, %v714_v22  ;;  %v793_v51 = vmul.f32 %v4727_v61, %v780_v19  ;;  %v694_v26 = vld [vmem:[%s4370_s16 + $0x11] sm:$0x1]  ;;  %v925_v19 = vld [vmem:[%s4370_s16 + $0x9] sm:$0x1]  ;;  %v954_v22 = vld [vmem:[%s4370_s16 + $0xa] sm:$0x1] }
  0x51   : > { %v400_v24 = vadd.f32 %v392_v48, %v371_v21  ;;  %v630_v43 = vadd.f32 %v622_v37, %v601_v4  ;;  %v515_v54 = vadd.f32 %v507_v3, %v486_v27  ;;  %v4750_v49 = vmul.f32 %v4459_v58, %v639_v63  ;;  %v582_v3 = vld [vmem:[%s4370_s16 + $0x7d] sm:$0x1]  ;;  %v781_v63 = vld [vmem:[%s4370_s16 + $0x14] sm:$0x1] }
  0x52   : > { %v479_v42 = vmul.f32 %v4422_v30, %v466_v31  ;;  %v508_v39 = vmul.f32 %v4426_v32, %v495_v6  ;;  %v772_v56 = vadd.f32 %v764_v1, %v743_v5  ;;  %v822_v37 = vmul.f32 %v4740_v36, %v809_v35  ;;  %v752_v32 = vld [vmem:[%s4370_s16 + $0x13] sm:$0x1]  ;;  %v4784_v31 = vld [vmem:[%s4375_s19 + $0x19] ss:$0 sm:$0xff]  ;;  %v4788_v1 = vld [vmem:[%s4375_s19 + $0x1a] ss:$0 sm:$0xff] }
  0x53   : > { %v429_v17 = vadd.f32 %v421_v29, %v400_v24  ;;  %v659_v30 = vadd.f32 %v4694_v47, %v630_v43  ;;  %v544_v60 = vadd.f32 %v536_v14, %v515_v54  ;;  %v851_v48 = vmul.f32 %v4746_v10, %v838_v38  ;;  %v640_v14 = vld [vmem:[%s4370_s16 + $0x7f] sm:$0x1]  ;;  %v810_v35 = vld [vmem:[%s4370_s16 + $0x15] sm:$0x1]  ;;  %v839_v38 = vld [vmem:[%s4370_s16 + $0x16] sm:$0x1] }
  0x54   : > { %v686_v25 = vmul.f32 %v4690_v46, %v672_v44  ;;  %v801_v9 = vadd.f32 %v793_v51, %v772_v56  ;;  %v707_v47 = vmul.f32 %v4698_v55, %v694_v26  ;;  %v736_v11 = vmul.f32 %v4702_v12, %v723_v57  ;;  %v695_v44 = vld [vmem:[%s4370_s16 + $0x21] sm:$0x1]  ;;  %v724_v26 = vld [vmem:[%s4370_s16 + $0x22] sm:$0x1]  ;;  %v753_v56 = vld [vmem:[%s4370_s16 + $0x23] sm:$0x1] }
  0x55   : > { %v458_v40 = vadd.f32 %v450_v33, %v429_v17  ;;  %668 = vst.msk [vmem:[%s4554_s23 + $0x28] sm:$0x1] %vm662_vm0, %v659_v30  ;;  %v573_v23 = vadd.f32 %v565_v15, %v544_v60  ;;  %v537_v20 = vmul.f32 %v4436_v41, %v524_v53  ;;  %v566_v13 = vmul.f32 %v4442_v45, %v553_v62  ;;  %v4805_v53 = vld [vmem:[%s4375_s19 + $0x1b] ss:$0 sm:$0xff]  ;;  %v4810_v62 = vld [vmem:[%s4375_s19 + $0x1c] ss:$0 sm:$0xff] }
  0x56   : > { %v880_v18 = vmul.f32 %v4761_v2, %v867_v0  ;;  %v830_v29 = vadd.f32 %v822_v37, %v801_v9  ;;  %v715_v15 = vadd.f32 %v707_v47, %v686_v25  ;;  %v765_v41 = vmul.f32 %v4713_v59, %v752_v32  ;;  %v1041_v0 = vld [vmem:[%s4370_s16 + $0xd] sm:$0x1]  ;;  %v4817_v30 = vld [vmem:[%s4375_s19 + $0x1d] ss:$0 sm:$0xff]  ;;  %v4825_v9 = vld [vmem:[%s4375_s19 + $0x1e] ss:$0 sm:$0xff] }
  0x57   : > { %v487_v21 = vadd.f32 %v479_v42, %v458_v40  ;;  %v602_v45 = vadd.f32 %v594_v28, %v573_v23  ;;  %v595_v4 = vmul.f32 %v4448_v50, %v582_v3  ;;  %v624_v27 = vmul.f32 %v4452_v52, %v611_v7  ;;  %v673_v28 = vld [vmem:[%s4370_s16 + $0x20] sm:$0x1]  ;;  %v983_v42 = vld [vmem:[%s4370_s16 + $0xb] sm:$0x1]  ;;  %v868_v3 = vld [vmem:[%s4370_s16 + $0x17] sm:$0x1] }
  0x58   : > { %v909_v6 = vmul.f32 %v4771_v8, %v896_v16  ;;  %v859_v33 = vadd.f32 %v851_v48, %v830_v29  ;;  %v744_v5 = vadd.f32 %v736_v11, %v715_v15  ;;  %v794_v51 = vmul.f32 %v4727_v61, %v781_v63  ;;  %v1070_v7 = vld [vmem:[%s4370_s16 + $0xe] sm:$0x1]  ;;  %v782_v47 = vld [vmem:[%s4370_s16 + $0x24] sm:$0x1]  ;;  %v926_v15 = vld [vmem:[%s4370_s16 + $0x19] sm:$0x1] }
  0x59   : > { %v516_v24 = vadd.f32 %v508_v39, %v487_v21  ;;  %v631_v50 = vadd.f32 %v4735_v34, %v602_v45  ;;  %v653_v52 = vmul.f32 %v4459_v58, %v640_v14  ;;  %v938_v43 = vmul.f32 %v4784_v31, %v925_v19  ;;  %v1012_v39 = vld [vmem:[%s4370_s16 + $0xc] sm:$0x1]  ;;  %v4837_v21 = vld [vmem:[%s4375_s19 + $0x1f] ss:$0 sm:$0xff] }
  0x5a   : > { %v967_v54 = vmul.f32 %v4788_v1, %v954_v22  ;;  %v888_v17 = vadd.f32 %v880_v18, %v859_v33  ;;  %v773_v34 = vadd.f32 %v765_v41, %v744_v5  ;;  %v823_v58 = vmul.f32 %v4740_v36, %v810_v35  ;;  %v811_v41 = vld [vmem:[%s4370_s16 + $0x25] sm:$0x1]  ;;  %v955_v35 = vld [vmem:[%s4370_s16 + $0x1a] sm:$0x1] }
  0x5b   : > { %v545_v57 = vadd.f32 %v537_v20, %v516_v24  ;;  %v660_v37 = vadd.f32 %v4750_v49, %v631_v50  ;;  %v852_v60 = vmul.f32 %v4746_v10, %v839_v38  ;;  %v687_v48 = vmul.f32 %v4690_v46, %v673_v28  ;;  %v1099_v20 = vld [vmem:[%s4370_s16 + $0xf] sm:$0x1]  ;;  %v840_v28 = vld [vmem:[%s4370_s16 + $0x26] sm:$0x1]  ;;  %v696_v50 = vld [vmem:[%s4370_s16 + $0x31] sm:$0x1] }
  0x5c   : > { %v708_v25 = vmul.f32 %v4698_v55, %v695_v44  ;;  %v917_v40 = vadd.f32 %v909_v6, %v888_v17  ;;  %v802_v49 = vadd.f32 %v794_v51, %v773_v34  ;;  %v737_v16 = vmul.f32 %v4702_v12, %v724_v26  ;;  %v674_v44 = vld [vmem:[%s4370_s16 + $0x30] sm:$0x1]  ;;  %v984_v26 = vld [vmem:[%s4370_s16 + $0x1b] sm:$0x1] }
  0x5d   : > { %v574_v32 = vadd.f32 %v566_v13, %v545_v57  ;;  %669 = vst.msk [vmem:[%s4554_s23 + $0x30] sm:$0x1] %vm662_vm0, %v660_v37  ;;  %v996_v11 = vmul.f32 %v4805_v53, %v983_v42  ;;  %v1025_v23 = vmul.f32 %v4810_v62, %v1012_v39  ;;  %v897_v13 = vld [vmem:[%s4370_s16 + $0x18] sm:$0x1]  ;;  %v766_v18 = vmul.f32 %v4713_v59, %v753_v56  ;;  %v869_v56 = vld [vmem:[%s4370_s16 + $0x27] sm:$0x1] }
  0x5e   : > { %v716_v14 = vadd.f32 %v708_v25, %v687_v48  ;;  %v946_v63 = vadd.f32 %v938_v43, %v917_v40  ;;  %v831_v29 = vadd.f32 %v823_v58, %v802_v49  ;;  %v881_v22 = vmul.f32 %v4761_v2, %v868_v3  ;;  %v754_v37 = vld [vmem:[%s4370_s16 + $0x33] sm:$0x1]  ;;  %v898_v49 = vld [vmem:[%s4370_s16 + $0x28] sm:$0x1] }
  0x5f   : > { %v603_v19 = vadd.f32 %v595_v4, %v574_v32  ;;  %v1054_v45 = vmul.f32 %v4817_v30, %v1041_v0  ;;  %v1083_v6 = vmul.f32 %v4825_v9, %v1070_v7  ;;  %v795_v4 = vmul.f32 %v4727_v61, %v782_v47  ;;  %v1013_v0 = vld [vmem:[%s4370_s16 + $0x1c] sm:$0x1]  ;;  %v783_v47 = vld [vmem:[%s4370_s16 + $0x34] sm:$0x1] }
  0x60   : > { %v745_v24 = vadd.f32 %v737_v16, %v716_v14  ;;  %v975_v5 = vadd.f32 %v967_v54, %v946_v63  ;;  %v860_v51 = vadd.f32 %v852_v60, %v831_v29  ;;  %v910_v38 = vmul.f32 %v4771_v8, %v897_v13  ;;  %v725_v54 = vld [vmem:[%s4370_s16 + $0x32] sm:$0x1]  ;;  %v1042_v60 = vld [vmem:[%s4370_s16 + $0x1d] sm:$0x1] }
  0x61   : > { %v632_v33 = vadd.f32 %v624_v27, %v603_v19  ;;  %v1112_v43 = vmul.f32 %v4837_v21, %v1099_v20  ;;  %v939_v42 = vmul.f32 %v4784_v31, %v926_v15  ;;  %v824_v27 = vmul.f32 %v4740_v36, %v811_v41  ;;  %v1100_v20 = vld [vmem:[%s4370_s16 + $0x1f] sm:$0x1]  ;;  %v927_v15 = vld [vmem:[%s4370_s16 + $0x29] sm:$0x1]  ;;  %v812_v41 = vld [vmem:[%s4370_s16 + $0x35] sm:$0x1] }
  0x62   : > { %v774_v57 = vadd.f32 %v766_v18, %v745_v24  ;;  %v1004_v39 = vadd.f32 %v996_v11, %v975_v5  ;;  %v889_v34 = vadd.f32 %v881_v22, %v860_v51  ;;  %v968_v58 = vmul.f32 %v4788_v1, %v955_v35  ;;  %v1071_v11 = vld [vmem:[%s4370_s16 + $0x1e] sm:$0x1] }
  0x63   : > { %v661_v17 = vadd.f32 %v653_v52, %v632_v33  ;;  %v853_v48 = vmul.f32 %v4746_v10, %v840_v28  ;;  %v688_v25 = vmul.f32 %v4690_v46, %v674_v44  ;;  %v709_v32 = vmul.f32 %v4698_v55, %v696_v50  ;;  %v675_v50 = vld [vmem:[%s4370_s16 + $0x40] sm:$0x1] }
  0x64   : > { %v803_v3 = vadd.f32 %v795_v4, %v774_v57  ;;  %v1033_v52 = vadd.f32 %v1025_v23, %v1004_v39  ;;  %v918_v40 = vadd.f32 %v910_v38, %v889_v34  ;;  %v997_v7 = vmul.f32 %v4805_v53, %v984_v26  ;;  %v956_v4 = vld [vmem:[%s4370_s16 + $0x2a] sm:$0x1]  ;;  %v726_v39 = vld [vmem:[%s4370_s16 + $0x42] sm:$0x1] }
  0x65   : > { %670 = vst.msk [vmem:[%s4554_s23 + $0x38] sm:$0x1] %vm662_vm0, %v661_v17  ;;  %v738_v16 = vmul.f32 %v4702_v12, %v725_v54  ;;  %v882_v14 = vmul.f32 %v4761_v2, %v869_v56  ;;  %v717_v18 = vadd.f32 %v709_v32, %v688_v25  ;;  %v767_v19 = vmul.f32 %v4713_v59, %v754_v37  ;;  %v899_v32 = vld [vmem:[%s4370_s16 + $0x38] sm:$0x1] }
  0x66   : > { %v832_v13 = vadd.f32 %v824_v27, %v803_v3  ;;  %v1062_v23 = vadd.f32 %v1054_v45, %v1033_v52  ;;  %v947_v63 = vadd.f32 %v939_v42, %v918_v40  ;;  %v1026_v29 = vmul.f32 %v4810_v62, %v1013_v0  ;;  %v841_v45 = vld [vmem:[%s4370_s16 + $0x36] sm:$0x1]  ;;  %v697_v42 = vld [vmem:[%s4370_s16 + $0x41] sm:$0x1]  ;;  %v985_v27 = vld [vmem:[%s4370_s16 + $0x2b] sm:$0x1] }
  0x67   : > { %v1055_v22 = vmul.f32 %v4817_v30, %v1042_v60  ;;  %v911_v24 = vmul.f32 %v4771_v8, %v898_v49  ;;  %v746_v33 = vadd.f32 %v738_v16, %v717_v18  ;;  %v796_v5 = vmul.f32 %v4727_v61, %v783_v47  ;;  %v755_v0 = vld [vmem:[%s4370_s16 + $0x43] sm:$0x1]  ;;  %v1014_v3 = vld [vmem:[%s4370_s16 + $0x2c] sm:$0x1]  ;;  %v784_v47 = vld [vmem:[%s4370_s16 + $0x44] sm:$0x1] }
  0x68   : > { %v861_v35 = vadd.f32 %v853_v48, %v832_v13  ;;  %v1091_v51 = vadd.f32 %v1083_v6, %v1062_v23  ;;  %v976_v38 = vadd.f32 %v968_v58, %v947_v63  ;;  %v1084_v28 = vmul.f32 %v4825_v9, %v1071_v11  ;;  %v870_v6 = vld [vmem:[%s4370_s16 + $0x37] sm:$0x1]  ;;  %v1043_v48 = vld [vmem:[%s4370_s16 + $0x2d] sm:$0x1]  ;;  %v1101_v13 = vld [vmem:[%s4370_s16 + $0x2f] sm:$0x1] }
  0x69   : > { %v1113_v44 = vmul.f32 %v4837_v21, %v1100_v20  ;;  %v940_v57 = vmul.f32 %v4784_v31, %v927_v15  ;;  %v775_v54 = vadd.f32 %v767_v19, %v746_v33  ;;  %v825_v17 = vmul.f32 %v4740_v36, %v812_v41  ;;  %v1072_v20 = vld [vmem:[%s4370_s16 + $0x2e] sm:$0x1]  ;;  %v928_v18 = vld [vmem:[%s4370_s16 + $0x39] sm:$0x1]  ;;  %v957_v33 = vld [vmem:[%s4370_s16 + $0x3a] sm:$0x1] }
  0x6a   : > { %v890_v26 = vadd.f32 %v882_v14, %v861_v35  ;;  %v1120_v34 = vadd.f32 %v1112_v43, %v1091_v51  ;;  %v1005_v58 = vadd.f32 %v997_v7, %v976_v38  ;;  %v969_v56 = vmul.f32 %v4788_v1, %v956_v4  ;;  %v813_v35 = vld [vmem:[%s4370_s16 + $0x45] sm:$0x1]  ;;  %v842_v51 = vld [vmem:[%s4370_s16 + $0x46] sm:$0x1] }
  0x6b   : > { %v854_v37 = vmul.f32 %v4746_v10, %v841_v45  ;;  %v804_v25 = vadd.f32 %v796_v5, %v775_v54  ;;  %v689_v52 = vmul.f32 %v4690_v46, %v675_v50  ;;  %v710_v40 = vmul.f32 %v4698_v55, %v697_v42 }
  0x6c   : > { %v919_v60 = vadd.f32 %v911_v24, %v890_v26  ;;  %1128 = vst.msk [vmem:[%s4554_s23 + $0x1] sm:$0x1] %vm662_vm0, %v1120_v34  ;;  %v1034_v43 = vadd.f32 %v1026_v29, %v1005_v58  ;;  %v998_v7 = vmul.f32 %v4805_v53, %v985_v27  ;;  %v883_v49 = vmul.f32 %v4761_v2, %v870_v6  ;;  %v698_v27 = vld [vmem:[%s4370_s16 + $0x51] sm:$0x1]  ;;  %v871_v34 = vld [vmem:[%s4370_s16 + $0x47] sm:$0x1] }
  0x6d   : > { %v739_v16 = vmul.f32 %v4702_v12, %v726_v39  ;;  %v833_v14 = vadd.f32 %v825_v17, %v804_v25  ;;  %v718_v19 = vadd.f32 %v710_v40, %v689_v52  ;;  %v768_v23 = vmul.f32 %v4713_v59, %v755_v0  ;;  %v727_v58 = vld [vmem:[%s4370_s16 + $0x52] sm:$0x1]  ;;  %v1015_v0 = vld [vmem:[%s4370_s16 + $0x3c] sm:$0x1]  ;;  %v900_v40 = vld [vmem:[%s4370_s16 + $0x48] sm:$0x1] }
  0x6e   : > { %v948_v11 = vadd.f32 %v940_v57, %v919_v60  ;;  %v1063_v63 = vadd.f32 %v1055_v22, %v1034_v43  ;;  %v1027_v29 = vmul.f32 %v4810_v62, %v1014_v3  ;;  %v1056_v15 = vmul.f32 %v4817_v30, %v1043_v48  ;;  %v676_v22 = vld [vmem:[%s4370_s16 + $0x50] sm:$0x1]  ;;  %v986_v57 = vld [vmem:[%s4370_s16 + $0x3b] sm:$0x1] }
  0x6f   : > { %v912_v41 = vmul.f32 %v4771_v8, %v899_v32  ;;  %v862_v4 = vadd.f32 %v854_v37, %v833_v14  ;;  %v747_v5 = vadd.f32 %v739_v16, %v718_v19  ;;  %v797_v45 = vmul.f32 %v4727_v61, %v784_v47  ;;  %v1044_v32 = vld [vmem:[%s4370_s16 + $0x3d] sm:$0x1]  ;;  %v1102_v14 = vld [vmem:[%s4370_s16 + $0x3f] sm:$0x1]  ;;  %v929_v19 = vld [vmem:[%s4370_s16 + $0x49] sm:$0x1] }
  0x70   : > { %v977_v24 = vadd.f32 %v969_v56, %v948_v11  ;;  %v1092_v38 = vadd.f32 %v1084_v28, %v1063_v63  ;;  %v1085_v50 = vmul.f32 %v4825_v9, %v1072_v20  ;;  %v1114_v42 = vmul.f32 %v4837_v21, %v1101_v13  ;;  %v756_v28 = vld [vmem:[%s4370_s16 + $0x53] sm:$0x1]  ;;  %v814_v63 = vld [vmem:[%s4370_s16 + $0x55] sm:$0x1] }
  0x71   : > { %v941_v26 = vmul.f32 %v4784_v31, %v928_v18  ;;  %v891_v17 = vadd.f32 %v883_v49, %v862_v4  ;;  %v776_v6 = vadd.f32 %v768_v23, %v747_v5  ;;  %v826_v39 = vmul.f32 %v4740_v36, %v813_v35  ;;  %v1073_v49 = vld [vmem:[%s4370_s16 + $0x3e] sm:$0x1] }
  0x72   : > { %v1006_v54 = vadd.f32 %v998_v7, %v977_v24  ;;  %v1121_v56 = vadd.f32 %v1113_v44, %v1092_v38  ;;  %v970_v37 = vmul.f32 %v4788_v1, %v957_v33  ;;  %v855_v60 = vmul.f32 %v4746_v10, %v842_v51  ;;  %v785_v7 = vld [vmem:[%s4370_s16 + $0x54] sm:$0x1]  ;;  %v958_v24 = vld [vmem:[%s4370_s16 + $0x4a] sm:$0x1]  ;;  %v843_v51 = vld [vmem:[%s4370_s16 + $0x56] sm:$0x1] }
  0x73   : > { %v690_v3 = vmul.f32 %v4690_v46, %v676_v22  ;;  %v920_v25 = vadd.f32 %v912_v41, %v891_v17  ;;  %v805_v52 = vadd.f32 %v797_v45, %v776_v6  ;;  %v711_v43 = vmul.f32 %v4698_v55, %v698_v27  ;;  %v677_v22 = vld [vmem:[%s4370_s16 + $0x60] sm:$0x1]  ;;  %v699_v38 = vld [vmem:[%s4370_s16 + $0x61] sm:$0x1]  ;;  %v728_v17 = vld [vmem:[%s4370_s16 + $0x62] sm:$0x1] }
  0x74   : > { %v1035_v48 = vadd.f32 %v1027_v29, %v1006_v54  ;;  %1129 = vst.msk [vmem:[%s4554_s23 + $0x9] sm:$0x1] %vm662_vm0, %v1121_v56  ;;  %v999_v44 = vmul.f32 %v4805_v53, %v986_v57  ;;  %v884_v16 = vmul.f32 %v4761_v2, %v871_v34  ;;  %v740_v47 = vmul.f32 %v4702_v12, %v727_v58  ;;  %v987_v34 = vld [vmem:[%s4370_s16 + $0x4b] sm:$0x1]  ;;  %v1016_v58 = vld [vmem:[%s4370_s16 + $0x4c] sm:$0x1] }
  0x75   : > { %v769_v11 = vmul.f32 %v4713_v59, %v756_v28  ;;  %v949_v13 = vadd.f32 %v941_v26, %v920_v25  ;;  %v834_v18 = vadd.f32 %v826_v39, %v805_v52  ;;  %v719_v23 = vadd.f32 %v711_v43, %v690_v3  ;;  %v757_v56 = vld [vmem:[%s4370_s16 + $0x63] sm:$0x1]  ;;  %v1074_v52 = vld [vmem:[%s4370_s16 + $0x4e] sm:$0x1] }
  0x76   : > { %v1064_v20 = vadd.f32 %v1056_v15, %v1035_v48  ;;  %v1028_v29 = vmul.f32 %v4810_v62, %v1015_v0  ;;  %v1057_v41 = vmul.f32 %v4817_v30, %v1044_v32  ;;  %v913_v35 = vmul.f32 %v4771_v8, %v900_v40  ;;  %v1045_v32 = vld [vmem:[%s4370_s16 + $0x4d] sm:$0x1] }
  0x77   : > { %v798_v4 = vmul.f32 %v4727_v61, %v785_v7  ;;  %v978_v33 = vadd.f32 %v970_v37, %v949_v13  ;;  %v863_v5 = vadd.f32 %v855_v60, %v834_v18  ;;  %v748_v45 = vadd.f32 %v740_v47, %v719_v23  ;;  %v872_v60 = vld [vmem:[%s4370_s16 + $0x57] sm:$0x1]  ;;  %v786_v7 = vld [vmem:[%s4370_s16 + $0x64] sm:$0x1]  ;;  %v930_v23 = vld [vmem:[%s4370_s16 + $0x59] sm:$0x1] }
  0x78   : > { %v1093_v15 = vadd.f32 %v1085_v50, %v1064_v20  ;;  %v1086_v26 = vmul.f32 %v4825_v9, %v1073_v49  ;;  %v1115_v57 = vmul.f32 %v4837_v21, %v1102_v14  ;;  %v942_v27 = vmul.f32 %v4784_v31, %v929_v19  ;;  %v1103_v14 = vld [vmem:[%s4370_s16 + $0x4f] sm:$0x1] }
  0x79   : > { %v827_v54 = vmul.f32 %v4740_v36, %v814_v63  ;;  %v1007_v6 = vadd.f32 %v999_v44, %v978_v33  ;;  %v892_v39 = vadd.f32 %v884_v16, %v863_v5  ;;  %v777_v28 = vadd.f32 %v769_v11, %v748_v45  ;;  %v901_v16 = vld [vmem:[%s4370_s16 + $0x58] sm:$0x1]  ;;  %v815_v63 = vld [vmem:[%s4370_s16 + $0x65] sm:$0x1] }
  0x7a   : > { %v1122_v50 = vadd.f32 %v1114_v42, %v1093_v15  ;;  %v971_v37 = vmul.f32 %v4788_v1, %v958_v24  ;;  %v856_v0 = vmul.f32 %v4746_v10, %v843_v51  ;;  %v691_v3 = vmul.f32 %v4690_v46, %v677_v22  ;;  %v959_v24 = vld [vmem:[%s4370_s16 + $0x5a] sm:$0x1]  ;;  %v844_v51 = vld [vmem:[%s4370_s16 + $0x66] sm:$0x1]  ;;  %v678_v22 = vld [vmem:[%s4370_s16 + $0x70] sm:$0x1] }
  0x7b   : > { %v712_v48 = vmul.f32 %v4698_v55, %v699_v38  ;;  %v1036_v42 = vadd.f32 %v1028_v29, %v1007_v6  ;;  %v921_v25 = vadd.f32 %v913_v35, %v892_v39  ;;  %v806_v40 = vadd.f32 %v798_v4, %v777_v28  ;;  %v700_v38 = vld [vmem:[%s4370_s16 + $0x71] sm:$0x1]  ;;  %v729_v6 = vld [vmem:[%s4370_s16 + $0x72] sm:$0x1] }
  0x7c   : > { %1130 = vst.msk [vmem:[%s4554_s23 + $0x11] sm:$0x1] %vm662_vm0, %v1122_v50  ;;  %v741_v43 = vmul.f32 %v4702_v12, %v728_v17  ;;  %v1000_v44 = vmul.f32 %v4805_v53, %v987_v34  ;;  %v1029_v49 = vmul.f32 %v4810_v62, %v1016_v58  ;;  %v770_v11 = vmul.f32 %v4713_v59, %v757_v56  ;;  %v988_v17 = vld [vmem:[%s4370_s16 + $0x5b] sm:$0x1]  ;;  %v873_v56 = vld [vmem:[%s4370_s16 + $0x67] sm:$0x1] }
  0x7d   : > { %v720_v47 = vadd.f32 %v712_v48, %v691_v3  ;;  %v1065_v20 = vadd.f32 %v1057_v41, %v1036_v42  ;;  %v950_v13 = vadd.f32 %v942_v27, %v921_v25  ;;  %v835_v18 = vadd.f32 %v827_v54, %v806_v40  ;;  %v902_v40 = vld [vmem:[%s4370_s16 + $0x68] sm:$0x1] }
  0x7e   : > { %v885_v19 = vmul.f32 %v4761_v2, %v872_v60  ;;  %v1058_v29 = vmul.f32 %v4817_v30, %v1045_v32  ;;  %v1087_v35 = vmul.f32 %v4825_v9, %v1074_v52  ;;  %v799_v41 = vmul.f32 %v4727_v61, %v786_v7  ;;  %v1046_v60 = vld [vmem:[%s4370_s16 + $0x5d] sm:$0x1]  ;;  %v787_v7 = vld [vmem:[%s4370_s16 + $0x74] sm:$0x1] }
  0x7f   : > { %v749_v4 = vadd.f32 %v741_v43, %v720_v47  ;;  %v1094_v15 = vadd.f32 %v1086_v26, %v1065_v20  ;;  %v979_v33 = vadd.f32 %v971_v37, %v950_v13  ;;  %v864_v5 = vadd.f32 %v856_v0, %v835_v18  ;;  %v758_v37 = vld [vmem:[%s4370_s16 + $0x73] sm:$0x1]  ;;  %v1017_v0 = vld [vmem:[%s4370_s16 + $0x5c] sm:$0x1]  ;;  %v960_v18 = vld [vmem:[%s4370_s16 + $0x6a] sm:$0x1] }
  0x80   : > { %v914_v45 = vmul.f32 %v4771_v8, %v901_v16  ;;  %v1116_v27 = vmul.f32 %v4837_v21, %v1103_v14  ;;  %v943_v54 = vmul.f32 %v4784_v31, %v930_v23  ;;  %v828_v26 = vmul.f32 %v4740_v36, %v815_v63  ;;  %v1104_v16 = vld [vmem:[%s4370_s16 + $0x5f] sm:$0x1] }
  0x81   : > { %v778_v50 = vadd.f32 %v770_v11, %v749_v4  ;;  %v1123_v39 = vadd.f32 %v1115_v57, %v1094_v15  ;;  %v1008_v34 = vadd.f32 %v1000_v44, %v979_v33  ;;  %v893_v58 = vadd.f32 %v885_v19, %v864_v5  ;;  %v1075_v44 = vld [vmem:[%s4370_s16 + $0x5e] sm:$0x1]  ;;  %v816_v19 = vld [vmem:[%s4370_s16 + $0x75] sm:$0x1] }
  0x82   : > { %v972_v28 = vmul.f32 %v4788_v1, %v959_v24  ;;  %v857_v48 = vmul.f32 %v4746_v10, %v844_v51  ;;  %v692_v42 = vmul.f32 %v4690_v46, %v678_v22  ;;  %v713_v25 = vmul.f32 %v4698_v55, %v700_v38  ;;  %v989_v24 = vld [vmem:[%s4370_s16 + $0x6b] sm:$0x1]  ;;  %v5024_v51 = vld [vmem:[%s4375_s19 + $0x20] ss:$0 sm:$0xff]  ;;  %v1158_v22 = vld [vmem:[%s4370_s16 + $0x1] sm:$0x1] }
  0x83   : > { %v807_v3 = vadd.f32 %v799_v41, %v778_v50  ;;  %1131 = vst.msk [vmem:[%s4554_s23 + $0x19] sm:$0x1] %vm662_vm0, %v1123_v39  ;;  %v1037_v57 = vadd.f32 %v1029_v49, %v1008_v34  ;;  %v922_v32 = vadd.f32 %v914_v45, %v893_v58  ;;  %v1001_v52 = vmul.f32 %v4805_v53, %v988_v17  ;;  %v1136_v41 = vld [vmem:[%s4370_s16] sm:$0x1]  ;;  %v5028_v38 = vld [vmem:[%s4375_s19 + $0x21] ss:$0 sm:$0xff] }
  0x84   : > { %v742_v43 = vmul.f32 %v4702_v12, %v729_v6  ;;  %v886_v46 = vmul.f32 %v4761_v2, %v873_v56  ;;  %v721_v55 = vadd.f32 %v713_v25, %v692_v42  ;;  %v771_v49 = vmul.f32 %v4713_v59, %v758_v37  ;;  %v931_v12 = vld [vmem:[%s4370_s16 + $0x69] sm:$0x1]  ;;  %v874_v50 = vld [vmem:[%s4370_s16 + $0x77] sm:$0x1]  ;;  %v5035_v6 = vld [vmem:[%s4375_s19 + $0x22] ss:$0 sm:$0xff] }
  0x85   : > { %v836_v47 = vadd.f32 %v828_v26, %v807_v3  ;;  %v1066_v11 = vadd.f32 %v1058_v29, %v1037_v57  ;;  %v951_v20 = vadd.f32 %v943_v54, %v922_v32  ;;  %v1030_v13 = vmul.f32 %v4810_v62, %v1017_v0  ;;  %v845_v29 = vld [vmem:[%s4370_s16 + $0x76] sm:$0x1]  ;;  %v1187_v26 = vld [vmem:[%s4370_s16 + $0x2] sm:$0x1]  ;;  %v1216_v56 = vld [vmem:[%s4370_s16 + $0x3] sm:$0x1] }
  0x86   : > { %v1059_v14 = vmul.f32 %v4817_v30, %v1046_v60  ;;  %v915_v63 = vmul.f32 %v4771_v8, %v902_v40  ;;  %v750_v4 = vadd.f32 %v742_v43, %v721_v55  ;;  %v800_v59 = vmul.f32 %v4727_v61, %v787_v7  ;;  %v5041_v37 = vld [vmem:[%s4375_s19 + $0x23] ss:$0 sm:$0xff]  ;;  %v1047_v60 = vld [vmem:[%s4370_s16 + $0x6d] sm:$0x1]  ;;  %v5055_v40 = vld [vmem:[%s4375_s19 + $0x24] ss:$0 sm:$0xff] }
  0x87   : > { %v865_v23 = vadd.f32 %v857_v48, %v836_v47  ;;  %v1095_v15 = vadd.f32 %v1087_v35, %v1066_v11  ;;  %v980_v33 = vadd.f32 %v972_v28, %v951_v20  ;;  %v1088_v5 = vmul.f32 %v4825_v9, %v1075_v44  ;;  %v903_v48 = vld [vmem:[%s4370_s16 + $0x78] sm:$0x1]  ;;  %v1076_v7 = vld [vmem:[%s4370_s16 + $0x6e] sm:$0x1]  ;;  %v1105_v44 = vld [vmem:[%s4370_s16 + $0x6f] sm:$0x1] }
  0x88   : > { %v5021_v45 = vmul.f32 %v4837_v21, %v1104_v16  ;;  %v944_v54 = vmul.f32 %v4784_v31, %v931_v12  ;;  %v779_v35 = vadd.f32 %v771_v49, %v750_v4  ;;  %v829_v17 = vmul.f32 %v4740_v36, %v816_v19  ;;  %v1018_v36 = vld [vmem:[%s4370_s16 + $0x6c] sm:$0x1]  ;;  %v932_v47 = vld [vmem:[%s4370_s16 + $0x79] sm:$0x1]  ;;  %v1274_v12 = vld [vmem:[%s4370_s16 + $0x5] sm:$0x1] }
  0x89   : > { %v894_v61 = vadd.f32 %v886_v46, %v865_v23  ;;  %v1124_v39 = vadd.f32 %v1116_v27, %v1095_v15  ;;  %v1009_v34 = vadd.f32 %v1001_v52, %v980_v33  ;;  %v973_v58 = vmul.f32 %v4788_v1, %v960_v18  ;;  %v1245_v52 = vld [vmem:[%s4370_s16 + $0x4] sm:$0x1]  ;;  %v5067_v18 = vld [vmem:[%s4375_s19 + $0x25] ss:$0 sm:$0xff]  ;;  %v5072_v4 = vld [vmem:[%s4375_s19 + $0x26] ss:$0 sm:$0xff] }
  0x8a   : > { %v858_v28 = vmul.f32 %v4746_v10, %v845_v29  ;;  %v808_v3 = vadd.f32 %v800_v59, %v779_v35  ;;  %v1150_v27 = vmul.f32 %v5024_v51, %v1136_v41  ;;  %v1171_v42 = vmul.f32 %v5028_v38, %v1158_v22  ;;  %v1137_v59 = vld [vmem:[%s4370_s16 + $0x10] sm:$0x1]  ;;  %v990_v33 = vld [vmem:[%s4370_s16 + $0x7b] sm:$0x1]  ;;  %v1332_v22 = vld [vmem:[%s4370_s16 + $0x7] sm:$0x1] }
  0x8b   : > { %v923_v0 = vadd.f32 %v915_v63, %v894_v61  ;;  %1132 = vst.msk [vmem:[%s4554_s23 + $0x21] sm:$0x1] %vm662_vm0, %v1124_v39  ;;  %v1038_v25 = vadd.f32 %v1030_v13, %v1009_v34  ;;  %v1002_v10 = vmul.f32 %v4805_v53, %v989_v24  ;;  %v887_v57 = vmul.f32 %v4761_v2, %v874_v50  ;;  %v961_v13 = vld [vmem:[%s4370_s16 + $0x7a] sm:$0x1]  ;;  %v1159_v61 = vld [vmem:[%s4370_s16 + $0x11] sm:$0x1] }
  0x8c   : > { %v1200_v32 = vmul.f32 %v5035_v6, %v1187_v26  ;;  %v837_v16 = vadd.f32 %v829_v17, %v808_v3  ;;  %v1179_v46 = vadd.f32 %v1171_v42, %v1150_v27  ;;  %v1229_v55 = vmul.f32 %v5041_v37, %v1216_v56  ;;  %v1188_v26 = vld [vmem:[%s4370_s16 + $0x12] sm:$0x1]  ;;  %v1217_v39 = vld [vmem:[%s4370_s16 + $0x13] sm:$0x1]  ;;  %v5095_v27 = vld [vmem:[%s4375_s19 + $0x28] ss:$0 sm:$0xff] }
  0x8d   : > { %v952_v43 = vadd.f32 %v944_v54, %v923_v0  ;;  %v1067_v49 = vadd.f32 %v1059_v14, %v1038_v25  ;;  %v1031_v2 = vmul.f32 %v4810_v62, %v1018_v36  ;;  %v1060_v11 = vmul.f32 %v4817_v30, %v1047_v60  ;;  %v1303_v14 = vld [vmem:[%s4370_s16 + $0x6] sm:$0x1]  ;;  %v1246_v42 = vld [vmem:[%s4370_s16 + $0x14] sm:$0x1]  ;;  %v1077_v25 = vld [vmem:[%s4370_s16 + $0x7e] sm:$0x1] }
  0x8e   : > { %v916_v20 = vmul.f32 %v4771_v8, %v903_v48  ;;  %v866_v23 = vadd.f32 %v858_v28, %v837_v16  ;;  %v1208_v63 = vadd.f32 %v1200_v32, %v1179_v46  ;;  %v1258_v24 = vmul.f32 %v5055_v40, %v1245_v52  ;;  %v1048_v28 = vld [vmem:[%s4370_s16 + $0x7d] sm:$0x1]  ;;  %v1361_v48 = vld [vmem:[%s4370_s16 + $0x8] sm:$0x1]  ;;  %v1390_v16 = vld [vmem:[%s4370_s16 + $0x9] sm:$0x1] }
  0x8f   : > { %v981_v19 = vadd.f32 %v973_v58, %v952_v43  ;;  %v1096_v29 = vadd.f32 %v1088_v5, %v1067_v49  ;;  %v1089_v8 = vmul.f32 %v4825_v9, %v1076_v7  ;;  %v1118_v41 = vmul.f32 %v4837_v21, %v1105_v44  ;;  %v5083_v5 = vld [vmem:[%s4375_s19 + $0x27] ss:$0 sm:$0xff]  ;;  %v1019_v58 = vld [vmem:[%s4370_s16 + $0x7c] sm:$0x1]  ;;  %v1275_v46 = vld [vmem:[%s4370_s16 + $0x15] sm:$0x1] }
  0x90   : > { %v945_v15 = vmul.f32 %v4784_v31, %v932_v47  ;;  %v895_v35 = vadd.f32 %v887_v57, %v866_v23  ;;  %v1237_v17 = vadd.f32 %v1229_v55, %v1208_v63  ;;  %v1287_v50 = vmul.f32 %v5067_v18, %v1274_v12  ;;  %v5109_v47 = vld [vmem:[%s4375_s19 + $0x29] ss:$0 sm:$0xff] }
  0x91   : > { %v1010_v54 = vadd.f32 %v1002_v10, %v981_v19  ;;  %v1125_v34 = vadd.f32 %v5021_v45, %v1096_v29  ;;  %v974_v31 = vmul.f32 %v4788_v1, %v961_v13  ;;  %v1316_v56 = vmul.f32 %v5072_v4, %v1303_v14  ;;  %v1106_v10 = vld [vmem:[%s4370_s16 + $0x7f] sm:$0x1]  ;;  %v1160_v14 = vld [vmem:[%s4370_s16 + $0x21] sm:$0x1] }
  0x92   : > { %v1151_v0 = vmul.f32 %v5024_v51, %v1137_v59  ;;  %v924_v60 = vadd.f32 %v916_v20, %v895_v35  ;;  %v1266_v3 = vadd.f32 %v1258_v24, %v1237_v17  ;;  %v1172_v45 = vmul.f32 %v5028_v38, %v1159_v61  ;;  %v1419_v20 = vld [vmem:[%s4370_s16 + $0xa] sm:$0x1]  ;;  %v1304_v24 = vld [vmem:[%s4370_s16 + $0x16] sm:$0x1]  ;;  %v1477_v17 = vld [vmem:[%s4370_s16 + $0xc] sm:$0x1] }
  0x93   : > { %v1039_v36 = vadd.f32 %v1031_v2, %v1010_v54  ;;  %1133 = vst.msk [vmem:[%s4554_s23 + $0x29] sm:$0x1] %vm662_vm0, %v1125_v34  ;;  %v1003_v1 = vmul.f32 %v4805_v53, %v990_v33  ;;  %v1345_v57 = vmul.f32 %v5083_v5, %v1332_v22  ;;  %v1201_v32 = vmul.f32 %v5035_v6, %v1188_v26  ;;  %v1189_v22 = vld [vmem:[%s4370_s16 + $0x22] sm:$0x1]  ;;  %v5140_v34 = vld [vmem:[%s4375_s19 + $0x2d] ss:$0 sm:$0xff] }
  0x94   : > { %v1230_v52 = vmul.f32 %v5041_v37, %v1217_v39  ;;  %v953_v7 = vadd.f32 %v945_v15, %v924_v60  ;;  %v1295_v44 = vadd.f32 %v1287_v50, %v1266_v3  ;;  %v1180_v53 = vadd.f32 %v1172_v45, %v1151_v0  ;;  %v1448_v15 = vld [vmem:[%s4370_s16 + $0xb] sm:$0x1]  ;;  %v1506_v39 = vld [vmem:[%s4370_s16 + $0xd] sm:$0x1]  ;;  %v5150_v60 = vld [vmem:[%s4375_s19 + $0x2e] ss:$0 sm:$0xff] }
  0x95   : > { %v1068_v43 = vadd.f32 %v1060_v11, %v1039_v36  ;;  %v1032_v55 = vmul.f32 %v4810_v62, %v1019_v58  ;;  %v1061_v49 = vmul.f32 %v4817_v30, %v1048_v28  ;;  %v1374_v2 = vmul.f32 %v5095_v27, %v1361_v48  ;;  %v5117_v11 = vld [vmem:[%s4375_s19 + $0x2a] ss:$0 sm:$0xff]  ;;  %v1138_v62 = vld [vmem:[%s4370_s16 + $0x20] sm:$0x1]  ;;  %v1535_v36 = vld [vmem:[%s4370_s16 + $0xe] sm:$0x1] }
  0x96   : > { %v1259_v13 = vmul.f32 %v5055_v40, %v1246_v42  ;;  %v982_v19 = vadd.f32 %v974_v31, %v953_v7  ;;  %v1324_v23 = vadd.f32 %v1316_v56, %v1295_v44  ;;  %v1209_v63 = vadd.f32 %v1201_v32, %v1180_v53  ;;  %v1247_v45 = vld [vmem:[%s4370_s16 + $0x24] sm:$0x1]  ;;  %v5160_v7 = vld [vmem:[%s4375_s19 + $0x2f] ss:$0 sm:$0xff]  ;;  %v1391_v53 = vld [vmem:[%s4370_s16 + $0x19] sm:$0x1] }
  0x97   : > { %v1097_v12 = vadd.f32 %v1089_v8, %v1068_v43  ;;  %v1090_v30 = vmul.f32 %v4825_v9, %v1077_v25  ;;  %v1119_v59 = vmul.f32 %v4837_v21, %v1106_v10  ;;  %v1403_v29 = vmul.f32 %v5109_v47, %v1390_v16  ;;  %v5128_v8 = vld [vmem:[%s4375_s19 + $0x2b] ss:$0 sm:$0xff]  ;;  %v5134_v9 = vld [vmem:[%s4375_s19 + $0x2c] ss:$0 sm:$0xff]  ;;  %v1218_v21 = vld [vmem:[%s4370_s16 + $0x23] sm:$0x1] }
  0x98   : > { %v1288_v33 = vmul.f32 %v5067_v18, %v1275_v46  ;;  %v1011_v54 = vadd.f32 %v1003_v1, %v982_v19  ;;  %v1353_v35 = vadd.f32 %v1345_v57, %v1324_v23  ;;  %v1238_v50 = vadd.f32 %v1230_v52, %v1209_v63  ;;  %v1564_v25 = vld [vmem:[%s4370_s16 + $0xf] sm:$0x1]  ;;  %v1362_v10 = vld [vmem:[%s4370_s16 + $0x18] sm:$0x1]  ;;  %v1276_v46 = vld [vmem:[%s4370_s16 + $0x25] sm:$0x1] }
  0x99   : > { %v1126_v61 = vadd.f32 %v1118_v41, %v1097_v12  ;;  %v1432_v26 = vmul.f32 %v5117_v11, %v1419_v20  ;;  %v1317_v31 = vmul.f32 %v5072_v4, %v1304_v24  ;;  %v1333_v41 = vld [vmem:[%s4370_s16 + $0x17] sm:$0x1]  ;;  %v1152_v58 = vmul.f32 %v5024_v51, %v1138_v62  ;;  %v1420_v20 = vld [vmem:[%s4370_s16 + $0x1a] sm:$0x1]  ;;  %v1305_v24 = vld [vmem:[%s4370_s16 + $0x26] sm:$0x1] }
  0x9a   : > { %v1173_v28 = vmul.f32 %v5028_v38, %v1160_v14  ;;  %v1040_v56 = vadd.f32 %v1032_v55, %v1011_v54  ;;  %v1382_v0 = vadd.f32 %v1374_v2, %v1353_v35  ;;  %v1267_v3 = vadd.f32 %v1259_v13, %v1238_v50  ;;  %v1139_v62 = vld [vmem:[%s4370_s16 + $0x30] sm:$0x1]  ;;  %v1161_v14 = vld [vmem:[%s4370_s16 + $0x31] sm:$0x1] }
  0x9b   : > { %1134 = vst.msk [vmem:[%s4554_s23 + $0x31] sm:$0x1] %vm662_vm0, %v1126_v61  ;;  %v1202_v48 = vmul.f32 %v5035_v6, %v1189_v22  ;;  %v1461_v42 = vmul.f32 %v5128_v8, %v1448_v15  ;;  %v1490_v1 = vmul.f32 %v5134_v9, %v1477_v17  ;;  %v1231_v32 = vmul.f32 %v5041_v37, %v1218_v21  ;;  %v1190_v61 = vld [vmem:[%s4370_s16 + $0x32] sm:$0x1]  ;;  %v1334_v21 = vld [vmem:[%s4370_s16 + $0x27] sm:$0x1] }
  0x9c   : > { %v1181_v57 = vadd.f32 %v1173_v28, %v1152_v58  ;;  %v1069_v52 = vadd.f32 %v1061_v49, %v1040_v56  ;;  %v1411_v43 = vadd.f32 %v1403_v29, %v1382_v0  ;;  %v1296_v44 = vadd.f32 %v1288_v33, %v1267_v3  ;;  %v1449_v33 = vld [vmem:[%s4370_s16 + $0x1b] sm:$0x1]  ;;  %v1363_v3 = vld [vmem:[%s4370_s16 + $0x28] sm:$0x1] }
  0x9d   : > { %v1346_v16 = vmul.f32 %v5083_v5, %v1333_v41  ;;  %v1519_v55 = vmul.f32 %v5140_v34, %v1506_v39  ;;  %v1548_v2 = vmul.f32 %v5150_v60, %v1535_v36  ;;  %v1260_v49 = vmul.f32 %v5055_v40, %v1247_v45  ;;  %v1478_v39 = vld [vmem:[%s4370_s16 + $0x1c] sm:$0x1]  ;;  %v1248_v45 = vld [vmem:[%s4370_s16 + $0x34] sm:$0x1] }
  0x9e   : > { %v1210_v13 = vadd.f32 %v1202_v48, %v1181_v57  ;;  %v1098_v12 = vadd.f32 %v1090_v30, %v1069_v52  ;;  %v1440_v19 = vadd.f32 %v1432_v26, %v1411_v43  ;;  %v1325_v23 = vadd.f32 %v1317_v31, %v1296_v44  ;;  %v1219_v26 = vld [vmem:[%s4370_s16 + $0x33] sm:$0x1]  ;;  %v1507_v31 = vld [vmem:[%s4370_s16 + $0x1d] sm:$0x1] }
  0x9f   : > { %v1375_v63 = vmul.f32 %v5095_v27, %v1362_v10  ;;  %v1577_v29 = vmul.f32 %v5160_v7, %v1564_v25  ;;  %v1404_v15 = vmul.f32 %v5109_v47, %v1391_v53  ;;  %v1289_v30 = vmul.f32 %v5067_v18, %v1276_v46  ;;  %v1565_v25 = vld [vmem:[%s4370_s16 + $0x1f] sm:$0x1]  ;;  %v1392_v53 = vld [vmem:[%s4370_s16 + $0x29] sm:$0x1]  ;;  %v1277_v46 = vld [vmem:[%s4370_s16 + $0x35] sm:$0x1] }
  0xa0   : > { %v1239_v22 = vadd.f32 %v1231_v32, %v1210_v13  ;;  %v1127_v54 = vadd.f32 %v1119_v59, %v1098_v12  ;;  %v1469_v35 = vadd.f32 %v1461_v42, %v1440_v19  ;;  %v1354_v17 = vadd.f32 %v1346_v16, %v1325_v23  ;;  %v1536_v42 = vld [vmem:[%s4370_s16 + $0x1e] sm:$0x1] }
  0xa1   : > { %v1433_v50 = vmul.f32 %v5117_v11, %v1420_v20  ;;  %v1318_v58 = vmul.f32 %v5072_v4, %v1305_v24  ;;  %v1153_v28 = vmul.f32 %v5024_v51, %v1139_v62  ;;  %v1174_v56 = vmul.f32 %v5028_v38, %v1161_v14  ;;  %v1140_v14 = vld [vmem:[%s4370_s16 + $0x40] sm:$0x1] }
  0xa2   : > { %v1268_v41 = vadd.f32 %v1260_v49, %v1239_v22  ;;  %1135 = vst.msk [vmem:[%s4554_s23 + $0x39] sm:$0x1] %vm662_vm0, %v1127_v54  ;;  %v1498_v59 = vadd.f32 %v1490_v1, %v1469_v35  ;;  %v1383_v0 = vadd.f32 %v1375_v63, %v1354_v17  ;;  %v1462_v36 = vmul.f32 %v5128_v8, %v1449_v33  ;;  %v1421_v49 = vld [vmem:[%s4370_s16 + $0x2a] sm:$0x1]  ;;  %v1191_v35 = vld [vmem:[%s4370_s16 + $0x42] sm:$0x1] }
  0xa3   : > { %v1203_v48 = vmul.f32 %v5035_v6, %v1190_v61  ;;  %v1347_v57 = vmul.f32 %v5083_v5, %v1334_v21  ;;  %v1182_v32 = vadd.f32 %v1174_v56, %v1153_v28  ;;  %v1232_v52 = vmul.f32 %v5041_v37, %v1219_v26  ;;  %v1364_v56 = vld [vmem:[%s4370_s16 + $0x38] sm:$0x1] }
  0xa4   : > { %v1297_v10 = vadd.f32 %v1289_v30, %v1268_v41  ;;  %v1527_v1 = vadd.f32 %v1519_v55, %v1498_v59  ;;  %v1412_v43 = vadd.f32 %v1404_v15, %v1383_v0  ;;  %v1491_v44 = vmul.f32 %v5134_v9, %v1478_v39  ;;  %v1306_v55 = vld [vmem:[%s4370_s16 + $0x36] sm:$0x1]  ;;  %v1162_v15 = vld [vmem:[%s4370_s16 + $0x41] sm:$0x1]  ;;  %v1450_v30 = vld [vmem:[%s4370_s16 + $0x2b] sm:$0x1] }
  0xa5   : > { %v1520_v16 = vmul.f32 %v5140_v34, %v1507_v31  ;;  %v1376_v13 = vmul.f32 %v5095_v27, %v1363_v3  ;;  %v1211_v12 = vadd.f32 %v1203_v48, %v1182_v32  ;;  %v1261_v19 = vmul.f32 %v5055_v40, %v1248_v45  ;;  %v1220_v39 = vld [vmem:[%s4370_s16 + $0x43] sm:$0x1]  ;;  %v1479_v41 = vld [vmem:[%s4370_s16 + $0x2c] sm:$0x1]  ;;  %v1249_v45 = vld [vmem:[%s4370_s16 + $0x44] sm:$0x1] }
  0xa6   : > { %v1326_v20 = vadd.f32 %v1318_v58, %v1297_v10  ;;  %v1556_v23 = vadd.f32 %v1548_v2, %v1527_v1  ;;  %v1441_v63 = vadd.f32 %v1433_v50, %v1412_v43  ;;  %v1549_v24 = vmul.f32 %v5150_v60, %v1536_v42  ;;  %v1335_v2 = vld [vmem:[%s4370_s16 + $0x37] sm:$0x1]  ;;  %v1508_v58 = vld [vmem:[%s4370_s16 + $0x2d] sm:$0x1]  ;;  %v1566_v10 = vld [vmem:[%s4370_s16 + $0x2f] sm:$0x1] }
  0xa7   : > { %v1578_v62 = vmul.f32 %v5160_v7, %v1565_v25  ;;  %v1405_v22 = vmul.f32 %v5109_v47, %v1392_v53  ;;  %v1240_v61 = vadd.f32 %v1232_v52, %v1211_v12  ;;  %v1290_v54 = vmul.f32 %v5067_v18, %v1277_v46  ;;  %v1537_v25 = vld [vmem:[%s4370_s16 + $0x2e] sm:$0x1]  ;;  %v1393_v32 = vld [vmem:[%s4370_s16 + $0x39] sm:$0x1]  ;;  %v1422_v12 = vld [vmem:[%s4370_s16 + $0x3a] sm:$0x1] }
  0xa8   : > { %v1355_v33 = vadd.f32 %v1347_v57, %v1326_v20  ;;  %v1585_v17 = vadd.f32 %v1577_v29, %v1556_v23  ;;  %v1470_v50 = vadd.f32 %v1462_v36, %v1441_v63  ;;  %v1434_v21 = vmul.f32 %v5117_v11, %v1421_v49  ;;  %v1278_v20 = vld [vmem:[%s4370_s16 + $0x45] sm:$0x1]  ;;  %v1307_v23 = vld [vmem:[%s4370_s16 + $0x46] sm:$0x1] }
  0xa9   : > { %v1319_v26 = vmul.f32 %v5072_v4, %v1306_v55  ;;  %v1269_v28 = vadd.f32 %v1261_v19, %v1240_v61  ;;  %v1154_v59 = vmul.f32 %v5024_v51, %v1140_v14  ;;  %v1175_v0 = vmul.f32 %v5028_v38, %v1162_v15 }
  0xaa   : > { %v1384_v31 = vadd.f32 %v1376_v13, %v1355_v33  ;;  %1593 = vst.msk [vmem:[%s4554_s23 + $0x2] sm:$0x1] %vm662_vm0, %v1585_v17  ;;  %v1499_v29 = vadd.f32 %v1491_v44, %v1470_v50  ;;  %v1463_v36 = vmul.f32 %v5128_v8, %v1450_v30  ;;  %v1348_v3 = vmul.f32 %v5083_v5, %v1335_v2  ;;  %v1163_v30 = vld [vmem:[%s4370_s16 + $0x51] sm:$0x1]  ;;  %v1336_v17 = vld [vmem:[%s4370_s16 + $0x47] sm:$0x1] }
  0xab   : > { %v1204_v48 = vmul.f32 %v5035_v6, %v1191_v35  ;;  %v1298_v57 = vadd.f32 %v1290_v54, %v1269_v28  ;;  %v1183_v52 = vadd.f32 %v1175_v0, %v1154_v59  ;;  %v1233_v1 = vmul.f32 %v5041_v37, %v1220_v39  ;;  %v1192_v50 = vld [vmem:[%s4370_s16 + $0x52] sm:$0x1]  ;;  %v1480_v39 = vld [vmem:[%s4370_s16 + $0x3c] sm:$0x1]  ;;  %v1365_v0 = vld [vmem:[%s4370_s16 + $0x48] sm:$0x1] }
  0xac   : > { %v1413_v42 = vadd.f32 %v1405_v22, %v1384_v31  ;;  %v1528_v43 = vadd.f32 %v1520_v16, %v1499_v29  ;;  %v1492_v44 = vmul.f32 %v5134_v9, %v1479_v41  ;;  %v1521_v53 = vmul.f32 %v5140_v34, %v1508_v58  ;;  %v1141_v16 = vld [vmem:[%s4370_s16 + $0x50] sm:$0x1]  ;;  %v1451_v22 = vld [vmem:[%s4370_s16 + $0x3b] sm:$0x1] }
  0xad   : > { %v1377_v46 = vmul.f32 %v5095_v27, %v1364_v56  ;;  %v1327_v49 = vadd.f32 %v1319_v26, %v1298_v57  ;;  %v1212_v19 = vadd.f32 %v1204_v48, %v1183_v52  ;;  %v1262_v55 = vmul.f32 %v5055_v40, %v1249_v45  ;;  %v1509_v56 = vld [vmem:[%s4370_s16 + $0x3d] sm:$0x1]  ;;  %v1567_v57 = vld [vmem:[%s4370_s16 + $0x3f] sm:$0x1]  ;;  %v1394_v52 = vld [vmem:[%s4370_s16 + $0x49] sm:$0x1] }
  0xae   : > { %v1442_v13 = vadd.f32 %v1434_v21, %v1413_v42  ;;  %v1557_v63 = vadd.f32 %v1549_v24, %v1528_v43  ;;  %v1550_v14 = vmul.f32 %v5150_v60, %v1537_v25  ;;  %v1579_v15 = vmul.f32 %v5160_v7, %v1566_v10  ;;  %v1221_v24 = vld [vmem:[%s4370_s16 + $0x53] sm:$0x1]  ;;  %v1279_v43 = vld [vmem:[%s4370_s16 + $0x55] sm:$0x1] }
  0xaf   : > { %v1406_v33 = vmul.f32 %v5109_v47, %v1393_v32  ;;  %v1356_v54 = vadd.f32 %v1348_v3, %v1327_v49  ;;  %v1241_v2 = vadd.f32 %v1233_v1, %v1212_v19  ;;  %v1291_v35 = vmul.f32 %v5067_v18, %v1278_v20  ;;  %v1538_v3 = vld [vmem:[%s4370_s16 + $0x3e] sm:$0x1] }
  0xb0   : > { %v1471_v61 = vadd.f32 %v1463_v36, %v1442_v13  ;;  %v1586_v21 = vadd.f32 %v1578_v62, %v1557_v63  ;;  %v1435_v26 = vmul.f32 %v5117_v11, %v1422_v12  ;;  %v1320_v31 = vmul.f32 %v5072_v4, %v1307_v23  ;;  %v1250_v36 = vld [vmem:[%s4370_s16 + $0x54] sm:$0x1]  ;;  %v1423_v13 = vld [vmem:[%s4370_s16 + $0x4a] sm:$0x1]  ;;  %v1308_v23 = vld [vmem:[%s4370_s16 + $0x56] sm:$0x1] }
  0xb1   : > { %v1155_v41 = vmul.f32 %v5024_v51, %v1141_v16  ;;  %v1385_v28 = vadd.f32 %v1377_v46, %v1356_v54  ;;  %v1270_v59 = vadd.f32 %v1262_v55, %v1241_v2  ;;  %v1176_v29 = vmul.f32 %v5028_v38, %v1163_v30  ;;  %v1142_v16 = vld [vmem:[%s4370_s16 + $0x60] sm:$0x1]  ;;  %v1164_v63 = vld [vmem:[%s4370_s16 + $0x61] sm:$0x1]  ;;  %v1193_v54 = vld [vmem:[%s4370_s16 + $0x62] sm:$0x1] }
  0xb2   : > { %v1500_v58 = vadd.f32 %v1492_v44, %v1471_v61  ;;  %1594 = vst.msk [vmem:[%s4554_s23 + $0xa] sm:$0x1] %vm662_vm0, %v1586_v21  ;;  %v1464_v62 = vmul.f32 %v5128_v8, %v1451_v22  ;;  %v1349_v48 = vmul.f32 %v5083_v5, %v1336_v17  ;;  %v1205_v45 = vmul.f32 %v5035_v6, %v1192_v50  ;;  %v1452_v17 = vld [vmem:[%s4370_s16 + $0x4b] sm:$0x1]  ;;  %v1481_v50 = vld [vmem:[%s4370_s16 + $0x4c] sm:$0x1] }
  0xb3   : > { %v1234_v42 = vmul.f32 %v5041_v37, %v1221_v24  ;;  %v1414_v10 = vadd.f32 %v1406_v33, %v1385_v28  ;;  %v1299_v32 = vadd.f32 %v1291_v35, %v1270_v59  ;;  %v1184_v1 = vadd.f32 %v1176_v29, %v1155_v41  ;;  %v1222_v21 = vld [vmem:[%s4370_s16 + $0x63] sm:$0x1]  ;;  %v1539_v59 = vld [vmem:[%s4370_s16 + $0x4e] sm:$0x1] }
  0xb4   : > { %v1529_v25 = vadd.f32 %v1521_v53, %v1500_v58  ;;  %v1493_v44 = vmul.f32 %v5134_v9, %v1480_v39  ;;  %v1522_v46 = vmul.f32 %v5140_v34, %v1509_v56  ;;  %v1378_v20 = vmul.f32 %v5095_v27, %v1365_v0  ;;  %v1510_v56 = vld [vmem:[%s4370_s16 + $0x4d] sm:$0x1] }
  0xb5   : > { %v1263_v49 = vmul.f32 %v5055_v40, %v1250_v36  ;;  %v1443_v12 = vadd.f32 %v1435_v26, %v1414_v10  ;;  %v1328_v19 = vadd.f32 %v1320_v31, %v1299_v32  ;;  %v1213_v55 = vadd.f32 %v1205_v45, %v1184_v1  ;;  %v1337_v31 = vld [vmem:[%s4370_s16 + $0x57] sm:$0x1]  ;;  %v1251_v36 = vld [vmem:[%s4370_s16 + $0x64] sm:$0x1]  ;;  %v1395_v1 = vld [vmem:[%s4370_s16 + $0x59] sm:$0x1] }
  0xb6   : > { %v1558_v53 = vadd.f32 %v1550_v14, %v1529_v25  ;;  %v1551_v33 = vmul.f32 %v5150_v60, %v1538_v3  ;;  %v1580_v22 = vmul.f32 %v5160_v7, %v1567_v57  ;;  %v1407_v30 = vmul.f32 %v5109_v47, %v1394_v52  ;;  %v1568_v57 = vld [vmem:[%s4370_s16 + $0x4f] sm:$0x1] }
  0xb7   : > { %v1292_v61 = vmul.f32 %v5067_v18, %v1279_v43  ;;  %v1472_v2 = vadd.f32 %v1464_v62, %v1443_v12  ;;  %v1357_v35 = vadd.f32 %v1349_v48, %v1328_v19  ;;  %v1242_v24 = vadd.f32 %v1234_v42, %v1213_v55  ;;  %v1366_v48 = vld [vmem:[%s4370_s16 + $0x58] sm:$0x1]  ;;  %v1280_v43 = vld [vmem:[%s4370_s16 + $0x65] sm:$0x1] }
  0xb8   : > { %v1587_v14 = vadd.f32 %v1579_v15, %v1558_v53  ;;  %v1436_v26 = vmul.f32 %v5117_v11, %v1423_v13  ;;  %v1321_v39 = vmul.f32 %v5072_v4, %v1308_v23  ;;  %v1156_v41 = vmul.f32 %v5024_v51, %v1142_v16  ;;  %v1424_v13 = vld [vmem:[%s4370_s16 + $0x5a] sm:$0x1]  ;;  %v1309_v23 = vld [vmem:[%s4370_s16 + $0x66] sm:$0x1]  ;;  %v1143_v16 = vld [vmem:[%s4370_s16 + $0x70] sm:$0x1] }
  0xb9   : > { %v1177_v58 = vmul.f32 %v5028_v38, %v1164_v63  ;;  %v1501_v15 = vadd.f32 %v1493_v44, %v1472_v2  ;;  %v1386_v28 = vadd.f32 %v1378_v20, %v1357_v35  ;;  %v1271_v0 = vadd.f32 %v1263_v49, %v1242_v24  ;;  %v1165_v63 = vld [vmem:[%s4370_s16 + $0x71] sm:$0x1]  ;;  %v1194_v2 = vld [vmem:[%s4370_s16 + $0x72] sm:$0x1] }
  0xba   : > { %1595 = vst.msk [vmem:[%s4554_s23 + $0x12] sm:$0x1] %vm662_vm0, %v1587_v14  ;;  %v1206_v29 = vmul.f32 %v5035_v6, %v1193_v54  ;;  %v1465_v62 = vmul.f32 %v5128_v8, %v1452_v17  ;;  %v1494_v3 = vmul.f32 %v5134_v9, %v1481_v50  ;;  %v1235_v42 = vmul.f32 %v5041_v37, %v1222_v21  ;;  %v1453_v54 = vld [vmem:[%s4370_s16 + $0x5b] sm:$0x1]  ;;  %v1338_v21 = vld [vmem:[%s4370_s16 + $0x67] sm:$0x1] }
  0xbb   : > { %v1185_v45 = vadd.f32 %v1177_v58, %v1156_v41  ;;  %v1530_v25 = vadd.f32 %v1522_v46, %v1501_v15  ;;  %v1415_v10 = vadd.f32 %v1407_v30, %v1386_v28  ;;  %v1300_v32 = vadd.f32 %v1292_v61, %v1271_v0  ;;  %v1367_v0 = vld [vmem:[%s4370_s16 + $0x68] sm:$0x1] }
  0xbc   : > { %v1350_v52 = vmul.f32 %v5083_v5, %v1337_v31  ;;  %v1523_v44 = vmul.f32 %v5140_v34, %v1510_v56  ;;  %v1552_v20 = vmul.f32 %v5150_v60, %v1539_v59  ;;  %v1264_v46 = vmul.f32 %v5055_v40, %v1251_v36  ;;  %v1511_v31 = vld [vmem:[%s4370_s16 + $0x5d] sm:$0x1]  ;;  %v1252_v36 = vld [vmem:[%s4370_s16 + $0x74] sm:$0x1] }
  0xbd   : > { %v1214_v49 = vadd.f32 %v1206_v29, %v1185_v45  ;;  %v1559_v53 = vadd.f32 %v1551_v33, %v1530_v25  ;;  %v1444_v12 = vadd.f32 %v1436_v26, %v1415_v10  ;;  %v1329_v19 = vadd.f32 %v1321_v39, %v1300_v32  ;;  %v1223_v26 = vld [vmem:[%s4370_s16 + $0x73] sm:$0x1]  ;;  %v1482_v39 = vld [vmem:[%s4370_s16 + $0x5c] sm:$0x1]  ;;  %v1425_v32 = vld [vmem:[%s4370_s16 + $0x6a] sm:$0x1] }
  0xbe   : > { %v1379_v55 = vmul.f32 %v5095_v27, %v1366_v48  ;;  %v1581_v30 = vmul.f32 %v5160_v7, %v1568_v57  ;;  %v1408_v61 = vmul.f32 %v5109_v47, %v1395_v1  ;;  %v1293_v33 = vmul.f32 %v5067_v18, %v1280_v43  ;;  %v1569_v48 = vld [vmem:[%s4370_s16 + $0x5f] sm:$0x1] }
  0xbf   : > { %v1243_v14 = vadd.f32 %v1235_v42, %v1214_v49  ;;  %v1588_v35 = vadd.f32 %v1580_v22, %v1559_v53  ;;  %v1473_v17 = vadd.f32 %v1465_v62, %v1444_v12  ;;  %v1358_v50 = vadd.f32 %v1350_v52, %v1329_v19  ;;  %v1540_v62 = vld [vmem:[%s4370_s16 + $0x5e] sm:$0x1]  ;;  %v1281_v52 = vld [vmem:[%s4370_s16 + $0x75] sm:$0x1] }
  0xc0   : > { %v1437_v24 = vmul.f32 %v5117_v11, %v1424_v13  ;;  %v1322_v58 = vmul.f32 %v5072_v4, %v1309_v23  ;;  %v1157_v15 = vmul.f32 %v5024_v51, %v1143_v16  ;;  %v1178_v28 = vmul.f32 %v5028_v38, %v1165_v63  ;;  %v1454_v13 = vld [vmem:[%s4370_s16 + $0x6b] sm:$0x1]  ;;  %v5347_v23 = vld [vmem:[%s4375_s19 + $0x30] ss:$0 sm:$0xff]  ;;  %v1623_v16 = vld [vmem:[%s4370_s16 + $0x1] sm:$0x1] }
  0xc1   : > { %v1272_v41 = vadd.f32 %v1264_v46, %v1243_v14  ;;  %1596 = vst.msk [vmem:[%s4554_s23 + $0x1a] sm:$0x1] %vm662_vm0, %v1588_v35  ;;  %v1502_v22 = vadd.f32 %v1494_v3, %v1473_v17  ;;  %v1387_v56 = vadd.f32 %v1379_v55, %v1358_v50  ;;  %v1466_v59 = vmul.f32 %v5128_v8, %v1453_v54  ;;  %v1601_v46 = vld [vmem:[%s4370_s16] sm:$0x1]  ;;  %v5351_v63 = vld [vmem:[%s4375_s19 + $0x31] ss:$0 sm:$0xff] }
  0xc2   : > { %v1207_v29 = vmul.f32 %v5035_v6, %v1194_v2  ;;  %v1351_v51 = vmul.f32 %v5083_v5, %v1338_v21  ;;  %v1186_v38 = vadd.f32 %v1178_v28, %v1157_v15  ;;  %v1236_v3 = vmul.f32 %v5041_v37, %v1223_v26  ;;  %v1396_v6 = vld [vmem:[%s4370_s16 + $0x69] sm:$0x1]  ;;  %v1339_v14 = vld [vmem:[%s4370_s16 + $0x77] sm:$0x1]  ;;  %v5358_v2 = vld [vmem:[%s4375_s19 + $0x32] ss:$0 sm:$0xff] }
  0xc3   : > { %v1301_v45 = vadd.f32 %v1293_v33, %v1272_v41  ;;  %v1531_v42 = vadd.f32 %v1523_v44, %v1502_v22  ;;  %v1416_v25 = vadd.f32 %v1408_v61, %v1387_v56  ;;  %v1495_v10 = vmul.f32 %v5134_v9, %v1482_v39  ;;  %v1310_v44 = vld [vmem:[%s4370_s16 + $0x76] sm:$0x1]  ;;  %v1652_v33 = vld [vmem:[%s4370_s16 + $0x2] sm:$0x1]  ;;  %v1681_v21 = vld [vmem:[%s4370_s16 + $0x3] sm:$0x1] }
  0xc4   : > { %v1524_v57 = vmul.f32 %v5140_v34, %v1511_v31  ;;  %v1380_v43 = vmul.f32 %v5095_v27, %v1367_v0  ;;  %v1215_v49 = vadd.f32 %v1207_v29, %v1186_v38  ;;  %v1265_v37 = vmul.f32 %v5055_v40, %v1252_v36  ;;  %v5364_v26 = vld [vmem:[%s4375_s19 + $0x33] ss:$0 sm:$0xff]  ;;  %v1512_v31 = vld [vmem:[%s4370_s16 + $0x6d] sm:$0x1]  ;;  %v5378_v0 = vld [vmem:[%s4375_s19 + $0x34] ss:$0 sm:$0xff] }
  0xc5   : > { %v1330_v1 = vadd.f32 %v1322_v58, %v1301_v45  ;;  %v1560_v53 = vadd.f32 %v1552_v20, %v1531_v42  ;;  %v1445_v12 = vadd.f32 %v1437_v24, %v1416_v25  ;;  %v1553_v19 = vmul.f32 %v5150_v60, %v1540_v62  ;;  %v1368_v58 = vld [vmem:[%s4370_s16 + $0x78] sm:$0x1]  ;;  %v1541_v36 = vld [vmem:[%s4370_s16 + $0x6e] sm:$0x1]  ;;  %v1570_v62 = vld [vmem:[%s4370_s16 + $0x6f] sm:$0x1] }
  0xc6   : > { %v5344_v55 = vmul.f32 %v5160_v7, %v1569_v48  ;;  %v1409_v61 = vmul.f32 %v5109_v47, %v1396_v6  ;;  %v1244_v20 = vadd.f32 %v1236_v3, %v1215_v49  ;;  %v1294_v54 = vmul.f32 %v5067_v18, %v1281_v52  ;;  %v1483_v18 = vld [vmem:[%s4370_s16 + $0x6c] sm:$0x1]  ;;  %v1397_v45 = vld [vmem:[%s4370_s16 + $0x79] sm:$0x1]  ;;  %v1739_v6 = vld [vmem:[%s4370_s16 + $0x5] sm:$0x1] }
  0xc7   : > { %v1359_v40 = vadd.f32 %v1351_v51, %v1330_v1  ;;  %v1589_v35 = vadd.f32 %v1581_v30, %v1560_v53  ;;  %v1474_v17 = vadd.f32 %v1466_v59, %v1445_v12  ;;  %v1438_v50 = vmul.f32 %v5117_v11, %v1425_v32  ;;  %v1710_v59 = vld [vmem:[%s4370_s16 + $0x4] sm:$0x1]  ;;  %v5390_v32 = vld [vmem:[%s4375_s19 + $0x35] ss:$0 sm:$0xff]  ;;  %v5395_v49 = vld [vmem:[%s4375_s19 + $0x36] ss:$0 sm:$0xff] }
  0xc8   : > { %v1323_v24 = vmul.f32 %v5072_v4, %v1310_v44  ;;  %v1273_v41 = vadd.f32 %v1265_v37, %v1244_v20  ;;  %v1615_v30 = vmul.f32 %v5347_v23, %v1601_v46  ;;  %v1636_v15 = vmul.f32 %v5351_v63, %v1623_v16  ;;  %v1602_v37 = vld [vmem:[%s4370_s16 + $0x10] sm:$0x1]  ;;  %v1455_v12 = vld [vmem:[%s4370_s16 + $0x7b] sm:$0x1]  ;;  %v1797_v16 = vld [vmem:[%s4370_s16 + $0x7] sm:$0x1] }
  0xc9   : > { %v1388_v39 = vadd.f32 %v1380_v43, %v1359_v40  ;;  %1597 = vst.msk [vmem:[%s4554_s23 + $0x22] sm:$0x1] %vm662_vm0, %v1589_v35  ;;  %v1503_v28 = vadd.f32 %v1495_v10, %v1474_v17  ;;  %v1467_v4 = vmul.f32 %v5128_v8, %v1454_v13  ;;  %v1352_v22 = vmul.f32 %v5083_v5, %v1339_v14  ;;  %v1426_v10 = vld [vmem:[%s4370_s16 + $0x7a] sm:$0x1]  ;;  %v1624_v40 = vld [vmem:[%s4370_s16 + $0x11] sm:$0x1] }
  0xca   : > { %v1665_v56 = vmul.f32 %v5358_v2, %v1652_v33  ;;  %v1302_v48 = vadd.f32 %v1294_v54, %v1273_v41  ;;  %v1644_v51 = vadd.f32 %v1636_v15, %v1615_v30  ;;  %v1694_v38 = vmul.f32 %v5364_v26, %v1681_v21  ;;  %v1653_v33 = vld [vmem:[%s4370_s16 + $0x12] sm:$0x1]  ;;  %v1682_v35 = vld [vmem:[%s4370_s16 + $0x13] sm:$0x1]  ;;  %v5418_v30 = vld [vmem:[%s4375_s19 + $0x38] ss:$0 sm:$0xff] }
  0xcb   : > { %v1417_v29 = vadd.f32 %v1409_v61, %v1388_v39  ;;  %v1532_v3 = vadd.f32 %v1524_v57, %v1503_v28  ;;  %v1496_v5 = vmul.f32 %v5134_v9, %v1483_v18  ;;  %v1525_v42 = vmul.f32 %v5140_v34, %v1512_v31  ;;  %v1768_v57 = vld [vmem:[%s4370_s16 + $0x6] sm:$0x1]  ;;  %v1711_v15 = vld [vmem:[%s4370_s16 + $0x14] sm:$0x1]  ;;  %v1542_v28 = vld [vmem:[%s4370_s16 + $0x7e] sm:$0x1] }
  0xcc   : > { %v1381_v25 = vmul.f32 %v5095_v27, %v1368_v58  ;;  %v1331_v1 = vadd.f32 %v1323_v24, %v1302_v48  ;;  %v1673_v43 = vadd.f32 %v1665_v56, %v1644_v51  ;;  %v1723_v13 = vmul.f32 %v5378_v0, %v1710_v59  ;;  %v1513_v24 = vld [vmem:[%s4370_s16 + $0x7d] sm:$0x1]  ;;  %v1826_v58 = vld [vmem:[%s4370_s16 + $0x8] sm:$0x1]  ;;  %v1855_v48 = vld [vmem:[%s4370_s16 + $0x9] sm:$0x1] }
  0xcd   : > { %v1446_v52 = vadd.f32 %v1438_v50, %v1417_v29  ;;  %v1561_v44 = vadd.f32 %v1553_v19, %v1532_v3  ;;  %v1554_v27 = vmul.f32 %v5150_v60, %v1541_v36  ;;  %v1583_v46 = vmul.f32 %v5160_v7, %v1570_v62  ;;  %v5406_v19 = vld [vmem:[%s4375_s19 + $0x37] ss:$0 sm:$0xff]  ;;  %v1484_v50 = vld [vmem:[%s4370_s16 + $0x7c] sm:$0x1]  ;;  %v1740_v51 = vld [vmem:[%s4370_s16 + $0x15] sm:$0x1] }
  0xce   : > { %v1410_v53 = vmul.f32 %v5109_v47, %v1397_v45  ;;  %v1360_v20 = vadd.f32 %v1352_v22, %v1331_v1  ;;  %v1702_v54 = vadd.f32 %v1694_v38, %v1673_v43  ;;  %v1752_v14 = vmul.f32 %v5390_v32, %v1739_v6  ;;  %v5432_v45 = vld [vmem:[%s4375_s19 + $0x39] ss:$0 sm:$0xff] }
  0xcf   : > { %v1475_v61 = vadd.f32 %v1467_v4, %v1446_v52  ;;  %v1590_v17 = vadd.f32 %v5344_v55, %v1561_v44  ;;  %v1439_v47 = vmul.f32 %v5117_v11, %v1426_v10  ;;  %v1781_v21 = vmul.f32 %v5395_v49, %v1768_v57  ;;  %v1571_v4 = vld [vmem:[%s4370_s16 + $0x7f] sm:$0x1]  ;;  %v1625_v57 = vld [vmem:[%s4370_s16 + $0x21] sm:$0x1] }
  0xd0   : > { %v1616_v39 = vmul.f32 %v5347_v23, %v1602_v37  ;;  %v1389_v31 = vadd.f32 %v1381_v25, %v1360_v20  ;;  %v1731_v41 = vadd.f32 %v1723_v13, %v1702_v54  ;;  %v1637_v55 = vmul.f32 %v5351_v63, %v1624_v40  ;;  %v1884_v25 = vld [vmem:[%s4370_s16 + $0xa] sm:$0x1]  ;;  %v1769_v13 = vld [vmem:[%s4370_s16 + $0x16] sm:$0x1]  ;;  %v1942_v54 = vld [vmem:[%s4370_s16 + $0xc] sm:$0x1] }
  0xd1   : > { %v1504_v18 = vadd.f32 %v1496_v5, %v1475_v61  ;;  %1598 = vst.msk [vmem:[%s4554_s23 + $0x2a] sm:$0x1] %vm662_vm0, %v1590_v17  ;;  %v1468_v11 = vmul.f32 %v5128_v8, %v1455_v12  ;;  %v1810_v22 = vmul.f32 %v5406_v19, %v1797_v16  ;;  %v1666_v56 = vmul.f32 %v5358_v2, %v1653_v33  ;;  %v1654_v16 = vld [vmem:[%s4370_s16 + $0x22] sm:$0x1]  ;;  %v5463_v17 = vld [vmem:[%s4375_s19 + $0x3d] ss:$0 sm:$0xff] }
  0xd2   : > { %v1695_v59 = vmul.f32 %v5364_v26, %v1682_v35  ;;  %v1418_v36 = vadd.f32 %v1410_v53, %v1389_v31  ;;  %v1760_v62 = vadd.f32 %v1752_v14, %v1731_v41  ;;  %v1645_v8 = vadd.f32 %v1637_v55, %v1616_v39  ;;  %v1913_v53 = vld [vmem:[%s4370_s16 + $0xb] sm:$0x1]  ;;  %v1971_v35 = vld [vmem:[%s4370_s16 + $0xd] sm:$0x1]  ;;  %v5473_v31 = vld [vmem:[%s4375_s19 + $0x3e] ss:$0 sm:$0xff] }
  0xd3   : > { %v1533_v29 = vadd.f32 %v1525_v42, %v1504_v18  ;;  %v1497_v38 = vmul.f32 %v5134_v9, %v1484_v50  ;;  %v1526_v3 = vmul.f32 %v5140_v34, %v1513_v24  ;;  %v1839_v5 = vmul.f32 %v5418_v30, %v1826_v58  ;;  %v5440_v42 = vld [vmem:[%s4375_s19 + $0x3a] ss:$0 sm:$0xff]  ;;  %v1603_v9 = vld [vmem:[%s4370_s16 + $0x20] sm:$0x1]  ;;  %v2000_v18 = vld [vmem:[%s4370_s16 + $0xe] sm:$0x1] }
  0xd4   : > { %v1724_v10 = vmul.f32 %v5378_v0, %v1711_v15  ;;  %v1447_v52 = vadd.f32 %v1439_v47, %v1418_v36  ;;  %v1789_v1 = vadd.f32 %v1781_v21, %v1760_v62  ;;  %v1674_v43 = vadd.f32 %v1666_v56, %v1645_v8  ;;  %v1712_v55 = vld [vmem:[%s4370_s16 + $0x24] sm:$0x1]  ;;  %v5483_v36 = vld [vmem:[%s4375_s19 + $0x3f] ss:$0 sm:$0xff]  ;;  %v1856_v8 = vld [vmem:[%s4370_s16 + $0x19] sm:$0x1] }
  0xd5   : > { %v1562_v6 = vadd.f32 %v1554_v27, %v1533_v29  ;;  %v1555_v34 = vmul.f32 %v5150_v60, %v1542_v28  ;;  %v1584_v37 = vmul.f32 %v5160_v7, %v1571_v4  ;;  %v1868_v44 = vmul.f32 %v5432_v45, %v1855_v48  ;;  %v5451_v27 = vld [vmem:[%s4375_s19 + $0x3b] ss:$0 sm:$0xff]  ;;  %v5457_v60 = vld [vmem:[%s4375_s19 + $0x3c] ss:$0 sm:$0xff]  ;;  %v1683_v7 = vld [vmem:[%s4370_s16 + $0x23] sm:$0x1] }
  0xd6   : > { %v1753_v12 = vmul.f32 %v5390_v32, %v1740_v51  ;;  %v1476_v61 = vadd.f32 %v1468_v11, %v1447_v52  ;;  %v1818_v20 = vadd.f32 %v1810_v22, %v1789_v1  ;;  %v1703_v14 = vadd.f32 %v1695_v59, %v1674_v43  ;;  %v2029_v28 = vld [vmem:[%s4370_s16 + $0xf] sm:$0x1]  ;;  %v1827_v4 = vld [vmem:[%s4370_s16 + $0x18] sm:$0x1]  ;;  %v1741_v51 = vld [vmem:[%s4370_s16 + $0x25] sm:$0x1] }
  0xd7   : > { %v1591_v40 = vadd.f32 %v1583_v46, %v1562_v6  ;;  %v1897_v33 = vmul.f32 %v5440_v42, %v1884_v25  ;;  %v1782_v47 = vmul.f32 %v5395_v49, %v1769_v13  ;;  %v1798_v46 = vld [vmem:[%s4370_s16 + $0x17] sm:$0x1]  ;;  %v1617_v50 = vmul.f32 %v5347_v23, %v1603_v9  ;;  %v1885_v25 = vld [vmem:[%s4370_s16 + $0x1a] sm:$0x1]  ;;  %v1770_v13 = vld [vmem:[%s4370_s16 + $0x26] sm:$0x1] }
  0xd8   : > { %v1638_v24 = vmul.f32 %v5351_v63, %v1625_v57  ;;  %v1505_v21 = vadd.f32 %v1497_v38, %v1476_v61  ;;  %v1847_v39 = vadd.f32 %v1839_v5, %v1818_v20  ;;  %v1732_v41 = vadd.f32 %v1724_v10, %v1703_v14  ;;  %v1604_v9 = vld [vmem:[%s4370_s16 + $0x30] sm:$0x1]  ;;  %v1626_v57 = vld [vmem:[%s4370_s16 + $0x31] sm:$0x1] }
  0xd9   : > { %1599 = vst.msk [vmem:[%s4554_s23 + $0x32] sm:$0x1] %vm662_vm0, %v1591_v40  ;;  %v1667_v58 = vmul.f32 %v5358_v2, %v1654_v16  ;;  %v1926_v15 = vmul.f32 %v5451_v27, %v1913_v53  ;;  %v1955_v11 = vmul.f32 %v5457_v60, %v1942_v54  ;;  %v1696_v56 = vmul.f32 %v5364_v26, %v1683_v7  ;;  %v1655_v40 = vld [vmem:[%s4370_s16 + $0x32] sm:$0x1]  ;;  %v1799_v7 = vld [vmem:[%s4370_s16 + $0x27] sm:$0x1] }
  0xda   : > { %v1646_v22 = vadd.f32 %v1638_v24, %v1617_v50  ;;  %v1534_v59 = vadd.f32 %v1526_v3, %v1505_v21  ;;  %v1876_v29 = vadd.f32 %v1868_v44, %v1847_v39  ;;  %v1761_v62 = vadd.f32 %v1753_v12, %v1732_v41  ;;  %v1914_v12 = vld [vmem:[%s4370_s16 + $0x1b] sm:$0x1]  ;;  %v1828_v41 = vld [vmem:[%s4370_s16 + $0x28] sm:$0x1] }
  0xdb   : > { %v1811_v48 = vmul.f32 %v5406_v19, %v1798_v46  ;;  %v1984_v38 = vmul.f32 %v5463_v17, %v1971_v35  ;;  %v2013_v5 = vmul.f32 %v5473_v31, %v2000_v18  ;;  %v1725_v3 = vmul.f32 %v5378_v0, %v1712_v55  ;;  %v1943_v35 = vld [vmem:[%s4370_s16 + $0x1c] sm:$0x1]  ;;  %v1713_v55 = vld [vmem:[%s4370_s16 + $0x34] sm:$0x1] }
  0xdc   : > { %v1675_v10 = vadd.f32 %v1667_v58, %v1646_v22  ;;  %v1563_v6 = vadd.f32 %v1555_v34, %v1534_v59  ;;  %v1905_v52 = vadd.f32 %v1897_v33, %v1876_v29  ;;  %v1790_v1 = vadd.f32 %v1782_v47, %v1761_v62  ;;  %v1684_v33 = vld [vmem:[%s4370_s16 + $0x33] sm:$0x1]  ;;  %v1972_v47 = vld [vmem:[%s4370_s16 + $0x1d] sm:$0x1] }
  0xdd   : > { %v1840_v43 = vmul.f32 %v5418_v30, %v1827_v4  ;;  %v2042_v44 = vmul.f32 %v5483_v36, %v2029_v28  ;;  %v1869_v53 = vmul.f32 %v5432_v45, %v1856_v8  ;;  %v1754_v34 = vmul.f32 %v5390_v32, %v1741_v51  ;;  %v2030_v28 = vld [vmem:[%s4370_s16 + $0x1f] sm:$0x1]  ;;  %v1857_v8 = vld [vmem:[%s4370_s16 + $0x29] sm:$0x1]  ;;  %v1742_v51 = vld [vmem:[%s4370_s16 + $0x35] sm:$0x1] }
  0xde   : > { %v1704_v16 = vadd.f32 %v1696_v56, %v1675_v10  ;;  %v1592_v61 = vadd.f32 %v1584_v37, %v1563_v6  ;;  %v1934_v20 = vadd.f32 %v1926_v15, %v1905_v52  ;;  %v1819_v54 = vadd.f32 %v1811_v48, %v1790_v1  ;;  %v2001_v15 = vld [vmem:[%s4370_s16 + $0x1e] sm:$0x1] }
  0xdf   : > { %v1898_v14 = vmul.f32 %v5440_v42, %v1885_v25  ;;  %v1783_v50 = vmul.f32 %v5395_v49, %v1770_v13  ;;  %v1618_v24 = vmul.f32 %v5347_v23, %v1604_v9  ;;  %v1639_v21 = vmul.f32 %v5351_v63, %v1626_v57  ;;  %v1605_v57 = vld [vmem:[%s4370_s16 + $0x40] sm:$0x1] }
  0xe0   : > { %v1733_v46 = vadd.f32 %v1725_v3, %v1704_v16  ;;  %1600 = vst.msk [vmem:[%s4554_s23 + $0x3a] sm:$0x1] %vm662_vm0, %v1592_v61  ;;  %v1963_v37 = vadd.f32 %v1955_v11, %v1934_v20  ;;  %v1848_v39 = vadd.f32 %v1840_v43, %v1819_v54  ;;  %v1927_v18 = vmul.f32 %v5451_v27, %v1914_v12  ;;  %v1886_v3 = vld [vmem:[%s4370_s16 + $0x2a] sm:$0x1]  ;;  %v1656_v20 = vld [vmem:[%s4370_s16 + $0x42] sm:$0x1] }
  0xe1   : > { %v1668_v58 = vmul.f32 %v5358_v2, %v1655_v40  ;;  %v1812_v22 = vmul.f32 %v5406_v19, %v1799_v7  ;;  %v1647_v56 = vadd.f32 %v1639_v21, %v1618_v24  ;;  %v1697_v59 = vmul.f32 %v5364_v26, %v1684_v33  ;;  %v1829_v21 = vld [vmem:[%s4370_s16 + $0x38] sm:$0x1] }
  0xe2   : > { %v1762_v4 = vadd.f32 %v1754_v34, %v1733_v46  ;;  %v1992_v11 = vadd.f32 %v1984_v38, %v1963_v37  ;;  %v1877_v29 = vadd.f32 %v1869_v53, %v1848_v39  ;;  %v1956_v62 = vmul.f32 %v5457_v60, %v1943_v35  ;;  %v1771_v38 = vld [vmem:[%s4370_s16 + $0x36] sm:$0x1]  ;;  %v1627_v53 = vld [vmem:[%s4370_s16 + $0x41] sm:$0x1]  ;;  %v1915_v34 = vld [vmem:[%s4370_s16 + $0x2b] sm:$0x1] }
  0xe3   : > { %v1985_v48 = vmul.f32 %v5463_v17, %v1972_v47  ;;  %v1841_v10 = vmul.f32 %v5418_v30, %v1828_v41  ;;  %v1676_v6 = vadd.f32 %v1668_v58, %v1647_v56  ;;  %v1726_v52 = vmul.f32 %v5378_v0, %v1713_v55  ;;  %v1685_v35 = vld [vmem:[%s4370_s16 + $0x43] sm:$0x1]  ;;  %v1944_v46 = vld [vmem:[%s4370_s16 + $0x2c] sm:$0x1]  ;;  %v1714_v55 = vld [vmem:[%s4370_s16 + $0x44] sm:$0x1] }
  0xe4   : > { %v1791_v25 = vadd.f32 %v1783_v50, %v1762_v4  ;;  %v2021_v1 = vadd.f32 %v2013_v5, %v1992_v11  ;;  %v1906_v43 = vadd.f32 %v1898_v14, %v1877_v29  ;;  %v2014_v13 = vmul.f32 %v5473_v31, %v2001_v15  ;;  %v1800_v5 = vld [vmem:[%s4370_s16 + $0x37] sm:$0x1]  ;;  %v1973_v50 = vld [vmem:[%s4370_s16 + $0x2d] sm:$0x1]  ;;  %v2031_v4 = vld [vmem:[%s4370_s16 + $0x2f] sm:$0x1] }
  0xe5   : > { %v2043_v9 = vmul.f32 %v5483_v36, %v2030_v28  ;;  %v1870_v16 = vmul.f32 %v5432_v45, %v1857_v8  ;;  %v1705_v40 = vadd.f32 %v1697_v59, %v1676_v6  ;;  %v1755_v61 = vmul.f32 %v5390_v32, %v1742_v51  ;;  %v2002_v28 = vld [vmem:[%s4370_s16 + $0x2e] sm:$0x1]  ;;  %v1858_v56 = vld [vmem:[%s4370_s16 + $0x39] sm:$0x1]  ;;  %v1887_v6 = vld [vmem:[%s4370_s16 + $0x3a] sm:$0x1] }
  0xe6   : > { %v1820_v12 = vadd.f32 %v1812_v22, %v1791_v25  ;;  %v2050_v54 = vadd.f32 %v2042_v44, %v2021_v1  ;;  %v1935_v14 = vadd.f32 %v1927_v18, %v1906_v43  ;;  %v1899_v7 = vmul.f32 %v5440_v42, %v1886_v3  ;;  %v1743_v25 = vld [vmem:[%s4370_s16 + $0x45] sm:$0x1]  ;;  %v1772_v1 = vld [vmem:[%s4370_s16 + $0x46] sm:$0x1] }
  0xe7   : > { %v1784_v33 = vmul.f32 %v5395_v49, %v1771_v38  ;;  %v1734_v24 = vadd.f32 %v1726_v52, %v1705_v40  ;;  %v1619_v37 = vmul.f32 %v5347_v23, %v1605_v57  ;;  %v1640_v39 = vmul.f32 %v5351_v63, %v1627_v53 }
  0xe8   : > { %v1849_v47 = vadd.f32 %v1841_v10, %v1820_v12  ;;  %2058 = vst.msk [vmem:[%s4554_s23 + $0x3] sm:$0x1] %vm662_vm0, %v2050_v54  ;;  %v1964_v44 = vadd.f32 %v1956_v62, %v1935_v14  ;;  %v1928_v18 = vmul.f32 %v5451_v27, %v1915_v34  ;;  %v1813_v41 = vmul.f32 %v5406_v19, %v1800_v5  ;;  %v1628_v34 = vld [vmem:[%s4370_s16 + $0x51] sm:$0x1]  ;;  %v1801_v54 = vld [vmem:[%s4370_s16 + $0x47] sm:$0x1] }
  0xe9   : > { %v1669_v58 = vmul.f32 %v5358_v2, %v1656_v20  ;;  %v1763_v22 = vadd.f32 %v1755_v61, %v1734_v24  ;;  %v1648_v59 = vadd.f32 %v1640_v39, %v1619_v37  ;;  %v1698_v11 = vmul.f32 %v5364_v26, %v1685_v35  ;;  %v1657_v14 = vld [vmem:[%s4370_s16 + $0x52] sm:$0x1]  ;;  %v1945_v35 = vld [vmem:[%s4370_s16 + $0x3c] sm:$0x1]  ;;  %v1830_v39 = vld [vmem:[%s4370_s16 + $0x48] sm:$0x1] }
  0xea   : > { %v1878_v15 = vadd.f32 %v1870_v16, %v1849_v47  ;;  %v1993_v29 = vadd.f32 %v1985_v48, %v1964_v44  ;;  %v1957_v62 = vmul.f32 %v5457_v60, %v1944_v46  ;;  %v1986_v8 = vmul.f32 %v5463_v17, %v1973_v50  ;;  %v1606_v48 = vld [vmem:[%s4370_s16 + $0x50] sm:$0x1]  ;;  %v1916_v16 = vld [vmem:[%s4370_s16 + $0x3b] sm:$0x1] }
  0xeb   : > { %v1842_v51 = vmul.f32 %v5418_v30, %v1829_v21  ;;  %v1792_v3 = vadd.f32 %v1784_v33, %v1763_v22  ;;  %v1677_v52 = vadd.f32 %v1669_v58, %v1648_v59  ;;  %v1727_v38 = vmul.f32 %v5378_v0, %v1714_v55  ;;  %v1974_v21 = vld [vmem:[%s4370_s16 + $0x3d] sm:$0x1]  ;;  %v2032_v22 = vld [vmem:[%s4370_s16 + $0x3f] sm:$0x1]  ;;  %v1859_v59 = vld [vmem:[%s4370_s16 + $0x49] sm:$0x1] }
  0xec   : > { %v1907_v10 = vadd.f32 %v1899_v7, %v1878_v15  ;;  %v2022_v43 = vadd.f32 %v2014_v13, %v1993_v29  ;;  %v2015_v57 = vmul.f32 %v5473_v31, %v2002_v28  ;;  %v2044_v53 = vmul.f32 %v5483_v36, %v2031_v4  ;;  %v1686_v13 = vld [vmem:[%s4370_s16 + $0x53] sm:$0x1]  ;;  %v1744_v29 = vld [vmem:[%s4370_s16 + $0x55] sm:$0x1] }
  0xed   : > { %v1871_v12 = vmul.f32 %v5432_v45, %v1858_v56  ;;  %v1821_v61 = vadd.f32 %v1813_v41, %v1792_v3  ;;  %v1706_v5 = vadd.f32 %v1698_v11, %v1677_v52  ;;  %v1756_v20 = vmul.f32 %v5390_v32, %v1743_v25  ;;  %v2003_v41 = vld [vmem:[%s4370_s16 + $0x3e] sm:$0x1] }
  0xee   : > { %v1936_v40 = vadd.f32 %v1928_v18, %v1907_v10  ;;  %v2051_v7 = vadd.f32 %v2043_v9, %v2022_v43  ;;  %v1900_v33 = vmul.f32 %v5440_v42, %v1887_v6  ;;  %v1785_v47 = vmul.f32 %v5395_v49, %v1772_v1  ;;  %v1715_v18 = vld [vmem:[%s4370_s16 + $0x54] sm:$0x1]  ;;  %v1888_v10 = vld [vmem:[%s4370_s16 + $0x4a] sm:$0x1]  ;;  %v1773_v1 = vld [vmem:[%s4370_s16 + $0x56] sm:$0x1] }
  0xef   : > { %v1620_v46 = vmul.f32 %v5347_v23, %v1606_v48  ;;  %v1850_v24 = vadd.f32 %v1842_v51, %v1821_v61  ;;  %v1735_v37 = vadd.f32 %v1727_v38, %v1706_v5  ;;  %v1641_v44 = vmul.f32 %v5351_v63, %v1628_v34  ;;  %v1607_v48 = vld [vmem:[%s4370_s16 + $0x60] sm:$0x1]  ;;  %v1629_v43 = vld [vmem:[%s4370_s16 + $0x61] sm:$0x1]  ;;  %v1658_v61 = vld [vmem:[%s4370_s16 + $0x62] sm:$0x1] }
  0xf0   : > { %v1965_v50 = vadd.f32 %v1957_v62, %v1936_v40  ;;  %2059 = vst.msk [vmem:[%s4554_s23 + $0xb] sm:$0x1] %vm662_vm0, %v2051_v7  ;;  %v1929_v9 = vmul.f32 %v5451_v27, %v1916_v16  ;;  %v1814_v58 = vmul.f32 %v5406_v19, %v1801_v54  ;;  %v1670_v55 = vmul.f32 %v5358_v2, %v1657_v14  ;;  %v1917_v54 = vld [vmem:[%s4370_s16 + $0x4b] sm:$0x1]  ;;  %v1946_v14 = vld [vmem:[%s4370_s16 + $0x4c] sm:$0x1] }
  0xf1   : > { %v1699_v15 = vmul.f32 %v5364_v26, %v1686_v13  ;;  %v1879_v4 = vadd.f32 %v1871_v12, %v1850_v24  ;;  %v1764_v56 = vadd.f32 %v1756_v20, %v1735_v37  ;;  %v1649_v11 = vadd.f32 %v1641_v44, %v1620_v46  ;;  %v1687_v7 = vld [vmem:[%s4370_s16 + $0x63] sm:$0x1]  ;;  %v2004_v37 = vld [vmem:[%s4370_s16 + $0x4e] sm:$0x1] }
  0xf2   : > { %v1994_v28 = vadd.f32 %v1986_v8, %v1965_v50  ;;  %v1958_v62 = vmul.f32 %v5457_v60, %v1945_v35  ;;  %v1987_v51 = vmul.f32 %v5463_v17, %v1974_v21  ;;  %v1843_v25 = vmul.f32 %v5418_v30, %v1830_v39  ;;  %v1975_v21 = vld [vmem:[%s4370_s16 + $0x4d] sm:$0x1] }
  0xf3   : > { %v1728_v3 = vmul.f32 %v5378_v0, %v1715_v18  ;;  %v1908_v6 = vadd.f32 %v1900_v33, %v1879_v4  ;;  %v1793_v52 = vadd.f32 %v1785_v47, %v1764_v56  ;;  %v1678_v38 = vadd.f32 %v1670_v55, %v1649_v11  ;;  %v1802_v47 = vld [vmem:[%s4370_s16 + $0x57] sm:$0x1]  ;;  %v1716_v18 = vld [vmem:[%s4370_s16 + $0x64] sm:$0x1]  ;;  %v1860_v11 = vld [vmem:[%s4370_s16 + $0x59] sm:$0x1] }
  0xf4   : > { %v2023_v8 = vadd.f32 %v2015_v57, %v1994_v28  ;;  %v2016_v12 = vmul.f32 %v5473_v31, %v2003_v41  ;;  %v2045_v16 = vmul.f32 %v5483_v36, %v2032_v22  ;;  %v1872_v34 = vmul.f32 %v5432_v45, %v1859_v59  ;;  %v2033_v22 = vld [vmem:[%s4370_s16 + $0x4f] sm:$0x1] }
  0xf5   : > { %v1757_v40 = vmul.f32 %v5390_v32, %v1744_v29  ;;  %v1937_v5 = vadd.f32 %v1929_v9, %v1908_v6  ;;  %v1822_v20 = vadd.f32 %v1814_v58, %v1793_v52  ;;  %v1707_v13 = vadd.f32 %v1699_v15, %v1678_v38  ;;  %v1831_v58 = vld [vmem:[%s4370_s16 + $0x58] sm:$0x1]  ;;  %v1745_v29 = vld [vmem:[%s4370_s16 + $0x65] sm:$0x1] }
  0xf6   : > { %v2052_v57 = vadd.f32 %v2044_v53, %v2023_v8  ;;  %v1901_v33 = vmul.f32 %v5440_v42, %v1888_v10  ;;  %v1786_v35 = vmul.f32 %v5395_v49, %v1773_v1  ;;  %v1621_v46 = vmul.f32 %v5347_v23, %v1607_v48  ;;  %v1889_v10 = vld [vmem:[%s4370_s16 + $0x5a] sm:$0x1]  ;;  %v1774_v1 = vld [vmem:[%s4370_s16 + $0x66] sm:$0x1]  ;;  %v1608_v48 = vld [vmem:[%s4370_s16 + $0x70] sm:$0x1] }
  0xf7   : > { %v1642_v50 = vmul.f32 %v5351_v63, %v1629_v43  ;;  %v1966_v53 = vadd.f32 %v1958_v62, %v1937_v5  ;;  %v1851_v24 = vadd.f32 %v1843_v25, %v1822_v20  ;;  %v1736_v39 = vadd.f32 %v1728_v3, %v1707_v13  ;;  %v1630_v43 = vld [vmem:[%s4370_s16 + $0x71] sm:$0x1]  ;;  %v1659_v5 = vld [vmem:[%s4370_s16 + $0x72] sm:$0x1] }
  0xf8   : > { %2060 = vst.msk [vmem:[%s4554_s23 + $0x13] sm:$0x1] %vm662_vm0, %v2052_v57  ;;  %v1671_v44 = vmul.f32 %v5358_v2, %v1658_v61  ;;  %v1930_v9 = vmul.f32 %v5451_v27, %v1917_v54  ;;  %v1959_v41 = vmul.f32 %v5457_v60, %v1946_v14  ;;  %v1700_v15 = vmul.f32 %v5364_v26, %v1687_v7  ;;  %v1918_v61 = vld [vmem:[%s4370_s16 + $0x5b] sm:$0x1]  ;;  %v1803_v7 = vld [vmem:[%s4370_s16 + $0x67] sm:$0x1] }
  0xf9   : > { %v1650_v55 = vadd.f32 %v1642_v50, %v1621_v46  ;;  %v1995_v28 = vadd.f32 %v1987_v51, %v1966_v53  ;;  %v1880_v4 = vadd.f32 %v1872_v34, %v1851_v24  ;;  %v1765_v56 = vadd.f32 %v1757_v40, %v1736_v39  ;;  %v1832_v39 = vld [vmem:[%s4370_s16 + $0x68] sm:$0x1] }
  0xfa   : > { %v1815_v59 = vmul.f32 %v5406_v19, %v1802_v47  ;;  %v1988_v62 = vmul.f32 %v5463_v17, %v1975_v21  ;;  %v2017_v25 = vmul.f32 %v5473_v31, %v2004_v37  ;;  %v1729_v51 = vmul.f32 %v5378_v0, %v1716_v18  ;;  %v1976_v47 = vld [vmem:[%s4370_s16 + $0x5d] sm:$0x1]  ;;  %v1717_v18 = vld [vmem:[%s4370_s16 + $0x74] sm:$0x1] }
  0xfb   : > { %v1679_v3 = vadd.f32 %v1671_v44, %v1650_v55  ;;  %v2024_v8 = vadd.f32 %v2016_v12, %v1995_v28  ;;  %v1909_v6 = vadd.f32 %v1901_v33, %v1880_v4  ;;  %v1794_v52 = vadd.f32 %v1786_v35, %v1765_v56  ;;  %v1688_v33 = vld [vmem:[%s4370_s16 + $0x73] sm:$0x1]  ;;  %v1947_v35 = vld [vmem:[%s4370_s16 + $0x5c] sm:$0x1]  ;;  %v1890_v56 = vld [vmem:[%s4370_s16 + $0x6a] sm:$0x1] }
  0xfc   : > { %v1844_v38 = vmul.f32 %v5418_v30, %v1831_v58  ;;  %v2046_v34 = vmul.f32 %v5483_v36, %v2033_v22  ;;  %v1873_v40 = vmul.f32 %v5432_v45, %v1860_v11  ;;  %v1758_v12 = vmul.f32 %v5390_v32, %v1745_v29  ;;  %v2034_v58 = vld [vmem:[%s4370_s16 + $0x5f] sm:$0x1] }
  0xfd   : > { %v1708_v57 = vadd.f32 %v1700_v15, %v1679_v3  ;;  %v2053_v20 = vadd.f32 %v2045_v16, %v2024_v8  ;;  %v1938_v54 = vadd.f32 %v1930_v9, %v1909_v6  ;;  %v1823_v14 = vadd.f32 %v1815_v59, %v1794_v52  ;;  %v2005_v9 = vld [vmem:[%s4370_s16 + $0x5e] sm:$0x1]  ;;  %v1746_v59 = vld [vmem:[%s4370_s16 + $0x75] sm:$0x1] }
  0xfe   : > { %v1902_v13 = vmul.f32 %v5440_v42, %v1889_v10  ;;  %v1787_v50 = vmul.f32 %v5395_v49, %v1774_v1  ;;  %v1622_v53 = vmul.f32 %v5347_v23, %v1608_v48  ;;  %v1643_v24 = vmul.f32 %v5351_v63, %v1630_v43  ;;  %v1919_v10 = vld [vmem:[%s4370_s16 + $0x6b] sm:$0x1]  ;;  %v5670_v1 = vld [vmem:[%s4375_s19 + $0x40] ss:$0 sm:$0xff]  ;;  %v2088_v48 = vld [vmem:[%s4370_s16 + $0x1] sm:$0x1] }
  0xff   : > { %v1737_v46 = vadd.f32 %v1729_v51, %v1708_v57  ;;  %2061 = vst.msk [vmem:[%s4554_s23 + $0x1b] sm:$0x1] %vm662_vm0, %v2053_v20  ;;  %v1967_v16 = vadd.f32 %v1959_v41, %v1938_v54  ;;  %v1852_v21 = vadd.f32 %v1844_v38, %v1823_v14  ;;  %v1931_v37 = vmul.f32 %v5451_v27, %v1918_v61  ;;  %v2066_v51 = vld [vmem:[%s4370_s16] sm:$0x1]  ;;  %v5674_v43 = vld [vmem:[%s4375_s19 + $0x41] ss:$0 sm:$0xff] }
 0x100   : > { %v1672_v44 = vmul.f32 %v5358_v2, %v1659_v5  ;;  %v1816_v23 = vmul.f32 %v5406_v19, %v1803_v7  ;;  %v1651_v63 = vadd.f32 %v1643_v24, %v1622_v53  ;;  %v1701_v41 = vmul.f32 %v5364_v26, %v1688_v33  ;;  %v1861_v2 = vld [vmem:[%s4370_s16 + $0x69] sm:$0x1]  ;;  %v1804_v57 = vld [vmem:[%s4370_s16 + $0x77] sm:$0x1]  ;;  %v5681_v5 = vld [vmem:[%s4375_s19 + $0x42] ss:$0 sm:$0xff] }
 0x101   : > { %v1766_v55 = vadd.f32 %v1758_v12, %v1737_v46  ;;  %v1996_v15 = vadd.f32 %v1988_v62, %v1967_v16  ;;  %v1881_v28 = vadd.f32 %v1873_v40, %v1852_v21  ;;  %v1960_v4 = vmul.f32 %v5457_v60, %v1947_v35  ;;  %v1775_v62 = vld [vmem:[%s4370_s16 + $0x76] sm:$0x1]  ;;  %v2117_v12 = vld [vmem:[%s4370_s16 + $0x2] sm:$0x1]  ;;  %v2146_v7 = vld [vmem:[%s4370_s16 + $0x3] sm:$0x1] }
 0x102   : > { %v1989_v22 = vmul.f32 %v5463_v17, %v1976_v47  ;;  %v1845_v29 = vmul.f32 %v5418_v30, %v1832_v39  ;;  %v1680_v3 = vadd.f32 %v1672_v44, %v1651_v63  ;;  %v1730_v26 = vmul.f32 %v5378_v0, %v1717_v18  ;;  %v5687_v33 = vld [vmem:[%s4375_s19 + $0x43] ss:$0 sm:$0xff]  ;;  %v1977_v47 = vld [vmem:[%s4370_s16 + $0x6d] sm:$0x1]  ;;  %v5701_v39 = vld [vmem:[%s4375_s19 + $0x44] ss:$0 sm:$0xff] }
 0x103   : > { %v1795_v11 = vadd.f32 %v1787_v50, %v1766_v55  ;;  %v2025_v8 = vadd.f32 %v2017_v25, %v1996_v15  ;;  %v1910_v6 = vadd.f32 %v1902_v13, %v1881_v28  ;;  %v2018_v52 = vmul.f32 %v5473_v31, %v2005_v9  ;;  %v1833_v50 = vld [vmem:[%s4370_s16 + $0x78] sm:$0x1]  ;;  %v2006_v18 = vld [vmem:[%s4370_s16 + $0x6e] sm:$0x1]  ;;  %v2035_v9 = vld [vmem:[%s4370_s16 + $0x6f] sm:$0x1] }
 0x104   : > { %v5667_v38 = vmul.f32 %v5483_v36, %v2034_v58  ;;  %v1874_v40 = vmul.f32 %v5432_v45, %v1861_v2  ;;  %v1709_v25 = vadd.f32 %v1701_v41, %v1680_v3  ;;  %v1759_v61 = vmul.f32 %v5390_v32, %v1746_v59  ;;  %v1948_v32 = vld [vmem:[%s4370_s16 + $0x6c] sm:$0x1]  ;;  %v1862_v55 = vld [vmem:[%s4370_s16 + $0x79] sm:$0x1]  ;;  %v2204_v2 = vld [vmem:[%s4370_s16 + $0x5] sm:$0x1] }
 0x105   : > { %v1824_v0 = vadd.f32 %v1816_v23, %v1795_v11  ;;  %v2054_v20 = vadd.f32 %v2046_v34, %v2025_v8  ;;  %v1939_v54 = vadd.f32 %v1931_v37, %v1910_v6  ;;  %v1903_v14 = vmul.f32 %v5440_v42, %v1890_v56  ;;  %v2175_v37 = vld [vmem:[%s4370_s16 + $0x4] sm:$0x1]  ;;  %v5713_v56 = vld [vmem:[%s4375_s19 + $0x45] ss:$0 sm:$0xff]  ;;  %v5718_v3 = vld [vmem:[%s4375_s19 + $0x46] ss:$0 sm:$0xff] }
 0x106   : > { %v1788_v13 = vmul.f32 %v5395_v49, %v1775_v62  ;;  %v1738_v46 = vadd.f32 %v1730_v26, %v1709_v25  ;;  %v2080_v34 = vmul.f32 %v5670_v1, %v2066_v51  ;;  %v2101_v53 = vmul.f32 %v5674_v43, %v2088_v48  ;;  %v2067_v26 = vld [vmem:[%s4370_s16 + $0x10] sm:$0x1]  ;;  %v1920_v6 = vld [vmem:[%s4370_s16 + $0x7b] sm:$0x1]  ;;  %v2262_v48 = vld [vmem:[%s4370_s16 + $0x7] sm:$0x1] }
 0x107   : > { %v1853_v35 = vadd.f32 %v1845_v29, %v1824_v0  ;;  %2062 = vst.msk [vmem:[%s4554_s23 + $0x23] sm:$0x1] %vm662_vm0, %v2054_v20  ;;  %v1968_v24 = vadd.f32 %v1960_v4, %v1939_v54  ;;  %v1932_v49 = vmul.f32 %v5451_v27, %v1919_v10  ;;  %v1817_v16 = vmul.f32 %v5406_v19, %v1804_v57  ;;  %v1891_v4 = vld [vmem:[%s4370_s16 + $0x7a] sm:$0x1]  ;;  %v2089_v0 = vld [vmem:[%s4370_s16 + $0x11] sm:$0x1] }
 0x108   : > { %v2130_v21 = vmul.f32 %v5681_v5, %v2117_v12  ;;  %v1767_v58 = vadd.f32 %v1759_v61, %v1738_v46  ;;  %v2109_v23 = vadd.f32 %v2101_v53, %v2080_v34  ;;  %v2159_v63 = vmul.f32 %v5687_v33, %v2146_v7  ;;  %v2118_v12 = vld [vmem:[%s4370_s16 + $0x12] sm:$0x1]  ;;  %v2147_v20 = vld [vmem:[%s4370_s16 + $0x13] sm:$0x1]  ;;  %v5741_v34 = vld [vmem:[%s4375_s19 + $0x48] ss:$0 sm:$0xff] }
 0x109   : > { %v1882_v44 = vadd.f32 %v1874_v40, %v1853_v35  ;;  %v1997_v41 = vadd.f32 %v1989_v22, %v1968_v24  ;;  %v1961_v19 = vmul.f32 %v5457_v60, %v1948_v32  ;;  %v1990_v15 = vmul.f32 %v5463_v17, %v1977_v47  ;;  %v2233_v22 = vld [vmem:[%s4370_s16 + $0x6] sm:$0x1]  ;;  %v2176_v53 = vld [vmem:[%s4370_s16 + $0x14] sm:$0x1]  ;;  %v2007_v24 = vld [vmem:[%s4370_s16 + $0x7e] sm:$0x1] }
 0x10a   : > { %v1846_v28 = vmul.f32 %v5418_v30, %v1833_v50  ;;  %v1796_v11 = vadd.f32 %v1788_v13, %v1767_v58  ;;  %v2138_v29 = vadd.f32 %v2130_v21, %v2109_v23  ;;  %v2188_v10 = vmul.f32 %v5701_v39, %v2175_v37  ;;  %v1978_v13 = vld [vmem:[%s4370_s16 + $0x7d] sm:$0x1]  ;;  %v2291_v50 = vld [vmem:[%s4370_s16 + $0x8] sm:$0x1]  ;;  %v2320_v58 = vld [vmem:[%s4370_s16 + $0x9] sm:$0x1] }
 0x10b   : > { %v1911_v59 = vadd.f32 %v1903_v14, %v1882_v44  ;;  %v2026_v62 = vadd.f32 %v2018_v52, %v1997_v41  ;;  %v2019_v30 = vmul.f32 %v5473_v31, %v2006_v18  ;;  %v2048_v51 = vmul.f32 %v5483_v36, %v2035_v9  ;;  %v5729_v52 = vld [vmem:[%s4375_s19 + $0x47] ss:$0 sm:$0xff]  ;;  %v1949_v14 = vld [vmem:[%s4370_s16 + $0x7c] sm:$0x1]  ;;  %v2205_v23 = vld [vmem:[%s4370_s16 + $0x15] sm:$0x1] }
 0x10c   : > { %v1875_v8 = vmul.f32 %v5432_v45, %v1862_v55  ;;  %v1825_v25 = vadd.f32 %v1817_v16, %v1796_v11  ;;  %v2167_v61 = vadd.f32 %v2159_v63, %v2138_v29  ;;  %v2217_v57 = vmul.f32 %v5713_v56, %v2204_v2  ;;  %v5755_v55 = vld [vmem:[%s4375_s19 + $0x49] ss:$0 sm:$0xff] }
 0x10d   : > { %v1940_v40 = vadd.f32 %v1932_v49, %v1911_v59  ;;  %v2055_v54 = vadd.f32 %v5667_v38, %v2026_v62  ;;  %v1904_v45 = vmul.f32 %v5440_v42, %v1891_v4  ;;  %v2246_v7 = vmul.f32 %v5718_v3, %v2233_v22  ;;  %v2036_v49 = vld [vmem:[%s4370_s16 + $0x7f] sm:$0x1]  ;;  %v2090_v22 = vld [vmem:[%s4370_s16 + $0x21] sm:$0x1] }
 0x10e   : > { %v2081_v35 = vmul.f32 %v5670_v1, %v2067_v26  ;;  %v1854_v47 = vadd.f32 %v1846_v28, %v1825_v25  ;;  %v2196_v46 = vadd.f32 %v2188_v10, %v2167_v61  ;;  %v2102_v38 = vmul.f32 %v5674_v43, %v2089_v0  ;;  %v2349_v28 = vld [vmem:[%s4370_s16 + $0xa] sm:$0x1]  ;;  %v2234_v10 = vld [vmem:[%s4370_s16 + $0x16] sm:$0x1]  ;;  %v2407_v61 = vld [vmem:[%s4370_s16 + $0xc] sm:$0x1] }
 0x10f   : > { %v1969_v32 = vadd.f32 %v1961_v19, %v1940_v40  ;;  %2063 = vst.msk [vmem:[%s4554_s23 + $0x2b] sm:$0x1] %vm662_vm0, %v2055_v54  ;;  %v1933_v42 = vmul.f32 %v5451_v27, %v1920_v6  ;;  %v2275_v16 = vmul.f32 %v5729_v52, %v2262_v48  ;;  %v2131_v21 = vmul.f32 %v5681_v5, %v2118_v12  ;;  %v2119_v48 = vld [vmem:[%s4370_s16 + $0x22] sm:$0x1]  ;;  %v5786_v54 = vld [vmem:[%s4375_s19 + $0x4d] ss:$0 sm:$0xff] }
 0x110   : > { %v2160_v37 = vmul.f32 %v5687_v33, %v2147_v20  ;;  %v1883_v18 = vadd.f32 %v1875_v8, %v1854_v47  ;;  %v2225_v9 = vadd.f32 %v2217_v57, %v2196_v46  ;;  %v2110_v27 = vadd.f32 %v2102_v38, %v2081_v35  ;;  %v2378_v8 = vld [vmem:[%s4370_s16 + $0xb] sm:$0x1]  ;;  %v2436_v20 = vld [vmem:[%s4370_s16 + $0xd] sm:$0x1]  ;;  %v5796_v47 = vld [vmem:[%s4375_s19 + $0x4e] ss:$0 sm:$0xff] }
 0x111   : > { %v1998_v44 = vadd.f32 %v1990_v15, %v1969_v32  ;;  %v1962_v63 = vmul.f32 %v5457_v60, %v1949_v14  ;;  %v1991_v41 = vmul.f32 %v5463_v17, %v1978_v13  ;;  %v2304_v19 = vmul.f32 %v5741_v34, %v2291_v50  ;;  %v5763_v15 = vld [vmem:[%s4375_s19 + $0x4a] ss:$0 sm:$0xff]  ;;  %v2068_v60 = vld [vmem:[%s4370_s16 + $0x20] sm:$0x1]  ;;  %v2465_v32 = vld [vmem:[%s4370_s16 + $0xe] sm:$0x1] }
 0x112   : > { %v2189_v4 = vmul.f32 %v5701_v39, %v2176_v53  ;;  %v1912_v59 = vadd.f32 %v1904_v45, %v1883_v18  ;;  %v2254_v11 = vadd.f32 %v2246_v7, %v2225_v9  ;;  %v2139_v29 = vadd.f32 %v2131_v21, %v2110_v27  ;;  %v2177_v38 = vld [vmem:[%s4370_s16 + $0x24] sm:$0x1]  ;;  %v5806_v18 = vld [vmem:[%s4375_s19 + $0x4f] ss:$0 sm:$0xff]  ;;  %v2321_v27 = vld [vmem:[%s4370_s16 + $0x19] sm:$0x1] }
 0x113   : > { %v2027_v2 = vadd.f32 %v2019_v30, %v1998_v44  ;;  %v2020_v17 = vmul.f32 %v5473_v31, %v2007_v24  ;;  %v2049_v26 = vmul.f32 %v5483_v36, %v2036_v49  ;;  %v2333_v62 = vmul.f32 %v5755_v55, %v2320_v58  ;;  %v5774_v30 = vld [vmem:[%s4375_s19 + $0x4b] ss:$0 sm:$0xff]  ;;  %v5780_v31 = vld [vmem:[%s4375_s19 + $0x4c] ss:$0 sm:$0xff]  ;;  %v2148_v36 = vld [vmem:[%s4370_s16 + $0x23] sm:$0x1] }
 0x114   : > { %v2218_v6 = vmul.f32 %v5713_v56, %v2205_v23  ;;  %v1941_v40 = vadd.f32 %v1933_v42, %v1912_v59  ;;  %v2283_v25 = vadd.f32 %v2275_v16, %v2254_v11  ;;  %v2168_v57 = vadd.f32 %v2160_v37, %v2139_v29  ;;  %v2494_v24 = vld [vmem:[%s4370_s16 + $0xf] sm:$0x1]  ;;  %v2292_v49 = vld [vmem:[%s4370_s16 + $0x18] sm:$0x1]  ;;  %v2206_v23 = vld [vmem:[%s4370_s16 + $0x25] sm:$0x1] }
 0x115   : > { %v2056_v0 = vadd.f32 %v2048_v51, %v2027_v2  ;;  %v2362_v12 = vmul.f32 %v5763_v15, %v2349_v28  ;;  %v2247_v45 = vmul.f32 %v5718_v3, %v2234_v10  ;;  %v2263_v51 = vld [vmem:[%s4370_s16 + $0x17] sm:$0x1]  ;;  %v2082_v14 = vmul.f32 %v5670_v1, %v2068_v60  ;;  %v2350_v28 = vld [vmem:[%s4370_s16 + $0x1a] sm:$0x1]  ;;  %v2235_v10 = vld [vmem:[%s4370_s16 + $0x26] sm:$0x1] }
 0x116   : > { %v2103_v13 = vmul.f32 %v5674_v43, %v2090_v22  ;;  %v1970_v7 = vadd.f32 %v1962_v63, %v1941_v40  ;;  %v2312_v35 = vadd.f32 %v2304_v19, %v2283_v25  ;;  %v2197_v46 = vadd.f32 %v2189_v4, %v2168_v57  ;;  %v2069_v60 = vld [vmem:[%s4370_s16 + $0x30] sm:$0x1]  ;;  %v2091_v22 = vld [vmem:[%s4370_s16 + $0x31] sm:$0x1] }
 0x117   : > { %2064 = vst.msk [vmem:[%s4554_s23 + $0x33] sm:$0x1] %vm662_vm0, %v2056_v0  ;;  %v2132_v50 = vmul.f32 %v5681_v5, %v2119_v48  ;;  %v2391_v53 = vmul.f32 %v5774_v30, %v2378_v8  ;;  %v2420_v42 = vmul.f32 %v5780_v31, %v2407_v61  ;;  %v2161_v21 = vmul.f32 %v5687_v33, %v2148_v36  ;;  %v2120_v0 = vld [vmem:[%s4370_s16 + $0x32] sm:$0x1]  ;;  %v2264_v36 = vld [vmem:[%s4370_s16 + $0x27] sm:$0x1] }
 0x118   : > { %v2111_v16 = vadd.f32 %v2103_v13, %v2082_v14  ;;  %v1999_v37 = vadd.f32 %v1991_v41, %v1970_v7  ;;  %v2341_v44 = vadd.f32 %v2333_v62, %v2312_v35  ;;  %v2226_v9 = vadd.f32 %v2218_v6, %v2197_v46  ;;  %v2379_v6 = vld [vmem:[%s4370_s16 + $0x1b] sm:$0x1]  ;;  %v2293_v46 = vld [vmem:[%s4370_s16 + $0x28] sm:$0x1] }
 0x119   : > { %v2276_v58 = vmul.f32 %v5729_v52, %v2263_v51  ;;  %v2449_v63 = vmul.f32 %v5786_v54, %v2436_v20  ;;  %v2478_v19 = vmul.f32 %v5796_v47, %v2465_v32  ;;  %v2190_v41 = vmul.f32 %v5701_v39, %v2177_v38  ;;  %v2408_v20 = vld [vmem:[%s4370_s16 + $0x1c] sm:$0x1]  ;;  %v2178_v38 = vld [vmem:[%s4370_s16 + $0x34] sm:$0x1] }
 0x11a   : > { %v2140_v4 = vadd.f32 %v2132_v50, %v2111_v16  ;;  %v2028_v2 = vadd.f32 %v2020_v17, %v1999_v37  ;;  %v2370_v59 = vadd.f32 %v2362_v12, %v2341_v44  ;;  %v2255_v11 = vadd.f32 %v2247_v45, %v2226_v9  ;;  %v2149_v12 = vld [vmem:[%s4370_s16 + $0x33] sm:$0x1]  ;;  %v2437_v45 = vld [vmem:[%s4370_s16 + $0x1d] sm:$0x1] }
 0x11b   : > { %v2305_v29 = vmul.f32 %v5741_v34, %v2292_v49  ;;  %v2507_v62 = vmul.f32 %v5806_v18, %v2494_v24  ;;  %v2334_v8 = vmul.f32 %v5755_v55, %v2321_v27  ;;  %v2219_v17 = vmul.f32 %v5713_v56, %v2206_v23  ;;  %v2495_v24 = vld [vmem:[%s4370_s16 + $0x1f] sm:$0x1]  ;;  %v2322_v27 = vld [vmem:[%s4370_s16 + $0x29] sm:$0x1]  ;;  %v2207_v23 = vld [vmem:[%s4370_s16 + $0x35] sm:$0x1] }
 0x11c   : > { %v2169_v48 = vadd.f32 %v2161_v21, %v2140_v4  ;;  %v2057_v40 = vadd.f32 %v2049_v26, %v2028_v2  ;;  %v2399_v25 = vadd.f32 %v2391_v53, %v2370_v59  ;;  %v2284_v61 = vadd.f32 %v2276_v58, %v2255_v11  ;;  %v2466_v53 = vld [vmem:[%s4370_s16 + $0x1e] sm:$0x1] }
 0x11d   : > { %v2363_v57 = vmul.f32 %v5763_v15, %v2350_v28  ;;  %v2248_v14 = vmul.f32 %v5718_v3, %v2235_v10  ;;  %v2083_v13 = vmul.f32 %v5670_v1, %v2069_v60  ;;  %v2104_v7 = vmul.f32 %v5674_v43, %v2091_v22  ;;  %v2070_v22 = vld [vmem:[%s4370_s16 + $0x40] sm:$0x1] }
 0x11e   : > { %v2198_v51 = vadd.f32 %v2190_v41, %v2169_v48  ;;  %2065 = vst.msk [vmem:[%s4554_s23 + $0x3b] sm:$0x1] %vm662_vm0, %v2057_v40  ;;  %v2428_v26 = vadd.f32 %v2420_v42, %v2399_v25  ;;  %v2313_v35 = vadd.f32 %v2305_v29, %v2284_v61  ;;  %v2392_v32 = vmul.f32 %v5774_v30, %v2379_v6  ;;  %v2351_v41 = vld [vmem:[%s4370_s16 + $0x2a] sm:$0x1]  ;;  %v2121_v25 = vld [vmem:[%s4370_s16 + $0x42] sm:$0x1] }
 0x11f   : > { %v2133_v50 = vmul.f32 %v5681_v5, %v2120_v0  ;;  %v2277_v16 = vmul.f32 %v5729_v52, %v2264_v36  ;;  %v2112_v21 = vadd.f32 %v2104_v7, %v2083_v13  ;;  %v2162_v37 = vmul.f32 %v5687_v33, %v2149_v12  ;;  %v2294_v7 = vld [vmem:[%s4370_s16 + $0x38] sm:$0x1] }
 0x120   : > { %v2227_v49 = vadd.f32 %v2219_v17, %v2198_v51  ;;  %v2457_v42 = vadd.f32 %v2449_v63, %v2428_v26  ;;  %v2342_v44 = vadd.f32 %v2334_v8, %v2313_v35  ;;  %v2421_v9 = vmul.f32 %v5780_v31, %v2408_v20  ;;  %v2236_v63 = vld [vmem:[%s4370_s16 + $0x36] sm:$0x1]  ;;  %v2092_v8 = vld [vmem:[%s4370_s16 + $0x41] sm:$0x1]  ;;  %v2380_v17 = vld [vmem:[%s4370_s16 + $0x2b] sm:$0x1] }
 0x121   : > { %v2450_v58 = vmul.f32 %v5786_v54, %v2437_v45  ;;  %v2306_v4 = vmul.f32 %v5741_v34, %v2293_v46  ;;  %v2141_v2 = vadd.f32 %v2133_v50, %v2112_v21  ;;  %v2191_v59 = vmul.f32 %v5701_v39, %v2178_v38  ;;  %v2150_v20 = vld [vmem:[%s4370_s16 + $0x43] sm:$0x1]  ;;  %v2409_v51 = vld [vmem:[%s4370_s16 + $0x2c] sm:$0x1]  ;;  %v2179_v38 = vld [vmem:[%s4370_s16 + $0x44] sm:$0x1] }
 0x122   : > { %v2256_v28 = vadd.f32 %v2248_v14, %v2227_v49  ;;  %v2486_v11 = vadd.f32 %v2478_v19, %v2457_v42  ;;  %v2371_v29 = vadd.f32 %v2363_v57, %v2342_v44  ;;  %v2479_v10 = vmul.f32 %v5796_v47, %v2466_v53  ;;  %v2265_v19 = vld [vmem:[%s4370_s16 + $0x37] sm:$0x1]  ;;  %v2438_v14 = vld [vmem:[%s4370_s16 + $0x2d] sm:$0x1]  ;;  %v2496_v49 = vld [vmem:[%s4370_s16 + $0x2f] sm:$0x1] }
 0x123   : > { %v2508_v60 = vmul.f32 %v5806_v18, %v2495_v24  ;;  %v2335_v48 = vmul.f32 %v5755_v55, %v2322_v27  ;;  %v2170_v0 = vadd.f32 %v2162_v37, %v2141_v2  ;;  %v2220_v40 = vmul.f32 %v5713_v56, %v2207_v23  ;;  %v2467_v24 = vld [vmem:[%s4370_s16 + $0x2e] sm:$0x1]  ;;  %v2323_v21 = vld [vmem:[%s4370_s16 + $0x39] sm:$0x1]  ;;  %v2352_v2 = vld [vmem:[%s4370_s16 + $0x3a] sm:$0x1] }
 0x124   : > { %v2285_v6 = vadd.f32 %v2277_v16, %v2256_v28  ;;  %v2515_v61 = vadd.f32 %v2507_v62, %v2486_v11  ;;  %v2400_v57 = vadd.f32 %v2392_v32, %v2371_v29  ;;  %v2364_v36 = vmul.f32 %v5763_v15, %v2351_v41  ;;  %v2208_v28 = vld [vmem:[%s4370_s16 + $0x45] sm:$0x1]  ;;  %v2237_v11 = vld [vmem:[%s4370_s16 + $0x46] sm:$0x1] }
 0x125   : > { %v2249_v12 = vmul.f32 %v5718_v3, %v2236_v63  ;;  %v2199_v13 = vadd.f32 %v2191_v59, %v2170_v0  ;;  %v2084_v26 = vmul.f32 %v5670_v1, %v2070_v22  ;;  %v2105_v35 = vmul.f32 %v5674_v43, %v2092_v8 }
 0x126   : > { %v2314_v45 = vadd.f32 %v2306_v4, %v2285_v6  ;;  %2523 = vst.msk [vmem:[%s4554_s23 + $0x4] sm:$0x1] %vm662_vm0, %v2515_v61  ;;  %v2429_v62 = vadd.f32 %v2421_v9, %v2400_v57  ;;  %v2393_v32 = vmul.f32 %v5774_v30, %v2380_v17  ;;  %v2278_v46 = vmul.f32 %v5729_v52, %v2265_v19  ;;  %v2093_v17 = vld [vmem:[%s4370_s16 + $0x51] sm:$0x1]  ;;  %v2266_v61 = vld [vmem:[%s4370_s16 + $0x47] sm:$0x1] }
 0x127   : > { %v2134_v50 = vmul.f32 %v5681_v5, %v2121_v25  ;;  %v2228_v16 = vadd.f32 %v2220_v40, %v2199_v13  ;;  %v2113_v37 = vadd.f32 %v2105_v35, %v2084_v26  ;;  %v2163_v42 = vmul.f32 %v5687_v33, %v2150_v20  ;;  %v2122_v57 = vld [vmem:[%s4370_s16 + $0x52] sm:$0x1]  ;;  %v2410_v20 = vld [vmem:[%s4370_s16 + $0x3c] sm:$0x1]  ;;  %v2295_v35 = vld [vmem:[%s4370_s16 + $0x48] sm:$0x1] }
 0x128   : > { %v2343_v53 = vadd.f32 %v2335_v48, %v2314_v45  ;;  %v2458_v44 = vadd.f32 %v2450_v58, %v2429_v62  ;;  %v2422_v9 = vmul.f32 %v5780_v31, %v2409_v51  ;;  %v2451_v27 = vmul.f32 %v5786_v54, %v2438_v14  ;;  %v2071_v58 = vld [vmem:[%s4370_s16 + $0x50] sm:$0x1]  ;;  %v2381_v48 = vld [vmem:[%s4370_s16 + $0x3b] sm:$0x1] }
 0x129   : > { %v2307_v23 = vmul.f32 %v5741_v34, %v2294_v7  ;;  %v2257_v41 = vadd.f32 %v2249_v12, %v2228_v16  ;;  %v2142_v59 = vadd.f32 %v2134_v50, %v2113_v37  ;;  %v2192_v63 = vmul.f32 %v5701_v39, %v2179_v38  ;;  %v2439_v7 = vld [vmem:[%s4370_s16 + $0x3d] sm:$0x1]  ;;  %v2497_v16 = vld [vmem:[%s4370_s16 + $0x3f] sm:$0x1]  ;;  %v2324_v37 = vld [vmem:[%s4370_s16 + $0x49] sm:$0x1] }
 0x12a   : > { %v2372_v4 = vadd.f32 %v2364_v36, %v2343_v53  ;;  %v2487_v29 = vadd.f32 %v2479_v10, %v2458_v44  ;;  %v2480_v22 = vmul.f32 %v5796_v47, %v2467_v24  ;;  %v2509_v8 = vmul.f32 %v5806_v18, %v2496_v49  ;;  %v2151_v10 = vld [vmem:[%s4370_s16 + $0x53] sm:$0x1]  ;;  %v2209_v44 = vld [vmem:[%s4370_s16 + $0x55] sm:$0x1] }
 0x12b   : > { %v2336_v6 = vmul.f32 %v5755_v55, %v2323_v21  ;;  %v2286_v40 = vadd.f32 %v2278_v46, %v2257_v41  ;;  %v2171_v19 = vadd.f32 %v2163_v42, %v2142_v59  ;;  %v2221_v25 = vmul.f32 %v5713_v56, %v2208_v28  ;;  %v2468_v46 = vld [vmem:[%s4370_s16 + $0x3e] sm:$0x1] }
 0x12c   : > { %v2401_v0 = vadd.f32 %v2393_v32, %v2372_v4  ;;  %v2516_v36 = vadd.f32 %v2508_v60, %v2487_v29  ;;  %v2365_v12 = vmul.f32 %v5763_v15, %v2352_v2  ;;  %v2250_v45 = vmul.f32 %v5718_v3, %v2237_v11  ;;  %v2180_v32 = vld [vmem:[%s4370_s16 + $0x54] sm:$0x1]  ;;  %v2353_v4 = vld [vmem:[%s4370_s16 + $0x4a] sm:$0x1]  ;;  %v2238_v11 = vld [vmem:[%s4370_s16 + $0x56] sm:$0x1] }
 0x12d   : > { %v2085_v51 = vmul.f32 %v5670_v1, %v2071_v58  ;;  %v2315_v13 = vadd.f32 %v2307_v23, %v2286_v40  ;;  %v2200_v26 = vadd.f32 %v2192_v63, %v2171_v19  ;;  %v2106_v62 = vmul.f32 %v5674_v43, %v2093_v17  ;;  %v2072_v58 = vld [vmem:[%s4370_s16 + $0x60] sm:$0x1]  ;;  %v2094_v29 = vld [vmem:[%s4370_s16 + $0x61] sm:$0x1]  ;;  %v2123_v40 = vld [vmem:[%s4370_s16 + $0x62] sm:$0x1] }
 0x12e   : > { %v2430_v14 = vadd.f32 %v2422_v9, %v2401_v0  ;;  %2524 = vst.msk [vmem:[%s4554_s23 + $0xc] sm:$0x1] %vm662_vm0, %v2516_v36  ;;  %v2394_v60 = vmul.f32 %v5774_v30, %v2381_v48  ;;  %v2279_v50 = vmul.f32 %v5729_v52, %v2266_v61  ;;  %v2135_v38 = vmul.f32 %v5681_v5, %v2122_v57  ;;  %v2382_v61 = vld [vmem:[%s4370_s16 + $0x4b] sm:$0x1]  ;;  %v2411_v57 = vld [vmem:[%s4370_s16 + $0x4c] sm:$0x1] }
 0x12f   : > { %v2164_v53 = vmul.f32 %v5687_v33, %v2151_v10  ;;  %v2344_v49 = vadd.f32 %v2336_v6, %v2315_v13  ;;  %v2229_v21 = vadd.f32 %v2221_v25, %v2200_v26  ;;  %v2114_v42 = vadd.f32 %v2106_v62, %v2085_v51  ;;  %v2152_v36 = vld [vmem:[%s4370_s16 + $0x63] sm:$0x1]  ;;  %v2469_v26 = vld [vmem:[%s4370_s16 + $0x4e] sm:$0x1] }
 0x130   : > { %v2459_v24 = vadd.f32 %v2451_v27, %v2430_v14  ;;  %v2423_v9 = vmul.f32 %v5780_v31, %v2410_v20  ;;  %v2452_v23 = vmul.f32 %v5786_v54, %v2439_v7  ;;  %v2308_v28 = vmul.f32 %v5741_v34, %v2295_v35  ;;  %v2440_v7 = vld [vmem:[%s4370_s16 + $0x4d] sm:$0x1] }
 0x131   : > { %v2193_v41 = vmul.f32 %v5701_v39, %v2180_v32  ;;  %v2373_v2 = vadd.f32 %v2365_v12, %v2344_v49  ;;  %v2258_v59 = vadd.f32 %v2250_v45, %v2229_v21  ;;  %v2143_v63 = vadd.f32 %v2135_v38, %v2114_v42  ;;  %v2267_v45 = vld [vmem:[%s4370_s16 + $0x57] sm:$0x1]  ;;  %v2181_v32 = vld [vmem:[%s4370_s16 + $0x64] sm:$0x1]  ;;  %v2325_v42 = vld [vmem:[%s4370_s16 + $0x59] sm:$0x1] }
 0x132   : > { %v2488_v27 = vadd.f32 %v2480_v22, %v2459_v24  ;;  %v2481_v6 = vmul.f32 %v5796_v47, %v2468_v46  ;;  %v2510_v48 = vmul.f32 %v5806_v18, %v2497_v16  ;;  %v2337_v17 = vmul.f32 %v5755_v55, %v2324_v37  ;;  %v2498_v16 = vld [vmem:[%s4370_s16 + $0x4f] sm:$0x1] }
 0x133   : > { %v2222_v0 = vmul.f32 %v5713_v56, %v2209_v44  ;;  %v2402_v19 = vadd.f32 %v2394_v60, %v2373_v2  ;;  %v2287_v25 = vadd.f32 %v2279_v50, %v2258_v59  ;;  %v2172_v10 = vadd.f32 %v2164_v53, %v2143_v63  ;;  %v2296_v50 = vld [vmem:[%s4370_s16 + $0x58] sm:$0x1]  ;;  %v2210_v44 = vld [vmem:[%s4370_s16 + $0x65] sm:$0x1] }
 0x134   : > { %v2517_v22 = vadd.f32 %v2509_v8, %v2488_v27  ;;  %v2366_v12 = vmul.f32 %v5763_v15, %v2353_v4  ;;  %v2251_v20 = vmul.f32 %v5718_v3, %v2238_v11  ;;  %v2086_v51 = vmul.f32 %v5670_v1, %v2072_v58  ;;  %v2354_v4 = vld [vmem:[%s4370_s16 + $0x5a] sm:$0x1]  ;;  %v2239_v11 = vld [vmem:[%s4370_s16 + $0x66] sm:$0x1]  ;;  %v2073_v58 = vld [vmem:[%s4370_s16 + $0x70] sm:$0x1] }
 0x135   : > { %v2107_v14 = vmul.f32 %v5674_v43, %v2094_v29  ;;  %v2431_v8 = vadd.f32 %v2423_v9, %v2402_v19  ;;  %v2316_v13 = vadd.f32 %v2308_v28, %v2287_v25  ;;  %v2201_v35 = vadd.f32 %v2193_v41, %v2172_v10  ;;  %v2095_v29 = vld [vmem:[%s4370_s16 + $0x71] sm:$0x1]  ;;  %v2124_v19 = vld [vmem:[%s4370_s16 + $0x72] sm:$0x1] }
 0x136   : > { %2525 = vst.msk [vmem:[%s4554_s23 + $0x14] sm:$0x1] %vm662_vm0, %v2517_v22  ;;  %v2136_v62 = vmul.f32 %v5681_v5, %v2123_v40  ;;  %v2395_v60 = vmul.f32 %v5774_v30, %v2382_v61  ;;  %v2424_v46 = vmul.f32 %v5780_v31, %v2411_v57  ;;  %v2165_v53 = vmul.f32 %v5687_v33, %v2152_v36  ;;  %v2383_v40 = vld [vmem:[%s4370_s16 + $0x5b] sm:$0x1]  ;;  %v2268_v36 = vld [vmem:[%s4370_s16 + $0x67] sm:$0x1] }
 0x137   : > { %v2115_v38 = vadd.f32 %v2107_v14, %v2086_v51  ;;  %v2460_v24 = vadd.f32 %v2452_v23, %v2431_v8  ;;  %v2345_v49 = vadd.f32 %v2337_v17, %v2316_v13  ;;  %v2230_v21 = vadd.f32 %v2222_v0, %v2201_v35  ;;  %v2297_v35 = vld [vmem:[%s4370_s16 + $0x68] sm:$0x1] }
 0x138   : > { %v2280_v37 = vmul.f32 %v5729_v52, %v2267_v45  ;;  %v2453_v9 = vmul.f32 %v5786_v54, %v2440_v7  ;;  %v2482_v28 = vmul.f32 %v5796_v47, %v2469_v26  ;;  %v2194_v23 = vmul.f32 %v5701_v39, %v2181_v32  ;;  %v2441_v45 = vld [vmem:[%s4370_s16 + $0x5d] sm:$0x1]  ;;  %v2182_v32 = vld [vmem:[%s4370_s16 + $0x74] sm:$0x1] }
 0x139   : > { %v2144_v41 = vadd.f32 %v2136_v62, %v2115_v38  ;;  %v2489_v27 = vadd.f32 %v2481_v6, %v2460_v24  ;;  %v2374_v2 = vadd.f32 %v2366_v12, %v2345_v49  ;;  %v2259_v59 = vadd.f32 %v2251_v20, %v2230_v21  ;;  %v2153_v12 = vld [vmem:[%s4370_s16 + $0x73] sm:$0x1]  ;;  %v2412_v20 = vld [vmem:[%s4370_s16 + $0x5c] sm:$0x1]  ;;  %v2355_v21 = vld [vmem:[%s4370_s16 + $0x6a] sm:$0x1] }
 0x13a   : > { %v2309_v63 = vmul.f32 %v5741_v34, %v2296_v50  ;;  %v2511_v17 = vmul.f32 %v5806_v18, %v2498_v16  ;;  %v2338_v0 = vmul.f32 %v5755_v55, %v2325_v42  ;;  %v2223_v6 = vmul.f32 %v5713_v56, %v2210_v44  ;;  %v2499_v50 = vld [vmem:[%s4370_s16 + $0x5f] sm:$0x1] }
 0x13b   : > { %v2173_v22 = vadd.f32 %v2165_v53, %v2144_v41  ;;  %v2518_v25 = vadd.f32 %v2510_v48, %v2489_v27  ;;  %v2403_v61 = vadd.f32 %v2395_v60, %v2374_v2  ;;  %v2288_v57 = vadd.f32 %v2280_v37, %v2259_v59  ;;  %v2470_v60 = vld [vmem:[%s4370_s16 + $0x5e] sm:$0x1]  ;;  %v2211_v37 = vld [vmem:[%s4370_s16 + $0x75] sm:$0x1] }
 0x13c   : > { %v2367_v10 = vmul.f32 %v5763_v15, %v2354_v4  ;;  %v2252_v14 = vmul.f32 %v5718_v3, %v2239_v11  ;;  %v2087_v8 = vmul.f32 %v5670_v1, %v2073_v58  ;;  %v2108_v13 = vmul.f32 %v5674_v43, %v2095_v29  ;;  %v2384_v4 = vld [vmem:[%s4370_s16 + $0x6b] sm:$0x1]  ;;  %v5993_v11 = vld [vmem:[%s4375_s19 + $0x50] ss:$0 sm:$0xff]  ;;  %v2553_v58 = vld [vmem:[%s4370_s16 + $0x1] sm:$0x1] }
 0x13d   : > { %v2202_v51 = vadd.f32 %v2194_v23, %v2173_v22  ;;  %2526 = vst.msk [vmem:[%s4554_s23 + $0x1c] sm:$0x1] %vm662_vm0, %v2518_v25  ;;  %v2432_v48 = vadd.f32 %v2424_v46, %v2403_v61  ;;  %v2317_v7 = vadd.f32 %v2309_v63, %v2288_v57  ;;  %v2396_v26 = vmul.f32 %v5774_v30, %v2383_v40  ;;  %v2531_v23 = vld [vmem:[%s4370_s16] sm:$0x1]  ;;  %v5997_v29 = vld [vmem:[%s4375_s19 + $0x51] ss:$0 sm:$0xff] }
 0x13e   : > { %v2137_v62 = vmul.f32 %v5681_v5, %v2124_v19  ;;  %v2281_v1 = vmul.f32 %v5729_v52, %v2268_v36  ;;  %v2116_v43 = vadd.f32 %v2108_v13, %v2087_v8  ;;  %v2166_v46 = vmul.f32 %v5687_v33, %v2153_v12  ;;  %v2326_v5 = vld [vmem:[%s4370_s16 + $0x69] sm:$0x1]  ;;  %v2269_v22 = vld [vmem:[%s4370_s16 + $0x77] sm:$0x1]  ;;  %v6004_v19 = vld [vmem:[%s4375_s19 + $0x52] ss:$0 sm:$0xff] }
 0x13f   : > { %v2231_v38 = vadd.f32 %v2223_v6, %v2202_v51  ;;  %v2461_v53 = vadd.f32 %v2453_v9, %v2432_v48  ;;  %v2346_v24 = vadd.f32 %v2338_v0, %v2317_v7  ;;  %v2425_v49 = vmul.f32 %v5780_v31, %v2412_v20  ;;  %v2240_v9 = vld [vmem:[%s4370_s16 + $0x76] sm:$0x1]  ;;  %v2582_v6 = vld [vmem:[%s4370_s16 + $0x2] sm:$0x1]  ;;  %v2611_v36 = vld [vmem:[%s4370_s16 + $0x3] sm:$0x1] }
 0x140   : > { %v2454_v16 = vmul.f32 %v5786_v54, %v2441_v45  ;;  %v2310_v44 = vmul.f32 %v5741_v34, %v2297_v35  ;;  %v2145_v41 = vadd.f32 %v2137_v62, %v2116_v43  ;;  %v2195_v33 = vmul.f32 %v5701_v39, %v2182_v32  ;;  %v6010_v12 = vld [vmem:[%s4375_s19 + $0x53] ss:$0 sm:$0xff]  ;;  %v2442_v45 = vld [vmem:[%s4370_s16 + $0x6d] sm:$0x1]  ;;  %v6024_v35 = vld [vmem:[%s4375_s19 + $0x54] ss:$0 sm:$0xff] }
 0x141   : > { %v2260_v42 = vadd.f32 %v2252_v14, %v2231_v38  ;;  %v2490_v27 = vadd.f32 %v2482_v28, %v2461_v53  ;;  %v2375_v2 = vadd.f32 %v2367_v10, %v2346_v24  ;;  %v2483_v59 = vmul.f32 %v5796_v47, %v2470_v60  ;;  %v2298_v14 = vld [vmem:[%s4370_s16 + $0x78] sm:$0x1]  ;;  %v2471_v32 = vld [vmem:[%s4370_s16 + $0x6e] sm:$0x1]  ;;  %v2500_v60 = vld [vmem:[%s4370_s16 + $0x6f] sm:$0x1] }
 0x142   : > { %v5990_v63 = vmul.f32 %v5806_v18, %v2499_v50  ;;  %v2339_v0 = vmul.f32 %v5755_v55, %v2326_v5  ;;  %v2174_v28 = vadd.f32 %v2166_v46, %v2145_v41  ;;  %v2224_v40 = vmul.f32 %v5713_v56, %v2211_v37  ;;  %v2413_v56 = vld [vmem:[%s4370_s16 + $0x6c] sm:$0x1]  ;;  %v2327_v38 = vld [vmem:[%s4370_s16 + $0x79] sm:$0x1]  ;;  %v2669_v5 = vld [vmem:[%s4370_s16 + $0x5] sm:$0x1] }
 0x143   : > { %v2289_v39 = vadd.f32 %v2281_v1, %v2260_v42  ;;  %v2519_v25 = vadd.f32 %v2511_v17, %v2490_v27  ;;  %v2404_v61 = vadd.f32 %v2396_v26, %v2375_v2  ;;  %v2368_v57 = vmul.f32 %v5763_v15, %v2355_v21  ;;  %v2640_v26 = vld [vmem:[%s4370_s16 + $0x4] sm:$0x1]  ;;  %v6036_v21 = vld [vmem:[%s4375_s19 + $0x55] ss:$0 sm:$0xff]  ;;  %v6041_v41 = vld [vmem:[%s4375_s19 + $0x56] ss:$0 sm:$0xff] }
 0x144   : > { %v2253_v10 = vmul.f32 %v5718_v3, %v2240_v9  ;;  %v2203_v51 = vadd.f32 %v2195_v33, %v2174_v28  ;;  %v2545_v17 = vmul.f32 %v5993_v11, %v2531_v23  ;;  %v2566_v8 = vmul.f32 %v5997_v29, %v2553_v58  ;;  %v2532_v33 = vld [vmem:[%s4370_s16 + $0x10] sm:$0x1]  ;;  %v2385_v2 = vld [vmem:[%s4370_s16 + $0x7b] sm:$0x1]  ;;  %v2727_v58 = vld [vmem:[%s4370_s16 + $0x7] sm:$0x1] }
 0x145   : > { %v2318_v20 = vadd.f32 %v2310_v44, %v2289_v39  ;;  %2527 = vst.msk [vmem:[%s4554_s23 + $0x24] sm:$0x1] %vm662_vm0, %v2519_v25  ;;  %v2433_v13 = vadd.f32 %v2425_v49, %v2404_v61  ;;  %v2397_v3 = vmul.f32 %v5774_v30, %v2384_v4  ;;  %v2282_v48 = vmul.f32 %v5729_v52, %v2269_v22  ;;  %v2356_v49 = vld [vmem:[%s4370_s16 + $0x7a] sm:$0x1]  ;;  %v2554_v39 = vld [vmem:[%s4370_s16 + $0x11] sm:$0x1] }
 0x146   : > { %v2595_v7 = vmul.f32 %v6004_v19, %v2582_v6  ;;  %v2232_v50 = vadd.f32 %v2224_v40, %v2203_v51  ;;  %v2574_v1 = vadd.f32 %v2566_v8, %v2545_v17  ;;  %v2624_v43 = vmul.f32 %v6010_v12, %v2611_v36  ;;  %v2583_v6 = vld [vmem:[%s4370_s16 + $0x12] sm:$0x1]  ;;  %v2612_v25 = vld [vmem:[%s4370_s16 + $0x13] sm:$0x1]  ;;  %v6064_v17 = vld [vmem:[%s4375_s19 + $0x58] ss:$0 sm:$0xff] }
 0x147   : > { %v2347_v62 = vadd.f32 %v2339_v0, %v2318_v20  ;;  %v2462_v46 = vadd.f32 %v2454_v16, %v2433_v13  ;;  %v2426_v52 = vmul.f32 %v5780_v31, %v2413_v56  ;;  %v2455_v53 = vmul.f32 %v5786_v54, %v2442_v45  ;;  %v2698_v16 = vld [vmem:[%s4370_s16 + $0x6] sm:$0x1]  ;;  %v2641_v8 = vld [vmem:[%s4370_s16 + $0x14] sm:$0x1]  ;;  %v2472_v13 = vld [vmem:[%s4370_s16 + $0x7e] sm:$0x1] }
 0x148   : > { %v2311_v24 = vmul.f32 %v5741_v34, %v2298_v14  ;;  %v2261_v42 = vadd.f32 %v2253_v10, %v2232_v50  ;;  %v2603_v44 = vadd.f32 %v2595_v7, %v2574_v1  ;;  %v2653_v4 = vmul.f32 %v6024_v35, %v2640_v26  ;;  %v2443_v10 = vld [vmem:[%s4370_s16 + $0x7d] sm:$0x1]  ;;  %v2756_v14 = vld [vmem:[%s4370_s16 + $0x8] sm:$0x1]  ;;  %v2785_v50 = vld [vmem:[%s4370_s16 + $0x9] sm:$0x1] }
 0x149   : > { %v2376_v37 = vadd.f32 %v2368_v57, %v2347_v62  ;;  %v2491_v9 = vadd.f32 %v2483_v59, %v2462_v46  ;;  %v2484_v34 = vmul.f32 %v5796_v47, %v2471_v32  ;;  %v2513_v23 = vmul.f32 %v5806_v18, %v2500_v60  ;;  %v6052_v59 = vld [vmem:[%s4375_s19 + $0x57] ss:$0 sm:$0xff]  ;;  %v2414_v57 = vld [vmem:[%s4370_s16 + $0x7c] sm:$0x1]  ;;  %v2670_v1 = vld [vmem:[%s4370_s16 + $0x15] sm:$0x1] }
 0x14a   : > { %v2340_v27 = vmul.f32 %v5755_v55, %v2327_v38  ;;  %v2290_v28 = vadd.f32 %v2282_v48, %v2261_v42  ;;  %v2632_v40 = vadd.f32 %v2624_v43, %v2603_v44  ;;  %v2682_v22 = vmul.f32 %v6036_v21, %v2669_v5  ;;  %v6078_v38 = vld [vmem:[%s4375_s19 + $0x59] ss:$0 sm:$0xff] }
 0x14b   : > { %v2405_v0 = vadd.f32 %v2397_v3, %v2376_v37  ;;  %v2520_v61 = vadd.f32 %v5990_v63, %v2491_v9  ;;  %v2369_v55 = vmul.f32 %v5763_v15, %v2356_v49  ;;  %v2711_v36 = vmul.f32 %v6041_v41, %v2698_v16  ;;  %v2501_v3 = vld [vmem:[%s4370_s16 + $0x7f] sm:$0x1]  ;;  %v2555_v16 = vld [vmem:[%s4370_s16 + $0x21] sm:$0x1] }
 0x14c   : > { %v2546_v20 = vmul.f32 %v5993_v11, %v2532_v33  ;;  %v2319_v45 = vadd.f32 %v2311_v24, %v2290_v28  ;;  %v2661_v51 = vadd.f32 %v2653_v4, %v2632_v40  ;;  %v2567_v63 = vmul.f32 %v5997_v29, %v2554_v39  ;;  %v2814_v24 = vld [vmem:[%s4370_s16 + $0xa] sm:$0x1]  ;;  %v2699_v4 = vld [vmem:[%s4370_s16 + $0x16] sm:$0x1]  ;;  %v2872_v40 = vld [vmem:[%s4370_s16 + $0xc] sm:$0x1] }
 0x14d   : > { %v2434_v56 = vadd.f32 %v2426_v52, %v2405_v0  ;;  %2528 = vst.msk [vmem:[%s4554_s23 + $0x2c] sm:$0x1] %vm662_vm0, %v2520_v61  ;;  %v2398_v15 = vmul.f32 %v5774_v30, %v2385_v2  ;;  %v2740_v48 = vmul.f32 %v6052_v59, %v2727_v58  ;;  %v2596_v7 = vmul.f32 %v6004_v19, %v2583_v6  ;;  %v2584_v58 = vld [vmem:[%s4370_s16 + $0x22] sm:$0x1]  ;;  %v6109_v61 = vld [vmem:[%s4375_s19 + $0x5d] ss:$0 sm:$0xff] }
 0x14e   : > { %v2625_v26 = vmul.f32 %v6010_v12, %v2612_v25  ;;  %v2348_v32 = vadd.f32 %v2340_v27, %v2319_v45  ;;  %v2690_v60 = vadd.f32 %v2682_v22, %v2661_v51  ;;  %v2575_v30 = vadd.f32 %v2567_v63, %v2546_v20  ;;  %v2843_v27 = vld [vmem:[%s4370_s16 + $0xb] sm:$0x1]  ;;  %v2901_v25 = vld [vmem:[%s4370_s16 + $0xd] sm:$0x1]  ;;  %v6119_v45 = vld [vmem:[%s4375_s19 + $0x5e] ss:$0 sm:$0xff] }
 0x14f   : > { %v2463_v62 = vadd.f32 %v2455_v53, %v2434_v56  ;;  %v2427_v43 = vmul.f32 %v5780_v31, %v2414_v57  ;;  %v2456_v46 = vmul.f32 %v5786_v54, %v2443_v10  ;;  %v2769_v52 = vmul.f32 %v6064_v17, %v2756_v14  ;;  %v6086_v53 = vld [vmem:[%s4375_s19 + $0x5a] ss:$0 sm:$0xff]  ;;  %v2533_v31 = vld [vmem:[%s4370_s16 + $0x20] sm:$0x1]  ;;  %v2930_v56 = vld [vmem:[%s4370_s16 + $0xe] sm:$0x1] }
 0x150   : > { %v2654_v49 = vmul.f32 %v6024_v35, %v2641_v8  ;;  %v2377_v37 = vadd.f32 %v2369_v55, %v2348_v32  ;;  %v2719_v42 = vadd.f32 %v2711_v36, %v2690_v60  ;;  %v2604_v44 = vadd.f32 %v2596_v7, %v2575_v30  ;;  %v2642_v63 = vld [vmem:[%s4370_s16 + $0x24] sm:$0x1]  ;;  %v6129_v32 = vld [vmem:[%s4375_s19 + $0x5f] ss:$0 sm:$0xff]  ;;  %v2786_v30 = vld [vmem:[%s4370_s16 + $0x19] sm:$0x1] }
 0x151   : > { %v2492_v5 = vadd.f32 %v2484_v34, %v2463_v62  ;;  %v2485_v54 = vmul.f32 %v5796_v47, %v2472_v13  ;;  %v2514_v33 = vmul.f32 %v5806_v18, %v2501_v3  ;;  %v2798_v9 = vmul.f32 %v6078_v38, %v2785_v50  ;;  %v6097_v34 = vld [vmem:[%s4375_s19 + $0x5b] ss:$0 sm:$0xff]  ;;  %v6103_v47 = vld [vmem:[%s4375_s19 + $0x5c] ss:$0 sm:$0xff]  ;;  %v2613_v18 = vld [vmem:[%s4370_s16 + $0x23] sm:$0x1] }
 0x152   : > { %v2683_v2 = vmul.f32 %v6036_v21, %v2670_v1  ;;  %v2406_v0 = vadd.f32 %v2398_v15, %v2377_v37  ;;  %v2748_v28 = vadd.f32 %v2740_v48, %v2719_v42  ;;  %v2633_v22 = vadd.f32 %v2625_v26, %v2604_v44  ;;  %v2959_v13 = vld [vmem:[%s4370_s16 + $0xf] sm:$0x1]  ;;  %v2757_v3 = vld [vmem:[%s4370_s16 + $0x18] sm:$0x1]  ;;  %v2671_v1 = vld [vmem:[%s4370_s16 + $0x25] sm:$0x1] }
 0x153   : > { %v2521_v39 = vadd.f32 %v2513_v23, %v2492_v5  ;;  %v2827_v6 = vmul.f32 %v6086_v53, %v2814_v24  ;;  %v2712_v55 = vmul.f32 %v6041_v41, %v2699_v4  ;;  %v2728_v23 = vld [vmem:[%s4370_s16 + $0x17] sm:$0x1]  ;;  %v2547_v57 = vmul.f32 %v5993_v11, %v2533_v31  ;;  %v2815_v24 = vld [vmem:[%s4370_s16 + $0x1a] sm:$0x1]  ;;  %v2700_v4 = vld [vmem:[%s4370_s16 + $0x26] sm:$0x1] }
 0x154   : > { %v2568_v10 = vmul.f32 %v5997_v29, %v2555_v16  ;;  %v2435_v36 = vadd.f32 %v2427_v43, %v2406_v0  ;;  %v2777_v20 = vadd.f32 %v2769_v52, %v2748_v28  ;;  %v2662_v51 = vadd.f32 %v2654_v49, %v2633_v22  ;;  %v2534_v31 = vld [vmem:[%s4370_s16 + $0x30] sm:$0x1]  ;;  %v2556_v16 = vld [vmem:[%s4370_s16 + $0x31] sm:$0x1] }
 0x155   : > { %2529 = vst.msk [vmem:[%s4554_s23 + $0x34] sm:$0x1] %vm662_vm0, %v2521_v39  ;;  %v2597_v14 = vmul.f32 %v6004_v19, %v2584_v58  ;;  %v2856_v8 = vmul.f32 %v6097_v34, %v2843_v27  ;;  %v2885_v15 = vmul.f32 %v6103_v47, %v2872_v40  ;;  %v2626_v7 = vmul.f32 %v6010_v12, %v2613_v18  ;;  %v2585_v39 = vld [vmem:[%s4370_s16 + $0x32] sm:$0x1]  ;;  %v2729_v18 = vld [vmem:[%s4370_s16 + $0x27] sm:$0x1] }
 0x156   : > { %v2576_v48 = vadd.f32 %v2568_v10, %v2547_v57  ;;  %v2464_v26 = vadd.f32 %v2456_v46, %v2435_v36  ;;  %v2806_v62 = vadd.f32 %v2798_v9, %v2777_v20  ;;  %v2691_v60 = vadd.f32 %v2683_v2, %v2662_v51  ;;  %v2844_v2 = vld [vmem:[%s4370_s16 + $0x1b] sm:$0x1]  ;;  %v2758_v51 = vld [vmem:[%s4370_s16 + $0x28] sm:$0x1] }
 0x157   : > { %v2741_v50 = vmul.f32 %v6052_v59, %v2728_v23  ;;  %v2914_v43 = vmul.f32 %v6109_v61, %v2901_v25  ;;  %v2943_v52 = vmul.f32 %v6119_v45, %v2930_v56  ;;  %v2655_v46 = vmul.f32 %v6024_v35, %v2642_v63  ;;  %v2873_v25 = vld [vmem:[%s4370_s16 + $0x1c] sm:$0x1]  ;;  %v2643_v63 = vld [vmem:[%s4370_s16 + $0x34] sm:$0x1] }
 0x158   : > { %v2605_v49 = vadd.f32 %v2597_v14, %v2576_v48  ;;  %v2493_v5 = vadd.f32 %v2485_v54, %v2464_v26  ;;  %v2835_v37 = vadd.f32 %v2827_v6, %v2806_v62  ;;  %v2720_v42 = vadd.f32 %v2712_v55, %v2691_v60  ;;  %v2614_v6 = vld [vmem:[%s4370_s16 + $0x33] sm:$0x1]  ;;  %v2902_v55 = vld [vmem:[%s4370_s16 + $0x1d] sm:$0x1] }
 0x159   : > { %v2770_v44 = vmul.f32 %v6064_v17, %v2757_v3  ;;  %v2972_v9 = vmul.f32 %v6129_v32, %v2959_v13  ;;  %v2799_v27 = vmul.f32 %v6078_v38, %v2786_v30  ;;  %v2684_v54 = vmul.f32 %v6036_v21, %v2671_v1  ;;  %v2960_v13 = vld [vmem:[%s4370_s16 + $0x1f] sm:$0x1]  ;;  %v2787_v30 = vld [vmem:[%s4370_s16 + $0x29] sm:$0x1]  ;;  %v2672_v1 = vld [vmem:[%s4370_s16 + $0x35] sm:$0x1] }
 0x15a   : > { %v2634_v58 = vadd.f32 %v2626_v7, %v2605_v49  ;;  %v2522_v0 = vadd.f32 %v2514_v33, %v2493_v5  ;;  %v2864_v28 = vadd.f32 %v2856_v8, %v2835_v37  ;;  %v2749_v40 = vadd.f32 %v2741_v50, %v2720_v42  ;;  %v2931_v8 = vld [vmem:[%s4370_s16 + $0x1e] sm:$0x1] }
 0x15b   : > { %v2828_v22 = vmul.f32 %v6086_v53, %v2815_v24  ;;  %v2713_v57 = vmul.f32 %v6041_v41, %v2700_v4  ;;  %v2548_v10 = vmul.f32 %v5993_v11, %v2534_v31  ;;  %v2569_v36 = vmul.f32 %v5997_v29, %v2556_v16  ;;  %v2535_v16 = vld [vmem:[%s4370_s16 + $0x40] sm:$0x1] }
 0x15c   : > { %v2663_v23 = vadd.f32 %v2655_v46, %v2634_v58  ;;  %2530 = vst.msk [vmem:[%s4554_s23 + $0x3c] sm:$0x1] %vm662_vm0, %v2522_v0  ;;  %v2893_v33 = vadd.f32 %v2885_v15, %v2864_v28  ;;  %v2778_v20 = vadd.f32 %v2770_v44, %v2749_v40  ;;  %v2857_v56 = vmul.f32 %v6097_v34, %v2844_v2  ;;  %v2816_v46 = vld [vmem:[%s4370_s16 + $0x2a] sm:$0x1]  ;;  %v2586_v28 = vld [vmem:[%s4370_s16 + $0x42] sm:$0x1] }
 0x15d   : > { %v2598_v14 = vmul.f32 %v6004_v19, %v2585_v39  ;;  %v2742_v48 = vmul.f32 %v6052_v59, %v2729_v18  ;;  %v2577_v7 = vadd.f32 %v2569_v36, %v2548_v10  ;;  %v2627_v26 = vmul.f32 %v6010_v12, %v2614_v6  ;;  %v2759_v36 = vld [vmem:[%s4370_s16 + $0x38] sm:$0x1] }
 0x15e   : > { %v2692_v3 = vadd.f32 %v2684_v54, %v2663_v23  ;;  %v2922_v15 = vadd.f32 %v2914_v43, %v2893_v33  ;;  %v2807_v62 = vadd.f32 %v2799_v27, %v2778_v20  ;;  %v2886_v60 = vmul.f32 %v6103_v47, %v2873_v25  ;;  %v2701_v43 = vld [vmem:[%s4370_s16 + $0x36] sm:$0x1]  ;;  %v2557_v27 = vld [vmem:[%s4370_s16 + $0x41] sm:$0x1]  ;;  %v2845_v54 = vld [vmem:[%s4370_s16 + $0x2b] sm:$0x1] }
 0x15f   : > { %v2915_v50 = vmul.f32 %v6109_v61, %v2902_v55  ;;  %v2771_v49 = vmul.f32 %v6064_v17, %v2758_v51  ;;  %v2606_v5 = vadd.f32 %v2598_v14, %v2577_v7  ;;  %v2656_v37 = vmul.f32 %v6024_v35, %v2643_v63  ;;  %v2615_v25 = vld [vmem:[%s4370_s16 + $0x43] sm:$0x1]  ;;  %v2874_v23 = vld [vmem:[%s4370_s16 + $0x2c] sm:$0x1]  ;;  %v2644_v63 = vld [vmem:[%s4370_s16 + $0x44] sm:$0x1] }
 0x160   : > { %v2721_v24 = vadd.f32 %v2713_v57, %v2692_v3  ;;  %v2951_v42 = vadd.f32 %v2943_v52, %v2922_v15  ;;  %v2836_v44 = vadd.f32 %v2828_v22, %v2807_v62  ;;  %v2944_v4 = vmul.f32 %v6119_v45, %v2931_v8  ;;  %v2730_v52 = vld [vmem:[%s4370_s16 + $0x37] sm:$0x1]  ;;  %v2903_v57 = vld [vmem:[%s4370_s16 + $0x2d] sm:$0x1]  ;;  %v2961_v3 = vld [vmem:[%s4370_s16 + $0x2f] sm:$0x1] }
 0x161   : > { %v2973_v31 = vmul.f32 %v6129_v32, %v2960_v13  ;;  %v2800_v58 = vmul.f32 %v6078_v38, %v2787_v30  ;;  %v2635_v39 = vadd.f32 %v2627_v26, %v2606_v5  ;;  %v2685_v0 = vmul.f32 %v6036_v21, %v2672_v1  ;;  %v2932_v13 = vld [vmem:[%s4370_s16 + $0x2e] sm:$0x1]  ;;  %v2788_v7 = vld [vmem:[%s4370_s16 + $0x39] sm:$0x1]  ;;  %v2817_v5 = vld [vmem:[%s4370_s16 + $0x3a] sm:$0x1] }
 0x162   : > { %v2750_v2 = vadd.f32 %v2742_v48, %v2721_v24  ;;  %v2980_v40 = vadd.f32 %v2972_v9, %v2951_v42  ;;  %v2865_v22 = vadd.f32 %v2857_v56, %v2836_v44  ;;  %v2829_v18 = vmul.f32 %v6086_v53, %v2816_v46  ;;  %v2673_v24 = vld [vmem:[%s4370_s16 + $0x45] sm:$0x1]  ;;  %v2702_v42 = vld [vmem:[%s4370_s16 + $0x46] sm:$0x1] }
 0x163   : > { %v2714_v6 = vmul.f32 %v6041_v41, %v2701_v43  ;;  %v2664_v10 = vadd.f32 %v2656_v37, %v2635_v39  ;;  %v2549_v33 = vmul.f32 %v5993_v11, %v2535_v16  ;;  %v2570_v20 = vmul.f32 %v5997_v29, %v2557_v27 }
 0x164   : > { %v2779_v55 = vadd.f32 %v2771_v49, %v2750_v2  ;;  %2988 = vst.msk [vmem:[%s4554_s23 + $0x5] sm:$0x1] %vm662_vm0, %v2980_v40  ;;  %v2894_v9 = vadd.f32 %v2886_v60, %v2865_v22  ;;  %v2858_v56 = vmul.f32 %v6097_v34, %v2845_v54  ;;  %v2743_v51 = vmul.f32 %v6052_v59, %v2730_v52  ;;  %v2558_v54 = vld [vmem:[%s4370_s16 + $0x51] sm:$0x1]  ;;  %v2731_v40 = vld [vmem:[%s4370_s16 + $0x47] sm:$0x1] }
 0x165   : > { %v2599_v14 = vmul.f32 %v6004_v19, %v2586_v28  ;;  %v2693_v48 = vadd.f32 %v2685_v0, %v2664_v10  ;;  %v2578_v26 = vadd.f32 %v2570_v20, %v2549_v33  ;;  %v2628_v15 = vmul.f32 %v6010_v12, %v2615_v25  ;;  %v2587_v22 = vld [vmem:[%s4370_s16 + $0x52] sm:$0x1]  ;;  %v2875_v25 = vld [vmem:[%s4370_s16 + $0x3c] sm:$0x1]  ;;  %v2760_v20 = vld [vmem:[%s4370_s16 + $0x48] sm:$0x1] }
 0x166   : > { %v2808_v8 = vadd.f32 %v2800_v58, %v2779_v55  ;;  %v2923_v62 = vadd.f32 %v2915_v50, %v2894_v9  ;;  %v2887_v60 = vmul.f32 %v6103_v47, %v2874_v23  ;;  %v2916_v30 = vmul.f32 %v6109_v61, %v2903_v57  ;;  %v2536_v50 = vld [vmem:[%s4370_s16 + $0x50] sm:$0x1]  ;;  %v2846_v58 = vld [vmem:[%s4370_s16 + $0x3b] sm:$0x1] }
 0x167   : > { %v2772_v1 = vmul.f32 %v6064_v17, %v2759_v36  ;;  %v2722_v46 = vadd.f32 %v2714_v6, %v2693_v48  ;;  %v2607_v37 = vadd.f32 %v2599_v14, %v2578_v26  ;;  %v2657_v43 = vmul.f32 %v6024_v35, %v2644_v63  ;;  %v2904_v36 = vld [vmem:[%s4370_s16 + $0x3d] sm:$0x1]  ;;  %v2962_v48 = vld [vmem:[%s4370_s16 + $0x3f] sm:$0x1]  ;;  %v2789_v26 = vld [vmem:[%s4370_s16 + $0x49] sm:$0x1] }
 0x168   : > { %v2837_v49 = vadd.f32 %v2829_v18, %v2808_v8  ;;  %v2952_v44 = vadd.f32 %v2944_v4, %v2923_v62  ;;  %v2945_v16 = vmul.f32 %v6119_v45, %v2932_v13  ;;  %v2974_v27 = vmul.f32 %v6129_v32, %v2961_v3  ;;  %v2616_v4 = vld [vmem:[%s4370_s16 + $0x53] sm:$0x1]  ;;  %v2674_v62 = vld [vmem:[%s4370_s16 + $0x55] sm:$0x1] }
 0x169   : > { %v2801_v2 = vmul.f32 %v6078_v38, %v2788_v7  ;;  %v2751_v0 = vadd.f32 %v2743_v51, %v2722_v46  ;;  %v2636_v52 = vadd.f32 %v2628_v15, %v2607_v37  ;;  %v2686_v28 = vmul.f32 %v6036_v21, %v2673_v24  ;;  %v2933_v51 = vld [vmem:[%s4370_s16 + $0x3e] sm:$0x1] }
 0x16a   : > { %v2866_v39 = vadd.f32 %v2858_v56, %v2837_v49  ;;  %v2981_v18 = vadd.f32 %v2973_v31, %v2952_v44  ;;  %v2830_v6 = vmul.f32 %v6086_v53, %v2817_v5  ;;  %v2715_v55 = vmul.f32 %v6041_v41, %v2702_v42  ;;  %v2645_v56 = vld [vmem:[%s4370_s16 + $0x54] sm:$0x1]  ;;  %v2818_v49 = vld [vmem:[%s4370_s16 + $0x4a] sm:$0x1]  ;;  %v2703_v42 = vld [vmem:[%s4370_s16 + $0x56] sm:$0x1] }
 0x16b   : > { %v2550_v23 = vmul.f32 %v5993_v11, %v2536_v50  ;;  %v2780_v10 = vadd.f32 %v2772_v1, %v2751_v0  ;;  %v2665_v33 = vadd.f32 %v2657_v43, %v2636_v52  ;;  %v2571_v9 = vmul.f32 %v5997_v29, %v2558_v54  ;;  %v2537_v50 = vld [vmem:[%s4370_s16 + $0x60] sm:$0x1]  ;;  %v2559_v44 = vld [vmem:[%s4370_s16 + $0x61] sm:$0x1]  ;;  %v2588_v0 = vld [vmem:[%s4370_s16 + $0x62] sm:$0x1] }
 0x16c   : > { %v2895_v57 = vadd.f32 %v2887_v60, %v2866_v39  ;;  %2989 = vst.msk [vmem:[%s4554_s23 + $0xd] sm:$0x1] %vm662_vm0, %v2981_v18  ;;  %v2859_v31 = vmul.f32 %v6097_v34, %v2846_v58  ;;  %v2744_v14 = vmul.f32 %v6052_v59, %v2731_v40  ;;  %v2600_v63 = vmul.f32 %v6004_v19, %v2587_v22  ;;  %v2847_v40 = vld [vmem:[%s4370_s16 + $0x4b] sm:$0x1]  ;;  %v2876_v22 = vld [vmem:[%s4370_s16 + $0x4c] sm:$0x1] }
 0x16d   : > { %v2629_v8 = vmul.f32 %v6010_v12, %v2616_v4  ;;  %v2809_v3 = vadd.f32 %v2801_v2, %v2780_v10  ;;  %v2694_v7 = vadd.f32 %v2686_v28, %v2665_v33  ;;  %v2579_v15 = vadd.f32 %v2571_v9, %v2550_v23  ;;  %v2617_v18 = vld [vmem:[%s4370_s16 + $0x63] sm:$0x1]  ;;  %v2934_v33 = vld [vmem:[%s4370_s16 + $0x4e] sm:$0x1] }
 0x16e   : > { %v2924_v13 = vadd.f32 %v2916_v30, %v2895_v57  ;;  %v2888_v60 = vmul.f32 %v6103_v47, %v2875_v25  ;;  %v2917_v1 = vmul.f32 %v6109_v61, %v2904_v36  ;;  %v2773_v24 = vmul.f32 %v6064_v17, %v2760_v20  ;;  %v2905_v36 = vld [vmem:[%s4370_s16 + $0x4d] sm:$0x1] }
 0x16f   : > { %v2658_v46 = vmul.f32 %v6024_v35, %v2645_v56  ;;  %v2838_v5 = vadd.f32 %v2830_v6, %v2809_v3  ;;  %v2723_v37 = vadd.f32 %v2715_v55, %v2694_v7  ;;  %v2608_v43 = vadd.f32 %v2600_v63, %v2579_v15  ;;  %v2732_v55 = vld [vmem:[%s4370_s16 + $0x57] sm:$0x1]  ;;  %v2646_v56 = vld [vmem:[%s4370_s16 + $0x64] sm:$0x1]  ;;  %v2790_v15 = vld [vmem:[%s4370_s16 + $0x59] sm:$0x1] }
 0x170   : > { %v2953_v30 = vadd.f32 %v2945_v16, %v2924_v13  ;;  %v2946_v2 = vmul.f32 %v6119_v45, %v2933_v51  ;;  %v2975_v58 = vmul.f32 %v6129_v32, %v2962_v48  ;;  %v2802_v54 = vmul.f32 %v6078_v38, %v2789_v26  ;;  %v2963_v48 = vld [vmem:[%s4370_s16 + $0x4f] sm:$0x1] }
 0x171   : > { %v2687_v39 = vmul.f32 %v6036_v21, %v2674_v62  ;;  %v2867_v52 = vadd.f32 %v2859_v31, %v2838_v5  ;;  %v2752_v28 = vadd.f32 %v2744_v14, %v2723_v37  ;;  %v2637_v4 = vadd.f32 %v2629_v8, %v2608_v43  ;;  %v2761_v14 = vld [vmem:[%s4370_s16 + $0x58] sm:$0x1]  ;;  %v2675_v62 = vld [vmem:[%s4370_s16 + $0x65] sm:$0x1] }
 0x172   : > { %v2982_v16 = vadd.f32 %v2974_v27, %v2953_v30  ;;  %v2831_v6 = vmul.f32 %v6086_v53, %v2818_v49  ;;  %v2716_v25 = vmul.f32 %v6041_v41, %v2703_v42  ;;  %v2551_v23 = vmul.f32 %v5993_v11, %v2537_v50  ;;  %v2819_v49 = vld [vmem:[%s4370_s16 + $0x5a] sm:$0x1]  ;;  %v2704_v42 = vld [vmem:[%s4370_s16 + $0x66] sm:$0x1]  ;;  %v2538_v50 = vld [vmem:[%s4370_s16 + $0x70] sm:$0x1] }
 0x173   : > { %v2572_v57 = vmul.f32 %v5997_v29, %v2559_v44  ;;  %v2896_v27 = vadd.f32 %v2888_v60, %v2867_v52  ;;  %v2781_v10 = vadd.f32 %v2773_v24, %v2752_v28  ;;  %v2666_v20 = vadd.f32 %v2658_v46, %v2637_v4  ;;  %v2560_v44 = vld [vmem:[%s4370_s16 + $0x71] sm:$0x1]  ;;  %v2589_v52 = vld [vmem:[%s4370_s16 + $0x72] sm:$0x1] }
 0x174   : > { %2990 = vst.msk [vmem:[%s4554_s23 + $0x15] sm:$0x1] %vm662_vm0, %v2982_v16  ;;  %v2601_v9 = vmul.f32 %v6004_v19, %v2588_v0  ;;  %v2860_v31 = vmul.f32 %v6097_v34, %v2847_v40  ;;  %v2889_v51 = vmul.f32 %v6103_v47, %v2876_v22  ;;  %v2630_v8 = vmul.f32 %v6010_v12, %v2617_v18  ;;  %v2848_v0 = vld [vmem:[%s4370_s16 + $0x5b] sm:$0x1]  ;;  %v2733_v18 = vld [vmem:[%s4370_s16 + $0x67] sm:$0x1] }
 0x175   : > { %v2580_v63 = vadd.f32 %v2572_v57, %v2551_v23  ;;  %v2925_v13 = vadd.f32 %v2917_v1, %v2896_v27  ;;  %v2810_v3 = vadd.f32 %v2802_v54, %v2781_v10  ;;  %v2695_v7 = vadd.f32 %v2687_v39, %v2666_v20  ;;  %v2762_v20 = vld [vmem:[%s4370_s16 + $0x68] sm:$0x1] }
 0x176   : > { %v2745_v26 = vmul.f32 %v6052_v59, %v2732_v55  ;;  %v2918_v60 = vmul.f32 %v6109_v61, %v2905_v36  ;;  %v2947_v24 = vmul.f32 %v6119_v45, %v2934_v33  ;;  %v2659_v1 = vmul.f32 %v6024_v35, %v2646_v56  ;;  %v2906_v55 = vld [vmem:[%s4370_s16 + $0x5d] sm:$0x1]  ;;  %v2647_v56 = vld [vmem:[%s4370_s16 + $0x74] sm:$0x1] }
 0x177   : > { %v2609_v46 = vadd.f32 %v2601_v9, %v2580_v63  ;;  %v2954_v30 = vadd.f32 %v2946_v2, %v2925_v13  ;;  %v2839_v5 = vadd.f32 %v2831_v6, %v2810_v3  ;;  %v2724_v37 = vadd.f32 %v2716_v25, %v2695_v7  ;;  %v2618_v6 = vld [vmem:[%s4370_s16 + $0x73] sm:$0x1]  ;;  %v2877_v25 = vld [vmem:[%s4370_s16 + $0x5c] sm:$0x1]  ;;  %v2820_v7 = vld [vmem:[%s4370_s16 + $0x6a] sm:$0x1] }
 0x178   : > { %v2774_v43 = vmul.f32 %v6064_v17, %v2761_v14  ;;  %v2976_v54 = vmul.f32 %v6129_v32, %v2963_v48  ;;  %v2803_v39 = vmul.f32 %v6078_v38, %v2790_v15  ;;  %v2688_v2 = vmul.f32 %v6036_v21, %v2675_v62  ;;  %v2964_v14 = vld [vmem:[%s4370_s16 + $0x5f] sm:$0x1] }
 0x179   : > { %v2638_v16 = vadd.f32 %v2630_v8, %v2609_v46  ;;  %v2983_v28 = vadd.f32 %v2975_v58, %v2954_v30  ;;  %v2868_v40 = vadd.f32 %v2860_v31, %v2839_v5  ;;  %v2753_v22 = vadd.f32 %v2745_v26, %v2724_v37  ;;  %v2935_v31 = vld [vmem:[%s4370_s16 + $0x5e] sm:$0x1]  ;;  %v2676_v26 = vld [vmem:[%s4370_s16 + $0x75] sm:$0x1] }
 0x17a   : > { %v2832_v4 = vmul.f32 %v6086_v53, %v2819_v49  ;;  %v2717_v57 = vmul.f32 %v6041_v41, %v2704_v42  ;;  %v2552_v27 = vmul.f32 %v5993_v11, %v2538_v50  ;;  %v2573_v10 = vmul.f32 %v5997_v29, %v2560_v44  ;;  %v2849_v49 = vld [vmem:[%s4370_s16 + $0x6b] sm:$0x1]  ;;  %v6316_v42 = vld [vmem:[%s4375_s19 + $0x60] ss:$0 sm:$0xff]  ;;  %v3018_v50 = vld [vmem:[%s4370_s16 + $0x1] sm:$0x1] }
 0x17b   : > { %v2667_v23 = vadd.f32 %v2659_v1, %v2638_v16  ;;  %2991 = vst.msk [vmem:[%s4554_s23 + $0x1d] sm:$0x1] %vm662_vm0, %v2983_v28  ;;  %v2897_v58 = vadd.f32 %v2889_v51, %v2868_v40  ;;  %v2782_v36 = vadd.f32 %v2774_v43, %v2753_v22  ;;  %v2861_v33 = vmul.f32 %v6097_v34, %v2848_v0  ;;  %v2996_v1 = vld [vmem:[%s4370_s16] sm:$0x1]  ;;  %v6320_v44 = vld [vmem:[%s4375_s19 + $0x61] ss:$0 sm:$0xff] }
 0x17c   : > { %v2602_v9 = vmul.f32 %v6004_v19, %v2589_v52  ;;  %v2746_v11 = vmul.f32 %v6052_v59, %v2733_v18  ;;  %v2581_v29 = vadd.f32 %v2573_v10, %v2552_v27  ;;  %v2631_v51 = vmul.f32 %v6010_v12, %v2618_v6  ;;  %v2791_v19 = vld [vmem:[%s4370_s16 + $0x69] sm:$0x1]  ;;  %v2734_v16 = vld [vmem:[%s4370_s16 + $0x77] sm:$0x1]  ;;  %v6327_v52 = vld [vmem:[%s4375_s19 + $0x62] ss:$0 sm:$0xff] }
 0x17d   : > { %v2696_v63 = vadd.f32 %v2688_v2, %v2667_v23  ;;  %v2926_v8 = vadd.f32 %v2918_v60, %v2897_v58  ;;  %v2811_v13 = vadd.f32 %v2803_v39, %v2782_v36  ;;  %v2890_v3 = vmul.f32 %v6103_v47, %v2877_v25  ;;  %v2705_v60 = vld [vmem:[%s4370_s16 + $0x76] sm:$0x1]  ;;  %v3047_v2 = vld [vmem:[%s4370_s16 + $0x2] sm:$0x1]  ;;  %v3076_v18 = vld [vmem:[%s4370_s16 + $0x3] sm:$0x1] }
 0x17e   : > { %v2919_v48 = vmul.f32 %v6109_v61, %v2906_v55  ;;  %v2775_v62 = vmul.f32 %v6064_v17, %v2762_v20  ;;  %v2610_v46 = vadd.f32 %v2602_v9, %v2581_v29  ;;  %v2660_v12 = vmul.f32 %v6024_v35, %v2647_v56  ;;  %v6333_v6 = vld [vmem:[%s4375_s19 + $0x63] ss:$0 sm:$0xff]  ;;  %v2907_v55 = vld [vmem:[%s4370_s16 + $0x6d] sm:$0x1]  ;;  %v6347_v20 = vld [vmem:[%s4375_s19 + $0x64] ss:$0 sm:$0xff] }
 0x17f   : > { %v2725_v15 = vadd.f32 %v2717_v57, %v2696_v63  ;;  %v2955_v30 = vadd.f32 %v2947_v24, %v2926_v8  ;;  %v2840_v5 = vadd.f32 %v2832_v4, %v2811_v13  ;;  %v2948_v37 = vmul.f32 %v6119_v45, %v2935_v31  ;;  %v2763_v57 = vld [vmem:[%s4370_s16 + $0x78] sm:$0x1]  ;;  %v2936_v56 = vld [vmem:[%s4370_s16 + $0x6e] sm:$0x1]  ;;  %v2965_v31 = vld [vmem:[%s4370_s16 + $0x6f] sm:$0x1] }
 0x180   : > { %v6313_v43 = vmul.f32 %v6129_v32, %v2964_v14  ;;  %v2804_v39 = vmul.f32 %v6078_v38, %v2791_v19  ;;  %v2639_v24 = vadd.f32 %v2631_v51, %v2610_v46  ;;  %v2689_v0 = vmul.f32 %v6036_v21, %v2676_v26  ;;  %v2878_v21 = vld [vmem:[%s4370_s16 + $0x6c] sm:$0x1]  ;;  %v2792_v63 = vld [vmem:[%s4370_s16 + $0x79] sm:$0x1]  ;;  %v3134_v19 = vld [vmem:[%s4370_s16 + $0x5] sm:$0x1] }
 0x181   : > { %v2754_v35 = vadd.f32 %v2746_v11, %v2725_v15  ;;  %v2984_v28 = vadd.f32 %v2976_v54, %v2955_v30  ;;  %v2869_v40 = vadd.f32 %v2861_v33, %v2840_v5  ;;  %v2833_v22 = vmul.f32 %v6086_v53, %v2820_v7  ;;  %v3105_v33 = vld [vmem:[%s4370_s16 + $0x4] sm:$0x1]  ;;  %v6359_v7 = vld [vmem:[%s4375_s19 + $0x65] ss:$0 sm:$0xff]  ;;  %v6364_v46 = vld [vmem:[%s4375_s19 + $0x66] ss:$0 sm:$0xff] }
 0x182   : > { %v2718_v4 = vmul.f32 %v6041_v41, %v2705_v60  ;;  %v2668_v23 = vadd.f32 %v2660_v12, %v2639_v24  ;;  %v3010_v54 = vmul.f32 %v6316_v42, %v2996_v1  ;;  %v3031_v27 = vmul.f32 %v6320_v44, %v3018_v50  ;;  %v2997_v12 = vld [vmem:[%s4370_s16 + $0x10] sm:$0x1]  ;;  %v2850_v5 = vld [vmem:[%s4370_s16 + $0x7b] sm:$0x1]  ;;  %v3192_v50 = vld [vmem:[%s4370_s16 + $0x7] sm:$0x1] }
 0x183   : > { %v2783_v25 = vadd.f32 %v2775_v62, %v2754_v35  ;;  %2992 = vst.msk [vmem:[%s4554_s23 + $0x25] sm:$0x1] %vm662_vm0, %v2984_v28  ;;  %v2898_v10 = vadd.f32 %v2890_v3, %v2869_v40  ;;  %v2862_v41 = vmul.f32 %v6097_v34, %v2849_v49  ;;  %v2747_v58 = vmul.f32 %v6052_v59, %v2734_v16  ;;  %v2821_v3 = vld [vmem:[%s4370_s16 + $0x7a] sm:$0x1]  ;;  %v3019_v35 = vld [vmem:[%s4370_s16 + $0x11] sm:$0x1] }
 0x184   : > { %v3060_v36 = vmul.f32 %v6327_v52, %v3047_v2  ;;  %v2697_v14 = vadd.f32 %v2689_v0, %v2668_v23  ;;  %v3039_v11 = vadd.f32 %v3031_v27, %v3010_v54  ;;  %v3089_v29 = vmul.f32 %v6333_v6, %v3076_v18  ;;  %v3048_v2 = vld [vmem:[%s4370_s16 + $0x12] sm:$0x1]  ;;  %v3077_v28 = vld [vmem:[%s4370_s16 + $0x13] sm:$0x1]  ;;  %v6387_v54 = vld [vmem:[%s4375_s19 + $0x68] ss:$0 sm:$0xff] }
 0x185   : > { %v2812_v9 = vadd.f32 %v2804_v39, %v2783_v25  ;;  %v2927_v51 = vadd.f32 %v2919_v48, %v2898_v10  ;;  %v2891_v59 = vmul.f32 %v6103_v47, %v2878_v21  ;;  %v2920_v8 = vmul.f32 %v6109_v61, %v2907_v55  ;;  %v3163_v48 = vld [vmem:[%s4370_s16 + $0x6] sm:$0x1]  ;;  %v3106_v27 = vld [vmem:[%s4370_s16 + $0x14] sm:$0x1]  ;;  %v2937_v10 = vld [vmem:[%s4370_s16 + $0x7e] sm:$0x1] }
 0x186   : > { %v2776_v13 = vmul.f32 %v6064_v17, %v2763_v57  ;;  %v2726_v15 = vadd.f32 %v2718_v4, %v2697_v14  ;;  %v3068_v62 = vadd.f32 %v3060_v36, %v3039_v11  ;;  %v3118_v49 = vmul.f32 %v6347_v20, %v3105_v33  ;;  %v2908_v4 = vld [vmem:[%s4370_s16 + $0x7d] sm:$0x1]  ;;  %v3221_v57 = vld [vmem:[%s4370_s16 + $0x8] sm:$0x1]  ;;  %v3250_v14 = vld [vmem:[%s4370_s16 + $0x9] sm:$0x1] }
 0x187   : > { %v2841_v26 = vadd.f32 %v2833_v22, %v2812_v9  ;;  %v2956_v60 = vadd.f32 %v2948_v37, %v2927_v51  ;;  %v2949_v17 = vmul.f32 %v6119_v45, %v2936_v56  ;;  %v2978_v1 = vmul.f32 %v6129_v32, %v2965_v31  ;;  %v6375_v37 = vld [vmem:[%s4375_s19 + $0x67] ss:$0 sm:$0xff]  ;;  %v2879_v22 = vld [vmem:[%s4370_s16 + $0x7c] sm:$0x1]  ;;  %v3135_v11 = vld [vmem:[%s4370_s16 + $0x15] sm:$0x1] }
 0x188   : > { %v2805_v30 = vmul.f32 %v6078_v38, %v2792_v63  ;;  %v2755_v24 = vadd.f32 %v2747_v58, %v2726_v15  ;;  %v3097_v0 = vadd.f32 %v3089_v29, %v3068_v62  ;;  %v3147_v16 = vmul.f32 %v6359_v7, %v3134_v19  ;;  %v6401_v63 = vld [vmem:[%s4375_s19 + $0x69] ss:$0 sm:$0xff] }
 0x189   : > { %v2870_v39 = vadd.f32 %v2862_v41, %v2841_v26  ;;  %v2985_v40 = vadd.f32 %v6313_v43, %v2956_v60  ;;  %v2834_v38 = vmul.f32 %v6086_v53, %v2821_v3  ;;  %v3176_v18 = vmul.f32 %v6364_v46, %v3163_v48  ;;  %v2966_v41 = vld [vmem:[%s4370_s16 + $0x7f] sm:$0x1]  ;;  %v3020_v48 = vld [vmem:[%s4370_s16 + $0x21] sm:$0x1] }
 0x18a   : > { %v3011_v25 = vmul.f32 %v6316_v42, %v2997_v12  ;;  %v2784_v55 = vadd.f32 %v2776_v13, %v2755_v24  ;;  %v3126_v23 = vadd.f32 %v3118_v49, %v3097_v0  ;;  %v3032_v43 = vmul.f32 %v6320_v44, %v3019_v35  ;;  %v3279_v13 = vld [vmem:[%s4370_s16 + $0xa] sm:$0x1]  ;;  %v3164_v49 = vld [vmem:[%s4370_s16 + $0x16] sm:$0x1]  ;;  %v3337_v0 = vld [vmem:[%s4370_s16 + $0xc] sm:$0x1] }
 0x18b   : > { %v2899_v21 = vadd.f32 %v2891_v59, %v2870_v39  ;;  %2993 = vst.msk [vmem:[%s4554_s23 + $0x2d] sm:$0x1] %vm662_vm0, %v2985_v40  ;;  %v2863_v53 = vmul.f32 %v6097_v34, %v2850_v5  ;;  %v3205_v58 = vmul.f32 %v6375_v37, %v3192_v50  ;;  %v3061_v36 = vmul.f32 %v6327_v52, %v3048_v2  ;;  %v3049_v50 = vld [vmem:[%s4370_s16 + $0x22] sm:$0x1]  ;;  %v6432_v40 = vld [vmem:[%s4375_s19 + $0x6d] ss:$0 sm:$0xff] }
 0x18c   : > { %v3090_v33 = vmul.f32 %v6333_v6, %v3077_v28  ;;  %v2813_v56 = vadd.f32 %v2805_v30, %v2784_v55  ;;  %v3155_v31 = vadd.f32 %v3147_v16, %v3126_v23  ;;  %v3040_v34 = vadd.f32 %v3032_v43, %v3011_v25  ;;  %v3308_v30 = vld [vmem:[%s4370_s16 + $0xb] sm:$0x1]  ;;  %v3366_v28 = vld [vmem:[%s4370_s16 + $0xd] sm:$0x1]  ;;  %v6442_v55 = vld [vmem:[%s4375_s19 + $0x6e] ss:$0 sm:$0xff] }
 0x18d   : > { %v2928_v9 = vadd.f32 %v2920_v8, %v2899_v21  ;;  %v2892_v29 = vmul.f32 %v6103_v47, %v2879_v22  ;;  %v2921_v51 = vmul.f32 %v6109_v61, %v2908_v4  ;;  %v3234_v59 = vmul.f32 %v6387_v54, %v3221_v57  ;;  %v6409_v8 = vld [vmem:[%s4375_s19 + $0x6a] ss:$0 sm:$0xff]  ;;  %v2998_v47 = vld [vmem:[%s4370_s16 + $0x20] sm:$0x1]  ;;  %v3395_v21 = vld [vmem:[%s4370_s16 + $0xe] sm:$0x1] }
 0x18e   : > { %v3119_v3 = vmul.f32 %v6347_v20, %v3106_v27  ;;  %v2842_v26 = vadd.f32 %v2834_v38, %v2813_v56  ;;  %v3184_v15 = vadd.f32 %v3176_v18, %v3155_v31  ;;  %v3069_v62 = vadd.f32 %v3061_v36, %v3040_v34  ;;  %v3107_v43 = vld [vmem:[%s4370_s16 + $0x24] sm:$0x1]  ;;  %v6452_v56 = vld [vmem:[%s4375_s19 + $0x6f] ss:$0 sm:$0xff]  ;;  %v3251_v34 = vld [vmem:[%s4370_s16 + $0x19] sm:$0x1] }
 0x18f   : > { %v2957_v19 = vadd.f32 %v2949_v17, %v2928_v9  ;;  %v2950_v61 = vmul.f32 %v6119_v45, %v2937_v10  ;;  %v2979_v12 = vmul.f32 %v6129_v32, %v2966_v41  ;;  %v3263_v60 = vmul.f32 %v6401_v63, %v3250_v14  ;;  %v6420_v17 = vld [vmem:[%s4375_s19 + $0x6b] ss:$0 sm:$0xff]  ;;  %v6426_v45 = vld [vmem:[%s4375_s19 + $0x6c] ss:$0 sm:$0xff]  ;;  %v3078_v32 = vld [vmem:[%s4370_s16 + $0x23] sm:$0x1] }
 0x190   : > { %v3148_v5 = vmul.f32 %v6359_v7, %v3135_v11  ;;  %v2871_v39 = vadd.f32 %v2863_v53, %v2842_v26  ;;  %v3213_v24 = vadd.f32 %v3205_v58, %v3184_v15  ;;  %v3098_v16 = vadd.f32 %v3090_v33, %v3069_v62  ;;  %v3424_v10 = vld [vmem:[%s4370_s16 + $0xf] sm:$0x1]  ;;  %v3222_v41 = vld [vmem:[%s4370_s16 + $0x18] sm:$0x1]  ;;  %v3136_v11 = vld [vmem:[%s4370_s16 + $0x25] sm:$0x1] }
 0x191   : > { %v2986_v35 = vadd.f32 %v2978_v1, %v2957_v19  ;;  %v3292_v2 = vmul.f32 %v6409_v8, %v3279_v13  ;;  %v3177_v38 = vmul.f32 %v6364_v46, %v3164_v49  ;;  %v3193_v1 = vld [vmem:[%s4370_s16 + $0x17] sm:$0x1]  ;;  %v3012_v22 = vmul.f32 %v6316_v42, %v2998_v47  ;;  %v3280_v13 = vld [vmem:[%s4370_s16 + $0x1a] sm:$0x1]  ;;  %v3165_v49 = vld [vmem:[%s4370_s16 + $0x26] sm:$0x1] }
 0x192   : > { %v3033_v4 = vmul.f32 %v6320_v44, %v3020_v48  ;;  %v2900_v18 = vadd.f32 %v2892_v29, %v2871_v39  ;;  %v3242_v25 = vadd.f32 %v3234_v59, %v3213_v24  ;;  %v3127_v23 = vadd.f32 %v3119_v3, %v3098_v16  ;;  %v2999_v47 = vld [vmem:[%s4370_s16 + $0x30] sm:$0x1]  ;;  %v3021_v48 = vld [vmem:[%s4370_s16 + $0x31] sm:$0x1] }
 0x193   : > { %2994 = vst.msk [vmem:[%s4554_s23 + $0x35] sm:$0x1] %vm662_vm0, %v2986_v35  ;;  %v3062_v57 = vmul.f32 %v6327_v52, %v3049_v50  ;;  %v3321_v27 = vmul.f32 %v6420_v17, %v3308_v30  ;;  %v3350_v53 = vmul.f32 %v6426_v45, %v3337_v0  ;;  %v3091_v36 = vmul.f32 %v6333_v6, %v3078_v32  ;;  %v3050_v35 = vld [vmem:[%s4370_s16 + $0x32] sm:$0x1]  ;;  %v3194_v32 = vld [vmem:[%s4370_s16 + $0x27] sm:$0x1] }
 0x194   : > { %v3041_v58 = vadd.f32 %v3033_v4, %v3012_v22  ;;  %v2929_v33 = vadd.f32 %v2921_v51, %v2900_v18  ;;  %v3271_v9 = vadd.f32 %v3263_v60, %v3242_v25  ;;  %v3156_v31 = vadd.f32 %v3148_v5, %v3127_v23  ;;  %v3309_v5 = vld [vmem:[%s4370_s16 + $0x1b] sm:$0x1]  ;;  %v3223_v23 = vld [vmem:[%s4370_s16 + $0x28] sm:$0x1] }
 0x195   : > { %v3206_v14 = vmul.f32 %v6375_v37, %v3193_v1  ;;  %v3379_v29 = vmul.f32 %v6432_v40, %v3366_v28  ;;  %v3408_v59 = vmul.f32 %v6442_v55, %v3395_v21  ;;  %v3120_v51 = vmul.f32 %v6347_v20, %v3107_v43  ;;  %v3338_v28 = vld [vmem:[%s4370_s16 + $0x1c] sm:$0x1]  ;;  %v3108_v43 = vld [vmem:[%s4370_s16 + $0x34] sm:$0x1] }
 0x196   : > { %v3070_v3 = vadd.f32 %v3062_v57, %v3041_v58  ;;  %v2958_v19 = vadd.f32 %v2950_v61, %v2929_v33  ;;  %v3300_v26 = vadd.f32 %v3292_v2, %v3271_v9  ;;  %v3185_v15 = vadd.f32 %v3177_v38, %v3156_v31  ;;  %v3079_v2 = vld [vmem:[%s4370_s16 + $0x33] sm:$0x1]  ;;  %v3367_v38 = vld [vmem:[%s4370_s16 + $0x1d] sm:$0x1] }
 0x197   : > { %v3235_v62 = vmul.f32 %v6387_v54, %v3222_v41  ;;  %v3437_v60 = vmul.f32 %v6452_v56, %v3424_v10  ;;  %v3264_v30 = vmul.f32 %v6401_v63, %v3251_v34  ;;  %v3149_v61 = vmul.f32 %v6359_v7, %v3136_v11  ;;  %v3425_v10 = vld [vmem:[%s4370_s16 + $0x1f] sm:$0x1]  ;;  %v3252_v34 = vld [vmem:[%s4370_s16 + $0x29] sm:$0x1]  ;;  %v3137_v11 = vld [vmem:[%s4370_s16 + $0x35] sm:$0x1] }
 0x198   : > { %v3099_v50 = vadd.f32 %v3091_v36, %v3070_v3  ;;  %v2987_v39 = vadd.f32 %v2979_v12, %v2958_v19  ;;  %v3329_v24 = vadd.f32 %v3321_v27, %v3300_v26  ;;  %v3214_v0 = vadd.f32 %v3206_v14, %v3185_v15  ;;  %v3396_v27 = vld [vmem:[%s4370_s16 + $0x1e] sm:$0x1] }
 0x199   : > { %v3293_v16 = vmul.f32 %v6409_v8, %v3280_v13  ;;  %v3178_v22 = vmul.f32 %v6364_v46, %v3165_v49  ;;  %v3013_v4 = vmul.f32 %v6316_v42, %v2999_v47  ;;  %v3034_v18 = vmul.f32 %v6320_v44, %v3021_v48  ;;  %v3000_v48 = vld [vmem:[%s4370_s16 + $0x40] sm:$0x1] }
 0x19a   : > { %v3128_v1 = vadd.f32 %v3120_v51, %v3099_v50  ;;  %2995 = vst.msk [vmem:[%s4554_s23 + $0x3d] sm:$0x1] %vm662_vm0, %v2987_v39  ;;  %v3358_v12 = vadd.f32 %v3350_v53, %v3329_v24  ;;  %v3243_v25 = vadd.f32 %v3235_v62, %v3214_v0  ;;  %v3322_v21 = vmul.f32 %v6420_v17, %v3309_v5  ;;  %v3281_v51 = vld [vmem:[%s4370_s16 + $0x2a] sm:$0x1]  ;;  %v3051_v24 = vld [vmem:[%s4370_s16 + $0x42] sm:$0x1] }
 0x19b   : > { %v3063_v57 = vmul.f32 %v6327_v52, %v3050_v35  ;;  %v3207_v58 = vmul.f32 %v6375_v37, %v3194_v32  ;;  %v3042_v36 = vadd.f32 %v3034_v18, %v3013_v4  ;;  %v3092_v33 = vmul.f32 %v6333_v6, %v3079_v2  ;;  %v3224_v18 = vld [vmem:[%s4370_s16 + $0x38] sm:$0x1] }
 0x19c   : > { %v3157_v41 = vadd.f32 %v3149_v61, %v3128_v1  ;;  %v3387_v53 = vadd.f32 %v3379_v29, %v3358_v12  ;;  %v3272_v9 = vadd.f32 %v3264_v30, %v3243_v25  ;;  %v3351_v31 = vmul.f32 %v6426_v45, %v3338_v28  ;;  %v3166_v29 = vld [vmem:[%s4370_s16 + $0x36] sm:$0x1]  ;;  %v3022_v30 = vld [vmem:[%s4370_s16 + $0x41] sm:$0x1]  ;;  %v3310_v61 = vld [vmem:[%s4370_s16 + $0x2b] sm:$0x1] }
 0x19d   : > { %v3380_v14 = vmul.f32 %v6432_v40, %v3367_v38  ;;  %v3236_v3 = vmul.f32 %v6387_v54, %v3223_v23  ;;  %v3071_v19 = vadd.f32 %v3063_v57, %v3042_v36  ;;  %v3121_v26 = vmul.f32 %v6347_v20, %v3108_v43  ;;  %v3080_v28 = vld [vmem:[%s4370_s16 + $0x43] sm:$0x1]  ;;  %v3339_v1 = vld [vmem:[%s4370_s16 + $0x2c] sm:$0x1]  ;;  %v3109_v43 = vld [vmem:[%s4370_s16 + $0x44] sm:$0x1] }
 0x19e   : > { %v3186_v13 = vadd.f32 %v3178_v22, %v3157_v41  ;;  %v3416_v15 = vadd.f32 %v3408_v59, %v3387_v53  ;;  %v3301_v62 = vadd.f32 %v3293_v16, %v3272_v9  ;;  %v3409_v49 = vmul.f32 %v6442_v55, %v3396_v27  ;;  %v3195_v59 = vld [vmem:[%s4370_s16 + $0x37] sm:$0x1]  ;;  %v3368_v22 = vld [vmem:[%s4370_s16 + $0x2d] sm:$0x1]  ;;  %v3426_v41 = vld [vmem:[%s4370_s16 + $0x2f] sm:$0x1] }
 0x19f   : > { %v3438_v47 = vmul.f32 %v6452_v56, %v3425_v10  ;;  %v3265_v50 = vmul.f32 %v6401_v63, %v3252_v34  ;;  %v3100_v35 = vadd.f32 %v3092_v33, %v3071_v19  ;;  %v3150_v39 = vmul.f32 %v6359_v7, %v3137_v11  ;;  %v3397_v10 = vld [vmem:[%s4370_s16 + $0x2e] sm:$0x1]  ;;  %v3253_v36 = vld [vmem:[%s4370_s16 + $0x39] sm:$0x1]  ;;  %v3282_v19 = vld [vmem:[%s4370_s16 + $0x3a] sm:$0x1] }
 0x1a0   : > { %v3215_v5 = vadd.f32 %v3207_v58, %v3186_v13  ;;  %v3445_v0 = vadd.f32 %v3437_v60, %v3416_v15  ;;  %v3330_v16 = vadd.f32 %v3322_v21, %v3301_v62  ;;  %v3294_v32 = vmul.f32 %v6409_v8, %v3281_v51  ;;  %v3138_v13 = vld [vmem:[%s4370_s16 + $0x45] sm:$0x1]  ;;  %v3167_v15 = vld [vmem:[%s4370_s16 + $0x46] sm:$0x1] }
 0x1a1   : > { %v3179_v2 = vmul.f32 %v6364_v46, %v3166_v29  ;;  %v3129_v4 = vadd.f32 %v3121_v26, %v3100_v35  ;;  %v3014_v12 = vmul.f32 %v6316_v42, %v3000_v48  ;;  %v3035_v25 = vmul.f32 %v6320_v44, %v3022_v30 }
 0x1a2   : > { %v3244_v38 = vadd.f32 %v3236_v3, %v3215_v5  ;;  %3453 = vst.msk [vmem:[%s4554_s23 + $0x6] sm:$0x1] %vm662_vm0, %v3445_v0  ;;  %v3359_v60 = vadd.f32 %v3351_v31, %v3330_v16  ;;  %v3323_v21 = vmul.f32 %v6420_v17, %v3310_v61  ;;  %v3208_v23 = vmul.f32 %v6375_v37, %v3195_v59  ;;  %v3023_v61 = vld [vmem:[%s4370_s16 + $0x51] sm:$0x1]  ;;  %v3196_v0 = vld [vmem:[%s4370_s16 + $0x47] sm:$0x1] }
 0x1a3   : > { %v3064_v57 = vmul.f32 %v6327_v52, %v3051_v24  ;;  %v3158_v58 = vadd.f32 %v3150_v39, %v3129_v4  ;;  %v3043_v33 = vadd.f32 %v3035_v25, %v3014_v12  ;;  %v3093_v53 = vmul.f32 %v6333_v6, %v3080_v28  ;;  %v3052_v16 = vld [vmem:[%s4370_s16 + $0x52] sm:$0x1]  ;;  %v3340_v28 = vld [vmem:[%s4370_s16 + $0x3c] sm:$0x1]  ;;  %v3225_v25 = vld [vmem:[%s4370_s16 + $0x48] sm:$0x1] }
 0x1a4   : > { %v3273_v27 = vadd.f32 %v3265_v50, %v3244_v38  ;;  %v3388_v9 = vadd.f32 %v3380_v14, %v3359_v60  ;;  %v3352_v31 = vmul.f32 %v6426_v45, %v3339_v1  ;;  %v3381_v34 = vmul.f32 %v6432_v40, %v3368_v22  ;;  %v3001_v14 = vld [vmem:[%s4370_s16 + $0x50] sm:$0x1]  ;;  %v3311_v50 = vld [vmem:[%s4370_s16 + $0x3b] sm:$0x1] }
 0x1a5   : > { %v3237_v11 = vmul.f32 %v6387_v54, %v3224_v18  ;;  %v3187_v51 = vadd.f32 %v3179_v2, %v3158_v58  ;;  %v3072_v26 = vadd.f32 %v3064_v57, %v3043_v33  ;;  %v3122_v29 = vmul.f32 %v6347_v20, %v3109_v43  ;;  %v3369_v18 = vld [vmem:[%s4370_s16 + $0x3d] sm:$0x1]  ;;  %v3427_v58 = vld [vmem:[%s4370_s16 + $0x3f] sm:$0x1]  ;;  %v3254_v33 = vld [vmem:[%s4370_s16 + $0x49] sm:$0x1] }
 0x1a6   : > { %v3302_v3 = vadd.f32 %v3294_v32, %v3273_v27  ;;  %v3417_v62 = vadd.f32 %v3409_v49, %v3388_v9  ;;  %v3410_v48 = vmul.f32 %v6442_v55, %v3397_v10  ;;  %v3439_v30 = vmul.f32 %v6452_v56, %v3426_v41  ;;  %v3081_v49 = vld [vmem:[%s4370_s16 + $0x53] sm:$0x1]  ;;  %v3139_v9 = vld [vmem:[%s4370_s16 + $0x55] sm:$0x1] }
 0x1a7   : > { %v3266_v5 = vmul.f32 %v6401_v63, %v3253_v36  ;;  %v3216_v39 = vadd.f32 %v3208_v23, %v3187_v51  ;;  %v3101_v59 = vadd.f32 %v3093_v53, %v3072_v26  ;;  %v3151_v24 = vmul.f32 %v6359_v7, %v3138_v13  ;;  %v3398_v23 = vld [vmem:[%s4370_s16 + $0x3e] sm:$0x1] }
 0x1a8   : > { %v3331_v35 = vadd.f32 %v3323_v21, %v3302_v3  ;;  %v3446_v32 = vadd.f32 %v3438_v47, %v3417_v62  ;;  %v3295_v2 = vmul.f32 %v6409_v8, %v3282_v19  ;;  %v3180_v38 = vmul.f32 %v6364_v46, %v3167_v15  ;;  %v3110_v21 = vld [vmem:[%s4370_s16 + $0x54] sm:$0x1]  ;;  %v3283_v3 = vld [vmem:[%s4370_s16 + $0x4a] sm:$0x1]  ;;  %v3168_v15 = vld [vmem:[%s4370_s16 + $0x56] sm:$0x1] }
 0x1a9   : > { %v3015_v1 = vmul.f32 %v6316_v42, %v3001_v14  ;;  %v3245_v4 = vadd.f32 %v3237_v11, %v3216_v39  ;;  %v3130_v12 = vadd.f32 %v3122_v29, %v3101_v59  ;;  %v3036_v60 = vmul.f32 %v6320_v44, %v3023_v61  ;;  %v3002_v14 = vld [vmem:[%s4370_s16 + $0x60] sm:$0x1]  ;;  %v3024_v62 = vld [vmem:[%s4370_s16 + $0x61] sm:$0x1]  ;;  %v3053_v39 = vld [vmem:[%s4370_s16 + $0x62] sm:$0x1] }
 0x1aa   : > { %v3360_v22 = vadd.f32 %v3352_v31, %v3331_v35  ;;  %3454 = vst.msk [vmem:[%s4554_s23 + $0xe] sm:$0x1] %vm662_vm0, %v3446_v32  ;;  %v3324_v47 = vmul.f32 %v6420_v17, %v3311_v50  ;;  %v3209_v57 = vmul.f32 %v6375_v37, %v3196_v0  ;;  %v3065_v43 = vmul.f32 %v6327_v52, %v3052_v16  ;;  %v3312_v0 = vld [vmem:[%s4370_s16 + $0x4b] sm:$0x1]  ;;  %v3341_v16 = vld [vmem:[%s4370_s16 + $0x4c] sm:$0x1] }
 0x1ab   : > { %v3094_v27 = vmul.f32 %v6333_v6, %v3081_v49  ;;  %v3274_v41 = vadd.f32 %v3266_v5, %v3245_v4  ;;  %v3159_v36 = vadd.f32 %v3151_v24, %v3130_v12  ;;  %v3044_v53 = vadd.f32 %v3036_v60, %v3015_v1  ;;  %v3082_v32 = vld [vmem:[%s4370_s16 + $0x63] sm:$0x1]  ;;  %v3399_v12 = vld [vmem:[%s4370_s16 + $0x4e] sm:$0x1] }
 0x1ac   : > { %v3389_v10 = vadd.f32 %v3381_v34, %v3360_v22  ;;  %v3353_v31 = vmul.f32 %v6426_v45, %v3340_v28  ;;  %v3382_v11 = vmul.f32 %v6432_v40, %v3369_v18  ;;  %v3238_v13 = vmul.f32 %v6387_v54, %v3225_v25  ;;  %v3370_v18 = vld [vmem:[%s4370_s16 + $0x4d] sm:$0x1] }
 0x1ad   : > { %v3123_v51 = vmul.f32 %v6347_v20, %v3110_v21  ;;  %v3303_v19 = vadd.f32 %v3295_v2, %v3274_v41  ;;  %v3188_v26 = vadd.f32 %v3180_v38, %v3159_v36  ;;  %v3073_v29 = vadd.f32 %v3065_v43, %v3044_v53  ;;  %v3197_v38 = vld [vmem:[%s4370_s16 + $0x57] sm:$0x1]  ;;  %v3111_v21 = vld [vmem:[%s4370_s16 + $0x64] sm:$0x1]  ;;  %v3255_v53 = vld [vmem:[%s4370_s16 + $0x59] sm:$0x1] }
 0x1ae   : > { %v3418_v34 = vadd.f32 %v3410_v48, %v3389_v10  ;;  %v3411_v5 = vmul.f32 %v6442_v55, %v3398_v23  ;;  %v3440_v50 = vmul.f32 %v6452_v56, %v3427_v58  ;;  %v3267_v61 = vmul.f32 %v6401_v63, %v3254_v33  ;;  %v3428_v58 = vld [vmem:[%s4370_s16 + $0x4f] sm:$0x1] }
 0x1af   : > { %v3152_v35 = vmul.f32 %v6359_v7, %v3139_v9  ;;  %v3332_v59 = vadd.f32 %v3324_v47, %v3303_v19  ;;  %v3217_v24 = vadd.f32 %v3209_v57, %v3188_v26  ;;  %v3102_v49 = vadd.f32 %v3094_v27, %v3073_v29  ;;  %v3226_v57 = vld [vmem:[%s4370_s16 + $0x58] sm:$0x1]  ;;  %v3140_v9 = vld [vmem:[%s4370_s16 + $0x65] sm:$0x1] }
 0x1b0   : > { %v3447_v48 = vadd.f32 %v3439_v30, %v3418_v34  ;;  %v3296_v2 = vmul.f32 %v6409_v8, %v3283_v3  ;;  %v3181_v28 = vmul.f32 %v6364_v46, %v3168_v15  ;;  %v3016_v1 = vmul.f32 %v6316_v42, %v3002_v14  ;;  %v3284_v3 = vld [vmem:[%s4370_s16 + $0x5a] sm:$0x1]  ;;  %v3169_v15 = vld [vmem:[%s4370_s16 + $0x66] sm:$0x1]  ;;  %v3003_v14 = vld [vmem:[%s4370_s16 + $0x70] sm:$0x1] }
 0x1b1   : > { %v3037_v22 = vmul.f32 %v6320_v44, %v3024_v62  ;;  %v3361_v30 = vadd.f32 %v3353_v31, %v3332_v59  ;;  %v3246_v4 = vadd.f32 %v3238_v13, %v3217_v24  ;;  %v3131_v25 = vadd.f32 %v3123_v51, %v3102_v49  ;;  %v3025_v62 = vld [vmem:[%s4370_s16 + $0x71] sm:$0x1]  ;;  %v3054_v59 = vld [vmem:[%s4370_s16 + $0x72] sm:$0x1] }
 0x1b2   : > { %3455 = vst.msk [vmem:[%s4554_s23 + $0x16] sm:$0x1] %vm662_vm0, %v3447_v48  ;;  %v3066_v60 = vmul.f32 %v6327_v52, %v3053_v39  ;;  %v3325_v47 = vmul.f32 %v6420_v17, %v3312_v0  ;;  %v3354_v23 = vmul.f32 %v6426_v45, %v3341_v16  ;;  %v3095_v27 = vmul.f32 %v6333_v6, %v3082_v32  ;;  %v3313_v39 = vld [vmem:[%s4370_s16 + $0x5b] sm:$0x1]  ;;  %v3198_v32 = vld [vmem:[%s4370_s16 + $0x67] sm:$0x1] }
 0x1b3   : > { %v3045_v43 = vadd.f32 %v3037_v22, %v3016_v1  ;;  %v3390_v10 = vadd.f32 %v3382_v11, %v3361_v30  ;;  %v3275_v41 = vadd.f32 %v3267_v61, %v3246_v4  ;;  %v3160_v36 = vadd.f32 %v3152_v35, %v3131_v25  ;;  %v3227_v25 = vld [vmem:[%s4370_s16 + $0x68] sm:$0x1] }
 0x1b4   : > { %v3210_v33 = vmul.f32 %v6375_v37, %v3197_v38  ;;  %v3383_v31 = vmul.f32 %v6432_v40, %v3370_v18  ;;  %v3412_v13 = vmul.f32 %v6442_v55, %v3399_v12  ;;  %v3124_v11 = vmul.f32 %v6347_v20, %v3111_v21  ;;  %v3371_v38 = vld [vmem:[%s4370_s16 + $0x5d] sm:$0x1]  ;;  %v3112_v21 = vld [vmem:[%s4370_s16 + $0x74] sm:$0x1] }
 0x1b5   : > { %v3074_v51 = vadd.f32 %v3066_v60, %v3045_v43  ;;  %v3419_v34 = vadd.f32 %v3411_v5, %v3390_v10  ;;  %v3304_v19 = vadd.f32 %v3296_v2, %v3275_v41  ;;  %v3189_v26 = vadd.f32 %v3181_v28, %v3160_v36  ;;  %v3083_v2 = vld [vmem:[%s4370_s16 + $0x73] sm:$0x1]  ;;  %v3342_v28 = vld [vmem:[%s4370_s16 + $0x5c] sm:$0x1]  ;;  %v3285_v36 = vld [vmem:[%s4370_s16 + $0x6a] sm:$0x1] }
 0x1b6   : > { %v3239_v29 = vmul.f32 %v6387_v54, %v3226_v57  ;;  %v3441_v61 = vmul.f32 %v6452_v56, %v3428_v58  ;;  %v3268_v35 = vmul.f32 %v6401_v63, %v3255_v53  ;;  %v3153_v5 = vmul.f32 %v6359_v7, %v3140_v9  ;;  %v3429_v57 = vld [vmem:[%s4370_s16 + $0x5f] sm:$0x1] }
 0x1b7   : > { %v3103_v48 = vadd.f32 %v3095_v27, %v3074_v51  ;;  %v3448_v24 = vadd.f32 %v3440_v50, %v3419_v34  ;;  %v3333_v0 = vadd.f32 %v3325_v47, %v3304_v19  ;;  %v3218_v16 = vadd.f32 %v3210_v33, %v3189_v26  ;;  %v3400_v47 = vld [vmem:[%s4370_s16 + $0x5e] sm:$0x1]  ;;  %v3141_v33 = vld [vmem:[%s4370_s16 + $0x75] sm:$0x1] }
 0x1b8   : > { %v3297_v49 = vmul.f32 %v6409_v8, %v3284_v3  ;;  %v3182_v22 = vmul.f32 %v6364_v46, %v3169_v15  ;;  %v3017_v30 = vmul.f32 %v6316_v42, %v3003_v14  ;;  %v3038_v4 = vmul.f32 %v6320_v44, %v3025_v62  ;;  %v3314_v3 = vld [vmem:[%s4370_s16 + $0x6b] sm:$0x1]  ;;  %v6639_v15 = vld [vmem:[%s4375_s19 + $0x70] ss:$0 sm:$0xff]  ;;  %v3483_v14 = vld [vmem:[%s4370_s16 + $0x1] sm:$0x1] }
 0x1b9   : > { %v3132_v1 = vadd.f32 %v3124_v11, %v3103_v48  ;;  %3456 = vst.msk [vmem:[%s4554_s23 + $0x1e] sm:$0x1] %vm662_vm0, %v3448_v24  ;;  %v3362_v50 = vadd.f32 %v3354_v23, %v3333_v0  ;;  %v3247_v18 = vadd.f32 %v3239_v29, %v3218_v16  ;;  %v3326_v12 = vmul.f32 %v6420_v17, %v3313_v39  ;;  %v3461_v11 = vld [vmem:[%s4370_s16] sm:$0x1]  ;;  %v6643_v62 = vld [vmem:[%s4375_s19 + $0x71] ss:$0 sm:$0xff] }
 0x1ba   : > { %v3067_v60 = vmul.f32 %v6327_v52, %v3054_v59  ;;  %v3211_v42 = vmul.f32 %v6375_v37, %v3198_v32  ;;  %v3046_v44 = vadd.f32 %v3038_v4, %v3017_v30  ;;  %v3096_v23 = vmul.f32 %v6333_v6, %v3083_v2  ;;  %v3256_v52 = vld [vmem:[%s4370_s16 + $0x69] sm:$0x1]  ;;  %v3199_v48 = vld [vmem:[%s4370_s16 + $0x77] sm:$0x1]  ;;  %v6650_v59 = vld [vmem:[%s4375_s19 + $0x72] ss:$0 sm:$0xff] }
 0x1bb   : > { %v3161_v43 = vadd.f32 %v3153_v5, %v3132_v1  ;;  %v3391_v27 = vadd.f32 %v3383_v31, %v3362_v50  ;;  %v3276_v10 = vadd.f32 %v3268_v35, %v3247_v18  ;;  %v3355_v41 = vmul.f32 %v6426_v45, %v3342_v28  ;;  %v3170_v31 = vld [vmem:[%s4370_s16 + $0x76] sm:$0x1]  ;;  %v3512_v5 = vld [vmem:[%s4370_s16 + $0x2] sm:$0x1]  ;;  %v3541_v32 = vld [vmem:[%s4370_s16 + $0x3] sm:$0x1] }
 0x1bc   : > { %v3384_v58 = vmul.f32 %v6432_v40, %v3371_v38  ;;  %v3240_v9 = vmul.f32 %v6387_v54, %v3227_v25  ;;  %v3075_v51 = vadd.f32 %v3067_v60, %v3046_v44  ;;  %v3125_v6 = vmul.f32 %v6347_v20, %v3112_v21  ;;  %v6656_v2 = vld [vmem:[%s4375_s19 + $0x73] ss:$0 sm:$0xff]  ;;  %v3372_v38 = vld [vmem:[%s4370_s16 + $0x6d] sm:$0x1]  ;;  %v6670_v25 = vld [vmem:[%s4375_s19 + $0x74] ss:$0 sm:$0xff] }
 0x1bd   : > { %v3190_v53 = vadd.f32 %v3182_v22, %v3161_v43  ;;  %v3420_v34 = vadd.f32 %v3412_v13, %v3391_v27  ;;  %v3305_v19 = vadd.f32 %v3297_v49, %v3276_v10  ;;  %v3413_v26 = vmul.f32 %v6442_v55, %v3400_v47  ;;  %v3228_v22 = vld [vmem:[%s4370_s16 + $0x78] sm:$0x1]  ;;  %v3401_v21 = vld [vmem:[%s4370_s16 + $0x6e] sm:$0x1]  ;;  %v3430_v47 = vld [vmem:[%s4370_s16 + $0x6f] sm:$0x1] }
 0x1be   : > { %v6636_v29 = vmul.f32 %v6452_v56, %v3429_v57  ;;  %v3269_v35 = vmul.f32 %v6401_v63, %v3256_v52  ;;  %v3104_v13 = vadd.f32 %v3096_v23, %v3075_v51  ;;  %v3154_v39 = vmul.f32 %v6359_v7, %v3141_v33  ;;  %v3343_v7 = vld [vmem:[%s4370_s16 + $0x6c] sm:$0x1]  ;;  %v3257_v43 = vld [vmem:[%s4370_s16 + $0x79] sm:$0x1]  ;;  %v3599_v52 = vld [vmem:[%s4370_s16 + $0x5] sm:$0x1] }
 0x1bf   : > { %v3219_v20 = vadd.f32 %v3211_v42, %v3190_v53  ;;  %v3449_v24 = vadd.f32 %v3441_v61, %v3420_v34  ;;  %v3334_v0 = vadd.f32 %v3326_v12, %v3305_v19  ;;  %v3298_v16 = vmul.f32 %v6409_v8, %v3285_v36  ;;  %v3570_v12 = vld [vmem:[%s4370_s16 + $0x4] sm:$0x1]  ;;  %v6682_v36 = vld [vmem:[%s4375_s19 + $0x75] ss:$0 sm:$0xff]  ;;  %v6687_v51 = vld [vmem:[%s4375_s19 + $0x76] ss:$0 sm:$0xff] }
 0x1c0   : > { %v3183_v49 = vmul.f32 %v6364_v46, %v3170_v31  ;;  %v3133_v1 = vadd.f32 %v3125_v6, %v3104_v13  ;;  %v3475_v61 = vmul.f32 %v6639_v15, %v3461_v11  ;;  %v3496_v30 = vmul.f32 %v6643_v62, %v3483_v14  ;;  %v3462_v6 = vld [vmem:[%s4370_s16 + $0x10] sm:$0x1]  ;;  %v3315_v19 = vld [vmem:[%s4370_s16 + $0x7b] sm:$0x1]  ;;  %v3657_v14 = vld [vmem:[%s4370_s16 + $0x7] sm:$0x1] }
 0x1c1   : > { %v3248_v28 = vadd.f32 %v3240_v9, %v3219_v20  ;;  %3457 = vst.msk [vmem:[%s4554_s23 + $0x26] sm:$0x1] %vm662_vm0, %v3449_v24  ;;  %v3363_v4 = vadd.f32 %v3355_v41, %v3334_v0  ;;  %v3327_v46 = vmul.f32 %v6420_v17, %v3314_v3  ;;  %v3212_v50 = vmul.f32 %v6375_v37, %v3199_v48  ;;  %v3286_v41 = vld [vmem:[%s4370_s16 + $0x7a] sm:$0x1]  ;;  %v3484_v20 = vld [vmem:[%s4370_s16 + $0x11] sm:$0x1] }
 0x1c2   : > { %v3525_v18 = vmul.f32 %v6650_v59, %v3512_v5  ;;  %v3162_v57 = vadd.f32 %v3154_v39, %v3133_v1  ;;  %v3504_v42 = vadd.f32 %v3496_v30, %v3475_v61  ;;  %v3554_v44 = vmul.f32 %v6656_v2, %v3541_v32  ;;  %v3513_v5 = vld [vmem:[%s4370_s16 + $0x12] sm:$0x1]  ;;  %v3542_v24 = vld [vmem:[%s4370_s16 + $0x13] sm:$0x1]  ;;  %v6710_v61 = vld [vmem:[%s4375_s19 + $0x78] ss:$0 sm:$0xff] }
 0x1c3   : > { %v3277_v60 = vadd.f32 %v3269_v35, %v3248_v28  ;;  %v3392_v23 = vadd.f32 %v3384_v58, %v3363_v4  ;;  %v3356_v37 = vmul.f32 %v6426_v45, %v3343_v7  ;;  %v3385_v27 = vmul.f32 %v6432_v40, %v3372_v38  ;;  %v3628_v58 = vld [vmem:[%s4370_s16 + $0x6] sm:$0x1]  ;;  %v3571_v30 = vld [vmem:[%s4370_s16 + $0x14] sm:$0x1]  ;;  %v3402_v4 = vld [vmem:[%s4370_s16 + $0x7e] sm:$0x1] }
 0x1c4   : > { %v3241_v10 = vmul.f32 %v6387_v54, %v3228_v22  ;;  %v3191_v53 = vadd.f32 %v3183_v49, %v3162_v57  ;;  %v3533_v9 = vadd.f32 %v3525_v18, %v3504_v42  ;;  %v3583_v3 = vmul.f32 %v6670_v25, %v3570_v12  ;;  %v3373_v49 = vld [vmem:[%s4370_s16 + $0x7d] sm:$0x1]  ;;  %v3686_v22 = vld [vmem:[%s4370_s16 + $0x8] sm:$0x1]  ;;  %v3715_v57 = vld [vmem:[%s4370_s16 + $0x9] sm:$0x1] }
 0x1c5   : > { %v3306_v33 = vadd.f32 %v3298_v16, %v3277_v60  ;;  %v3421_v31 = vadd.f32 %v3413_v26, %v3392_v23  ;;  %v3414_v54 = vmul.f32 %v6442_v55, %v3401_v21  ;;  %v3443_v11 = vmul.f32 %v6452_v56, %v3430_v47  ;;  %v6698_v26 = vld [vmem:[%s4375_s19 + $0x77] ss:$0 sm:$0xff]  ;;  %v3344_v16 = vld [vmem:[%s4370_s16 + $0x7c] sm:$0x1]  ;;  %v3600_v42 = vld [vmem:[%s4370_s16 + $0x15] sm:$0x1] }
 0x1c6   : > { %v3270_v34 = vmul.f32 %v6401_v63, %v3257_v43  ;;  %v3220_v13 = vadd.f32 %v3212_v50, %v3191_v53  ;;  %v3562_v39 = vadd.f32 %v3554_v44, %v3533_v9  ;;  %v3612_v48 = vmul.f32 %v6682_v36, %v3599_v52  ;;  %v6724_v43 = vld [vmem:[%s4375_s19 + $0x79] ss:$0 sm:$0xff] }
 0x1c7   : > { %v3335_v35 = vadd.f32 %v3327_v46, %v3306_v33  ;;  %v3450_v0 = vadd.f32 %v6636_v29, %v3421_v31  ;;  %v3299_v63 = vmul.f32 %v6409_v8, %v3286_v41  ;;  %v3641_v32 = vmul.f32 %v6687_v51, %v3628_v58  ;;  %v3431_v46 = vld [vmem:[%s4370_s16 + $0x7f] sm:$0x1]  ;;  %v3485_v58 = vld [vmem:[%s4370_s16 + $0x21] sm:$0x1] }
 0x1c8   : > { %v3476_v28 = vmul.f32 %v6639_v15, %v3462_v6  ;;  %v3249_v38 = vadd.f32 %v3241_v10, %v3220_v13  ;;  %v3591_v1 = vadd.f32 %v3583_v3, %v3562_v39  ;;  %v3497_v29 = vmul.f32 %v6643_v62, %v3484_v20  ;;  %v3744_v10 = vld [vmem:[%s4370_s16 + $0xa] sm:$0x1]  ;;  %v3629_v3 = vld [vmem:[%s4370_s16 + $0x16] sm:$0x1]  ;;  %v3802_v39 = vld [vmem:[%s4370_s16 + $0xc] sm:$0x1] }
 0x1c9   : > { %v3364_v7 = vadd.f32 %v3356_v37, %v3335_v35  ;;  %3458 = vst.msk [vmem:[%s4554_s23 + $0x2e] sm:$0x1] %vm662_vm0, %v3450_v0  ;;  %v3328_v8 = vmul.f32 %v6420_v17, %v3315_v19  ;;  %v3670_v50 = vmul.f32 %v6698_v26, %v3657_v14  ;;  %v3526_v18 = vmul.f32 %v6650_v59, %v3513_v5  ;;  %v3514_v14 = vld [vmem:[%s4370_s16 + $0x22] sm:$0x1]  ;;  %v6755_v0 = vld [vmem:[%s4375_s19 + $0x7d] ss:$0 sm:$0xff] }
 0x1ca   : > { %v3555_v12 = vmul.f32 %v6656_v2, %v3542_v24  ;;  %v3278_v21 = vadd.f32 %v3270_v34, %v3249_v38  ;;  %v3620_v47 = vadd.f32 %v3612_v48, %v3591_v1  ;;  %v3505_v17 = vadd.f32 %v3497_v29, %v3476_v28  ;;  %v3773_v34 = vld [vmem:[%s4370_s16 + $0xb] sm:$0x1]  ;;  %v3831_v24 = vld [vmem:[%s4370_s16 + $0xd] sm:$0x1]  ;;  %v6765_v38 = vld [vmem:[%s4375_s19 + $0x7e] ss:$0 sm:$0xff] }
 0x1cb   : > { %v3393_v60 = vadd.f32 %v3385_v27, %v3364_v7  ;;  %v3357_v44 = vmul.f32 %v6426_v45, %v3344_v16  ;;  %v3386_v23 = vmul.f32 %v6432_v40, %v3373_v49  ;;  %v3699_v37 = vmul.f32 %v6710_v61, %v3686_v22  ;;  %v6732_v27 = vld [vmem:[%s4375_s19 + $0x7a] ss:$0 sm:$0xff]  ;;  %v3463_v45 = vld [vmem:[%s4370_s16 + $0x20] sm:$0x1]  ;;  %v3860_v7 = vld [vmem:[%s4370_s16 + $0xe] sm:$0x1] }
 0x1cc   : > { %v3584_v41 = vmul.f32 %v6670_v25, %v3571_v30  ;;  %v3307_v33 = vadd.f32 %v3299_v63, %v3278_v21  ;;  %v3649_v53 = vadd.f32 %v3641_v32, %v3620_v47  ;;  %v3534_v9 = vadd.f32 %v3526_v18, %v3505_v17  ;;  %v3572_v29 = vld [vmem:[%s4370_s16 + $0x24] sm:$0x1]  ;;  %v6775_v21 = vld [vmem:[%s4375_s19 + $0x7f] ss:$0 sm:$0xff]  ;;  %v3716_v17 = vld [vmem:[%s4370_s16 + $0x19] sm:$0x1] }
 0x1cd   : > { %v3422_v52 = vadd.f32 %v3414_v54, %v3393_v60  ;;  %v3415_v40 = vmul.f32 %v6442_v55, %v3402_v4  ;;  %v3444_v6 = vmul.f32 %v6452_v56, %v3431_v46  ;;  %v3728_v31 = vmul.f32 %v6724_v43, %v3715_v57  ;;  %v6743_v54 = vld [vmem:[%s4375_s19 + $0x7b] ss:$0 sm:$0xff]  ;;  %v6749_v55 = vld [vmem:[%s4375_s19 + $0x7c] ss:$0 sm:$0xff]  ;;  %v3543_v56 = vld [vmem:[%s4370_s16 + $0x23] sm:$0x1] }
 0x1ce   : > { %v3613_v19 = vmul.f32 %v6682_v36, %v3600_v42  ;;  %v3336_v35 = vadd.f32 %v3328_v8, %v3307_v33  ;;  %v3678_v13 = vadd.f32 %v3670_v50, %v3649_v53  ;;  %v3563_v48 = vadd.f32 %v3555_v12, %v3534_v9  ;;  %v3889_v4 = vld [vmem:[%s4370_s16 + $0xf] sm:$0x1]  ;;  %v3687_v46 = vld [vmem:[%s4370_s16 + $0x18] sm:$0x1]  ;;  %v3601_v42 = vld [vmem:[%s4370_s16 + $0x25] sm:$0x1] }
 0x1cf   : > { %v3451_v20 = vadd.f32 %v3443_v11, %v3422_v52  ;;  %v3757_v5 = vmul.f32 %v6732_v27, %v3744_v10  ;;  %v3642_v63 = vmul.f32 %v6687_v51, %v3629_v3  ;;  %v3658_v11 = vld [vmem:[%s4370_s16 + $0x17] sm:$0x1]  ;;  %v3477_v16 = vmul.f32 %v6639_v15, %v3463_v45  ;;  %v3745_v10 = vld [vmem:[%s4370_s16 + $0x1a] sm:$0x1]  ;;  %v3630_v3 = vld [vmem:[%s4370_s16 + $0x26] sm:$0x1] }
 0x1d0   : > { %v3498_v49 = vmul.f32 %v6643_v62, %v3485_v58  ;;  %v3365_v32 = vadd.f32 %v3357_v44, %v3336_v35  ;;  %v3707_v28 = vadd.f32 %v3699_v37, %v3678_v13  ;;  %v3592_v1 = vadd.f32 %v3584_v41, %v3563_v48  ;;  %v3464_v45 = vld [vmem:[%s4370_s16 + $0x30] sm:$0x1]  ;;  %v3486_v58 = vld [vmem:[%s4370_s16 + $0x31] sm:$0x1] }
 0x1d1   : > { %3459 = vst.msk [vmem:[%s4554_s23 + $0x36] sm:$0x1] %vm662_vm0, %v3451_v20  ;;  %v3527_v22 = vmul.f32 %v6650_v59, %v3514_v14  ;;  %v3786_v30 = vmul.f32 %v6743_v54, %v3773_v34  ;;  %v3815_v8 = vmul.f32 %v6749_v55, %v3802_v39  ;;  %v3556_v18 = vmul.f32 %v6656_v2, %v3543_v56  ;;  %v3515_v20 = vld [vmem:[%s4370_s16 + $0x32] sm:$0x1]  ;;  %v3659_v56 = vld [vmem:[%s4370_s16 + $0x27] sm:$0x1] }
 0x1d2   : > { %v3506_v50 = vadd.f32 %v3498_v49, %v3477_v16  ;;  %v3394_v12 = vadd.f32 %v3386_v23, %v3365_v32  ;;  %v3736_v60 = vadd.f32 %v3728_v31, %v3707_v28  ;;  %v3621_v47 = vadd.f32 %v3613_v19, %v3592_v1  ;;  %v3774_v19 = vld [vmem:[%s4370_s16 + $0x1b] sm:$0x1]  ;;  %v3688_v1 = vld [vmem:[%s4370_s16 + $0x28] sm:$0x1] }
 0x1d3   : > { %v3671_v57 = vmul.f32 %v6698_v26, %v3658_v11  ;;  %v3844_v44 = vmul.f32 %v6755_v0, %v3831_v24  ;;  %v3873_v37 = vmul.f32 %v6765_v38, %v3860_v7  ;;  %v3585_v23 = vmul.f32 %v6670_v25, %v3572_v29  ;;  %v3803_v24 = vld [vmem:[%s4370_s16 + $0x1c] sm:$0x1]  ;;  %v3573_v29 = vld [vmem:[%s4370_s16 + $0x34] sm:$0x1] }
 0x1d4   : > { %v3535_v41 = vadd.f32 %v3527_v22, %v3506_v50  ;;  %v3423_v52 = vadd.f32 %v3415_v40, %v3394_v12  ;;  %v3765_v33 = vadd.f32 %v3757_v5, %v3736_v60  ;;  %v3650_v53 = vadd.f32 %v3642_v63, %v3621_v47  ;;  %v3544_v5 = vld [vmem:[%s4370_s16 + $0x33] sm:$0x1]  ;;  %v3832_v63 = vld [vmem:[%s4370_s16 + $0x1d] sm:$0x1] }
 0x1d5   : > { %v3700_v9 = vmul.f32 %v6710_v61, %v3687_v46  ;;  %v3902_v31 = vmul.f32 %v6775_v21, %v3889_v4  ;;  %v3729_v34 = vmul.f32 %v6724_v43, %v3716_v17  ;;  %v3614_v40 = vmul.f32 %v6682_v36, %v3601_v42  ;;  %v3890_v4 = vld [vmem:[%s4370_s16 + $0x1f] sm:$0x1]  ;;  %v3717_v17 = vld [vmem:[%s4370_s16 + $0x29] sm:$0x1]  ;;  %v3602_v42 = vld [vmem:[%s4370_s16 + $0x35] sm:$0x1] }
 0x1d6   : > { %v3564_v14 = vadd.f32 %v3556_v18, %v3535_v41  ;;  %v3452_v35 = vadd.f32 %v3444_v6, %v3423_v52  ;;  %v3794_v13 = vadd.f32 %v3786_v30, %v3765_v33  ;;  %v3679_v39 = vadd.f32 %v3671_v57, %v3650_v53  ;;  %v3861_v30 = vld [vmem:[%s4370_s16 + $0x1e] sm:$0x1] }
 0x1d7   : > { %v3758_v48 = vmul.f32 %v6732_v27, %v3745_v10  ;;  %v3643_v16 = vmul.f32 %v6687_v51, %v3630_v3  ;;  %v3478_v49 = vmul.f32 %v6639_v15, %v3464_v45  ;;  %v3499_v32 = vmul.f32 %v6643_v62, %v3486_v58  ;;  %v3465_v58 = vld [vmem:[%s4370_s16 + $0x40] sm:$0x1] }
 0x1d8   : > { %v3593_v11 = vadd.f32 %v3585_v23, %v3564_v14  ;;  %3460 = vst.msk [vmem:[%s4554_s23 + $0x3e] sm:$0x1] %vm662_vm0, %v3452_v35  ;;  %v3823_v6 = vadd.f32 %v3815_v8, %v3794_v13  ;;  %v3708_v28 = vadd.f32 %v3700_v9, %v3679_v39  ;;  %v3787_v7 = vmul.f32 %v6743_v54, %v3774_v19  ;;  %v3746_v23 = vld [vmem:[%s4370_s16 + $0x2a] sm:$0x1]  ;;  %v3516_v13 = vld [vmem:[%s4370_s16 + $0x42] sm:$0x1] }
 0x1d9   : > { %v3528_v22 = vmul.f32 %v6650_v59, %v3515_v20  ;;  %v3672_v50 = vmul.f32 %v6698_v26, %v3659_v56  ;;  %v3507_v18 = vadd.f32 %v3499_v32, %v3478_v49  ;;  %v3557_v12 = vmul.f32 %v6656_v2, %v3544_v5  ;;  %v3689_v32 = vld [vmem:[%s4370_s16 + $0x38] sm:$0x1] }
 0x1da   : > { %v3622_v46 = vadd.f32 %v3614_v40, %v3593_v11  ;;  %v3852_v8 = vadd.f32 %v3844_v44, %v3823_v6  ;;  %v3737_v60 = vadd.f32 %v3729_v34, %v3708_v28  ;;  %v3816_v47 = vmul.f32 %v6749_v55, %v3803_v24  ;;  %v3631_v44 = vld [vmem:[%s4370_s16 + $0x36] sm:$0x1]  ;;  %v3487_v34 = vld [vmem:[%s4370_s16 + $0x41] sm:$0x1]  ;;  %v3775_v40 = vld [vmem:[%s4370_s16 + $0x2b] sm:$0x1] }
 0x1db   : > { %v3845_v57 = vmul.f32 %v6755_v0, %v3832_v63  ;;  %v3701_v41 = vmul.f32 %v6710_v61, %v3688_v1  ;;  %v3536_v52 = vadd.f32 %v3528_v22, %v3507_v18  ;;  %v3586_v33 = vmul.f32 %v6670_v25, %v3573_v29  ;;  %v3545_v24 = vld [vmem:[%s4370_s16 + $0x43] sm:$0x1]  ;;  %v3804_v11 = vld [vmem:[%s4370_s16 + $0x2c] sm:$0x1]  ;;  %v3574_v29 = vld [vmem:[%s4370_s16 + $0x44] sm:$0x1] }
 0x1dc   : > { %v3651_v10 = vadd.f32 %v3643_v16, %v3622_v46  ;;  %v3881_v53 = vadd.f32 %v3873_v37, %v3852_v8  ;;  %v3766_v9 = vadd.f32 %v3758_v48, %v3737_v60  ;;  %v3874_v3 = vmul.f32 %v6765_v38, %v3861_v30  ;;  %v3660_v37 = vld [vmem:[%s4370_s16 + $0x37] sm:$0x1]  ;;  %v3833_v16 = vld [vmem:[%s4370_s16 + $0x2d] sm:$0x1]  ;;  %v3891_v46 = vld [vmem:[%s4370_s16 + $0x2f] sm:$0x1] }
 0x1dd   : > { %v3903_v45 = vmul.f32 %v6775_v21, %v3890_v4  ;;  %v3730_v14 = vmul.f32 %v6724_v43, %v3717_v17  ;;  %v3565_v20 = vadd.f32 %v3557_v12, %v3536_v52  ;;  %v3615_v35 = vmul.f32 %v6682_v36, %v3602_v42  ;;  %v3862_v4 = vld [vmem:[%s4370_s16 + $0x2e] sm:$0x1]  ;;  %v3718_v18 = vld [vmem:[%s4370_s16 + $0x39] sm:$0x1]  ;;  %v3747_v52 = vld [vmem:[%s4370_s16 + $0x3a] sm:$0x1] }
 0x1de   : > { %v3680_v19 = vadd.f32 %v3672_v50, %v3651_v10  ;;  %v3910_v39 = vadd.f32 %v3902_v31, %v3881_v53  ;;  %v3795_v48 = vadd.f32 %v3787_v7, %v3766_v9  ;;  %v3759_v56 = vmul.f32 %v6732_v27, %v3746_v23  ;;  %v3603_v10 = vld [vmem:[%s4370_s16 + $0x45] sm:$0x1]  ;;  %v3632_v53 = vld [vmem:[%s4370_s16 + $0x46] sm:$0x1] }
 0x1df   : > { %v3644_v5 = vmul.f32 %v6687_v51, %v3631_v44  ;;  %v3594_v49 = vadd.f32 %v3586_v33, %v3565_v20  ;;  %v3479_v6 = vmul.f32 %v6639_v15, %v3465_v58  ;;  %v3500_v28 = vmul.f32 %v6643_v62, %v3487_v34 }
 0x1e0   : > { %v3709_v63 = vadd.f32 %v3701_v41, %v3680_v19  ;;  %3918 = vst.msk [vmem:[%s4554_s23 + $0x7] sm:$0x1] %vm662_vm0, %v3910_v39  ;;  %v3824_v31 = vadd.f32 %v3816_v47, %v3795_v48  ;;  %v3788_v7 = vmul.f32 %v6743_v54, %v3775_v40  ;;  %v3673_v1 = vmul.f32 %v6698_v26, %v3660_v37  ;;  %v3488_v40 = vld [vmem:[%s4370_s16 + $0x51] sm:$0x1]  ;;  %v3661_v39 = vld [vmem:[%s4370_s16 + $0x47] sm:$0x1] }
 0x1e1   : > { %v3529_v22 = vmul.f32 %v6650_v59, %v3516_v13  ;;  %v3623_v50 = vadd.f32 %v3615_v35, %v3594_v49  ;;  %v3508_v12 = vadd.f32 %v3500_v28, %v3479_v6  ;;  %v3558_v8 = vmul.f32 %v6656_v2, %v3545_v24  ;;  %v3546_v48 = vld [vmem:[%s4370_s16 + $0x53] sm:$0x1]  ;;  %v3805_v49 = vld [vmem:[%s4370_s16 + $0x3c] sm:$0x1]  ;;  %v3690_v6 = vld [vmem:[%s4370_s16 + $0x48] sm:$0x1] }
 0x1e2   : > { %v3738_v30 = vadd.f32 %v3730_v14, %v3709_v63  ;;  %v3853_v60 = vadd.f32 %v3845_v57, %v3824_v31  ;;  %v3817_v47 = vmul.f32 %v6749_v55, %v3804_v11  ;;  %v3846_v17 = vmul.f32 %v6755_v0, %v3833_v16  ;;  %v3466_v57 = vld [vmem:[%s4370_s16 + $0x50] sm:$0x1]  ;;  %v3776_v14 = vld [vmem:[%s4370_s16 + $0x3b] sm:$0x1]  ;;  %v3575_v31 = vld [vmem:[%s4370_s16 + $0x54] sm:$0x1] }
 0x1e3   : > { %v3702_v42 = vmul.f32 %v6710_v61, %v3689_v32  ;;  %v3652_v23 = vadd.f32 %v3644_v5, %v3623_v50  ;;  %v3537_v33 = vadd.f32 %v3529_v22, %v3508_v12  ;;  %v3587_v44 = vmul.f32 %v6670_v25, %v3574_v29 }
 0x1e4   : > { %v3767_v41 = vadd.f32 %v3759_v56, %v3738_v30  ;;  %v3882_v9 = vadd.f32 %v3874_v3, %v3853_v60  ;;  %v3875_v58 = vmul.f32 %v6765_v38, %v3862_v4  ;;  %v3904_v34 = vmul.f32 %v6775_v21, %v3891_v46  ;;  %v3517_v3 = vld [vmem:[%s4370_s16 + $0x52] sm:$0x1]  ;;  %v3863_v46 = vld [vmem:[%s4370_s16 + $0x3e] sm:$0x1] }
 0x1e5   : > { %v3731_v19 = vmul.f32 %v6724_v43, %v3718_v18  ;;  %v3681_v35 = vadd.f32 %v3673_v1, %v3652_v23  ;;  %v3566_v37 = vadd.f32 %v3558_v8, %v3537_v33  ;;  %v3616_v13 = vmul.f32 %v6682_v36, %v3603_v10  ;;  %v3719_v18 = vld [vmem:[%s4370_s16 + $0x49] sm:$0x1]  ;;  %v3604_v8 = vld [vmem:[%s4370_s16 + $0x55] sm:$0x1]  ;;  %v3633_v33 = vld [vmem:[%s4370_s16 + $0x56] sm:$0x1] }
 0x1e6   : > { %v3796_v20 = vadd.f32 %v3788_v7, %v3767_v41  ;;  %v3911_v56 = vadd.f32 %v3903_v45, %v3882_v9  ;;  %v3760_v5 = vmul.f32 %v6732_v27, %v3747_v52  ;;  %v3645_v24 = vmul.f32 %v6687_v51, %v3632_v53  ;;  %v3834_v7 = vld [vmem:[%s4370_s16 + $0x3d] sm:$0x1]  ;;  %v3489_v53 = vld [vmem:[%s4370_s16 + $0x61] sm:$0x1] }
 0x1e7   : > { %v3480_v63 = vmul.f32 %v6639_v15, %v3466_v57  ;;  %v3710_v16 = vadd.f32 %v3702_v42, %v3681_v35  ;;  %v3595_v32 = vadd.f32 %v3587_v44, %v3566_v37  ;;  %v3501_v28 = vmul.f32 %v6643_v62, %v3488_v40  ;;  %v3748_v42 = vld [vmem:[%s4370_s16 + $0x4a] sm:$0x1]  ;;  %v3467_v44 = vld [vmem:[%s4370_s16 + $0x60] sm:$0x1]  ;;  %v3518_v40 = vld [vmem:[%s4370_s16 + $0x62] sm:$0x1] }
 0x1e8   : > { %v3825_v11 = vadd.f32 %v3817_v47, %v3796_v20  ;;  %3919 = vst.msk [vmem:[%s4554_s23 + $0xf] sm:$0x1] %vm662_vm0, %v3911_v56  ;;  %v3789_v45 = vmul.f32 %v6743_v54, %v3776_v14  ;;  %v3674_v1 = vmul.f32 %v6698_v26, %v3661_v39  ;;  %v3530_v22 = vmul.f32 %v6650_v59, %v3517_v3  ;;  %v3892_v35 = vld [vmem:[%s4370_s16 + $0x3f] sm:$0x1]  ;;  %v3547_v3 = vld [vmem:[%s4370_s16 + $0x63] sm:$0x1] }
 0x1e9   : > { %v3559_v29 = vmul.f32 %v6656_v2, %v3546_v48  ;;  %v3739_v4 = vadd.f32 %v3731_v19, %v3710_v16  ;;  %v3624_v50 = vadd.f32 %v3616_v13, %v3595_v32  ;;  %v3509_v12 = vadd.f32 %v3501_v28, %v3480_v63  ;;  %v3777_v13 = vld [vmem:[%s4370_s16 + $0x4b] sm:$0x1]  ;;  %v3806_v16 = vld [vmem:[%s4370_s16 + $0x4c] sm:$0x1] }
 0x1ea   : > { %v3854_v30 = vadd.f32 %v3846_v17, %v3825_v11  ;;  %v3818_v60 = vmul.f32 %v6749_v55, %v3805_v49  ;;  %v3703_v47 = vmul.f32 %v6710_v61, %v3690_v6  ;;  %v3588_v10 = vmul.f32 %v6670_v25, %v3575_v31  ;;  %v3576_v6 = vld [vmem:[%s4370_s16 + $0x64] sm:$0x1] }
 0x1eb   : > { %v3768_v17 = vadd.f32 %v3760_v5, %v3739_v4  ;;  %v3653_v23 = vadd.f32 %v3645_v24, %v3624_v50  ;;  %v3538_v52 = vadd.f32 %v3530_v22, %v3509_v12  ;;  %v3847_v57 = vmul.f32 %v6755_v0, %v3834_v7  ;;  %v3662_v5 = vld [vmem:[%s4370_s16 + $0x57] sm:$0x1]  ;;  %v3864_v4 = vld [vmem:[%s4370_s16 + $0x4e] sm:$0x1] }
 0x1ec   : > { %v3883_v41 = vadd.f32 %v3875_v58, %v3854_v30  ;;  %v3876_v9 = vmul.f32 %v6765_v38, %v3863_v46  ;;  %v3732_v19 = vmul.f32 %v6724_v43, %v3719_v18  ;;  %v3617_v14 = vmul.f32 %v6682_v36, %v3604_v8  ;;  %v3835_v30 = vld [vmem:[%s4370_s16 + $0x4d] sm:$0x1]  ;;  %v3605_v18 = vld [vmem:[%s4370_s16 + $0x65] sm:$0x1]  ;;  %v3720_v8 = vld [vmem:[%s4370_s16 + $0x59] sm:$0x1] }
 0x1ed   : > { %v3797_v20 = vadd.f32 %v3789_v45, %v3768_v17  ;;  %v3682_v37 = vadd.f32 %v3674_v1, %v3653_v23  ;;  %v3567_v39 = vadd.f32 %v3559_v29, %v3538_v52  ;;  %v3761_v48 = vmul.f32 %v6732_v27, %v3748_v42  ;;  %v3691_v45 = vld [vmem:[%s4370_s16 + $0x58] sm:$0x1]  ;;  %v3634_v23 = vld [vmem:[%s4370_s16 + $0x66] sm:$0x1]  ;;  %v3468_v52 = vld [vmem:[%s4370_s16 + $0x70] sm:$0x1] }
 0x1ee   : > { %v3912_v58 = vadd.f32 %v3904_v34, %v3883_v41  ;;  %v3646_v56 = vmul.f32 %v6687_v51, %v3633_v33  ;;  %v3481_v24 = vmul.f32 %v6639_v15, %v3467_v44  ;;  %v3502_v63 = vmul.f32 %v6643_v62, %v3489_v53  ;;  %v3490_v33 = vld [vmem:[%s4370_s16 + $0x71] sm:$0x1] }
 0x1ef   : > { %v3826_v34 = vadd.f32 %v3818_v60, %v3797_v20  ;;  %v3711_v11 = vadd.f32 %v3703_v47, %v3682_v37  ;;  %v3596_v49 = vadd.f32 %v3588_v10, %v3567_v39  ;;  %v3531_v32 = vmul.f32 %v6650_v59, %v3518_v40  ;;  %v3663_v37 = vld [vmem:[%s4370_s16 + $0x67] sm:$0x1]  ;;  %v3893_v39 = vld [vmem:[%s4370_s16 + $0x4f] sm:$0x1] }
 0x1f0   : > { %3920 = vst.msk [vmem:[%s4554_s23 + $0x17] sm:$0x1] %vm662_vm0, %v3912_v58  ;;  %v3905_v28 = vmul.f32 %v6775_v21, %v3892_v35  ;;  %v3790_v31 = vmul.f32 %v6743_v54, %v3777_v13  ;;  %v3510_v7 = vadd.f32 %v3502_v63, %v3481_v24  ;;  %v3560_v1 = vmul.f32 %v6656_v2, %v3547_v3  ;;  %v3548_v13 = vld [vmem:[%s4370_s16 + $0x73] sm:$0x1]  ;;  %v3778_v3 = vld [vmem:[%s4370_s16 + $0x5b] sm:$0x1] }
 0x1f1   : > { %v3855_v22 = vadd.f32 %v3847_v57, %v3826_v34  ;;  %v3740_v29 = vadd.f32 %v3732_v19, %v3711_v11  ;;  %v3625_v46 = vadd.f32 %v3617_v14, %v3596_v49  ;;  %v3675_v50 = vmul.f32 %v6698_v26, %v3662_v5  ;;  %v3749_v57 = vld [vmem:[%s4370_s16 + $0x5a] sm:$0x1]  ;;  %v3519_v14 = vld [vmem:[%s4370_s16 + $0x72] sm:$0x1] }
 0x1f2   : > { %v3819_v12 = vmul.f32 %v6749_v55, %v3806_v16  ;;  %v3539_v60 = vadd.f32 %v3531_v32, %v3510_v7  ;;  %v3589_v47 = vmul.f32 %v6670_v25, %v3576_v6  ;;  %v3704_v17 = vmul.f32 %v6710_v61, %v3691_v45  ;;  %v3692_v16 = vld [vmem:[%s4370_s16 + $0x68] sm:$0x1]  ;;  %v3577_v32 = vld [vmem:[%s4370_s16 + $0x74] sm:$0x1]  ;;  %v3807_v6 = vld [vmem:[%s4370_s16 + $0x5c] sm:$0x1] }
 0x1f3   : > { %v3884_v42 = vadd.f32 %v3876_v9, %v3855_v22  ;;  %v3769_v10 = vadd.f32 %v3761_v48, %v3740_v29  ;;  %v3654_v41 = vadd.f32 %v3646_v56, %v3625_v46  ;;  %v3848_v44 = vmul.f32 %v6755_v0, %v3835_v30  ;;  %v3721_v29 = vld [vmem:[%s4370_s16 + $0x69] sm:$0x1]  ;;  %v3606_v30 = vld [vmem:[%s4370_s16 + $0x75] sm:$0x1] }
 0x1f4   : > { %v3877_v53 = vmul.f32 %v6765_v38, %v3864_v4  ;;  %v3568_v19 = vadd.f32 %v3560_v1, %v3539_v60  ;;  %v3618_v9 = vmul.f32 %v6682_v36, %v3605_v18  ;;  %v3733_v35 = vmul.f32 %v6724_v43, %v3720_v8  ;;  %v3750_v60 = vld [vmem:[%s4370_s16 + $0x6a] sm:$0x1] }
 0x1f5   : > { %v3913_v40 = vadd.f32 %v3905_v28, %v3884_v42  ;;  %v3798_v58 = vadd.f32 %v3790_v31, %v3769_v10  ;;  %v3683_v20 = vadd.f32 %v3675_v50, %v3654_v41  ;;  %v3647_v56 = vmul.f32 %v6687_v51, %v3634_v23  ;;  %v3865_v42 = vld [vmem:[%s4370_s16 + $0x5e] sm:$0x1] }
 0x1f6   : > { %v3597_v48 = vadd.f32 %v3589_v47, %v3568_v19  ;;  %v3482_v5 = vmul.f32 %v6639_v15, %v3468_v52  ;;  %v3503_v24 = vmul.f32 %v6643_v62, %v3490_v33  ;;  %v3762_v11 = vmul.f32 %v6732_v27, %v3749_v57  ;;  %v3635_v47 = vld [vmem:[%s4370_s16 + $0x76] sm:$0x1]  ;;  %v3894_v57 = vld [vmem:[%s4370_s16 + $0x5f] sm:$0x1] }
 0x1f7   : > { %3921 = vst.msk [vmem:[%s4554_s23 + $0x1f] sm:$0x1] %vm662_vm0, %v3913_v40  ;;  %v3827_v63 = vadd.f32 %v3819_v12, %v3798_v58  ;;  %v3712_v34 = vadd.f32 %v3704_v17, %v3683_v20  ;;  %v3532_v49 = vmul.f32 %v6650_v59, %v3519_v14  ;;  %v3676_v31 = vmul.f32 %v6698_v26, %v3663_v37  ;;  %v3836_v59 = vld [vmem:[%s4370_s16 + $0x5d] sm:$0x1]  ;;  %v3808_v20 = vld [vmem:[%s4370_s16 + $0x6c] sm:$0x1] }
 0x1f8   : > { %v3626_v28 = vadd.f32 %v3618_v9, %v3597_v48  ;;  %v3511_v15 = vadd.f32 %v3503_v24, %v3482_v5  ;;  %v3561_v62 = vmul.f32 %v6656_v2, %v3548_v13  ;;  %v3906_v7 = vmul.f32 %v6775_v21, %v3893_v39  ;;  %v3722_v5 = vld [vmem:[%s4370_s16 + $0x79] sm:$0x1] }
 0x1f9   : > { %v3856_v45 = vadd.f32 %v3848_v44, %v3827_v63  ;;  %v3741_v1 = vadd.f32 %v3733_v35, %v3712_v34  ;;  %v3791_v22 = vmul.f32 %v6743_v54, %v3778_v3  ;;  %v3705_v46 = vmul.f32 %v6710_v61, %v3692_v16  ;;  %v3779_v44 = vld [vmem:[%s4370_s16 + $0x6b] sm:$0x1]  ;;  %v3693_v35 = vld [vmem:[%s4370_s16 + $0x78] sm:$0x1] }
 0x1fa   : > { %v3655_v4 = vadd.f32 %v3647_v56, %v3626_v28  ;;  %v3540_v50 = vadd.f32 %v3532_v49, %v3511_v15  ;;  %v3590_v18 = vmul.f32 %v6670_v25, %v3577_v32  ;;  %v3820_v8 = vmul.f32 %v6749_v55, %v3807_v6  ;;  %v3866_v49 = vld [vmem:[%s4370_s16 + $0x6e] sm:$0x1]  ;;  %v3751_v32 = vld [vmem:[%s4370_s16 + $0x7a] sm:$0x1] }
 0x1fb   : > { %v3885_v2 = vadd.f32 %v3877_v53, %v3856_v45  ;;  %v3770_v12 = vadd.f32 %v3762_v11, %v3741_v1  ;;  %v3734_v41 = vmul.f32 %v6724_v43, %v3721_v29  ;;  %v3619_v23 = vmul.f32 %v6682_v36, %v3606_v30  ;;  %v3664_v53 = vld [vmem:[%s4370_s16 + $0x77] sm:$0x1]  ;;  %v3780_v45 = vld [vmem:[%s4370_s16 + $0x7b] sm:$0x1]  ;;  %v3809_v29 = vld [vmem:[%s4370_s16 + $0x7c] sm:$0x1] }
 0x1fc   : > { %v3684_v10 = vadd.f32 %v3676_v31, %v3655_v4  ;;  %v3569_v17 = vadd.f32 %v3561_v62, %v3540_v50  ;;  %v3849_v25 = vmul.f32 %v6755_v0, %v3836_v59  ;;  %v3763_v9 = vmul.f32 %v6732_v27, %v3750_v60  ;;  %v3895_v62 = vld [vmem:[%s4370_s16 + $0x6f] sm:$0x1] }
 0x1fd   : > { %v3914_v52 = vadd.f32 %v3906_v7, %v3885_v2  ;;  %v3799_v33 = vadd.f32 %v3791_v22, %v3770_v12  ;;  %v3648_v40 = vmul.f32 %v6687_v51, %v3635_v47  ;;  %v3878_v36 = vmul.f32 %v6765_v38, %v3865_v42  ;;  %v3837_v51 = vld [vmem:[%s4370_s16 + $0x6d] sm:$0x1]  ;;  %v3867_v12 = vld [vmem:[%s4370_s16 + $0x7e] sm:$0x1]  ;;  %v3896_v47 = vld [vmem:[%s4370_s16 + $0x7f] sm:$0x1] }
 0x1fe   : > { %v3713_v19 = vadd.f32 %v3705_v46, %v3684_v10  ;;  %v3598_v14 = vadd.f32 %v3590_v18, %v3569_v17  ;;  %v3792_v13 = vmul.f32 %v6743_v54, %v3779_v44  ;;  %v3677_v3 = vmul.f32 %v6698_v26, %v3664_v53  ;;  %v3838_v46 = vld [vmem:[%s4370_s16 + $0x7d] sm:$0x1] }
 0x1ff   : > { %3922 = vst.msk [vmem:[%s4554_s23 + $0x27] sm:$0x1] %vm662_vm0, %v3914_v52  ;;  %v3828_v58 = vadd.f32 %v3820_v8, %v3799_v33  ;;  %v3907_v56 = vmul.f32 %v6775_v21, %v3894_v57  ;;  %v3821_v63 = vmul.f32 %v6749_v55, %v3808_v20  ;;  %v3706_v11 = vmul.f32 %v6710_v61, %v3693_v35 }
 0x200   : > { %v3742_v37 = vadd.f32 %v3734_v41, %v3713_v19  ;;  %v3627_v39 = vadd.f32 %v3619_v23, %v3598_v14  ;;  %v3850_v26 = vmul.f32 %v6755_v0, %v3837_v51  ;;  %v3735_v31 = vmul.f32 %v6724_v43, %v3722_v5 }
 0x201   : > { %v3857_v48 = vadd.f32 %v3849_v25, %v3828_v58  ;;  %v3879_v1 = vmul.f32 %v6765_v38, %v3866_v49  ;;  %v3764_v61 = vmul.f32 %v6732_v27, %v3751_v32  ;;  %v3908_v59 = vmul.f32 %v6775_v21, %v3895_v62 }
 0x202   : > { %v3771_v24 = vadd.f32 %v3763_v9, %v3742_v37  ;;  %v3656_v34 = vadd.f32 %v3648_v40, %v3627_v39  ;;  %v3793_v43 = vmul.f32 %v6743_v54, %v3780_v45  ;;  %v3822_v2 = vmul.f32 %v6749_v55, %v3809_v29 }
 0x203   : > { %v3886_v16 = vadd.f32 %v3878_v36, %v3857_v48  ;;  %v3851_v27 = vmul.f32 %v6755_v0, %v3838_v46  ;;  %v3880_v10 = vmul.f32 %v6765_v38, %v3867_v12  ;;  %v3909_v54 = vmul.f32 %v6775_v21, %v3896_v47 }
 0x204   : > { %v3800_v6 = vadd.f32 %v3792_v13, %v3771_v24  ;;  %v3685_v28 = vadd.f32 %v3677_v3, %v3656_v34 }
 0x205   : > { %v3915_v15 = vadd.f32 %v3907_v56, %v3886_v16 }
 0x206   : > { %v3829_v7 = vadd.f32 %v3821_v63, %v3800_v6  ;;  %v3714_v22 = vadd.f32 %v3706_v11, %v3685_v28 }
 0x207   : > { %3923 = vst.msk [vmem:[%s4554_s23 + $0x2f] sm:$0x1] %vm662_vm0, %v3915_v15 }
 0x208   : > { %v3858_v30 = vadd.f32 %v3850_v26, %v3829_v7  ;;  %v3743_v4 = vadd.f32 %v3735_v31, %v3714_v22 }
 0x20a   : > { %v3887_v50 = vadd.f32 %v3879_v1, %v3858_v30  ;;  %v3772_v18 = vadd.f32 %v3764_v61, %v3743_v4 }
 0x20c   : > { %v3916_v8 = vadd.f32 %v3908_v59, %v3887_v50  ;;  %v3801_v60 = vadd.f32 %v3793_v43, %v3772_v18 }
 0x20e   : > { %3924 = vst.msk [vmem:[%s4554_s23 + $0x37] sm:$0x1] %vm662_vm0, %v3916_v8  ;;  %v3830_v42 = vadd.f32 %v3822_v2, %v3801_v60 }
 0x210   : > { %v3859_v41 = vadd.f32 %v3851_v27, %v3830_v42 }
 0x212   : > { %v3888_v17 = vadd.f32 %v3880_v10, %v3859_v41 }
 0x214   : > { %v3917_v23 = vadd.f32 %v3909_v54, %v3888_v17 }
 0x216   : > { %3925 = vst.msk [vmem:[%s4554_s23 + $0x3f] sm:$0x1] %vm662_vm0, %v3917_v23 }
 0x217 PF: > { %s12_s11 = sadd.s32 1, %s4329_s11   ;;  %s7009_s9 = smov %s4325_s10 }
 0x218   : > { %p9_p5 = scmp.ge.s32.totalorder %s12_s11, 4   ;;  %s7010_s10 = smov %s7012_s12 }
 0x21a   :  { %11 = sbr.rel (!%p9_p5) target bundleno = 2 (0x2), region = 68 }

</bundles_post_ra>
